<compile_context>
chip_gen: v7x
topology: tpu7x:2x2x1
jax: 0.10.0
libtpu: 0.0.40
codegen_flags: <defaults>
</compile_context>

<pallas_src>
import math

import jax
import jax.numpy as jnp
from jax.experimental import pallas as pl
from jax.experimental.pallas import tpu as pltpu


# ---------------------------------------------------------------------------
# Fused kernel:  conv1 + BN1 + PReLU  ->  z (VMEM)  ->  conv2 + BN2 + residual
# ---------------------------------------------------------------------------
def _make_kernel(H, W, C, TH):
    """Kernel closure for one batch element (whole padded image in VMEM)."""

    def kernel(xp_ref, w1_ref, w2_ref, b1_ref, alpha_ref, b2_ref, o_ref, z_ref):
        # xp_ref:    (1, H+2, W+2, C) bf16  zero-padded input tile
        # w1/w2_ref: (9, C, C)        bf16  per-tap weights (BN scale folded)
        # b1/alpha/b2_ref: (1, C)     f32
        # o_ref:     (1, H, W, C)     f32   output tile
        # z_ref:     (H+2, W+2, C)    bf16  conv1 output + zero halo (scratch)

        # PyTorch zero-pads the intermediate activation before conv2.
        z_ref[...] = jnp.zeros_like(z_ref)

        def conv3x3(load_window, w_ref, nr):
            """Sum of 9 shifted (nr*W, C) @ (C, C) matmuls, f32 accumulate."""
            acc = None
            for t in range(9):
                ky, kx = divmod(t, 3)
                a = load_window(ky, kx)                       # (nr*W, C) bf16
                p = jnp.dot(a, w_ref[t], preferred_element_type=jnp.float32)
                acc = p if acc is None else acc + p
            return acc                                        # (nr*W, C) f32

        # ---- conv1 + folded BN1 + PReLU  ->  z interior --------------------
        for r0 in range(0, H, TH):
            nr = min(TH, H - r0)

            def load_x(ky, kx, r0=r0, nr=nr):
                win = xp_ref[0, r0 + ky:r0 + ky + nr, kx:kx + W, :]
                return win.reshape(nr * W, C)

            y = conv3x3(load_x, w1_ref, nr) + b1_ref[...]
            y = jnp.where(y > 0, y, alpha_ref[...] * y)        # per-channel PReLU
            z_ref[1 + r0:1 + r0 + nr, 1:1 + W, :] = (
                y.reshape(nr, W, C).astype(jnp.bfloat16))

        # ---- conv2 + folded BN2 + residual add ------------------------------
        for r0 in range(0, H, TH):
            nr = min(TH, H - r0)

            def load_z(ky, kx, r0=r0, nr=nr):
                win = z_ref[r0 + ky:r0 + ky + nr, kx:kx + W, :]
                return win.reshape(nr * W, C)

            y = conv3x3(load_z, w2_ref, nr) + b2_ref[...]
            # residual: interior of the (already resident) bf16 padded-x tile
            res = xp_ref[0, 1 + r0:1 + r0 + nr, 1:1 + W, :].reshape(nr * W, C)
            y = y + res.astype(jnp.float32)
            o_ref[0, r0:r0 + nr, :, :] = y.reshape(nr, W, C).astype(o_ref.dtype)

    return kernel


def _fused_residual_block(xp, w1, w2, b1, alpha, b2, out_dtype=jnp.float32):
    """xp: (N, H+2, W+2, C) bf16 zero-padded NHWC input; weights (9, C, C)."""
    n, hp2, wp2, c = xp.shape
    H, W = hp2 - 2, wp2 - 2

    # rows per in-kernel chunk: keep the matmul M-dim (TH*W) around ~2K rows
    TH = max(1, min(H, max(8, 2048 // max(W, 1))))
    kernel = _make_kernel(H, W, c, TH)

    # ---- VMEM budget (double-buffered blocks + z scratch + headroom) -------
    xp_bytes = hp2 * wp2 * c * 2
    out_bytes = H * W * c * 4
    w_bytes = 2 * 9 * c * c * 2
    vec_bytes = 3 * c * 4
    need = 2 * (xp_bytes + out_bytes + w_bytes + vec_bytes) + xp_bytes
    if need > (40 << 20):
        # TODO(synk): row-halo manual-DMA tiling for very large images.
        raise ValueError("image too large for single-step VMEM residency")
    vmem_limit = int(min(max(2 * need + (8 << 20), 16 << 20), 48 << 20))

    cost = pl.CostEstimate(
        flops=int(2 * 2 * 9 * c * c * n * H * W),
        transcendentals=0,
        bytes_accessed=int(n * (xp_bytes + out_bytes) + w_bytes + vec_bytes))

    return pl.pallas_call(
        kernel,
        out_shape=jax.ShapeDtypeStruct((n, H, W, c), out_dtype),
        grid_spec=pltpu.PrefetchScalarGridSpec(
            num_scalar_prefetch=0,
            grid=(n,),
            in_specs=[
                pl.BlockSpec((1, hp2, wp2, c), lambda i: (i, 0, 0, 0)),
                pl.BlockSpec((9, c, c), lambda i: (0, 0, 0)),
                pl.BlockSpec((9, c, c), lambda i: (0, 0, 0)),
                pl.BlockSpec((1, c), lambda i: (0, 0)),
                pl.BlockSpec((1, c), lambda i: (0, 0)),
                pl.BlockSpec((1, c), lambda i: (0, 0)),
            ],
            out_specs=pl.BlockSpec((1, H, W, c), lambda i: (i, 0, 0, 0)),
            scratch_shapes=[pltpu.VMEM((hp2, wp2, c), jnp.bfloat16)],
        ),
        compiler_params=pltpu.CompilerParams(
            dimension_semantics=("parallel",),
            vmem_limit_bytes=vmem_limit,
        ),
        cost_estimate=cost,
    )(xp, w1, w2, b1, alpha, b2)


# ---------------------------------------------------------------------------
# Parameters (deterministic, mirrors ResidualBlock.__init__, BN folded)
# ---------------------------------------------------------------------------
def init_params(key, c, eps=1e-5):
    k1, k2, k3, k4 = jax.random.split(key, 4)
    fan = 1.0 / math.sqrt(9 * c)
    conv1_w = jax.random.normal(k1, (3, 3, c, c), jnp.float32) * fan   # HWIO
    conv1_b = jax.random.normal(k2, (c,), jnp.float32) * 0.05
    conv2_w = jax.random.normal(k3, (3, 3, c, c), jnp.float32) * fan
    conv2_b = jax.random.normal(k4, (c,), jnp.float32) * 0.05

    def fold_bn(w_hwio, conv_bias):
        # eval-mode BN with PyTorch-init buffers folded into weights + bias
        gamma = jnp.ones((c,), jnp.float32)
        beta = jnp.zeros((c,), jnp.float32)
        rmean = jnp.zeros((c,), jnp.float32)
        rvar = jnp.ones((c,), jnp.float32)
        scale = gamma / jnp.sqrt(rvar + eps)
        w = (w_hwio * scale).reshape(9, c, c).astype(jnp.bfloat16)  # tap-major
        bias = beta + (conv_bias - rmean) * scale
        return w, bias

    w1, b1 = fold_bn(conv1_w, conv1_b)
    w2, b2 = fold_bn(conv2_w, conv2_b)
    alpha = jnp.full((c,), 0.25, jnp.float32)          # nn.PReLU(C) default
    return {"w1": w1, "b1": b1, "w2": w2, "b2": b2, "alpha": alpha}


# ---------------------------------------------------------------------------
# Forward:  y = x + BN2(Conv2(PReLU(BN1(Conv1(x)))))
# ---------------------------------------------------------------------------
@jax.jit
def residual_block_forward(x_nhwc, params):
    n, h, w, c = x_nhwc.shape
    xp = jnp.pad(x_nhwc.astype(jnp.bfloat16), ((0, 0), (1, 1), (1, 1), (0, 0)))
    return _fused_residual_block(
        xp, params["w1"], params["w2"],
        params["b1"].reshape(1, c).astype(jnp.float32),
        params["alpha"].reshape(1, c).astype(jnp.float32),
        params["b2"].reshape(1, c).astype(jnp.float32))


# Pure-JAX reference (same folded weights) for a numerical sanity check.
def _reference_forward(x_nhwc, params):
    c = x_nhwc.shape[-1]
    dn = ("NHWC", "HWIO", "NHWC")
    w1 = params["w1"].astype(jnp.float32).reshape(3, 3, c, c)
    w2 = params["w2"].astype(jnp.float32).reshape(3, 3, c, c)
    y = jax.lax.conv_general_dilated(x_nhwc, w1, (1, 1), "SAME",
                                     dimension_numbers=dn) + params["b1"]
    y = jnp.where(y > 0, y, params["alpha"] * y)
    y = jax.lax.conv_general_dilated(y, w2, (1, 1), "SAME",
                                     dimension_numbers=dn) + params["b2"]
    return x_nhwc + y


if __name__ == "__main__":
    key = jax.random.PRNGKey(0)
    N, C, H, W = 2, 64, 16, 16                      # small SRGAN-like block

    kp, kx = jax.random.split(key)
    params = init_params(kp, C)

    x_nchw = jax.random.normal(kx, (N, C, H, W), jnp.float32)   # PyTorch layout
    x_nhwc = jnp.transpose(x_nchw, (0, 2, 3, 1))                # kernel layout

    out = residual_block_forward(x_nhwc, params)
    out = jax.block_until_ready(out)

    assert out.shape == (N, H, W, C), out.shape
    assert out.dtype == jnp.float32
    assert bool(jnp.all(jnp.isfinite(out)))

    ref = _reference_forward(x_nhwc, params)
    max_err = float(jnp.max(jnp.abs(out - ref)))
    assert max_err < 0.15, f"max abs err vs reference = {max_err}"   # bf16 drift

    print("KERNEL_OK")
</pallas_src>

<mosaic_0001>
module attributes {stable_mosaic.version = 11 : i64} {
  func.func @kernel(%arg0: i32, %arg1: memref<1x18x18x64xbf16, #tpu.memory_space<vmem>>, %arg2: memref<9x64x64xbf16, #tpu.memory_space<vmem>>, %arg3: memref<9x64x64xbf16, #tpu.memory_space<vmem>>, %arg4: memref<1x64xf32, #tpu.memory_space<vmem>>, %arg5: memref<1x64xf32, #tpu.memory_space<vmem>>, %arg6: memref<1x64xf32, #tpu.memory_space<vmem>>, %arg7: memref<1x16x16x64xf32, #tpu.memory_space<vmem>>, %arg8: memref<18x18x64xbf16, #tpu.memory_space<vmem>>) attributes {dimension_semantics = [#tpu.dimension_semantics<parallel>], iteration_bounds = array<i64: 2>, scalar_prefetch = 0 : i64, scratch_operands = 1 : i64, tpu.core_type = #tpu.core_type<tc>, window_params = [{transform_indices = @transform_0, window_bounds = array<i64: 1, 18, 18, 64>}, {pipeline_mode = #tpu.pipeline_mode<synchronous>, transform_indices = @transform_1, window_bounds = array<i64: 9, 64, 64>}, {pipeline_mode = #tpu.pipeline_mode<synchronous>, transform_indices = @transform_2, window_bounds = array<i64: 9, 64, 64>}, {pipeline_mode = #tpu.pipeline_mode<synchronous>, transform_indices = @transform_3, window_bounds = array<i64: 1, 64>}, {pipeline_mode = #tpu.pipeline_mode<synchronous>, transform_indices = @transform_4, window_bounds = array<i64: 1, 64>}, {pipeline_mode = #tpu.pipeline_mode<synchronous>, transform_indices = @transform_5, window_bounds = array<i64: 1, 64>}, {transform_indices = @transform_6, window_bounds = array<i64: 1, 16, 16, 64>}]} {
    %cst = arith.constant 0.000000e+00 : bf16
    %0 = vector.broadcast %cst : bf16 to vector<18x18x64xbf16>
    %c0 = arith.constant 0 : index
    %c0_0 = arith.constant 0 : index
    %c0_1 = arith.constant 0 : index
    %1 = vector.load %arg8[%c0, %c0_0, %c0_1] : memref<18x18x64xbf16, #tpu.memory_space<vmem>>, vector<18x18x64xbf16>
    tpu.vector_store %arg8[%c0, %c0_0, %c0_1], %0 {strides = array<i32>} : memref<18x18x64xbf16, #tpu.memory_space<vmem>>, vector<18x18x64xbf16>,
    %c0_2 = arith.constant 0 : index
    %c0_3 = arith.constant 0 : index
    %c0_4 = arith.constant 0 : index
    %c0_5 = arith.constant 0 : index
    %2 = vector.load %arg1[%c0_2, %c0_3, %c0_4, %c0_5] : memref<1x18x18x64xbf16, #tpu.memory_space<vmem>>, vector<1x16x16x64xbf16>
    %3 = vector.shape_cast %2 : vector<1x16x16x64xbf16> to vector<16x16x64xbf16>
    %4 = vector.shape_cast %3 : vector<16x16x64xbf16> to vector<256x64xbf16>
    %c0_6 = arith.constant 0 : index
    %c0_7 = arith.constant 0 : index
    %c0_8 = arith.constant 0 : index
    %5 = vector.load %arg2[%c0_6, %c0_7, %c0_8] : memref<9x64x64xbf16, #tpu.memory_space<vmem>>, vector<1x64x64xbf16>
    %6 = vector.shape_cast %5 : vector<1x64x64xbf16> to vector<64x64xbf16>
    %cst_9 = arith.constant dense<0.000000e+00> : vector<256x64xf32>
    %7 = tpu.matmul %4, %6, %cst_9 {dimension_numbers = #tpu.dot_dimension_numbers<[1], [0], [0], [1], [0, 0, 1, 1], [], []>} : vector<256x64xbf16>, vector<64x64xbf16>, vector<256x64xf32> -> vector<256x64xf32>
    %c0_10 = arith.constant 0 : index
    %c0_11 = arith.constant 0 : index
    %c1 = arith.constant 1 : index
    %c0_12 = arith.constant 0 : index
    %8 = vector.load %arg1[%c0_10, %c0_11, %c1, %c0_12] : memref<1x18x18x64xbf16, #tpu.memory_space<vmem>>, vector<1x16x16x64xbf16>
    %9 = vector.shape_cast %8 : vector<1x16x16x64xbf16> to vector<16x16x64xbf16>
    %10 = vector.shape_cast %9 : vector<16x16x64xbf16> to vector<256x64xbf16>
    %c1_13 = arith.constant 1 : index
    %c0_14 = arith.constant 0 : index
    %c0_15 = arith.constant 0 : index
    %11 = vector.load %arg2[%c1_13, %c0_14, %c0_15] : memref<9x64x64xbf16, #tpu.memory_space<vmem>>, vector<1x64x64xbf16>
    %12 = vector.shape_cast %11 : vector<1x64x64xbf16> to vector<64x64xbf16>
    %cst_16 = arith.constant dense<0.000000e+00> : vector<256x64xf32>
    %13 = tpu.matmul %10, %12, %cst_16 {dimension_numbers = #tpu.dot_dimension_numbers<[1], [0], [0], [1], [0, 0, 1, 1], [], []>} : vector<256x64xbf16>, vector<64x64xbf16>, vector<256x64xf32> -> vector<256x64xf32>
    %14 = arith.addf %7, %13 : vector<256x64xf32>
    %c0_17 = arith.constant 0 : index
    %c0_18 = arith.constant 0 : index
    %c2 = arith.constant 2 : index
    %c0_19 = arith.constant 0 : index
    %15 = vector.load %arg1[%c0_17, %c0_18, %c2, %c0_19] : memref<1x18x18x64xbf16, #tpu.memory_space<vmem>>, vector<1x16x16x64xbf16>
    %16 = vector.shape_cast %15 : vector<1x16x16x64xbf16> to vector<16x16x64xbf16>
    %17 = vector.shape_cast %16 : vector<16x16x64xbf16> to vector<256x64xbf16>
    %c2_20 = arith.constant 2 : index
    %c0_21 = arith.constant 0 : index
    %c0_22 = arith.constant 0 : index
    %18 = vector.load %arg2[%c2_20, %c0_21, %c0_22] : memref<9x64x64xbf16, #tpu.memory_space<vmem>>, vector<1x64x64xbf16>
    %19 = vector.shape_cast %18 : vector<1x64x64xbf16> to vector<64x64xbf16>
    %cst_23 = arith.constant dense<0.000000e+00> : vector<256x64xf32>
    %20 = tpu.matmul %17, %19, %cst_23 {dimension_numbers = #tpu.dot_dimension_numbers<[1], [0], [0], [1], [0, 0, 1, 1], [], []>} : vector<256x64xbf16>, vector<64x64xbf16>, vector<256x64xf32> -> vector<256x64xf32>
    %21 = arith.addf %14, %20 : vector<256x64xf32>
    %c0_24 = arith.constant 0 : index
    %c1_25 = arith.constant 1 : index
    %c0_26 = arith.constant 0 : index
    %c0_27 = arith.constant 0 : index
    %22 = vector.load %arg1[%c0_24, %c1_25, %c0_26, %c0_27] : memref<1x18x18x64xbf16, #tpu.memory_space<vmem>>, vector<1x16x16x64xbf16>
    %23 = vector.shape_cast %22 : vector<1x16x16x64xbf16> to vector<16x16x64xbf16>
    %24 = vector.shape_cast %23 : vector<16x16x64xbf16> to vector<256x64xbf16>
    %c3 = arith.constant 3 : index
    %c0_28 = arith.constant 0 : index
    %c0_29 = arith.constant 0 : index
    %25 = vector.load %arg2[%c3, %c0_28, %c0_29] : memref<9x64x64xbf16, #tpu.memory_space<vmem>>, vector<1x64x64xbf16>
    %26 = vector.shape_cast %25 : vector<1x64x64xbf16> to vector<64x64xbf16>
    %cst_30 = arith.constant dense<0.000000e+00> : vector<256x64xf32>
    %27 = tpu.matmul %24, %26, %cst_30 {dimension_numbers = #tpu.dot_dimension_numbers<[1], [0], [0], [1], [0, 0, 1, 1], [], []>} : vector<256x64xbf16>, vector<64x64xbf16>, vector<256x64xf32> -> vector<256x64xf32>
    %28 = arith.addf %21, %27 : vector<256x64xf32>
    %c0_31 = arith.constant 0 : index
    %c1_32 = arith.constant 1 : index
    %c1_33 = arith.constant 1 : index
    %c0_34 = arith.constant 0 : index
    %29 = vector.load %arg1[%c0_31, %c1_32, %c1_33, %c0_34] : memref<1x18x18x64xbf16, #tpu.memory_space<vmem>>, vector<1x16x16x64xbf16>
    %30 = vector.shape_cast %29 : vector<1x16x16x64xbf16> to vector<16x16x64xbf16>
    %31 = vector.shape_cast %30 : vector<16x16x64xbf16> to vector<256x64xbf16>
    %c4 = arith.constant 4 : index
    %c0_35 = arith.constant 0 : index
    %c0_36 = arith.constant 0 : index
    %32 = vector.load %arg2[%c4, %c0_35, %c0_36] : memref<9x64x64xbf16, #tpu.memory_space<vmem>>, vector<1x64x64xbf16>
    %33 = vector.shape_cast %32 : vector<1x64x64xbf16> to vector<64x64xbf16>
    %cst_37 = arith.constant dense<0.000000e+00> : vector<256x64xf32>
    %34 = tpu.matmul %31, %33, %cst_37 {dimension_numbers = #tpu.dot_dimension_numbers<[1], [0], [0], [1], [0, 0, 1, 1], [], []>} : vector<256x64xbf16>, vector<64x64xbf16>, vector<256x64xf32> -> vector<256x64xf32>
    %35 = arith.addf %28, %34 : vector<256x64xf32>
    %c0_38 = arith.constant 0 : index
    %c1_39 = arith.constant 1 : index
    %c2_40 = arith.constant 2 : index
    %c0_41 = arith.constant 0 : index
    %36 = vector.load %arg1[%c0_38, %c1_39, %c2_40, %c0_41] : memref<1x18x18x64xbf16, #tpu.memory_space<vmem>>, vector<1x16x16x64xbf16>
    %37 = vector.shape_cast %36 : vector<1x16x16x64xbf16> to vector<16x16x64xbf16>
    %38 = vector.shape_cast %37 : vector<16x16x64xbf16> to vector<256x64xbf16>
    %c5 = arith.constant 5 : index
    %c0_42 = arith.constant 0 : index
    %c0_43 = arith.constant 0 : index
    %39 = vector.load %arg2[%c5, %c0_42, %c0_43] : memref<9x64x64xbf16, #tpu.memory_space<vmem>>, vector<1x64x64xbf16>
    %40 = vector.shape_cast %39 : vector<1x64x64xbf16> to vector<64x64xbf16>
    %cst_44 = arith.constant dense<0.000000e+00> : vector<256x64xf32>
    %41 = tpu.matmul %38, %40, %cst_44 {dimension_numbers = #tpu.dot_dimension_numbers<[1], [0], [0], [1], [0, 0, 1, 1], [], []>} : vector<256x64xbf16>, vector<64x64xbf16>, vector<256x64xf32> -> vector<256x64xf32>
    %42 = arith.addf %35, %41 : vector<256x64xf32>
    %c0_45 = arith.constant 0 : index
    %c2_46 = arith.constant 2 : index
    %c0_47 = arith.constant 0 : index
    %c0_48 = arith.constant 0 : index
    %43 = vector.load %arg1[%c0_45, %c2_46, %c0_47, %c0_48] : memref<1x18x18x64xbf16, #tpu.memory_space<vmem>>, vector<1x16x16x64xbf16>
    %44 = vector.shape_cast %43 : vector<1x16x16x64xbf16> to vector<16x16x64xbf16>
    %45 = vector.shape_cast %44 : vector<16x16x64xbf16> to vector<256x64xbf16>
    %c6 = arith.constant 6 : index
    %c0_49 = arith.constant 0 : index
    %c0_50 = arith.constant 0 : index
    %46 = vector.load %arg2[%c6, %c0_49, %c0_50] : memref<9x64x64xbf16, #tpu.memory_space<vmem>>, vector<1x64x64xbf16>
    %47 = vector.shape_cast %46 : vector<1x64x64xbf16> to vector<64x64xbf16>
    %cst_51 = arith.constant dense<0.000000e+00> : vector<256x64xf32>
    %48 = tpu.matmul %45, %47, %cst_51 {dimension_numbers = #tpu.dot_dimension_numbers<[1], [0], [0], [1], [0, 0, 1, 1], [], []>} : vector<256x64xbf16>, vector<64x64xbf16>, vector<256x64xf32> -> vector<256x64xf32>
    %49 = arith.addf %42, %48 : vector<256x64xf32>
    %c0_52 = arith.constant 0 : index
    %c2_53 = arith.constant 2 : index
    %c1_54 = arith.constant 1 : index
    %c0_55 = arith.constant 0 : index
    %50 = vector.load %arg1[%c0_52, %c2_53, %c1_54, %c0_55] : memref<1x18x18x64xbf16, #tpu.memory_space<vmem>>, vector<1x16x16x64xbf16>
    %51 = vector.shape_cast %50 : vector<1x16x16x64xbf16> to vector<16x16x64xbf16>
    %52 = vector.shape_cast %51 : vector<16x16x64xbf16> to vector<256x64xbf16>
    %c7 = arith.constant 7 : index
    %c0_56 = arith.constant 0 : index
    %c0_57 = arith.constant 0 : index
    %53 = vector.load %arg2[%c7, %c0_56, %c0_57] : memref<9x64x64xbf16, #tpu.memory_space<vmem>>, vector<1x64x64xbf16>
    %54 = vector.shape_cast %53 : vector<1x64x64xbf16> to vector<64x64xbf16>
    %cst_58 = arith.constant dense<0.000000e+00> : vector<256x64xf32>
    %55 = tpu.matmul %52, %54, %cst_58 {dimension_numbers = #tpu.dot_dimension_numbers<[1], [0], [0], [1], [0, 0, 1, 1], [], []>} : vector<256x64xbf16>, vector<64x64xbf16>, vector<256x64xf32> -> vector<256x64xf32>
    %56 = arith.addf %49, %55 : vector<256x64xf32>
    %c0_59 = arith.constant 0 : index
    %c2_60 = arith.constant 2 : index
    %c2_61 = arith.constant 2 : index
    %c0_62 = arith.constant 0 : index
    %57 = vector.load %arg1[%c0_59, %c2_60, %c2_61, %c0_62] : memref<1x18x18x64xbf16, #tpu.memory_space<vmem>>, vector<1x16x16x64xbf16>
    %58 = vector.shape_cast %57 : vector<1x16x16x64xbf16> to vector<16x16x64xbf16>
    %59 = vector.shape_cast %58 : vector<16x16x64xbf16> to vector<256x64xbf16>
    %c8 = arith.constant 8 : index
    %c0_63 = arith.constant 0 : index
    %c0_64 = arith.constant 0 : index
    %60 = vector.load %arg2[%c8, %c0_63, %c0_64] : memref<9x64x64xbf16, #tpu.memory_space<vmem>>, vector<1x64x64xbf16>
    %61 = vector.shape_cast %60 : vector<1x64x64xbf16> to vector<64x64xbf16>
    %cst_65 = arith.constant dense<0.000000e+00> : vector<256x64xf32>
    %62 = tpu.matmul %59, %61, %cst_65 {dimension_numbers = #tpu.dot_dimension_numbers<[1], [0], [0], [1], [0, 0, 1, 1], [], []>} : vector<256x64xbf16>, vector<64x64xbf16>, vector<256x64xf32> -> vector<256x64xf32>
    %63 = arith.addf %56, %62 : vector<256x64xf32>
    %c0_66 = arith.constant 0 : index
    %c0_67 = arith.constant 0 : index
    %64 = vector.load %arg4[%c0_66, %c0_67] : memref<1x64xf32, #tpu.memory_space<vmem>>, vector<1x64xf32>
    %65 = vector.broadcast %64 : vector<1x64xf32> to vector<256x64xf32>
    %66 = arith.addf %63, %65 : vector<256x64xf32>
    %cst_68 = arith.constant 0.000000e+00 : f32
    %67 = vector.broadcast %cst_68 : f32 to vector<256x64xf32>
    %68 = arith.cmpf ogt, %66, %67 : vector<256x64xf32>
    %c0_69 = arith.constant 0 : index
    %c0_70 = arith.constant 0 : index
    %69 = vector.load %arg5[%c0_69, %c0_70] : memref<1x64xf32, #tpu.memory_space<vmem>>, vector<1x64xf32>
    %70 = vector.broadcast %69 : vector<1x64xf32> to vector<256x64xf32>
    %71 = arith.mulf %70, %66 : vector<256x64xf32>
    %72 = arith.select %68, %66, %71 : vector<256x64xi1>, vector<256x64xf32>
    %73 = vector.shape_cast %72 : vector<256x64xf32> to vector<16x16x64xf32>
    %74 = arith.truncf %73 : vector<16x16x64xf32> to vector<16x16x64xbf16>
    %c1_71 = arith.constant 1 : index
    %c1_72 = arith.constant 1 : index
    %c0_73 = arith.constant 0 : index
    %75 = vector.load %arg8[%c1_71, %c1_72, %c0_73] : memref<18x18x64xbf16, #tpu.memory_space<vmem>>, vector<16x16x64xbf16>
    tpu.vector_store %arg8[%c1_71, %c1_72, %c0_73], %74 {strides = array<i32>} : memref<18x18x64xbf16, #tpu.memory_space<vmem>>, vector<16x16x64xbf16>,
    %c0_74 = arith.constant 0 : index
    %c0_75 = arith.constant 0 : index
    %c0_76 = arith.constant 0 : index
    %76 = vector.load %arg8[%c0_74, %c0_75, %c0_76] : memref<18x18x64xbf16, #tpu.memory_space<vmem>>, vector<16x16x64xbf16>
    %77 = vector.shape_cast %76 : vector<16x16x64xbf16> to vector<256x64xbf16>
    %c0_77 = arith.constant 0 : index
    %c0_78 = arith.constant 0 : index
    %c0_79 = arith.constant 0 : index
    %78 = vector.load %arg3[%c0_77, %c0_78, %c0_79] : memref<9x64x64xbf16, #tpu.memory_space<vmem>>, vector<1x64x64xbf16>
    %79 = vector.shape_cast %78 : vector<1x64x64xbf16> to vector<64x64xbf16>
    %cst_80 = arith.constant dense<0.000000e+00> : vector<256x64xf32>
    %80 = tpu.matmul %77, %79, %cst_80 {dimension_numbers = #tpu.dot_dimension_numbers<[1], [0], [0], [1], [0, 0, 1, 1], [], []>} : vector<256x64xbf16>, vector<64x64xbf16>, vector<256x64xf32> -> vector<256x64xf32>
    %c0_81 = arith.constant 0 : index
    %c1_82 = arith.constant 1 : index
    %c0_83 = arith.constant 0 : index
    %81 = vector.load %arg8[%c0_81, %c1_82, %c0_83] : memref<18x18x64xbf16, #tpu.memory_space<vmem>>, vector<16x16x64xbf16>
    %82 = vector.shape_cast %81 : vector<16x16x64xbf16> to vector<256x64xbf16>
    %c1_84 = arith.constant 1 : index
    %c0_85 = arith.constant 0 : index
    %c0_86 = arith.constant 0 : index
    %83 = vector.load %arg3[%c1_84, %c0_85, %c0_86] : memref<9x64x64xbf16, #tpu.memory_space<vmem>>, vector<1x64x64xbf16>
    %84 = vector.shape_cast %83 : vector<1x64x64xbf16> to vector<64x64xbf16>
    %cst_87 = arith.constant dense<0.000000e+00> : vector<256x64xf32>
    %85 = tpu.matmul %82, %84, %cst_87 {dimension_numbers = #tpu.dot_dimension_numbers<[1], [0], [0], [1], [0, 0, 1, 1], [], []>} : vector<256x64xbf16>, vector<64x64xbf16>, vector<256x64xf32> -> vector<256x64xf32>
    %86 = arith.addf %80, %85 : vector<256x64xf32>
    %c0_88 = arith.constant 0 : index
    %c2_89 = arith.constant 2 : index
    %c0_90 = arith.constant 0 : index
    %87 = vector.load %arg8[%c0_88, %c2_89, %c0_90] : memref<18x18x64xbf16, #tpu.memory_space<vmem>>, vector<16x16x64xbf16>
    %88 = vector.shape_cast %87 : vector<16x16x64xbf16> to vector<256x64xbf16>
    %c2_91 = arith.constant 2 : index
    %c0_92 = arith.constant 0 : index
    %c0_93 = arith.constant 0 : index
    %89 = vector.load %arg3[%c2_91, %c0_92, %c0_93] : memref<9x64x64xbf16, #tpu.memory_space<vmem>>, vector<1x64x64xbf16>
    %90 = vector.shape_cast %89 : vector<1x64x64xbf16> to vector<64x64xbf16>
    %cst_94 = arith.constant dense<0.000000e+00> : vector<256x64xf32>
    %91 = tpu.matmul %88, %90, %cst_94 {dimension_numbers = #tpu.dot_dimension_numbers<[1], [0], [0], [1], [0, 0, 1, 1], [], []>} : vector<256x64xbf16>, vector<64x64xbf16>, vector<256x64xf32> -> vector<256x64xf32>
    %92 = arith.addf %86, %91 : vector<256x64xf32>
    %c1_95 = arith.constant 1 : index
    %c0_96 = arith.constant 0 : index
    %c0_97 = arith.constant 0 : index
    %93 = vector.load %arg8[%c1_95, %c0_96, %c0_97] : memref<18x18x64xbf16, #tpu.memory_space<vmem>>, vector<16x16x64xbf16>
    %94 = vector.shape_cast %93 : vector<16x16x64xbf16> to vector<256x64xbf16>
    %c3_98 = arith.constant 3 : index
    %c0_99 = arith.constant 0 : index
    %c0_100 = arith.constant 0 : index
    %95 = vector.load %arg3[%c3_98, %c0_99, %c0_100] : memref<9x64x64xbf16, #tpu.memory_space<vmem>>, vector<1x64x64xbf16>
    %96 = vector.shape_cast %95 : vector<1x64x64xbf16> to vector<64x64xbf16>
    %cst_101 = arith.constant dense<0.000000e+00> : vector<256x64xf32>
    %97 = tpu.matmul %94, %96, %cst_101 {dimension_numbers = #tpu.dot_dimension_numbers<[1], [0], [0], [1], [0, 0, 1, 1], [], []>} : vector<256x64xbf16>, vector<64x64xbf16>, vector<256x64xf32> -> vector<256x64xf32>
    %98 = arith.addf %92, %97 : vector<256x64xf32>
    %c1_102 = arith.constant 1 : index
    %c1_103 = arith.constant 1 : index
    %c0_104 = arith.constant 0 : index
    %99 = vector.load %arg8[%c1_102, %c1_103, %c0_104] : memref<18x18x64xbf16, #tpu.memory_space<vmem>>, vector<16x16x64xbf16>
    %100 = vector.shape_cast %99 : vector<16x16x64xbf16> to vector<256x64xbf16>
    %c4_105 = arith.constant 4 : index
    %c0_106 = arith.constant 0 : index
    %c0_107 = arith.constant 0 : index
    %101 = vector.load %arg3[%c4_105, %c0_106, %c0_107] : memref<9x64x64xbf16, #tpu.memory_space<vmem>>, vector<1x64x64xbf16>
    %102 = vector.shape_cast %101 : vector<1x64x64xbf16> to vector<64x64xbf16>
    %cst_108 = arith.constant dense<0.000000e+00> : vector<256x64xf32>
    %103 = tpu.matmul %100, %102, %cst_108 {dimension_numbers = #tpu.dot_dimension_numbers<[1], [0], [0], [1], [0, 0, 1, 1], [], []>} : vector<256x64xbf16>, vector<64x64xbf16>, vector<256x64xf32> -> vector<256x64xf32>
    %104 = arith.addf %98, %103 : vector<256x64xf32>
    %c1_109 = arith.constant 1 : index
    %c2_110 = arith.constant 2 : index
    %c0_111 = arith.constant 0 : index
    %105 = vector.load %arg8[%c1_109, %c2_110, %c0_111] : memref<18x18x64xbf16, #tpu.memory_space<vmem>>, vector<16x16x64xbf16>
    %106 = vector.shape_cast %105 : vector<16x16x64xbf16> to vector<256x64xbf16>
    %c5_112 = arith.constant 5 : index
    %c0_113 = arith.constant 0 : index
    %c0_114 = arith.constant 0 : index
    %107 = vector.load %arg3[%c5_112, %c0_113, %c0_114] : memref<9x64x64xbf16, #tpu.memory_space<vmem>>, vector<1x64x64xbf16>
    %108 = vector.shape_cast %107 : vector<1x64x64xbf16> to vector<64x64xbf16>
    %cst_115 = arith.constant dense<0.000000e+00> : vector<256x64xf32>
    %109 = tpu.matmul %106, %108, %cst_115 {dimension_numbers = #tpu.dot_dimension_numbers<[1], [0], [0], [1], [0, 0, 1, 1], [], []>} : vector<256x64xbf16>, vector<64x64xbf16>, vector<256x64xf32> -> vector<256x64xf32>
    %110 = arith.addf %104, %109 : vector<256x64xf32>
    %c2_116 = arith.constant 2 : index
    %c0_117 = arith.constant 0 : index
    %c0_118 = arith.constant 0 : index
    %111 = vector.load %arg8[%c2_116, %c0_117, %c0_118] : memref<18x18x64xbf16, #tpu.memory_space<vmem>>, vector<16x16x64xbf16>
    %112 = vector.shape_cast %111 : vector<16x16x64xbf16> to vector<256x64xbf16>
    %c6_119 = arith.constant 6 : index
    %c0_120 = arith.constant 0 : index
    %c0_121 = arith.constant 0 : index
    %113 = vector.load %arg3[%c6_119, %c0_120, %c0_121] : memref<9x64x64xbf16, #tpu.memory_space<vmem>>, vector<1x64x64xbf16>
    %114 = vector.shape_cast %113 : vector<1x64x64xbf16> to vector<64x64xbf16>
    %cst_122 = arith.constant dense<0.000000e+00> : vector<256x64xf32>
    %115 = tpu.matmul %112, %114, %cst_122 {dimension_numbers = #tpu.dot_dimension_numbers<[1], [0], [0], [1], [0, 0, 1, 1], [], []>} : vector<256x64xbf16>, vector<64x64xbf16>, vector<256x64xf32> -> vector<256x64xf32>
    %116 = arith.addf %110, %115 : vector<256x64xf32>
    %c2_123 = arith.constant 2 : index
    %c1_124 = arith.constant 1 : index
    %c0_125 = arith.constant 0 : index
    %117 = vector.load %arg8[%c2_123, %c1_124, %c0_125] : memref<18x18x64xbf16, #tpu.memory_space<vmem>>, vector<16x16x64xbf16>
    %118 = vector.shape_cast %117 : vector<16x16x64xbf16> to vector<256x64xbf16>
    %c7_126 = arith.constant 7 : index
    %c0_127 = arith.constant 0 : index
    %c0_128 = arith.constant 0 : index
    %119 = vector.load %arg3[%c7_126, %c0_127, %c0_128] : memref<9x64x64xbf16, #tpu.memory_space<vmem>>, vector<1x64x64xbf16>
    %120 = vector.shape_cast %119 : vector<1x64x64xbf16> to vector<64x64xbf16>
    %cst_129 = arith.constant dense<0.000000e+00> : vector<256x64xf32>
    %121 = tpu.matmul %118, %120, %cst_129 {dimension_numbers = #tpu.dot_dimension_numbers<[1], [0], [0], [1], [0, 0, 1, 1], [], []>} : vector<256x64xbf16>, vector<64x64xbf16>, vector<256x64xf32> -> vector<256x64xf32>
    %122 = arith.addf %116, %121 : vector<256x64xf32>
    %c2_130 = arith.constant 2 : index
    %c2_131 = arith.constant 2 : index
    %c0_132 = arith.constant 0 : index
    %123 = vector.load %arg8[%c2_130, %c2_131, %c0_132] : memref<18x18x64xbf16, #tpu.memory_space<vmem>>, vector<16x16x64xbf16>
    %124 = vector.shape_cast %123 : vector<16x16x64xbf16> to vector<256x64xbf16>
    %c8_133 = arith.constant 8 : index
    %c0_134 = arith.constant 0 : index
    %c0_135 = arith.constant 0 : index
    %125 = vector.load %arg3[%c8_133, %c0_134, %c0_135] : memref<9x64x64xbf16, #tpu.memory_space<vmem>>, vector<1x64x64xbf16>
    %126 = vector.shape_cast %125 : vector<1x64x64xbf16> to vector<64x64xbf16>
    %cst_136 = arith.constant dense<0.000000e+00> : vector<256x64xf32>
    %127 = tpu.matmul %124, %126, %cst_136 {dimension_numbers = #tpu.dot_dimension_numbers<[1], [0], [0], [1], [0, 0, 1, 1], [], []>} : vector<256x64xbf16>, vector<64x64xbf16>, vector<256x64xf32> -> vector<256x64xf32>
    %128 = arith.addf %122, %127 : vector<256x64xf32>
    %c0_137 = arith.constant 0 : index
    %c0_138 = arith.constant 0 : index
    %129 = vector.load %arg6[%c0_137, %c0_138] : memref<1x64xf32, #tpu.memory_space<vmem>>, vector<1x64xf32>
    %130 = vector.broadcast %129 : vector<1x64xf32> to vector<256x64xf32>
    %131 = arith.addf %128, %130 : vector<256x64xf32>
    %c0_139 = arith.constant 0 : index
    %c1_140 = arith.constant 1 : index
    %c1_141 = arith.constant 1 : index
    %c0_142 = arith.constant 0 : index
    %132 = vector.load %arg1[%c0_139, %c1_140, %c1_141, %c0_142] : memref<1x18x18x64xbf16, #tpu.memory_space<vmem>>, vector<1x16x16x64xbf16>
    %133 = vector.shape_cast %132 : vector<1x16x16x64xbf16> to vector<16x16x64xbf16>
    %134 = vector.shape_cast %133 : vector<16x16x64xbf16> to vector<256x64xbf16>
    %135 = arith.extf %134 : vector<256x64xbf16> to vector<256x64xf32>
    %136 = arith.addf %131, %135 : vector<256x64xf32>
    %137 = vector.shape_cast %136 : vector<256x64xf32> to vector<16x16x64xf32>
    %c0_143 = arith.constant 0 : index
    %c0_144 = arith.constant 0 : index
    %c0_145 = arith.constant 0 : index
    %c0_146 = arith.constant 0 : index
    %138 = vector.load %arg7[%c0_143, %c0_144, %c0_145, %c0_146] : memref<1x16x16x64xf32, #tpu.memory_space<vmem>>, vector<1x16x16x64xf32>
    %139 = vector.shape_cast %138 : vector<1x16x16x64xf32> to vector<16x16x64xf32>
    %140 = vector.shape_cast %137 : vector<16x16x64xf32> to vector<1x16x16x64xf32>
    tpu.vector_store %arg7[%c0_143, %c0_144, %c0_145, %c0_146], %140 {strides = array<i32>} : memref<1x16x16x64xf32, #tpu.memory_space<vmem>>, vector<1x16x16x64xf32>,
    return
  }
  func.func @transform_0(%arg0: i32) -> (i32, i32, i32, i32) {
    %c0_i32 = arith.constant 0 : i32
    %c0_i32_0 = arith.constant 0 : i32
    %c0_i32_1 = arith.constant 0 : i32
    %c0_i32_2 = arith.constant 0 : i32
    return %arg0, %c0_i32, %c0_i32_0, %c0_i32_1 : i32, i32, i32, i32
  }
  func.func @transform_1(%arg0: i32) -> (i32, i32, i32) {
    %c0_i32 = arith.constant 0 : i32
    %c0_i32_0 = arith.constant 0 : i32
    %c0_i32_1 = arith.constant 0 : i32
    %c0_i32_2 = arith.constant 0 : i32
    return %c0_i32, %c0_i32_0, %c0_i32_1 : i32, i32, i32
  }
  func.func @transform_2(%arg0: i32) -> (i32, i32, i32) {
    %c0_i32 = arith.constant 0 : i32
    %c0_i32_0 = arith.constant 0 : i32
    %c0_i32_1 = arith.constant 0 : i32
    %c0_i32_2 = arith.constant 0 : i32
    return %c0_i32, %c0_i32_0, %c0_i32_1 : i32, i32, i32
  }
  func.func @transform_3(%arg0: i32) -> (i32, i32) {
    %c0_i32 = arith.constant 0 : i32
    %c0_i32_0 = arith.constant 0 : i32
    %c0_i32_1 = arith.constant 0 : i32
    return %c0_i32, %c0_i32_0 : i32, i32
  }
  func.func @transform_4(%arg0: i32) -> (i32, i32) {
    %c0_i32 = arith.constant 0 : i32
    %c0_i32_0 = arith.constant 0 : i32
    %c0_i32_1 = arith.constant 0 : i32
    return %c0_i32, %c0_i32_0 : i32, i32
  }
  func.func @transform_5(%arg0: i32) -> (i32, i32) {
    %c0_i32 = arith.constant 0 : i32
    %c0_i32_0 = arith.constant 0 : i32
    %c0_i32_1 = arith.constant 0 : i32
    return %c0_i32, %c0_i32_0 : i32, i32
  }
  func.func @transform_6(%arg0: i32) -> (i32, i32, i32, i32) {
    %c0_i32 = arith.constant 0 : i32
    %c0_i32_0 = arith.constant 0 : i32
    %c0_i32_1 = arith.constant 0 : i32
    %c0_i32_2 = arith.constant 0 : i32
    return %arg0, %c0_i32, %c0_i32_0, %c0_i32_1 : i32, i32, i32, i32
  }
}

</mosaic_0001>

<bundles_post_ra>
// kernel: residual_block_forward.1
= control target key start
LH: loop header
LB: loop body
LE: loop exit
PB: predicated region body
PF: predicated region fallthrough
CT: control target
= control target key end

     0   :  { %11 = vsyncpa [#allocation4], 0  ;;  %s18729_s0 = inlined_call_operand.vmem [shape: bf16[2,18,18,64], index: 0, kind: input, shape index: {}]   ;;  %s18730_s1 = inlined_call_operand.vmem [shape: bf16[9,64,64], index: 1, kind: input, shape index: {}]   ;;  %s18731_s2 = inlined_call_operand.vmem [shape: bf16[9,64,64], index: 2, kind: input, shape index: {}]   ;;  %s18732_s3 = inlined_call_operand.vmem [shape: f32[1,64], index: 3, kind: input, shape index: {}]   ;;  %s18733_s4 = inlined_call_operand.vmem [shape: f32[1,64], index: 4, kind: input, shape index: {}]   ;;  %s18734_s5 = inlined_call_operand.vmem [shape: f32[1,64], index: 5, kind: input, shape index: {}]   ;;  %s18735_s6 = inlined_call_operand.hbm [shape: f32[2,16,16,64], index: 6, kind: output, shape index: {}]  }
   0x1   :  { %13 = vsyncpa [#allocation4 + $0x1], 0  ;;  %s14401_s21 = smov 0   ;;  %s14403_s22 = smov 0  }
   0x2   :  { %s14405_s23 = smov 0   ;;  %s14407_s24 = smov 0  }
   0x3 LB: > { %s14422_s25 = sadd.s32 4294967295, %s14360_s24   ;;  %s11273_s26 = sadd.s32 4294967294, %s14360_s24   ;;  %s14360_s24 = sphi %s14407_s24, %s19095_s24   ;;  %s14356_s23 = sphi %s14405_s23, %s19094_s23   ;;  %s14352_s22 = sphi %s14403_s22, %s19093_s22   ;;  %s14348_s21 = sphi %s14401_s21, %s19092_s21  }
   0x4   : > { %s14426_s27 = sadd.s32 1, %s14360_s24   ;;  %s157_s28 = sadd.s32 1, %s14356_s23 }
   0x5   : > { %s154_s29 = ssub.s32 %s14360_s24, %s14426_s27  ;;  %p167_p0 = scmp.ne.s32.totalorder %s14356_s23, %s14352_s22 }
   0x6   : > { %p155_p1 = scmp.eq.s32.totalorder %s154_s29, 0  ;;  %p168_p2 = scmp.eq.s32.totalorder %s14422_s25, 1 }
   0x7   : > { %p173_p3 = scmp.ne.s32.totalorder %s14352_s22, %s14348_s21  ;;  %p174_p4 = scmp.eq.s32.totalorder %s11273_s26, 1 }
   0x8   : > { %s14437_s30 = scalar_select %p155_p1, %s14356_s23, %s157_s28  }
   0x9   : > { %p14439_p5 = por %p168_p2, %p167_p0  ;;  %p14443_p6 = por %p174_p4, %p173_p3 }
   0xa   : > { %p11276_p7 = scmp.ge.s32.totalorder %s14360_s24, 1  ;;  %p215_p8 = scmp.lt.s32.totalorder %s14360_s24, 3 }
   0xc   : > { %p216_p9 = pnand %p11276_p7, %p215_p8 }
   0xe   : > { %219 = sbr.rel (%p216_p9) target bundleno = 1681 (0x691), region = 44 }
  0x15   : > { %v14099_v0 = vld [vmem:[%s18730_s1 + $0x20] sm:$0xff]   ;;  %p245_p10 = scmp.lt.s32.totalorder %s14422_s25, 1  ;;  %v14100_v1 = vld [vmem:[%s18730_s1 + $0x28] sm:$0xff]   ;;  %v14101_v2 = vld [vmem:[%s18730_s1 + $0x30] sm:$0xff]   ;;  %vm363_vm0 = vsmask.f32 3328 }
  0x16   : > { %12824 = vmatprep.subr.bf16.mxu0 %v14099_v0  ;;  %v14102_v3 = vld [vmem:[%s18730_s1 + $0x38] sm:$0xff]   ;;  %vm364_vm1 = vsmask.f32 7440  ;;  %v14103_v25 = vld [vmem:[%s18730_s1] sm:$0xff]   ;;  %vm831_vm3 = vcmask 523264   ;;  %vm1402_vm4 = vcmask 1042432  }
  0x17   : > { %s246_s13 = scalar_select %p245_p10, %s14422_s25, 1  ;;  %12825 = vmatpush3.bf16.msra.mxu0 %v14099_v0  ;;  %vm14501_vm2 = vmor %vm363_vm0, %vm364_vm1  ;;  %vm1403_vm5 = vcmask 1046532   ;;  %vm251_vm7 = vcmask 519168   ;;  %vm254_vm8 = vcmask 516096   ;;  %vm5680_vm11 = vsmask.f32 7938 }
  0x18   : > { %12826 = vmatprep.subr.bf16.mxu0 %v14100_v1  ;;  %vm14817_vm6 = vmor %vm1402_vm4, %vm1403_vm5  ;;  %vm5355_vm14 = vsmask.f32 256  ;;  %vm5356_vm15 = vsmask.f32 4368  ;;  %s242_s11 = sand.u32 1, %s14352_s22   ;;  %s14363_s28 = smov [#allocation3]  }
  0x19   : > { %s14056_s16 = smul.u32 216, %s246_s13  ;;  %vm16491_vm0 = vmand %vm251_vm7, %vm5680_vm11  ;;  %s18432_s14 = sshll.u32 %s242_s11, 8 }
  0x1a   : > { %vm16497_vm4 = vmor %vm5355_vm14, %vm5356_vm15  ;;  %s18454_s15 = scalar_lea.vmem [#allocation3], %s18432_s14  ;;  %s14302_s29 = sshll.u32 %s14363_s28, 4  ;;  %s14303_s29 = int_to_ptr.vmem [resolvable:$false] %s14302_s29 }
  0x1b   : > { %s14466_s26 = scalar_lea.vmem %s18729_s0, %s14056_s16  ;;  %12827 = vmatpush3.bf16.msra.mxu0 %v14100_v1  ;;  %vm16504_vm5 = vmand %vm254_vm8, %vm5355_vm14  ;;  %s11211_s16 = sshll.u32 %s18454_s15, 4  ;;  %s18678_s16 = int_to_ptr.vmem [resolvable:$true] %s11211_s16 }
  0x1c   : > { %v14469_v4 = vld [vmem:[%s14466_s26] sm:$0xf]  ;;  %v14472_v5 = vld [vmem:[%s14466_s26 + $0x4] sm:$0xf]  ;;  %v347_v6 = vld [vmem:[%s14466_s26 + $0x8] sm:$0x1]  ;;  %12828 = vmatprep.subr.bf16.mxu0 %v14101_v2  ;;  %p14305_p0 = scmp.lt.s32.totalorder %s18678_s16, %s14303_s29 }
  0x1d   : > { %v367_v7 = vshrl.u32 %v14469_v4, 16  ;;  %v370_v8 = vshll.u32 %v14469_v4, 16  ;;  %v376_v9 = vshll.u32 %v14472_v5, 16  ;;  %v380_v10 = vshrl.u32 %v14472_v5, 16  ;;  %v14480_v11 = vld [vmem:[%s14466_s26 + $0xc] sm:$0xf] }
  0x1e   : > { %v386_v12 = vshll.u32 %v347_v6, 16  ;;  %v14483_v13 = vld [vmem:[%s14466_s26 + $0x10] sm:$0xf]  ;;  %v14486_v14 = vld [vmem:[%s14466_s26 + $0x14] sm:$0x1]  ;;  %v391_v20 = vshrl.u32 %v14480_v11, 16 }
  0x1f   : > { %v369_v15 = vrot.slane %v367_v7, 4  ;;  %v372_v16 = vrot.slane %v370_v8, 5  ;;  %v378_v17 = vrot.slane %v376_v9, 5  ;;  %v382_v18 = vrot.slane %v380_v10, 4  ;;  %12829 = vmatpush3.bf16.msra.mxu0 %v14101_v2  ;;  %v14497_v28 = vld [vmem:[%s14466_s26 + $0x18] sm:$0xf] }
  0x20   : > { %v388_v19 = vrot.slane %v386_v12, 5  ;;  %v394_v21 = vshll.u32 %v14480_v11, 16  ;;  %v400_v22 = vshll.u32 %v14483_v13, 16  ;;  %12830 = vmatprep.subr.bf16.mxu0 %v14102_v3  ;;  %v404_v26 = vshrl.u32 %v14483_v13, 16  ;;  %v14506_v33 = vld [vmem:[%s14466_s26 + $0x1c] sm:$0xf] }
  0x21   : > { %v373_v23 = vor.u32 %v372_v16, %v369_v15  ;;  %v383_v24 = vor.u32 %v382_v18, %v378_v17  ;;  %v410_v27 = vshll.u32 %v14486_v14, 16  ;;  %v393_v30 = vrot.slane %v391_v20, 4  ;;  %v349_v40 = vld [vmem:[%s14466_s26 + $0x20] sm:$0x1]  ;;  %v14519_v47 = vld [vmem:[%s14466_s26 + $0x24] sm:$0xf] }
  0x22   : > { %v396_v31 = vrot.slane %v394_v21, 5  ;;  %v402_v32 = vrot.slane %v400_v22, 5  ;;  %v406_v36 = vrot.slane %v404_v26, 4  ;;  %v415_v41 = vshrl.u32 %v14497_v28, 16  ;;  %v14522_v52 = vld [vmem:[%s14466_s26 + $0x28] sm:$0xf] }
  0x23   : > { %v374_v34 = vrot.slane %v373_v23, 4  ;;  %v384_v35 = vrot.slane %v383_v24, 4  ;;  %12831 = vmatpush3.bf16.msra.mxu0 %v14102_v3  ;;  %v412_v39 = vrot.slane %v410_v27, 5  ;;  %v418_v42 = vshll.u32 %v14497_v28, 16  ;;  %v350_v59 = vld [vmem:[%s14466_s26 + $0x2c] sm:$0x1] }
  0x24   : > { %v397_v38 = vor.u32 %v396_v31, %v393_v30  ;;  %12864 = vmatprep.subr.bf16.mxu0 %v14103_v25  ;;  %v407_v45 = vor.u32 %v406_v36, %v402_v32  ;;  %v424_v46 = vshll.u32 %v14506_v33, 16  ;;  %v417_v50 = vrot.slane %v415_v41, 4  ;;  %v14535_v2 = vld [vmem:[%s14466_s26 + $0x30] sm:$0xf]  ;;  %v14538_v9 = vld [vmem:[%s14466_s26 + $0x34] sm:$0xf] }
  0x25   : > { %v379_v43 = vsel %vm14501_vm2, %v374_v34, %v378_v17  ;;  %v389_v44 = vsel %vm14501_vm2, %v384_v35, %v388_v19  ;;  %v420_v51 = vrot.slane %v418_v42, 5  ;;  %v428_v55 = vshrl.u32 %v14506_v33, 16  ;;  %v14104_v10 = vld [vmem:[%s18730_s1 + $0x8] sm:$0xff]   ;;  %v14548_v20 = vld [vmem:[%s14466_s26 + $0x38] sm:$0x1]  ;;  %v14105_v30 = vld [vmem:[%s18730_s1 + $0x10] sm:$0xff]  }
  0x26   : > { %v11287_v48 = vcombine.low %v379_v43, %v389_v44  ;;  %v398_v49 = vrot.slane %v397_v38, 4  ;;  %v408_v53 = vrot.slane %v407_v45, 4  ;;  %v426_v54 = vrot.slane %v424_v46, 5  ;;  %v14558_v36 = vld [vmem:[%s14466_s26 + $0x3c] sm:$0xf]  ;;  %s14298_s20 = scalar_lea.vmem %s18678_s16, 4096 }
  0x27   : > { %v434_v56 = vshll.u32 %v349_v40, 16  ;;  %v421_v58 = vor.u32 %v420_v51, %v417_v50  ;;  %v439_v60 = vshrl.u32 %v14519_v47, 16  ;;  %v442_v61 = vshll.u32 %v14519_v47, 16  ;;  %v14564_v41 = vld [vmem:[%s14466_s26 + $0x40] sm:$0xf]  ;;  %p14299_p11 = scmp.ne.s32.totalorder %s18678_s16, %s14298_s20  ;;  %s14304_s9 = scalar_lea.vmem %s14303_s29, 8192 }
  0x28   : > { %12832 = vmatprep.mubr.msk.bf16.mxu0 %vm831_vm3, %v11287_v48  ;;  %v403_v57 = vsel %vm14501_vm2, %v398_v49, %v402_v32  ;;  %v413_v62 = vsel %vm14501_vm2, %v408_v53, %v412_v39  ;;  %v430_v63 = vrot.slane %v428_v55, 4  ;;  %v448_v1 = vshll.u32 %v14522_v52, 16  ;;  %v14569_v46 = vld [vmem:[%s14466_s26 + $0x44] sm:$0x1]  ;;  %p14306_p1 = scmp.lt.s32.totalorder %s14304_s9, %s14298_s20 }
  0x29   : > { %v436_v0 = vrot.slane %v434_v56, 5  ;;  %v11288_v3 = vcombine.low %v403_v57, %v413_v62  ;;  %v422_v6 = vrot.slane %v421_v58, 4  ;;  %v441_v7 = vrot.slane %v439_v60, 4  ;;  %v14577_v57 = vld [vmem:[%s14466_s26 + $0x48] sm:$0xf]  ;;  %v14106_v58 = vld [vmem:[%s18730_s1 + $0x18] sm:$0xff]   ;;  %p14300_p12 = pnand %p14299_p11, %p14439_p5 }
  0x2a   : > { %v444_v8 = vrot.slane %v442_v61, 5  ;;  %v431_v12 = vor.u32 %v430_v63, %v426_v54  ;;  %v450_v15 = vrot.slane %v448_v1, 5  ;;  %v452_v16 = vshrl.u32 %v14522_v52, 16  ;;  %v14586_v63 = vld [vmem:[%s14466_s26 + $0x4c] sm:$0xf]  ;;  %p14307_p2 = por %p14306_p1, %p14305_p0 }
  0x2b   : > { %v458_v17 = vshll.u32 %v350_v59, 16  ;;  %12833 = vmatmul.mubr.msk.bf16.vlgmr.msra.gmra.mrb[0].mxu0 %vm831_vm3, %v11288_v3  ;;  %v427_v18 = vsel %vm14501_vm2, %v422_v6, %v426_v54  ;;  %v463_v21 = vshrl.u32 %v14535_v2, 16  ;;  %v466_v22 = vshll.u32 %v14535_v2, 16  ;;  %p14301_p13 = pneg %p14300_p12 }
  0x2c   : > { %v445_v19 = vor.u32 %v444_v8, %v441_v7  ;;  %12865 = vmatpush3.bf16.msra.mxu0 %v14103_v25  ;;  %v432_v23 = vrot.slane %v431_v12, 4  ;;  %v454_v24 = vrot.slane %v452_v16, 4  ;;  %v472_v27 = vshll.u32 %v14538_v9, 16  ;;  %v14591_v12 = vld [vmem:[%s14466_s26 + $0x50] sm:$0x1] }
  0x2d   : > { %v460_v26 = vrot.slane %v458_v17, 5  ;;  %v465_v32 = vrot.slane %v463_v21, 4  ;;  %v468_v34 = vrot.slane %v466_v22, 5  ;;  %v476_v35 = vshrl.u32 %v14538_v9, 16  ;;  %12866 = vmatprep.subr.bf16.mxu0 %v14104_v10  ;;  %v14601_v21 = vld [vmem:[%s14466_s26 + $0x54] sm:$0xf]  ;;  %p14308_p3 = pnand %p14307_p2, %p14301_p13 }
  0x2e   : > { %v446_v31 = vrot.slane %v445_v19, 4  ;;  %v437_v25 = vsel %vm14501_vm2, %v432_v23, %v436_v0  ;;  %v455_v38 = vor.u32 %v454_v24, %v450_v15  ;;  %v474_v39 = vrot.slane %v472_v27, 5  ;;  %v14606_v22 = vld [vmem:[%s18730_s1 + $0x40] sm:$0xff]  }
  0x2f   : > { %v482_v40 = vshll.u32 %v14548_v20, 16  ;;  %v11289_v42 = vcombine.low %v427_v18, %v437_v25  ;;  %v469_v44 = vor.u32 %v468_v34, %v465_v32  ;;  %v478_v45 = vrot.slane %v476_v35, 4  ;;  %v14613_v25 = vld [vmem:[%s14466_s26 + $0x5c] sm:$0x1] }
  0x30   : > { %v451_v43 = vsel %vm14501_vm2, %v446_v31, %v450_v15  ;;  %v456_v48 = vrot.slane %v455_v38, 4  ;;  %v487_v50 = vshrl.u32 %v14558_v36, 16  ;;  %v490_v51 = vshll.u32 %v14558_v36, 16  ;;  %12867 = vmatpush3.bf16.msra.mxu0 %v14104_v10 }
  0x31   : > { %v484_v49 = vrot.slane %v482_v40, 5  ;;  %12836 = vmatprep.mubr.msk.bf16.mxu0 %vm831_vm3, %v11289_v42  ;;  %v470_v53 = vrot.slane %v469_v44, 4  ;;  %v479_v54 = vor.u32 %v478_v45, %v474_v39  ;;  %v496_v55 = vshll.u32 %v14564_v41, 16  ;;  %12868 = vmatprep.subr.bf16.mxu0 %v14105_v30 }
  0x32   : > { %v500_v56 = vshrl.u32 %v14564_v41, 16  ;;  %v461_v59 = vsel %vm14501_vm2, %v456_v48, %v460_v26  ;;  %v489_v60 = vrot.slane %v487_v50, 4  ;;  %v492_v61 = vrot.slane %v490_v51, 5 }
  0x33   : > { %v506_v62 = vshll.u32 %v14569_v46, 16  ;;  %v11290_v0 = vcombine.low %v451_v43, %v461_v59  ;;  %v475_v1 = vsel %vm14501_vm2, %v470_v53, %v474_v39  ;;  %v480_v3 = vrot.slane %v479_v54, 4  ;;  %v14621_v43 = vld [vmem:[%s14466_s26 + $0x60] sm:$0xf] }
  0x34   : > { %v498_v6 = vrot.slane %v496_v55, 5  ;;  %v493_v7 = vor.u32 %v492_v61, %v489_v60  ;;  %v502_v8 = vrot.slane %v500_v56, 4  ;;  %v511_v15 = vshrl.u32 %v14577_v57, 16  ;;  %12869 = vmatpush3.bf16.msra.mxu0 %v14105_v30  ;;  %v14609_v30 = vld [vmem:[%s14466_s26 + $0x58] sm:$0xf] }
  0x35   : > { %v508_v10 = vrot.slane %v506_v62, 5  ;;  %12837 = vmatmul.mubr.msk.bf16.gmra.mrb[4].mxu0 %vm831_vm3, %v11290_v0  ;;  %v485_v16 = vsel %vm14501_vm2, %v480_v3, %v484_v49  ;;  %v514_v17 = vshll.u32 %v14577_v57, 16  ;;  %v520_v18 = vshll.u32 %v14586_v63, 16  ;;  %12870 = vmatprep.subr.bf16.mxu0 %v14106_v58  ;;  %v14629_v55 = vld [vmem:[%s14466_s26 + $0x64] sm:$0xf] }
  0x36   : > { %v524_v19 = vshrl.u32 %v14586_v63, 16  ;;  %v11291_v23 = vcombine.low %v475_v1, %v485_v16  ;;  %v494_v24 = vrot.slane %v493_v7, 4  ;;  %v503_v26 = vor.u32 %v502_v8, %v498_v6  ;;  %v14639_v7 = vld [vmem:[%s14466_s26 + $0x68] sm:$0x1] }
  0x37   : > { %v513_v27 = vrot.slane %v511_v15, 4  ;;  %v516_v31 = vrot.slane %v514_v17, 5  ;;  %v522_v32 = vrot.slane %v520_v18, 5  ;;  %v530_v35 = vshll.u32 %v14591_v12, 16  ;;  %18835 = vst [vmem:[#allocation6_spill] sm:$0xff] %v14639_v7 }
  0x38   : > { %v526_v34 = vrot.slane %v524_v19, 4  ;;  %12840 = vmatprep.mubr.msk.bf16.mxu0 %vm831_vm3, %v11291_v23  ;;  %v499_v38 = vsel %vm14501_vm2, %v494_v24, %v498_v6  ;;  %v504_v39 = vrot.slane %v503_v26, 4  ;;  %v535_v40 = vshrl.u32 %v14601_v21, 16  ;;  %12871 = vmatpush3.bf16.msra.mxu0 %v14106_v58  ;;  %v14644_v15 = vld [vmem:[%s14466_s26 + $0x6c] sm:$0xf] }
  0x39   : > { %v538_v42 = vshll.u32 %v14601_v21, 16  ;;  %v517_v44 = vor.u32 %v516_v31, %v513_v27  ;;  %v532_v48 = vrot.slane %v530_v35, 5  ;;  %v544_v49 = vshll.u32 %v14609_v30, 16  ;;  %12904 = vmatprep.subr.bf16.mxu0 %v14606_v22  ;;  %v14647_v23 = vld [vmem:[%s14466_s26 + $0x70] sm:$0xf] }
  0x3a   : > { %v527_v45 = vor.u32 %v526_v34, %v522_v32  ;;  %v509_v50 = vsel %vm14501_vm2, %v504_v39, %v508_v10  ;;  %v537_v51 = vrot.slane %v535_v40, 4  ;;  %v548_v54 = vshrl.u32 %v14609_v30, 16  ;;  %v14659_v40 = vld [vmem:[%s14466_s26 + $0x78] sm:$0xf] }
  0x3b   : > { %v540_v53 = vrot.slane %v538_v42, 5  ;;  %v11292_v56 = vcombine.low %v499_v38, %v509_v50  ;;  %v518_v58 = vrot.slane %v517_v44, 4  ;;  %v546_v60 = vrot.slane %v544_v49, 5  ;;  %v14664_v49 = vld [vmem:[%s14466_s26 + $0x7c] sm:$0xf] }
  0x3c   : > { %v528_v59 = vrot.slane %v527_v45, 4  ;;  %v550_v62 = vrot.slane %v548_v54, 4  ;;  %v554_v0 = vshll.u32 %v14613_v25, 16  ;;  %v559_v1 = vshrl.u32 %v14621_v43, 16 }
  0x3d   : > { %v541_v61 = vor.u32 %v540_v53, %v537_v51  ;;  %12841 = vmatmul.mubr.msk.bf16.gmra.mrb[8].mxu0 %vm831_vm3, %v11292_v56  ;;  %v523_v3 = vsel %vm14501_vm2, %v518_v58, %v522_v32  ;;  %v562_v8 = vshll.u32 %v14621_v43, 16  ;;  %v568_v10 = vshll.u32 %v14629_v55, 16  ;;  %v14651_v32 = vld [vmem:[%s14466_s26 + $0x74] sm:$0x1] }
  0x3e   : > { %v533_v6 = vsel %vm14501_vm2, %v528_v59, %v532_v48  ;;  %v551_v18 = vor.u32 %v550_v62, %v546_v60  ;;  %v556_v19 = vrot.slane %v554_v0, 5  ;;  %v561_v24 = vrot.slane %v559_v1, 4  ;;  %18836 = vst [vmem:[#allocation7_spill] sm:$0xff] %v14651_v32 }
  0x3f   : > { %v11293_v16 = vcombine.low %v523_v3, %v533_v6  ;;  %v542_v17 = vrot.slane %v541_v61, 4  ;;  %v564_v26 = vrot.slane %v562_v8, 5  ;;  %v570_v27 = vrot.slane %v568_v10, 5  ;;  %v14670_v61 = vld [vmem:[%s14466_s26 + $0x80] sm:$0x1] }
  0x40   : > { %v572_v31 = vshrl.u32 %v14629_v55, 16  ;;  %v552_v35 = vrot.slane %v551_v18, 4  ;;  %v578_v38 = vshll.u32 %v14639_v7, 16  ;;  %v583_v39 = vshrl.u32 %v14644_v15, 16  ;;  %18837 = vst [vmem:[#allocation8_spill] sm:$0xff] %v14670_v61 }
  0x41   : > { %12844 = vmatprep.mubr.msk.bf16.mxu0 %vm831_vm3, %v11293_v16  ;;  %v547_v34 = vsel %vm14501_vm2, %v542_v17, %v546_v60  ;;  %v565_v42 = vor.u32 %v564_v26, %v561_v24  ;;  %v586_v45 = vshll.u32 %v14644_v15, 16  ;;  %v592_v48 = vshll.u32 %v14647_v23, 16  ;;  %v14675_v6 = vld [vmem:[%s14466_s26 + $0x84] sm:$0xf] }
  0x42   : > { %v574_v44 = vrot.slane %v572_v31, 4  ;;  %v557_v50 = vsel %vm14501_vm2, %v552_v35, %v556_v19  ;;  %v580_v51 = vrot.slane %v578_v38, 5  ;;  %v585_v53 = vrot.slane %v583_v39, 4  ;;  %v14686_v39 = vld [vmem:[%s14466_s26 + $0x88] sm:$0xf] }
  0x43   : > { %v596_v54 = vshrl.u32 %v14647_v23, 16  ;;  %v11294_v56 = vcombine.low %v547_v34, %v557_v50  ;;  %v566_v58 = vrot.slane %v565_v42, 4  ;;  %v588_v60 = vrot.slane %v586_v45, 5 }
  0x44   : > { %v575_v59 = vor.u32 %v574_v44, %v570_v27  ;;  %v594_v62 = vrot.slane %v592_v48, 5  ;;  %v602_v1 = vshll.u32 %v14651_v32, 16  ;;  %v607_v3 = vshrl.u32 %v14659_v40, 16 }
  0x45   : > { %v598_v0 = vrot.slane %v596_v54, 4  ;;  %12845 = vmatmul.mubr.msk.bf16.gmra.mrb[12].mxu0 %vm831_vm3, %v11294_v56  ;;  %v571_v8 = vsel %vm14501_vm2, %v566_v58, %v570_v27  ;;  %v589_v16 = vor.u32 %v588_v60, %v585_v53  ;;  %v610_v17 = vshll.u32 %v14659_v40, 16  ;;  %v14692_v54 = vld [vmem:[%s14466_s26 + $0x8c] sm:$0x1] }
  0x46   : > { %v576_v10 = vrot.slane %v575_v59, 4  ;;  %v604_v19 = vrot.slane %v602_v1, 5  ;;  %v609_v24 = vrot.slane %v607_v3, 4  ;;  %v616_v26 = vshll.u32 %v14664_v49, 16  ;;  %18838 = vst [vmem:[#allocation9_spill] sm:$0xff] %v14692_v54 }
  0x47   : > { %v599_v18 = vor.u32 %v598_v0, %v594_v62  ;;  %v590_v34 = vrot.slane %v589_v16, 4  ;;  %v612_v35 = vrot.slane %v610_v17, 5  ;;  %v620_v38 = vshrl.u32 %v14664_v49, 16  ;;  %v14701_v0 = vld [vmem:[%s14466_s26 + $0x90] sm:$0xf] }
  0x48   : > { %v581_v31 = vsel %vm14501_vm2, %v576_v10, %v580_v51  ;;  %v618_v44 = vrot.slane %v616_v26, 5  ;;  %v626_v45 = vshll.u32 %v14670_v61, 16  ;;  %v631_v51 = vshrl.u32 %v14675_v6, 16  ;;  %v14704_v10 = vld [vmem:[%s14466_s26 + $0x94] sm:$0xf] }
  0x49   : > { %v11295_v27 = vcombine.low %v571_v8, %v581_v31  ;;  %v600_v42 = vrot.slane %v599_v18, 4  ;;  %v595_v48 = vsel %vm14501_vm2, %v590_v34, %v594_v62  ;;  %v613_v50 = vor.u32 %v612_v35, %v609_v24  ;;  %v14709_v24 = vld [vmem:[%s14466_s26 + $0x98] sm:$0x1]  ;;  %v14766_v61 = vld [vmem:[%s14466_s26 + $0xbc] sm:$0x1] }
  0x4a   : > { %v622_v53 = vrot.slane %v620_v38, 4  ;;  %v628_v58 = vrot.slane %v626_v45, 5  ;;  %v634_v59 = vshll.u32 %v14675_v6, 16  ;;  %v640_v60 = vshll.u32 %v14686_v39, 16  ;;  %18839 = vst [vmem:[#allocation10_spill] sm:$0xff] %v14709_v24 }
  0x4b   : > { %12848 = vmatprep.mubr.msk.bf16.mxu0 %vm831_vm3, %v11295_v27  ;;  %v605_v56 = vsel %vm14501_vm2, %v600_v42, %v604_v19  ;;  %v614_v1 = vrot.slane %v613_v50, 4  ;;  %v633_v8 = vrot.slane %v631_v51, 4  ;;  %v644_v18 = vshrl.u32 %v14686_v39, 16 }
  0x4c   : > { %v11296_v62 = vcombine.low %v595_v48, %v605_v56  ;;  %v623_v3 = vor.u32 %v622_v53, %v618_v44  ;;  %v636_v16 = vrot.slane %v634_v59, 5  ;;  %v642_v17 = vrot.slane %v640_v60, 5  ;;  %v14718_v48 = vld [vmem:[%s14466_s26 + $0x9c] sm:$0xf]  ;;  %v14724_v56 = vld [vmem:[%s14466_s26 + $0xa0] sm:$0xf] }
  0x4d   : > { %v650_v19 = vshll.u32 %v14692_v54, 16  ;;  %v619_v26 = vsel %vm14501_vm2, %v614_v1, %v618_v44  ;;  %v655_v34 = vshrl.u32 %v14701_v0, 16  ;;  %v658_v35 = vshll.u32 %v14701_v0, 16 }
  0x4e   : > { %12849 = vmatmul.mubr.msk.bf16.gmra.mrb[16].mxu0 %vm831_vm3, %v11296_v62  ;;  %v624_v31 = vrot.slane %v623_v3, 4  ;;  %v637_v38 = vor.u32 %v636_v16, %v633_v8  ;;  %v646_v27 = vrot.slane %v644_v18, 4  ;;  %v664_v45 = vshll.u32 %v14704_v10, 16  ;;  %v14727_v3 = vld [vmem:[%s14466_s26 + $0xa4] sm:$0x1] }
  0x4f   : > { %v652_v42 = vrot.slane %v650_v19, 5  ;;  %v657_v53 = vrot.slane %v655_v34, 4  ;;  %v660_v51 = vrot.slane %v658_v35, 5  ;;  %v668_v44 = vshrl.u32 %v14704_v10, 16  ;;  %18840 = vst [vmem:[#allocation11_spill] sm:$0xff] %v14727_v3 }
  0x50   : > { %v629_v50 = vsel %vm14501_vm2, %v624_v31, %v628_v58  ;;  %v638_v60 = vrot.slane %v637_v38, 4  ;;  %v647_v62 = vor.u32 %v646_v27, %v642_v17  ;;  %v666_v1 = vrot.slane %v664_v45, 5 }
  0x51   : > { %v11297_v59 = vcombine.low %v619_v26, %v629_v50  ;;  %v661_v8 = vor.u32 %v660_v51, %v657_v53  ;;  %v670_v16 = vrot.slane %v668_v44, 4  ;;  %v674_v18 = vshll.u32 %v14709_v24, 16  ;;  %v14737_v50 = vld [vmem:[%s14466_s26 + $0xa8] sm:$0xf] }
  0x52   : > { %v679_v58 = vshrl.u32 %v14718_v48, 16  ;;  %v643_v19 = vsel %vm14501_vm2, %v638_v60, %v642_v17  ;;  %v648_v31 = vrot.slane %v647_v62, 4  ;;  %v682_v26 = vshll.u32 %v14718_v48, 16  ;;  %v14743_v17 = vld [vmem:[%s14466_s26 + $0xac] sm:$0xf] }
  0x53   : > { %12852 = vmatprep.mubr.msk.bf16.mxu0 %vm831_vm3, %v11297_v59  ;;  %v688_v34 = vshll.u32 %v14724_v56, 16  ;;  %v662_v35 = vrot.slane %v661_v8, 4  ;;  %v671_v38 = vor.u32 %v670_v16, %v666_v1  ;;  %v676_v27 = vrot.slane %v674_v18, 5  ;;  %v14749_v18 = vld [vmem:[%s14466_s26 + $0xb0] sm:$0x1] }
  0x54   : > { %v681_v45 = vrot.slane %v679_v58, 4  ;;  %v653_v53 = vsel %vm14501_vm2, %v648_v31, %v652_v42  ;;  %v684_v51 = vrot.slane %v682_v26, 5  ;;  %v692_v59 = vshrl.u32 %v14724_v56, 16  ;;  %18841 = vst [vmem:[#allocation12_spill] sm:$0xff] %v14749_v18 }
  0x55   : > { %v690_v44 = vrot.slane %v688_v34, 5  ;;  %v11298_v60 = vcombine.low %v643_v19, %v653_v53  ;;  %v667_v62 = vsel %vm14501_vm2, %v662_v35, %v666_v1  ;;  %v672_v8 = vrot.slane %v671_v38, 4  ;;  %v14759_v35 = vld [vmem:[%s14466_s26 + $0xb4] sm:$0xf] }
  0x56   : > { %v698_v16 = vshll.u32 %v14727_v3, 16  ;;  %v685_v58 = vor.u32 %v684_v51, %v681_v45  ;;  %v694_v37 = vrot.slane %v692_v59, 4  ;;  %v703_v42 = vshrl.u32 %v14737_v50, 16  ;;  %v14762_v59 = vld [vmem:[%s14466_s26 + $0xb8] sm:$0xf] }
  0x57   : > { %v706_v31 = vshll.u32 %v14737_v50, 16  ;;  %12853 = vmatmul.mubr.msk.bf16.gmra.mrb[20].mxu0 %vm831_vm3, %v11298_v60  ;;  %v677_v19 = vsel %vm14501_vm2, %v672_v8, %v676_v27  ;;  %v712_v1 = vshll.u32 %v14743_v17, 16  ;;  %v716_v34 = vshrl.u32 %v14743_v17, 16 }
  0x58   : > { %v700_v26 = vrot.slane %v698_v16, 5  ;;  %v11299_v38 = vcombine.low %v667_v62, %v677_v19  ;;  %v686_v45 = vrot.slane %v685_v58, 4  ;;  %v695_v53 = vor.u32 %v694_v37, %v690_v44 }
  0x59   : > { %v705_v51 = vrot.slane %v703_v42, 4  ;;  %v708_v3 = vrot.slane %v706_v31, 5  ;;  %v714_v24 = vrot.slane %v712_v1, 5  ;;  %v718_v54 = vrot.slane %v716_v34, 4 }
  0x5a   : > { %v722_v60 = vshll.u32 %v14749_v18, 16  ;;  %12856 = vmatprep.mubr.msk.bf16.mxu0 %vm831_vm3, %v11299_v38  ;;  %v691_v27 = vsel %vm14501_vm2, %v686_v45, %v690_v44  ;;  %v696_v8 = vrot.slane %v695_v53, 4  ;;  %v727_v62 = vshrl.u32 %v14759_v35, 16 }
  0x5b   : > { %v730_v37 = vshll.u32 %v14759_v35, 16  ;;  %v709_v16 = vor.u32 %v708_v3, %v705_v51  ;;  %v719_v58 = vor.u32 %v718_v54, %v714_v24  ;;  %v736_v31 = vshll.u32 %v14762_v59, 16 }
  0x5c   : > { %v724_v42 = vrot.slane %v722_v60, 5  ;;  %v701_v19 = vsel %vm14501_vm2, %v696_v8, %v700_v26  ;;  %v729_v1 = vrot.slane %v727_v62, 4  ;;  %v740_v38 = vshrl.u32 %v14762_v59, 16 }
  0x5d   : > { %v732_v34 = vrot.slane %v730_v37, 5  ;;  %v11300_v18 = vcombine.low %v691_v27, %v701_v19  ;;  %v710_v32 = vrot.slane %v709_v16, 4  ;;  %v720_v44 = vrot.slane %v719_v58, 4 }
  0x5e   : > { %v738_v45 = vrot.slane %v736_v31, 5  ;;  %v742_v7 = vrot.slane %v740_v38, 4  ;;  %v746_v3 = vshll.u32 %v14766_v61, 16  ;;  %v11324_v54 = vcombine.low %v14480_v11, %v14483_v13 }
  0x5f   : > { %v733_v53 = vor.u32 %v732_v34, %v729_v1  ;;  %v1414_v51 = vrot.slane %v14483_v13, 5  ;;  %v1417_v26 = vrot.slane %v14486_v14, 5  ;;  %12857 = vmatmul.mubr.msk.bf16.gmra.mrb[24].mxu0 %vm831_vm3, %v11300_v18  ;;  %v715_v60 = vsel %vm14501_vm2, %v710_v32, %v714_v24  ;;  %v1355_v32 = vld [vmem:[%s14466_s26 + $0xc] sm:$0xe]  ;;  %v1365_v34 = vld [vmem:[%s14466_s26 + $0x84] sm:$0xe] }
  0x60   : > { %v725_v27 = vsel %vm14501_vm2, %v720_v44, %v724_v42  ;;  %v743_v37 = vor.u32 %v742_v7, %v738_v45  ;;  %v748_v16 = vrot.slane %v746_v3, 5  ;;  %v11327_v58 = vcombine.low %v14535_v2, %v14538_v9  ;;  %v1363_v44 = vld [vmem:[%s14466_s26 + $0x6c] sm:$0xe]  ;;  %v1366_v1 = vld [vmem:[%s14466_s26 + $0x90] sm:$0xe] }
  0x61   : > { %v11301_v8 = vcombine.low %v715_v60, %v725_v27  ;;  %v734_v62 = vrot.slane %v733_v53, 4  ;;  %v11328_v11 = vcombine.low %v14558_v36, %v14564_v41  ;;  %v11329_v13 = vcombine.low %v14577_v57, %v14586_v63 }
  0x62   : > { %v744_v7 = vrot.slane %v743_v37, 4  ;;  %v11360_v60 = vrot.slane %v1355_v32, 9  ;;  %v1416_v27 = vrot.slane %v1414_v51, 4  ;;  %v1362_v32 = vld [vmem:[%s14466_s26 + $0x60] sm:$0xe]  ;;  %v18852_v57 = vcombine.low %v14601_v21, %v14609_v30 }
  0x63   : > { %12860 = vmatprep.mubr.msk.bf16.mxu0 %vm831_vm3, %v11301_v8  ;;  %v739_v24 = vsel %vm14501_vm2, %v734_v62, %v738_v45  ;;  %v1358_v8 = vld [vmem:[%s14466_s26 + $0x30] sm:$0xe]  ;;  %v18844_v62 = vcombine.low %v14469_v4, %v14472_v5  ;;  %v11325_v4 = vcombine.low %v14497_v28, %v14506_v33  ;;  %v1438_v5 = vrot.slane %v14548_v20, 5  ;;  %v14260_v21 = vld [vmem:[%s14466_s26 + $0x4] sm:$0xf] }
  0x64   : > { %v749_v38 = vsel %vm14501_vm2, %v744_v7, %v748_v16  ;;  %v14829_v37 = vsel %vm14817_vm6, %v11360_v60, %v1414_v51  ;;  %v14833_v16 = vsel %vm14817_vm6, %v1416_v27, %v1417_v26  ;;  %v1360_v7 = vld [vmem:[%s14466_s26 + $0x48] sm:$0xe]  ;;  %v1361_v51 = vld [vmem:[%s14466_s26 + $0x54] sm:$0xe]  ;;  %v1445_v45 = vrot.slane %v14569_v46, 5 }
  0x65   : > { %v11302_v53 = vcombine.low %v739_v24, %v749_v38  ;;  %v1359_v24 = vld [vmem:[%s14466_s26 + $0x3c] sm:$0xe]  ;;  %v11363_v38 = vrot.slane %v1358_v8, 9  ;;  %v14113_v8 = vld [vmem:[%s18730_s1 + $0x48] sm:$0xff]   ;;  %v11365_v28 = vrot.slane %v1360_v7, 9  ;;  %v1449_v33 = vrot.slane %v14586_v63, 5 }
  0x66   : > { %v11364_v27 = vrot.slane %v1359_v24, 9  ;;  %v11326_v20 = vcombine.low %v14519_v47, %v14522_v52  ;;  %v1452_v52 = vrot.slane %v14591_v12, 5  ;;  %v1364_v12 = vld [vmem:[%s14466_s26 + $0x78] sm:$0xe]  ;;  %v18853_v63 = vcombine.low %v14621_v43, %v14629_v55  ;;  %v14261_v43 = vld [vmem:[%s14466_s26 + $0x8] sm:$0x1] }
  0x67   : > { %12861 = vmatmul.mubr.msk.bf16.gmra.mrb[28].mxu0 %vm831_vm3, %v11302_v53  ;;  %v1435_v53 = vrot.slane %v14538_v9, 5  ;;  %v14871_v7 = vsel %vm14817_vm6, %v11365_v28, %v1449_v33  ;;  %v1451_v47 = vrot.slane %v1449_v33, 4  ;;  %v11367_v28 = vrot.slane %v1362_v32, 9 }
  0x68   : > { %12872 = vmatprep.mubr.msk.bf16.mxu0 %vm831_vm3, %v18844_v62  ;;  %v1442_v62 = vrot.slane %v14564_v41, 5  ;;  %v1463_v33 = vrot.slane %v14629_v55, 5  ;;  %v11368_v32 = vrot.slane %v1363_v44, 9  ;;  %v11369_v19 = vrot.slane %v1364_v12, 9  ;;  %v1367_v12 = vld [vmem:[%s14466_s26 + $0x9c] sm:$0xe] }
  0x69   : > { %v14846_v60 = vsel %vm14817_vm6, %v11363_v38, %v1435_v53  ;;  %v1437_v26 = vrot.slane %v1435_v53, 4  ;;  %v18847_v44 = vld [vmem:[#allocation8_spill] sm:$0xff]  ;;  %v1410_v55 = vrot.slane %v14261_v43, 5 }
  0x6a   : > { %v14863_v24 = vsel %vm14817_vm6, %v11364_v27, %v1442_v62  ;;  %v1444_v53 = vrot.slane %v1442_v62, 4  ;;  %v1456_v27 = vrot.slane %v14609_v30, 5  ;;  %v1459_v62 = vrot.slane %v14613_v25, 5 }
  0x6b   : > { %v14859_v38 = vsel %vm14817_vm6, %v1437_v26, %v1438_v5  ;;  %v14118_v5 = vld [vmem:[%s18730_s1 + $0x50] sm:$0xff]   ;;  %v11366_v26 = vrot.slane %v1361_v51, 9  ;;  %v1480_v42 = vrot.slane %v18847_v44, 5  ;;  %v1368_v44 = vld [vmem:[%s14466_s26 + $0xa8] sm:$0xe]  ;;  %v1407_v30 = vrot.slane %v14260_v21, 5 }
  0x6c   : > { %v1458_v25 = vrot.slane %v1456_v27, 4 }
  0x6d   : > { %v14897_v51 = vsel %vm14817_vm6, %v11366_v26, %v1456_v27  ;;  %v18846_v26 = vld [vmem:[#allocation7_spill] sm:$0xff] }
  0x6e   : > { %v1473_v27 = vrot.slane %v18846_v26, 5 }
  0x6f   : > { %12873 = vmatmul.mubr.msk.bf16.vlgmr.msra.gmra.mrb[0].mxu0 %vm831_vm3, %v11324_v54  ;;  %v14881_v54 = vsel %vm14817_vm6, %v1444_v53, %v1445_v45  ;;  %v18845_v53 = vld [vmem:[#allocation6_spill] sm:$0xff]  ;;  %v14909_v45 = vsel %vm14817_vm6, %v1458_v25, %v1459_v62 }
  0x70   : > { %12905 = vmatpush3.bf16.msra.mxu0 %v14606_v22  ;;  %12876 = vmatprep.mubr.msk.bf16.mxu0 %vm831_vm3, %v11325_v4  ;;  %v14890_v4 = vsel %vm14817_vm6, %v1451_v47, %v1452_v52  ;;  %v1466_v46 = vrot.slane %v18845_v53, 5  ;;  %v14903_v22 = vsel %vm14817_vm6, %v11367_v28, %v1463_v33  ;;  %v1465_v47 = vrot.slane %v1463_v33, 4  ;;  %v14123_v28 = vld [vmem:[%s18730_s1 + $0x58] sm:$0xff]  }
  0x71   : > { %12906 = vmatprep.subr.bf16.mxu0 %v14113_v8  ;;  %v1470_v52 = vrot.slane %v14647_v23, 5  ;;  %v1477_v53 = vrot.slane %v14664_v49, 5 }
  0x73   : > { %v14924_v62 = vsel %vm14817_vm6, %v11368_v32, %v1470_v52  ;;  %v1472_v33 = vrot.slane %v1470_v52, 4  ;;  %v14931_v26 = vsel %vm14817_vm6, %v11369_v19, %v1477_v53  ;;  %v1479_v31 = vrot.slane %v1477_v53, 4  ;;  %v18848_v19 = vld [vmem:[#allocation9_spill] sm:$0xff] }
  0x74   : > { %12907 = vmatpush3.bf16.msra.mxu0 %v14113_v8  ;;  %v14920_v8 = vsel %vm14817_vm6, %v1465_v47, %v1466_v46  ;;  %v14938_v46 = vld [vmem:[%s18730_s1 + $0x60] sm:$0xff]   ;;  %v11370_v32 = vrot.slane %v1365_v34, 9  ;;  %v1484_v52 = vrot.slane %v14686_v39, 5  ;;  %v1487_v25 = vrot.slane %v18848_v19, 5  ;;  %v1369_v19 = vld [vmem:[%s14466_s26 + $0xb4] sm:$0xe] }
  0x75   : > { %12908 = vmatprep.subr.bf16.mxu0 %v14118_v5  ;;  %v14942_v47 = vsel %vm14817_vm6, %v1472_v33, %v1473_v27  ;;  %v14954_v53 = vsel %vm14817_vm6, %v1479_v31, %v1480_v42  ;;  %v11371_v27 = vrot.slane %v1366_v1, 9  ;;  %v1491_v34 = vrot.slane %v14704_v10, 5  ;;  %v18850_v33 = vld [vmem:[#allocation11_spill] sm:$0xff] }
  0x76   : > { %v14962_v2 = vsel %vm14817_vm6, %v11370_v32, %v1484_v52  ;;  %v1486_v9 = vrot.slane %v1484_v52, 4  ;;  %v11372_v1 = vrot.slane %v1367_v12, 9  ;;  %v1501_v14 = vrot.slane %v18850_v33, 5  ;;  %v18851_v33 = vld [vmem:[#allocation12_spill] sm:$0xff] }
  0x77   : > { %12877 = vmatmul.mubr.msk.bf16.gmra.mrb[4].mxu0 %vm831_vm3, %v11326_v20  ;;  %v14968_v42 = vsel %vm14817_vm6, %v11371_v27, %v1491_v34  ;;  %v1493_v31 = vrot.slane %v1491_v34, 4  ;;  %v1498_v20 = vrot.slane %v14724_v56, 5  ;;  %v11373_v32 = vrot.slane %v1368_v44, 9 }
  0x78   : > { %12880 = vmatprep.mubr.msk.bf16.mxu0 %vm831_vm3, %v11327_v58  ;;  %12909 = vmatpush3.bf16.msra.mxu0 %v14118_v5  ;;  %v18849_v58 = vld [vmem:[#allocation10_spill] sm:$0xff]  ;;  %v14973_v18 = vsel %vm14817_vm6, %v1486_v9, %v1487_v25  ;;  %v1505_v52 = vrot.slane %v14743_v17, 5  ;;  %v1508_v9 = vrot.slane %v18851_v33, 5 }
  0x79   : > { %12910 = vmatprep.subr.bf16.mxu0 %v14123_v28  ;;  %v1494_v5 = vrot.slane %v18849_v58, 5  ;;  %v11394_v58 = vcombine.low %v14962_v2, %v14973_v18  ;;  %v14985_v12 = vsel %vm14817_vm6, %v11372_v1, %v1498_v20  ;;  %v1500_v34 = vrot.slane %v1498_v20, 4  ;;  %v14131_v18 = vld [vmem:[%s14466_s26 + $0xc] sm:$0xff]  }
  0x7a   : > { %v1507_v44 = vrot.slane %v1505_v52, 4  ;;  %v1512_v20 = vrot.slane %v14762_v59, 5  ;;  %v1515_v1 = vrot.slane %v14766_v61, 5 }
  0x7b   : > { %v14981_v27 = vsel %vm14817_vm6, %v1493_v31, %v1494_v5  ;;  %v14997_v5 = vsel %vm14817_vm6, %v1500_v34, %v1501_v14  ;;  %v11374_v31 = vrot.slane %v1369_v19, 9  ;;  %v1354_v34 = vld [vmem:[%s14466_s26] sm:$0xe] }
  0x7c   : > { %12911 = vmatpush3.bf16.msra.mxu0 %v14123_v28  ;;  %v11395_v25 = vcombine.low %v14968_v42, %v14981_v27  ;;  %v14992_v28 = vsel %vm14817_vm6, %v11373_v32, %v1505_v52  ;;  %v11396_v32 = vcombine.low %v14985_v12, %v14997_v5  ;;  %v15009_v14 = vsel %vm14817_vm6, %v1507_v44, %v1508_v9  ;;  %v1356_v9 = vld [vmem:[%s14466_s26 + $0x18] sm:$0xe] }
  0x7d   : > { %12944 = vmatprep.subr.bf16.mxu0 %v14938_v46  ;;  %v11397_v61 = vcombine.low %v14992_v28, %v15009_v14  ;;  %v15019_v36 = vsel %vm14817_vm6, %v11374_v31, %v1512_v20  ;;  %v1514_v41 = vrot.slane %v1512_v20, 4  ;;  %v18855_v52 = vcombine.low %v14659_v40, %v14664_v49  ;;  %v14263_v20 = vld [vmem:[%s14466_s26 + $0x20] sm:$0x1]  ;;  %v14139_v5 = vld [vmem:[%s14466_s26 + $0x54] sm:$0xff]   ;;  %v15371_v14 = vld [vmem:[%s14466_s26 + $0xc8] sm:$0x1] }
  0x7e   : > { %v18856_v44 = vcombine.low %v14675_v6, %v14686_v39  ;;  %v1409_v40 = vrot.slane %v1407_v30, 4  ;;  %v18858_v49 = vcombine.low %v14718_v48, %v14724_v56  ;;  %v18859_v6 = vcombine.low %v14737_v50, %v14743_v17  ;;  %v14262_v39 = vld [vmem:[%s14466_s26 + $0x1c] sm:$0xf]  ;;  %v1357_v17 = vld [vmem:[%s14466_s26 + $0x24] sm:$0xe] }
  0x7f   : > { %12881 = vmatmul.mubr.msk.bf16.gmra.mrb[8].mxu0 %vm831_vm3, %v11328_v11  ;;  %v15023_v11 = vsel %vm14817_vm6, %v1514_v41, %v1515_v1  ;;  %v1421_v33 = vrot.slane %v14262_v39, 5  ;;  %v11361_v48 = vrot.slane %v1356_v9, 9  ;;  %v1424_v1 = vrot.slane %v14263_v20, 5  ;;  %v14264_v41 = vld [vmem:[%s14466_s26 + $0x28] sm:$0xf] }
  0x80   : > { %12884 = vmatprep.mubr.msk.bf16.mxu0 %vm831_vm3, %v11329_v13  ;;  %v11398_v19 = vcombine.low %v15019_v36, %v15023_v11  ;;  %v18854_v13 = vcombine.low %v14644_v15, %v14647_v23  ;;  %v18857_v15 = vcombine.low %v14701_v0, %v14704_v10  ;;  %v11359_v23 = vrot.slane %v1354_v34, 9  ;;  %v14265_v34 = vld [vmem:[%s14466_s26 + $0x2c] sm:$0x1]  ;;  %v15203_v36 = vld [vmem:[%s14466_s26 + $0x68] sm:$0x1] }
  0x81   : > { %v1411_v10 = vsel %vm14817_vm6, %v1409_v40, %v1410_v55  ;;  %v1423_v56 = vrot.slane %v1421_v33, 4  ;;  %v18860_v50 = vcombine.low %v14759_v35, %v14762_v59  ;;  %v14128_v35 = vld [vmem:[%s18730_s1 + $0x68] sm:$0xff]   ;;  %v18861_v59 = vcombine.low %v14829_v37, %v14833_v16  ;;  %v14130_v37 = vld [vmem:[%s18730_s1 + $0x78] sm:$0xff]   ;;  %v11594_v11 = vld [vmem:[%s14466_s26 + $0x60] sm:$0xe] }
  0x82   : > { %v1408_v0 = vsel %vm14817_vm6, %v11359_v23, %v1407_v30  ;;  %v18862_v16 = vcombine.low %v14846_v60, %v14859_v38  ;;  %v18863_v40 = vcombine.low %v14863_v24, %v14881_v54  ;;  %v18864_v60 = vcombine.low %v14871_v7, %v14890_v4  ;;  %v14133_v54 = vld [vmem:[%s14466_s26 + $0x18] sm:$0xff]   ;;  %v14137_v4 = vld [vmem:[%s18730_s1 + $0x88] sm:$0xff]   ;;  %v15212_v9 = vld [vmem:[%s14466_s26 + $0x10] sm:$0xf] }
  0x83   : > { %v11383_v31 = vcombine.low %v1408_v0, %v1411_v10  ;;  %v18865_v38 = vcombine.low %v14897_v51, %v14909_v45  ;;  %v18867_v24 = vcombine.low %v14924_v62, %v14942_v47  ;;  %v18868_v7 = vcombine.low %v14931_v26, %v14954_v53  ;;  %v14142_v45 = vld [vmem:[%s18730_s1 + $0x90] sm:$0xff]   ;;  %v14147_v62 = vld [vmem:[%s18730_s1 + $0x98] sm:$0xff]   ;;  %v15171_v26 = vld [vmem:[%s14466_s26 + $0x4c] sm:$0xf] }
  0x84   : > { %v14135_v51 = vld [vmem:[%s14466_s26 + $0x30] sm:$0xff]   ;;  %v11592_v53 = vld [vmem:[%s14466_s26 + $0x48] sm:$0xe]  ;;  %v3081_v2 = vrot.slane %v15171_v26, 5  ;;  %v11610_v39 = vrot.slane %v11594_v11, 9  ;;  %v14140_v0 = vld [vmem:[%s14466_s26 + $0x60] sm:$0xff]  }
  0x85   : > { %v15174_v47 = vld [vmem:[%s14466_s26 + $0x50] sm:$0x1]  ;;  %v11608_v27 = vrot.slane %v11592_v53, 9  ;;  %v11495_v10 = vld [vmem:[%s14466_s26 + $0xc] sm:$0xf] }
  0x86   : > { %v3084_v42 = vrot.slane %v15174_v47, 5  ;;  %v3083_v12 = vrot.slane %v3081_v2, 4  ;;  %v15269_v53 = vld [vmem:[%s14466_s26 + $0x28] sm:$0xf] }
  0x87   : > { %12885 = vmatmul.mubr.msk.bf16.gmra.mrb[12].mxu0 %vm831_vm3, %v18852_v57  ;;  %v1428_v57 = vrot.slane %v14264_v41, 5  ;;  %v15188_v28 = vsel %vm14817_vm6, %v11608_v27, %v3081_v2  ;;  %v2284_v41 = vshll.u32 %v15212_v9, 16  ;;  %v15272_v2 = vld [vmem:[%s14466_s26 + $0x94] sm:$0xf] }
  0x88   : > { %12888 = vmatprep.mubr.msk.bf16.mxu0 %vm831_vm3, %v18853_v63  ;;  %v1422_v63 = vsel %vm14817_vm6, %v11361_v48, %v1421_v33  ;;  %v14141_v48 = vld [vmem:[%s14466_s26 + $0x6c] sm:$0xff]  }
  0x89   : > { %v1430_v30 = vrot.slane %v1428_v57, 4 }
  0x8f   : > { %12889 = vmatmul.mubr.msk.bf16.gmra.mrb[16].mxu0 %vm831_vm3, %v18854_v13  ;;  %v1425_v13 = vsel %vm14817_vm6, %v1423_v56, %v1424_v1  ;;  %v11498_v56 = vld [vmem:[%s14466_s26 + $0x18] sm:$0xf]  ;;  %v15368_v1 = vld [vmem:[%s14466_s26 + $0xc4] sm:$0xf] }
  0x90   : > { %12892 = vmatprep.mubr.msk.bf16.mxu0 %vm831_vm3, %v18855_v52  ;;  %v11362_v52 = vrot.slane %v1357_v17, 9  ;;  %v11385_v21 = vcombine.low %v1422_v63, %v1425_v13  ;;  %v2278_v17 = vshll.u32 %v11495_v10, 16  ;;  %v2299_v63 = vshrl.u32 %v11498_v56, 16 }
  0x91   : > { %v2302_v13 = vshll.u32 %v11498_v56, 16  ;;  %v15288_v56 = vld [vmem:[%s14466_s26 + $0x34] sm:$0xf] }
  0x92   : > { %v1429_v43 = vsel %vm14817_vm6, %v11362_v52, %v1428_v57  ;;  %v2288_v57 = vshrl.u32 %v15212_v9, 16  ;;  %v15230_v52 = vld [vmem:[%s14466_s26 + $0x7c] sm:$0xf] }
  0x97   : > { %12893 = vmatmul.mubr.msk.bf16.gmra.mrb[20].mxu0 %vm831_vm3, %v18856_v44  ;;  %v1431_v44 = vrot.slane %v14265_v34, 5  ;;  %v3109_v34 = vrot.slane %v15230_v52, 5 }
  0x98   : > { %12896 = vmatprep.mubr.msk.bf16.mxu0 %vm831_vm3, %v18857_v15  ;;  %v14129_v15 = vld [vmem:[%s18730_s1 + $0x70] sm:$0xff]  }
  0x99   : > { %v1432_v55 = vsel %vm14817_vm6, %v1430_v30, %v1431_v44  ;;  %v11596_v30 = vld [vmem:[%s14466_s26 + $0x78] sm:$0xe] }
  0x9a   : > { %v11386_v23 = vcombine.low %v1429_v43, %v1432_v55  ;;  %v2280_v43 = vrot.slane %v2278_v17, 5  ;;  %v15239_v55 = vrot.slane %v2284_v41, 5  ;;  %v14145_v17 = vld [vmem:[%s14466_s26 + $0x90] sm:$0xff]  }
  0x9f   : > { %12897 = vmatmul.mubr.msk.bf16.gmra.mrb[24].mxu0 %vm831_vm3, %v18858_v49  ;;  %v18866_v49 = vcombine.low %v14903_v22, %v14920_v8  ;;  %v14134_v22 = vld [vmem:[%s14466_s26 + $0x24] sm:$0xff]   ;;  %v14136_v8 = vld [vmem:[%s14466_s26 + $0x3c] sm:$0xff]  }
  0xa0   : > { %12900 = vmatprep.mubr.msk.bf16.mxu0 %vm831_vm3, %v18859_v6  ;;  %v3098_v6 = vrot.slane %v15203_v36, 5 }
  0xa7   : > { %12901 = vmatmul.mubr.msk.bf16.gmra.mrb[28].mxu0 %vm831_vm3, %v18860_v50  ;;  %v2275_v50 = vshrl.u32 %v11495_v10, 16  ;;  %v2332_v10 = vshll.u32 %v15269_v53, 16 }
  0xa8   : > { %12912 = vmatprep.mubr.msk.bf16.mxu0 %vm831_vm3, %v11383_v31 }
  0xaf   : > { %12913 = vmatmul.mubr.msk.bf16.vlgmr.msra.gmra.mrb[0].mxu0 %vm831_vm3, %v18861_v59  ;;  %v2277_v59 = vrot.slane %v2275_v50, 4 }
  0xb0   : > { %12945 = vmatpush3.bf16.msra.mxu0 %v14938_v46  ;;  %12916 = vmatprep.mubr.msk.bf16.mxu0 %vm831_vm3, %v11385_v21  ;;  %v14132_v46 = vld [vmem:[%s18730_s1 + $0x80] sm:$0xff]  }
  0xb1   : > { %12946 = vmatprep.subr.bf16.mxu0 %v14128_v35  ;;  %v15233_v21 = vld [vmem:[%s14466_s26 + $0x80] sm:$0x1] }
  0xb2   : > { %v3112_v44 = vrot.slane %v15233_v21, 5 }
  0xb4   : > { %12947 = vmatpush3.bf16.msra.mxu0 %v14128_v35  ;;  %v11612_v35 = vrot.slane %v11596_v30, 9  ;;  %v14146_v30 = vld [vmem:[%s14466_s26 + $0x9c] sm:$0xff]  }
  0xb5   : > { %12948 = vmatprep.subr.bf16.mxu0 %v14129_v15 }
  0xb7   : > { %12917 = vmatmul.mubr.msk.bf16.gmra.mrb[4].mxu0 %vm831_vm3, %v11386_v23  ;;  %v3111_v23 = vrot.slane %v3109_v34, 4 }
  0xb8   : > { %12920 = vmatprep.mubr.msk.bf16.mxu0 %vm831_vm3, %v18862_v16  ;;  %12949 = vmatpush3.bf16.msra.mxu0 %v14129_v15  ;;  %v15242_v15 = vld [vmem:[%s14466_s26 + $0x1c] sm:$0xf]  ;;  %v15246_v16 = vld [vmem:[%s14466_s26 + $0x14] sm:$0x1] }
  0xb9   : > { %12950 = vmatprep.subr.bf16.mxu0 %v14130_v37 }
  0xbc   : > { %12951 = vmatpush3.bf16.msra.mxu0 %v14130_v37  ;;  %v14143_v37 = vld [vmem:[%s14466_s26 + $0x78] sm:$0xff]  }
  0xbd   : > { %12984 = vmatprep.subr.bf16.mxu0 %v14132_v46 }
  0xbf   : > { %12921 = vmatmul.mubr.msk.bf16.gmra.mrb[8].mxu0 %vm831_vm3, %v18863_v40  ;;  %v2301_v40 = vrot.slane %v2299_v63, 4 }
  0xc0   : > { %12924 = vmatprep.mubr.msk.bf16.mxu0 %vm831_vm3, %v18864_v60  ;;  %v2304_v60 = vrot.slane %v2302_v13, 5 }
  0xc7   : > { %12925 = vmatmul.mubr.msk.bf16.gmra.mrb[12].mxu0 %vm831_vm3, %v18865_v38  ;;  %v15250_v38 = vsel %vm14817_vm6, %v11612_v35, %v3109_v34 }
  0xc8   : > { %12928 = vmatprep.mubr.msk.bf16.mxu0 %vm831_vm3, %v18866_v49  ;;  %v14144_v49 = vld [vmem:[%s14466_s26 + $0x84] sm:$0xff]  }
  0xcf   : > { %12929 = vmatmul.mubr.msk.bf16.gmra.mrb[16].mxu0 %vm831_vm3, %v18867_v24  ;;  %v15255_v24 = vsel %vm14817_vm6, %v3111_v23, %v3112_v44 }
  0xd0   : > { %12932 = vmatprep.mubr.msk.bf16.mxu0 %vm831_vm3, %v18868_v7  ;;  %18869 = vst [vmem:[#allocation6_spill] sm:$0xff] %v15255_v24  ;;  %v2308_v7 = vshll.u32 %v15242_v15, 16  ;;  %v15395_v24 = vld [vmem:[%s14466_s26 + $0x58] sm:$0xf] }
  0xd7   : > { %12933 = vmatmul.mubr.msk.bf16.gmra.mrb[20].mxu0 %vm831_vm3, %v11394_v58  ;;  %v15183_v58 = vld [vmem:[%s18730_s1 + $0xa0] sm:$0xff]  }
  0xd8   : > { %12936 = vmatprep.mubr.msk.bf16.mxu0 %vm831_vm3, %v11395_v25  ;;  %v14138_v25 = vld [vmem:[%s14466_s26 + $0x48] sm:$0xff]  }
  0xdf   : > { %12937 = vmatmul.mubr.msk.bf16.gmra.mrb[24].mxu0 %vm831_vm3, %v11396_v32  ;;  %v15193_v32 = vsel %vm14817_vm6, %v3083_v12, %v3084_v42  ;;  %v15275_v42 = vld [vmem:[%s14466_s26 + $0x98] sm:$0x1] }
  0xe0   : > { %12940 = vmatprep.mubr.msk.bf16.mxu0 %vm831_vm3, %v11397_v61  ;;  %v15200_v61 = vld [vmem:[%s14466_s26 + $0x64] sm:$0xf]  ;;  %v3126_v11 = vrot.slane %v15275_v42, 5 }
  0xe7   : > { %12941 = vmatmul.mubr.msk.bf16.gmra.mrb[28].mxu0 %vm831_vm3, %v11398_v19  ;;  %v3095_v19 = vrot.slane %v15200_v61, 5 }
  0xe8   : > { %12952 = vmatprep.mubr.msk.bf16.mxu0 %vm831_vm3, %v14131_v18  ;;  %v2312_v18 = vshrl.u32 %v15242_v15, 16 }
  0xe9   : > { %v3097_v33 = vrot.slane %v3095_v19, 4  ;;  %v15216_v31 = vsel %vm14817_vm6, %v11610_v39, %v3095_v19  ;;  %v15281_v19 = vrot.slane %v2308_v7, 5  ;;  %v11504_v39 = vld [vmem:[%s14466_s26 + $0x30] sm:$0xf] }
  0xea   : > { %v2347_v23 = vshrl.u32 %v11504_v39, 16 }
  0xeb   : > { %v15222_v20 = vsel %vm14817_vm6, %v3097_v33, %v3098_v6  ;;  %v2314_v6 = vrot.slane %v2312_v18, 4  ;;  %v2360_v18 = vshrl.u32 %v15288_v56, 16 }
  0xef   : > { %12953 = vmatmul.mubr.msk.bf16.vlgmr.msra.gmra.mrb[0].mxu0 %vm831_vm3, %v14133_v54  ;;  %v11501_v54 = vld [vmem:[%s14466_s26 + $0x24] sm:$0xf] }
  0xf0   : > { %12985 = vmatpush3.bf16.msra.mxu0 %v14132_v46  ;;  %12956 = vmatprep.mubr.msk.bf16.mxu0 %vm831_vm3, %v14134_v22  ;;  %v2290_v46 = vrot.slane %v2288_v57, 4  ;;  %v2323_v27 = vshrl.u32 %v11501_v54, 16  ;;  %v2326_v12 = vshll.u32 %v11501_v54, 16  ;;  %v2315_v54 = vor.u32 %v2314_v6, %v15281_v19  ;;  %v11510_v22 = vld [vmem:[%s14466_s26 + $0x48] sm:$0xf] }
  0xf1   : > { %12986 = vmatprep.subr.bf16.mxu0 %v14137_v4  ;;  %v2349_v6 = vrot.slane %v2347_v23, 4 }
  0xf2   : > { %v2325_v44 = vrot.slane %v2323_v27, 4  ;;  %v2328_v35 = vrot.slane %v2326_v12, 5  ;;  %v11600_v12 = vld [vmem:[%s14466_s26 + $0xa8] sm:$0xe] }
  0xf4   : > { %12987 = vmatpush3.bf16.msra.mxu0 %v14137_v4  ;;  %v2294_v4 = vshll.u32 %v15246_v16, 16 }
  0xf5   : > { %12988 = vmatprep.subr.bf16.mxu0 %v14142_v45 }
  0xf6   : > { %v2296_v63 = vrot.slane %v2294_v4, 5  ;;  %v11507_v4 = vld [vmem:[%s14466_s26 + $0x3c] sm:$0xf] }
  0xf7   : > { %12957 = vmatmul.mubr.msk.bf16.gmra.mrb[4].mxu0 %vm831_vm3, %v14135_v51  ;;  %v2281_v51 = vor.u32 %v2280_v43, %v2277_v59  ;;  %v15303_v43 = vld [vmem:[%s14466_s26 + $0x2c] sm:$0x1] }
  0xf8   : > { %12960 = vmatprep.mubr.msk.bf16.mxu0 %vm831_vm3, %v14136_v8  ;;  %12989 = vmatpush3.bf16.msra.mxu0 %v14142_v45  ;;  %v15264_v45 = vld [vmem:[%s14466_s26 + $0x20] sm:$0x1]  ;;  %v2291_v8 = vor.u32 %v2290_v46, %v15239_v55  ;;  %v2356_v46 = vshll.u32 %v15288_v56, 16  ;;  %v2342_v27 = vshll.u32 %v15303_v43, 16 }
  0xf9   : > { %12990 = vmatprep.subr.bf16.mxu0 %v14147_v62  ;;  %v2282_v41 = vrot.slane %v2281_v51, 4  ;;  %v15317_v51 = vld [vmem:[%s14466_s26 + $0xac] sm:$0xf] }
  0xfa   : > { %v2292_v57 = vrot.slane %v2291_v8, 4  ;;  %v15320_v8 = vld [vmem:[%s14466_s26 + $0xb0] sm:$0x1] }
  0xfc   : > { %12991 = vmatpush3.bf16.msra.mxu0 %v14147_v62  ;;  %v2305_v62 = vor.u32 %v2304_v60, %v2301_v40  ;;  %v2297_v23 = vsel %vm14501_vm2, %v2292_v57, %v2296_v63  ;;  %v15351_v40 = vrot.slane %v2342_v27, 5 }
  0xfd   : > { %13024 = vmatprep.subr.bf16.mxu0 %v15183_v58 }
  0xfe   : > { %v15296_v34 = vrot.slane %v2305_v62, 4  ;;  %v2329_v62 = vor.u32 %v2328_v35, %v2325_v44  ;;  %v14148_v44 = vld [vmem:[%s14466_s26 + $0xa8] sm:$0xff]   ;;  %v2287_v35 = vsel %vm14501_vm2, %v2282_v41, %v15239_v55 }
  0xff   : > { %12961 = vmatmul.mubr.msk.bf16.gmra.mrb[8].mxu0 %vm831_vm3, %v14138_v25  ;;  %v11598_v25 = vld [vmem:[%s14466_s26 + $0x90] sm:$0xe] }
 0x100   : > { %12964 = vmatprep.mubr.msk.bf16.mxu0 %vm831_vm3, %v14139_v5  ;;  %v3123_v5 = vrot.slane %v15272_v2, 5  ;;  %v11614_v33 = vrot.slane %v11598_v25, 9  ;;  %v3137_v25 = vrot.slane %v15317_v51, 5 }
 0x102   : > { %v3125_v50 = vrot.slane %v3123_v5, 4  ;;  %v15293_v13 = vsel %vm14817_vm6, %v11614_v33, %v3123_v5  ;;  %v3140_v5 = vrot.slane %v15320_v8, 5  ;;  %v15330_v33 = vrot.slane %v2356_v46, 5 }
 0x103   : > { %18870 = vst [vmem:[#allocation7_spill] sm:$0xff] %v15293_v13  ;;  %v2404_v13 = vshll.u32 %v15171_v26, 16 }
 0x104   : > { %v15300_v59 = vsel %vm14817_vm6, %v3125_v50, %v3126_v11  ;;  %v15328_v11 = vld [vmem:[%s14466_s26 + $0x38] sm:$0x1]  ;;  %v15334_v50 = vld [vmem:[%s14466_s26 + $0x40] sm:$0xf] }
 0x105   : > { %18871 = vst [vmem:[#allocation8_spill] sm:$0xff] %v15300_v59  ;;  %v2366_v41 = vshll.u32 %v15328_v11, 16  ;;  %v2380_v57 = vshll.u32 %v15334_v50, 16  ;;  %v2384_v63 = vshrl.u32 %v15334_v50, 16  ;;  %v14150_v59 = vld [vmem:[%s14466_s26 + $0xc0] sm:$0xff]  }
 0x107   : > { %12965 = vmatmul.mubr.msk.bf16.gmra.mrb[12].mxu0 %vm831_vm3, %v14140_v0  ;;  %v2318_v0 = vshll.u32 %v15264_v45, 16 }
 0x108   : > { %12968 = vmatprep.mubr.msk.bf16.mxu0 %vm831_vm3, %v14141_v48  ;;  %v2336_v48 = vshrl.u32 %v15269_v53, 16 }
 0x109   : > { %v15308_v60 = vrot.slane %v2318_v0, 5  ;;  %v11616_v0 = vrot.slane %v11600_v12, 9  ;;  %v14149_v12 = vld [vmem:[%s14466_s26 + $0xb4] sm:$0xff]  }
 0x10a   : > { %v2338_v7 = vrot.slane %v2336_v48, 4  ;;  %v2362_v48 = vrot.slane %v2360_v18, 4  ;;  %v15349_v18 = vrot.slane %v2329_v62, 4 }
 0x10b   : > { %v15344_v46 = vsel %vm14817_vm6, %v11616_v0, %v3137_v25 }
 0x10c   : > { %18872 = vst [vmem:[#allocation9_spill] sm:$0xff] %v15344_v46  ;;  %v2363_v27 = vor.u32 %v2362_v48, %v15330_v33  ;;  %v11602_v48 = vld [vmem:[%s14466_s26 + $0xc0] sm:$0xe] }
 0x10f   : > { %12969 = vmatmul.mubr.msk.bf16.gmra.mrb[16].mxu0 %vm831_vm3, %v14143_v37  ;;  %v2350_v37 = vshll.u32 %v11504_v39, 16 }
 0x110   : > { %12972 = vmatprep.mubr.msk.bf16.mxu0 %vm831_vm3, %v14144_v49  ;;  %v15310_v49 = vrot.slane %v2332_v10, 5 }
 0x111   : > { %v2352_v39 = vrot.slane %v2350_v37, 5  ;;  %v2374_v37 = vshll.u32 %v11507_v4, 16 }
 0x112   : > { %v2339_v10 = vor.u32 %v2338_v7, %v15310_v49  ;;  %v15347_v7 = vrot.slane %v2315_v54, 4  ;;  %v11618_v54 = vrot.slane %v11602_v48, 9 }
 0x113   : > { %v2353_v62 = vor.u32 %v2352_v39, %v2349_v6  ;;  %v2376_v0 = vrot.slane %v2374_v37, 5  ;;  %v2311_v6 = vsel %vm14501_vm2, %v15296_v34, %v15281_v19  ;;  %v2398_v37 = vshll.u32 %v11510_v22, 16 }
 0x114   : > { %v2321_v39 = vsel %vm14501_vm2, %v15347_v7, %v15308_v60  ;;  %v2364_v34 = vrot.slane %v2363_v27, 4 }
 0x115   : > { %v2354_v19 = vrot.slane %v2353_v62, 4 }
 0x117   : > { %12973 = vmatmul.mubr.msk.bf16.gmra.mrb[20].mxu0 %vm831_vm3, %v14145_v17  ;;  %v2371_v17 = vshrl.u32 %v11507_v4, 16  ;;  %v15363_v4 = vrot.slane %v2339_v10, 4  ;;  %v15383_v10 = vld [vmem:[%s14466_s26 + $0x44] sm:$0x1] }
 0x118   : > { %12976 = vmatprep.mubr.msk.bf16.mxu0 %vm831_vm3, %v14146_v30  ;;  %v3139_v30 = vrot.slane %v3137_v25, 4  ;;  %v2390_v7 = vshll.u32 %v15383_v10, 16 }
 0x119   : > { %v2373_v25 = vrot.slane %v2371_v17, 4  ;;  %v3151_v17 = vrot.slane %v15368_v1, 5 }
 0x11a   : > { %v15356_v55 = vsel %vm14817_vm6, %v3139_v30, %v3140_v5  ;;  %v11551_v5 = vcombine.low %v2287_v35, %v2297_v23  ;;  %v2395_v30 = vshrl.u32 %v11510_v22, 16  ;;  %v15388_v35 = vrot.slane %v2380_v57, 5 }
 0x11b   : > { %18873 = vst [vmem:[#allocation10_spill] sm:$0xff] %v15356_v55  ;;  %v2386_v23 = vrot.slane %v2384_v63, 4  ;;  %v2368_v55 = vrot.slane %v2366_v41, 5  ;;  %v3153_v46 = vrot.slane %v3151_v17, 4  ;;  %v2377_v60 = vor.u32 %v2376_v0, %v2373_v25 }
 0x11c   : > { %v15399_v57 = vsel %vm14817_vm6, %v11618_v54, %v3151_v17  ;;  %v2408_v22 = vshrl.u32 %v15171_v26, 16  ;;  %v2397_v25 = vrot.slane %v2395_v30, 4  ;;  %v2400_v0 = vrot.slane %v2398_v37, 5 }
 0x11d   : > { %18874 = vst [vmem:[#allocation11_spill] sm:$0xff] %v15399_v57  ;;  %v2387_v27 = vor.u32 %v2386_v23, %v15388_v35  ;;  %v2335_v54 = vsel %vm14501_vm2, %v15349_v18, %v15310_v49  ;;  %v2345_v26 = vsel %vm14501_vm2, %v15363_v4, %v15351_v40  ;;  %v2432_v17 = vshrl.u32 %v15395_v24, 16 }
 0x11e   : > { %v2359_v30 = vsel %vm14501_vm2, %v2354_v19, %v15330_v33  ;;  %v2369_v49 = vsel %vm14501_vm2, %v2364_v34, %v2368_v55  ;;  %v2378_v18 = vrot.slane %v2377_v60, 4  ;;  %v15426_v23 = vrot.slane %v2404_v13, 5  ;;  %v15431_v19 = vld [vmem:[%s14466_s26 + $0x5c] sm:$0x1] }
 0x11f   : > { %12977 = vmatmul.mubr.msk.bf16.gmra.mrb[24].mxu0 %vm831_vm3, %v14148_v44  ;;  %v3154_v44 = vrot.slane %v15371_v14, 5  ;;  %v2410_v40 = vrot.slane %v2408_v22, 4  ;;  %v2414_v4 = vshll.u32 %v15174_v47, 16  ;;  %v2388_v48 = vrot.slane %v2387_v27, 4  ;;  %v15445_v27 = vld [vmem:[%s14466_s26 + $0x70] sm:$0xf] }
 0x120   : > { %12980 = vmatprep.mubr.msk.bf16.mxu0 %vm831_vm3, %v14149_v12  ;;  %v11513_v12 = vld [vmem:[%s14466_s26 + $0x54] sm:$0xf]  ;;  %v11552_v33 = vcombine.low %v2311_v6, %v2321_v39  ;;  %v2434_v13 = vrot.slane %v2432_v17, 4  ;;  %v11554_v60 = vcombine.low %v2359_v30, %v2369_v49  ;;  %v2452_v47 = vshll.u32 %v15200_v61, 16 }
 0x121   : > { %v2419_v63 = vshrl.u32 %v11513_v12, 16  ;;  %v2422_v62 = vshll.u32 %v11513_v12, 16  ;;  %v15404_v41 = vsel %vm14817_vm6, %v3153_v46, %v3154_v44  ;;  %v2428_v46 = vshll.u32 %v15395_v24, 16  ;;  %v11516_v44 = vld [vmem:[%s14466_s26 + $0x60] sm:$0xf] }
 0x122   : > { %18875 = vst [vmem:[#allocation12_spill] sm:$0xff] %v15404_v41  ;;  %v2401_v41 = vor.u32 %v2400_v0, %v2397_v25  ;;  %v2443_v57 = vshrl.u32 %v11516_v44, 16  ;;  %v2446_v34 = vshll.u32 %v11516_v44, 16  ;;  %v2456_v22 = vshrl.u32 %v15200_v61, 16  ;;  %v14152_v0 = vld [vmem:[%s18730_s1 + $0xa8] sm:$0xff]  }
 0x123   : > { %v2421_v37 = vrot.slane %v2419_v63, 4  ;;  %v2424_v12 = vrot.slane %v2422_v62, 5  ;;  %v15433_v55 = vrot.slane %v2428_v46, 5  ;;  %v11519_v63 = vld [vmem:[%s14466_s26 + $0x6c] sm:$0xf]  ;;  %v2411_v6 = vor.u32 %v2410_v40, %v15426_v23 }
 0x124   : > { %v15442_v39 = vrot.slane %v2414_v4, 5  ;;  %v2402_v61 = vrot.slane %v2401_v41, 4  ;;  %v11522_v46 = vld [vmem:[%s14466_s26 + $0x78] sm:$0xf]  ;;  %v2448_v17 = vrot.slane %v2446_v34, 5  ;;  %v2467_v44 = vshrl.u32 %v11519_v63, 16 }
 0x125   : > { %v2425_v62 = vor.u32 %v2424_v12, %v2421_v37  ;;  %v2470_v30 = vshll.u32 %v11519_v63, 16  ;;  %v15456_v49 = vrot.slane %v2452_v47, 5  ;;  %v2480_v40 = vshrl.u32 %v15445_v27, 16 }
 0x126   : > { %v2462_v4 = vshll.u32 %v15203_v36, 16  ;;  %v2491_v37 = vshrl.u32 %v11522_v46, 16  ;;  %v2469_v47 = vrot.slane %v2467_v44, 4 }
 0x127   : > { %12981 = vmatmul.mubr.msk.bf16.gmra.mrb[28].mxu0 %vm831_vm3, %v14150_v59  ;;  %v2392_v59 = vrot.slane %v2390_v7, 5  ;;  %v2383_v7 = vsel %vm14501_vm2, %v2378_v18, %v15388_v35  ;;  %v2435_v35 = vor.u32 %v2434_v13, %v15433_v55  ;;  %v2458_v18 = vrot.slane %v2456_v22, 4 }
 0x128   : > { %12992 = vmatprep.mubr.msk.bf16.mxu0 %vm831_vm3, %v11551_v5  ;;  %v11553_v5 = vcombine.low %v2335_v54, %v2345_v26  ;;  %v2438_v54 = vshll.u32 %v15431_v19, 16  ;;  %v2445_v26 = vrot.slane %v2443_v57, 4  ;;  %v2412_v57 = vrot.slane %v2411_v6, 4  ;;  %v15470_v6 = vld [vmem:[%s14466_s26 + $0x74] sm:$0x1] }
 0x129   : > { %v2393_v25 = vsel %vm14501_vm2, %v2388_v48, %v2392_v59  ;;  %v2476_v48 = vshll.u32 %v15445_v27, 16  ;;  %v2426_v41 = vrot.slane %v2425_v62, 4  ;;  %v14153_v59 = vld [vmem:[%s18730_s1 + $0xb0] sm:$0xff]   ;;  %v2500_v13 = vshll.u32 %v15230_v52, 16 }
 0x12a   : > { %v2440_v12 = vrot.slane %v2438_v54, 5  ;;  %v2436_v34 = vrot.slane %v2435_v35, 4  ;;  %v2472_v22 = vrot.slane %v2470_v30, 5  ;;  %v11555_v63 = vcombine.low %v2383_v7, %v2393_v25  ;;  %v11525_v25 = vld [vmem:[%s14466_s26 + $0x84] sm:$0xf] }
 0x12b   : > { %v2459_v36 = vor.u32 %v2458_v18, %v15456_v49  ;;  %v15472_v62 = vrot.slane %v2476_v48, 5  ;;  %v2482_v54 = vrot.slane %v2480_v40, 4  ;;  %v2493_v7 = vrot.slane %v2491_v37, 4  ;;  %v15489_v18 = vld [vmem:[%s14466_s26 + $0x88] sm:$0xf] }
 0x12c   : > { %v2431_v35 = vsel %vm14501_vm2, %v2426_v41, %v15433_v55  ;;  %v15486_v44 = vrot.slane %v2500_v13, 5  ;;  %v2486_v48 = vshll.u32 %v15470_v6, 16  ;;  %v2518_v41 = vshll.u32 %v11525_v25, 16 }
 0x12d   : > { %v2460_v55 = vrot.slane %v2459_v36, 4  ;;  %v2483_v40 = vor.u32 %v2482_v54, %v15472_v62  ;;  %v2528_v37 = vshrl.u32 %v15489_v18, 16 }
 0x12f   : > { %12993 = vmatmul.mubr.msk.bf16.vlgmr.msra.gmra.mrb[0].mxu0 %vm831_vm3, %v11552_v33  ;;  %v2494_v33 = vshll.u32 %v11522_v46, 16  ;;  %v2407_v46 = vsel %vm14501_vm2, %v2402_v61, %v15426_v23  ;;  %v14154_v23 = vld [vmem:[%s18730_s1 + $0xb8] sm:$0xff]   ;;  %v2473_v61 = vor.u32 %v2472_v22, %v2469_v47  ;;  %v2488_v22 = vrot.slane %v2486_v48, 5 }
 0x130   : > { %13025 = vmatpush3.bf16.msra.mxu0 %v15183_v58  ;;  %12996 = vmatprep.mubr.msk.bf16.mxu0 %vm831_vm3, %v11553_v5  ;;  %v2504_v58 = vshrl.u32 %v15230_v52, 16  ;;  %v2449_v5 = vor.u32 %v2448_v17, %v2445_v26  ;;  %v2417_v52 = vsel %vm14501_vm2, %v2412_v57, %v15442_v39  ;;  %v15480_v26 = vrot.slane %v2462_v4, 5 }
 0x131   : > { %13026 = vmatprep.subr.bf16.mxu0 %v14152_v0  ;;  %v2496_v17 = vrot.slane %v2494_v33, 5  ;;  %v2441_v39 = vsel %vm14501_vm2, %v2436_v34, %v2440_v12  ;;  %v2515_v57 = vshrl.u32 %v11525_v25, 16  ;;  %v2524_v4 = vshll.u32 %v15489_v18, 16  ;;  %v15508_v34 = vld [vmem:[%s18730_s1 + $0xc0] sm:$0xff]  }
 0x132   : > { %v2506_v30 = vrot.slane %v2504_v58, 4  ;;  %v11556_v12 = vcombine.low %v2407_v46, %v2417_v52  ;;  %v11528_v58 = vld [vmem:[%s14466_s26 + $0x90] sm:$0xf]  ;;  %v2474_v47 = vrot.slane %v2473_v61, 4  ;;  %v2484_v36 = vrot.slane %v2483_v40, 4 }
 0x133   : > { %v2497_v33 = vor.u32 %v2496_v17, %v2493_v7  ;;  %v2517_v54 = vrot.slane %v2515_v57, 4  ;;  %v2520_v46 = vrot.slane %v2518_v41, 5  ;;  %v11531_v52 = vld [vmem:[%s14466_s26 + $0x9c] sm:$0xf]  ;;  %v15520_v7 = vrot.slane %v2524_v4, 5 }
 0x134   : > { %13027 = vmatpush3.bf16.msra.mxu0 %v14152_v0  ;;  %v2450_v0 = vrot.slane %v2449_v5, 4  ;;  %v2507_v13 = vor.u32 %v2506_v30, %v15486_v44  ;;  %v2530_v25 = vrot.slane %v2528_v37, 4  ;;  %v2542_v17 = vshll.u32 %v11528_v58, 16  ;;  %v15523_v30 = vld [vmem:[%s14466_s26 + $0xa0] sm:$0xf] }
 0x135   : > { %13028 = vmatprep.subr.bf16.mxu0 %v14153_v59  ;;  %v2552_v48 = vshrl.u32 %v15272_v2, 16  ;;  %v2566_v40 = vshll.u32 %v11531_v52, 16  ;;  %v2479_v57 = vsel %vm14501_vm2, %v2474_v47, %v15472_v62  ;;  %v2572_v41 = vshll.u32 %v15523_v30, 16 }
 0x136   : > { %v2455_v5 = vsel %vm14501_vm2, %v2450_v0, %v15456_v49  ;;  %v2498_v49 = vrot.slane %v2497_v33, 4  ;;  %v2576_v4 = vshrl.u32 %v15523_v30, 16  ;;  %v2521_v37 = vor.u32 %v2520_v46, %v2517_v54  ;;  %v15547_v46 = vld [vmem:[%s14466_s26 + $0xa4] sm:$0x1] }
 0x137   : > { %12997 = vmatmul.mubr.msk.bf16.gmra.mrb[4].mxu0 %vm831_vm3, %v11554_v60  ;;  %v2510_v60 = vshll.u32 %v15233_v21, 16  ;;  %v2465_v21 = vsel %vm14501_vm2, %v2460_v55, %v15480_v26  ;;  %v2548_v26 = vshll.u32 %v15272_v2, 16  ;;  %v2563_v55 = vshrl.u32 %v11531_v52, 16 }
 0x138   : > { %13000 = vmatprep.mubr.msk.bf16.mxu0 %vm831_vm3, %v11555_v63  ;;  %13029 = vmatpush3.bf16.msra.mxu0 %v14153_v59  ;;  %v11557_v59 = vcombine.low %v2431_v35, %v2441_v39  ;;  %v15514_v63 = vld [vmem:[%s14466_s26 + $0x8c] sm:$0x1]  ;;  %v2539_v35 = vshrl.u32 %v11528_v58, 16  ;;  %v2508_v39 = vrot.slane %v2507_v13, 4  ;;  %v2531_v2 = vor.u32 %v2530_v25, %v15520_v7 }
 0x139   : > { %13030 = vmatprep.subr.bf16.mxu0 %v14154_v23  ;;  %v2512_v0 = vrot.slane %v2510_v60, 5  ;;  %v2534_v61 = vshll.u32 %v15514_v63, 16  ;;  %v2503_v62 = vsel %vm14501_vm2, %v2498_v49, %v15486_v44  ;;  %v15544_v58 = vrot.slane %v2548_v26, 5 }
 0x13a   : > { %v2541_v33 = vrot.slane %v2539_v35, 4  ;;  %v2554_v47 = vrot.slane %v2552_v48, 4  ;;  %v2574_v52 = vrot.slane %v2572_v41, 5  ;;  %v2578_v25 = vrot.slane %v2576_v4, 4  ;;  %v11534_v35 = vld [vmem:[%s14466_s26 + $0xa8] sm:$0xf] }
 0x13b   : > { %v2513_v13 = vsel %vm14501_vm2, %v2508_v39, %v2512_v0  ;;  %v2536_v60 = vrot.slane %v2534_v61, 5  ;;  %v2532_v44 = vrot.slane %v2531_v2, 4  ;;  %v2558_v39 = vshll.u32 %v15275_v42, 16 }
 0x13c   : > { %13031 = vmatpush3.bf16.msra.mxu0 %v14154_v23  ;;  %v2489_v23 = vsel %vm14501_vm2, %v2484_v36, %v2488_v22  ;;  %v2565_v22 = vrot.slane %v2563_v55, 4  ;;  %v2568_v36 = vrot.slane %v2566_v40, 5  ;;  %v11560_v0 = vcombine.low %v2503_v62, %v2513_v13 }
 0x13d   : > { %13064 = vmatprep.subr.bf16.mxu0 %v15508_v34  ;;  %v11559_v54 = vcombine.low %v2479_v57, %v2489_v23  ;;  %v2555_v61 = vor.u32 %v2554_v47, %v15544_v58  ;;  %v2582_v48 = vshll.u32 %v15547_v46, 16  ;;  %v2587_v55 = vshrl.u32 %v11534_v35, 16 }
 0x13e   : > { %v2569_v26 = vor.u32 %v2568_v36, %v2565_v22  ;;  %v2579_v40 = vor.u32 %v2578_v25, %v2574_v52  ;;  %v2590_v57 = vshll.u32 %v11534_v35, 16  ;;  %v2596_v23 = vshll.u32 %v15317_v51, 16 }
 0x13f   : > { %13001 = vmatmul.mubr.msk.bf16.gmra.mrb[8].mxu0 %vm831_vm3, %v11556_v12  ;;  %v2544_v12 = vrot.slane %v2542_v17, 5  ;;  %v2522_v17 = vrot.slane %v2521_v37, 4  ;;  %v2600_v41 = vshrl.u32 %v15317_v51, 16  ;;  %v2537_v4 = vsel %vm14501_vm2, %v2532_v44, %v2536_v60 }
 0x140   : > { %13004 = vmatprep.mubr.msk.bf16.mxu0 %vm831_vm3, %v11557_v59  ;;  %v11558_v59 = vcombine.low %v2455_v5, %v2465_v21  ;;  %v11537_v5 = vld [vmem:[%s14466_s26 + $0xb4] sm:$0xf]  ;;  %v15555_v21 = vld [vmem:[%s14466_s26 + $0xb8] sm:$0xf]  ;;  %v2560_v2 = vrot.slane %v2558_v39, 5  ;;  %v2556_v47 = vrot.slane %v2555_v61, 4 }
 0x141   : > { %v2545_v49 = vor.u32 %v2544_v12, %v2541_v33  ;;  %v2527_v42 = vsel %vm14501_vm2, %v2522_v17, %v15520_v7  ;;  %v2611_v33 = vshrl.u32 %v11537_v5, 16  ;;  %v2614_v12 = vshll.u32 %v11537_v5, 16  ;;  %v11540_v39 = vld [vmem:[%s14466_s26 + $0xc0] sm:$0xf] }
 0x142   : > { %v2620_v62 = vshll.u32 %v15555_v21, 16  ;;  %v2624_v13 = vshrl.u32 %v15555_v21, 16  ;;  %v2570_v51 = vrot.slane %v2569_v26, 4  ;;  %v2584_v22 = vrot.slane %v2582_v48, 5  ;;  %v15576_v48 = vld [vmem:[%s14466_s26 + $0xbc] sm:$0x1] }
 0x143   : > { %v2546_v37 = vrot.slane %v2545_v49, 4  ;;  %v2589_v36 = vrot.slane %v2587_v55, 4  ;;  %v2598_v7 = vrot.slane %v2596_v23, 5  ;;  %v2602_v25 = vrot.slane %v2600_v41, 4 }
 0x144   : > { %v11561_v35 = vcombine.low %v2527_v42, %v2537_v4  ;;  %v2613_v60 = vrot.slane %v2611_v33, 4  ;;  %v2616_v17 = vrot.slane %v2614_v12, 5  ;;  %v2622_v44 = vrot.slane %v2620_v62, 5 }
 0x145   : > { %v2626_v49 = vrot.slane %v2624_v13, 4  ;;  %v2551_v5 = vsel %vm14501_vm2, %v2546_v37, %v15544_v58  ;;  %v2561_v61 = vsel %vm14501_vm2, %v2556_v47, %v2560_v2  ;;  %v2606_v26 = vshll.u32 %v15320_v8, 16 }
 0x146   : > { %v2575_v55 = vsel %vm14501_vm2, %v2570_v51, %v2574_v52  ;;  %v2603_v23 = vor.u32 %v2602_v25, %v2598_v7  ;;  %v2635_v58 = vshrl.u32 %v11540_v39, 16  ;;  %v2638_v41 = vshll.u32 %v11540_v39, 16 }
 0x147   : > { %13005 = vmatmul.mubr.msk.bf16.gmra.mrb[12].mxu0 %vm831_vm3, %v11558_v59  ;;  %v2580_v59 = vrot.slane %v2579_v40, 4  ;;  %v2644_v42 = vshll.u32 %v15368_v1, 16  ;;  %v2648_v8 = vshrl.u32 %v15368_v1, 16  ;;  %v2617_v4 = vor.u32 %v2616_v17, %v2613_v60 }
 0x148   : > { %13008 = vmatprep.mubr.msk.bf16.mxu0 %vm831_vm3, %v11559_v54  ;;  %v2592_v54 = vrot.slane %v2590_v57, 5  ;;  %v2627_v37 = vor.u32 %v2626_v49, %v2622_v44  ;;  %v11562_v2 = vcombine.low %v2551_v5, %v2561_v61  ;;  %v2604_v12 = vrot.slane %v2603_v23, 4  ;;  %v11587_v61 = vld [vmem:[%s14466_s26 + $0xc] sm:$0xe] }
 0x149   : > { %v2585_v40 = vsel %vm14501_vm2, %v2580_v59, %v2584_v22  ;;  %v2608_v62 = vrot.slane %v2606_v26, 5  ;;  %v2637_v13 = vrot.slane %v2635_v58, 4  ;;  %v2640_v47 = vrot.slane %v2638_v41, 5 }
 0x14a   : > { %v2593_v57 = vor.u32 %v2592_v54, %v2589_v36  ;;  %v11563_v33 = vcombine.low %v2575_v55, %v2585_v40  ;;  %v2646_v51 = vrot.slane %v2644_v42, 5  ;;  %v2650_v22 = vrot.slane %v2648_v8, 4 }
 0x14b   : > { %v2618_v36 = vrot.slane %v2617_v4, 4  ;;  %v2628_v59 = vrot.slane %v2627_v37, 4  ;;  %v2609_v25 = vsel %vm14501_vm2, %v2604_v12, %v2608_v62  ;;  %v2654_v17 = vshll.u32 %v15371_v14, 16  ;;  %v11588_v4 = vld [vmem:[%s14466_s26 + $0x18] sm:$0xe] }
 0x14c   : > { %v2594_v52 = vrot.slane %v2593_v57, 4  ;;  %v2651_v60 = vor.u32 %v2650_v22, %v2646_v51  ;;  %v3046_v5 = vrot.slane %v15212_v9, 5  ;;  %v11603_v23 = vrot.slane %v11587_v61, 9  ;;  %v11589_v37 = vld [vmem:[%s14466_s26 + $0x24] sm:$0xe] }
 0x14d   : > { %v2623_v49 = vsel %vm14501_vm2, %v2618_v36, %v2622_v44  ;;  %v2656_v57 = vrot.slane %v2654_v17, 5  ;;  %v3049_v14 = vrot.slane %v15246_v16, 5  ;;  %v3053_v41 = vrot.slane %v15242_v15, 5  ;;  %v11590_v36 = vld [vmem:[%s14466_s26 + $0x30] sm:$0xe] }
 0x14e   : > { %v2599_v1 = vsel %vm14501_vm2, %v2594_v52, %v2598_v7  ;;  %v2652_v40 = vrot.slane %v2651_v60, 4  ;;  %v3048_v58 = vrot.slane %v3046_v5, 4  ;;  %v3047_v42 = vsel %vm14817_vm6, %v11603_v23, %v3046_v5 }
 0x14f   : > { %13009 = vmatmul.mubr.msk.bf16.gmra.mrb[16].mxu0 %vm831_vm3, %v11560_v0  ;;  %v2630_v0 = vshll.u32 %v15576_v48, 16  ;;  %v11564_v7 = vcombine.low %v2599_v1, %v2609_v25  ;;  %v3060_v16 = vrot.slane %v15269_v53, 5  ;;  %v3055_v52 = vrot.slane %v3053_v41, 4 }
 0x150   : > { %13012 = vmatprep.mubr.msk.bf16.mxu0 %vm831_vm3, %v11561_v35  ;;  %v2641_v35 = vor.u32 %v2640_v47, %v2637_v13  ;;  %v2657_v9 = vsel %vm14501_vm2, %v2652_v40, %v2656_v57  ;;  %v3050_v8 = vsel %vm14817_vm6, %v3048_v58, %v3049_v14  ;;  %v3056_v12 = vrot.slane %v15264_v45, 5  ;;  %v14158_v58 = vld [vmem:[%s18730_s1 + $0xd8] sm:$0xff]  }
 0x151   : > { %v2632_v54 = vrot.slane %v2630_v0, 5  ;;  %v11605_v62 = vrot.slane %v11589_v37, 9  ;;  %v3062_v15 = vrot.slane %v3060_v16, 4  ;;  %v3063_v13 = vrot.slane %v15303_v43, 5 }
 0x152   : > { %v2642_v55 = vrot.slane %v2641_v35, 4  ;;  %v3057_v47 = vsel %vm14817_vm6, %v3055_v52, %v3056_v12  ;;  %v3074_v43 = vrot.slane %v15334_v50, 5  ;;  %v11606_v25 = vrot.slane %v11590_v36, 9 }
 0x153   : > { %v2633_v39 = vsel %vm14501_vm2, %v2628_v59, %v2632_v54  ;;  %v3061_v22 = vsel %vm14817_vm6, %v11605_v62, %v3060_v16  ;;  %v3064_v45 = vsel %vm14817_vm6, %v3062_v15, %v3063_v13  ;;  %v11591_v59 = vld [vmem:[%s14466_s26 + $0x3c] sm:$0xe]  ;;  %v3070_v60 = vrot.slane %v15328_v11, 5 }
 0x154   : > { %v11565_v26 = vcombine.low %v2623_v49, %v2633_v39  ;;  %v2647_v44 = vsel %vm14501_vm2, %v2642_v55, %v2646_v51  ;;  %v3067_v51 = vrot.slane %v15288_v56, 5  ;;  %v11629_v1 = vcombine.low %v3061_v22, %v3064_v45  ;;  %v14156_v39 = vld [vmem:[%s18730_s1 + $0xc8] sm:$0xff]   ;;  %v11599_v15 = vld [vmem:[%s14466_s26 + $0x9c] sm:$0xe]  ;;  %v11601_v45 = vld [vmem:[%s14466_s26 + $0xb4] sm:$0xe] }
 0x155   : > { %v11566_v0 = vcombine.low %v2647_v44, %v2657_v9  ;;  %v11607_v17 = vrot.slane %v11591_v59, 9  ;;  %v3076_v49 = vrot.slane %v3074_v43, 4  ;;  %v3077_v56 = vrot.slane %v15383_v10, 5  ;;  %v11595_v9 = vld [vmem:[%s14466_s26 + $0x6c] sm:$0xe]  ;;  %v18880_v59 = vld [vmem:[#allocation7_spill] sm:$0xff] }
 0x156   : > { %v3069_v35 = vrot.slane %v3067_v51, 4  ;;  %v3068_v50 = vsel %vm14817_vm6, %v11606_v25, %v3067_v51  ;;  %v3088_v61 = vrot.slane %v15395_v24, 5  ;;  %v3091_v23 = vrot.slane %v15431_v19, 5  ;;  %v14160_v19 = vld [vmem:[%s18730_s1 + $0xe0] sm:$0xff]  }
 0x157   : > { %13013 = vmatmul.mubr.msk.bf16.gmra.mrb[20].mxu0 %vm831_vm3, %v11562_v2  ;;  %v11627_v2 = vcombine.low %v3047_v42, %v3050_v8  ;;  %v3075_v5 = vsel %vm14817_vm6, %v11607_v17, %v3074_v43  ;;  %v3078_v10 = vsel %vm14817_vm6, %v3076_v49, %v3077_v56  ;;  %v3102_v44 = vrot.slane %v15445_v27, 5  ;;  %v18884_v17 = vld [vmem:[#allocation10_spill] sm:$0xff]  ;;  %v18886_v56 = vld [vmem:[#allocation11_spill] sm:$0xff] }
 0x158   : > { %13016 = vmatprep.mubr.msk.bf16.mxu0 %vm831_vm3, %v11563_v33  ;;  %v11604_v33 = vrot.slane %v11588_v4, 9  ;;  %v3071_v11 = vsel %vm14817_vm6, %v3069_v35, %v3070_v60  ;;  %v11631_v55 = vcombine.low %v3075_v5, %v3078_v10  ;;  %v3090_v57 = vrot.slane %v3088_v61, 4  ;;  %v18883_v60 = vld [vmem:[#allocation9_spill] sm:$0xff]  ;;  %v14165_v10 = vld [vmem:[%s18730_s1 + $0xe8] sm:$0xff]  }
 0x159   : > { %v11611_v42 = vrot.slane %v11595_v9, 9  ;;  %v3104_v8 = vrot.slane %v3102_v44, 4  ;;  %v3105_v4 = vrot.slane %v15470_v6, 5  ;;  %v18876_v16 = vcombine.low %v15188_v28, %v15193_v32  ;;  %v14162_v5 = vld [vmem:[%s14466_s26 + $0x30] sm:$0xff]  }
 0x15a   : > { %v3054_v53 = vsel %vm14817_vm6, %v11604_v33, %v3053_v41  ;;  %v3092_v14 = vsel %vm14817_vm6, %v3090_v57, %v3091_v23  ;;  %v3119_v12 = vrot.slane %v15514_v63, 5  ;;  %v18877_v28 = vcombine.low %v15216_v31, %v15222_v20  ;;  %v18878_v31 = vld [vmem:[#allocation6_spill] sm:$0xff]  ;;  %v11836_v57 = vld [vmem:[%s14466_s26 + $0x54] sm:$0xe] }
 0x15b   : > { %v11628_v54 = vcombine.low %v3054_v53, %v3057_v47  ;;  %v3103_v27 = vsel %vm14817_vm6, %v11611_v42, %v3102_v44  ;;  %v3106_v37 = vsel %vm14817_vm6, %v3104_v8, %v3105_v4  ;;  %v3130_v62 = vrot.slane %v15523_v30, 5  ;;  %v15770_v4 = vld [vmem:[%s14466_s26 + $0x70] sm:$0xf] }
 0x15c   : > { %v11635_v33 = vcombine.low %v3103_v27, %v3106_v37  ;;  %v11615_v53 = vrot.slane %v11599_v15, 9  ;;  %v3133_v47 = vrot.slane %v15547_v46, 5  ;;  %v18879_v20 = vcombine.low %v15250_v38, %v18878_v31  ;;  %v11838_v27 = vld [vmem:[%s14466_s26 + $0x6c] sm:$0xe]  ;;  %v15802_v31 = vld [vmem:[%s14466_s26 + $0x8c] sm:$0x1] }
 0x15d   : > { %v3132_v63 = vrot.slane %v3130_v62, 4  ;;  %v3144_v22 = vrot.slane %v15555_v21, 5  ;;  %v11617_v36 = vrot.slane %v11601_v45, 9  ;;  %v3147_v38 = vrot.slane %v15576_v48, 5  ;;  %v14159_v48 = vld [vmem:[%s14466_s26 + $0x18] sm:$0xff]  }
 0x15e   : > { %v3131_v51 = vsel %vm14817_vm6, %v11615_v53, %v3130_v62  ;;  %v18885_v49 = vcombine.low %v18883_v60, %v18884_v17  ;;  %v4734_v37 = vrot.slane %v15770_v4, 5  ;;  %v11742_v45 = vld [vmem:[%s14466_s26 + $0x24] sm:$0xf]  ;;  %v11745_v17 = vld [vmem:[%s14466_s26 + $0x30] sm:$0xf] }
 0x15f   : > { %13017 = vmatmul.mubr.msk.bf16.gmra.mrb[24].mxu0 %vm831_vm3, %v11564_v7  ;;  %v11593_v7 = vld [vmem:[%s14466_s26 + $0x54] sm:$0xe]  ;;  %v3134_v30 = vsel %vm14817_vm6, %v3132_v63, %v3133_v47  ;;  %v3146_v43 = vrot.slane %v3144_v22, 4  ;;  %v3145_v25 = vsel %vm14817_vm6, %v11617_v36, %v3144_v22  ;;  %v15799_v47 = vld [vmem:[%s14466_s26 + $0x88] sm:$0xf]  ;;  %v3938_v60 = vshrl.u32 %v11742_v45, 16 }
 0x160   : > { %13020 = vmatprep.mubr.msk.bf16.mxu0 %vm831_vm3, %v11565_v26  ;;  %v11630_v26 = vcombine.low %v3068_v50, %v3071_v11  ;;  %v11609_v40 = vrot.slane %v11593_v7, 9  ;;  %v11639_v46 = vcombine.low %v3131_v51, %v3134_v30  ;;  %v14161_v11 = vld [vmem:[%s14466_s26 + $0x24] sm:$0xff]   ;;  %v4748_v51 = vrot.slane %v15799_v47, 5 }
 0x161   : > { %v3148_v21 = vsel %vm14817_vm6, %v3146_v43, %v3147_v38  ;;  %v14164_v7 = vld [vmem:[%s14466_s26 + $0x48] sm:$0xff]   ;;  %v4751_v30 = vrot.slane %v15802_v31, 5 }
 0x162   : > { %v3089_v24 = vsel %vm14817_vm6, %v11609_v40, %v3088_v61  ;;  %v11641_v35 = vcombine.low %v3145_v25, %v3148_v21  ;;  %v14170_v61 = vld [vmem:[%s18730_s1 + $0xf0] sm:$0xff]   ;;  %v15744_v40 = vld [vmem:[%s14466_s26 + $0x5c] sm:$0x1]  ;;  %v15816_v25 = vld [vmem:[%s14466_s26 + $0x20] sm:$0x1] }
 0x163   : > { %v11633_v41 = vcombine.low %v3089_v24, %v3092_v14  ;;  %v15753_v24 = vld [vmem:[%s18730_s1 + $0x100] sm:$0xff]   ;;  %v11852_v14 = vrot.slane %v11836_v57, 9 }
 0x164   : > { %v15842_v57 = vld [vmem:[%s14466_s26 + $0xa4] sm:$0x1] }
 0x167   : > { %13021 = vmatmul.mubr.msk.bf16.gmra.mrb[28].mxu0 %vm831_vm3, %v11566_v0  ;;  %v3116_v0 = vrot.slane %v15489_v18, 5 }
 0x168   : > { %13032 = vmatprep.mubr.msk.bf16.mxu0 %vm831_vm3, %v11627_v2  ;;  %v11597_v2 = vld [vmem:[%s14466_s26 + $0x84] sm:$0xe] }
 0x169   : > { %v11613_v6 = vrot.slane %v11597_v2, 9  ;;  %v3118_v52 = vrot.slane %v3116_v0, 4  ;;  %v11854_v2 = vrot.slane %v11838_v27, 9 }
 0x16b   : > { %v3117_v32 = vsel %vm14817_vm6, %v11613_v6, %v3116_v0  ;;  %v3120_v18 = vsel %vm14817_vm6, %v3118_v52, %v3119_v12  ;;  %v4736_v6 = vrot.slane %v4734_v37, 4  ;;  %v14168_v52 = vld [vmem:[%s14466_s26 + $0x6c] sm:$0xff]   ;;  %v15782_v12 = vld [vmem:[%s14466_s26 + $0x1c] sm:$0xf] }
 0x16c   : > { %v11637_v13 = vcombine.low %v3117_v32, %v3120_v18  ;;  %v14169_v32 = vld [vmem:[%s14466_s26 + $0x78] sm:$0xff]   ;;  %v3923_v53 = vshll.u32 %v15782_v12, 16  ;;  %v3927_v63 = vshrl.u32 %v15782_v12, 16 }
 0x16e   : > { %v15809_v43 = vrot.slane %v3923_v53, 5  ;;  %v3929_v38 = vrot.slane %v3927_v63, 4  ;;  %v14173_v53 = vld [vmem:[%s14466_s26 + $0x9c] sm:$0xff]  }
 0x16f   : > { %13033 = vmatmul.mubr.msk.bf16.vlgmr.msra.gmra.mrb[0].mxu0 %vm831_vm3, %v11628_v54  ;;  %v18881_v54 = vld [vmem:[#allocation8_spill] sm:$0xff] }
 0x170   : > { %13065 = vmatpush3.bf16.msra.mxu0 %v15508_v34  ;;  %13036 = vmatprep.mubr.msk.bf16.mxu0 %vm831_vm3, %v11629_v1  ;;  %v14157_v34 = vld [vmem:[%s18730_s1 + $0xd0] sm:$0xff]   ;;  %v18882_v1 = vcombine.low %v18880_v59, %v18881_v54  ;;  %v15812_v59 = vld [vmem:[%s14466_s26 + $0x28] sm:$0xf]  ;;  %v4750_v54 = vrot.slane %v4748_v51, 4 }
 0x171   : > { %13066 = vmatprep.subr.bf16.mxu0 %v14156_v39 }
 0x174   : > { %13067 = vmatpush3.bf16.msra.mxu0 %v14156_v39  ;;  %v18887_v39 = vld [vmem:[#allocation12_spill] sm:$0xff] }
 0x175   : > { %13068 = vmatprep.subr.bf16.mxu0 %v14157_v34  ;;  %v18888_v50 = vcombine.low %v18886_v56, %v18887_v39  ;;  %v3947_v56 = vshll.u32 %v15812_v59, 16  ;;  %v15830_v39 = vld [vmem:[%s14466_s26 + $0x34] sm:$0xf] }
 0x177   : > { %13037 = vmatmul.mubr.msk.bf16.gmra.mrb[4].mxu0 %vm831_vm3, %v11630_v26  ;;  %v14175_v26 = vld [vmem:[%s18730_s1 + $0xf8] sm:$0xff]  }
 0x178   : > { %13040 = vmatprep.mubr.msk.bf16.mxu0 %vm831_vm3, %v11631_v55  ;;  %13069 = vmatpush3.bf16.msra.mxu0 %v14157_v34  ;;  %v14163_v34 = vld [vmem:[%s14466_s26 + $0x3c] sm:$0xff]   ;;  %v15741_v55 = vld [vmem:[%s14466_s26 + $0x58] sm:$0xf] }
 0x179   : > { %13070 = vmatprep.subr.bf16.mxu0 %v14158_v58  ;;  %v4720_v23 = vrot.slane %v15741_v55, 5 }
 0x17b   : > { %v4722_v44 = vrot.slane %v4720_v23, 4  ;;  %v15758_v9 = vsel %vm14817_vm6, %v11852_v14, %v4720_v23  ;;  %v3940_v23 = vrot.slane %v3938_v60, 4  ;;  %v11842_v14 = vld [vmem:[%s14466_s26 + $0x9c] sm:$0xe] }
 0x17c   : > { %13071 = vmatpush3.bf16.msra.mxu0 %v14158_v58  ;;  %v4723_v58 = vrot.slane %v15744_v40, 5 }
 0x17d   : > { %13104 = vmatprep.subr.bf16.mxu0 %v14160_v19 }
 0x17e   : > { %v15763_v42 = vsel %vm14817_vm6, %v4722_v44, %v4723_v58  ;;  %v3971_v58 = vshll.u32 %v15830_v39, 16 }
 0x17f   : > { %13041 = vmatmul.mubr.msk.bf16.gmra.mrb[8].mxu0 %vm831_vm3, %v18876_v16  ;;  %v15773_v16 = vld [vmem:[%s14466_s26 + $0x74] sm:$0x1] }
 0x180   : > { %13044 = vmatprep.mubr.msk.bf16.mxu0 %vm831_vm3, %v11633_v41  ;;  %v14167_v41 = vld [vmem:[%s14466_s26 + $0x60] sm:$0xff]   ;;  %v4737_v0 = vrot.slane %v15773_v16, 5 }
 0x182   : > { %v15791_v18 = vsel %vm14817_vm6, %v4736_v6, %v4737_v0  ;;  %v3975_v0 = vshrl.u32 %v15830_v39, 16 }
 0x187   : > { %13045 = vmatmul.mubr.msk.bf16.gmra.mrb[12].mxu0 %vm831_vm3, %v18877_v28  ;;  %v15786_v28 = vsel %vm14817_vm6, %v11854_v2, %v4734_v37  ;;  %v15852_v37 = vrot.slane %v3947_v56, 5  ;;  %v11748_v2 = vld [vmem:[%s14466_s26 + $0x3c] sm:$0xf] }
 0x188   : > { %13048 = vmatprep.mubr.msk.bf16.mxu0 %vm831_vm3, %v11635_v33  ;;  %v11739_v33 = vld [vmem:[%s14466_s26 + $0x18] sm:$0xf] }
 0x189   : > { %v3914_v62 = vshrl.u32 %v11739_v33, 16 }
 0x18b   : > { %v3916_v22 = vrot.slane %v3914_v62, 4  ;;  %v15857_v62 = vld [vmem:[%s14466_s26 + $0x40] sm:$0xf] }
 0x18c   : > { %v3999_v60 = vshrl.u32 %v15857_v62, 16 }
 0x18f   : > { %13049 = vmatmul.mubr.msk.bf16.gmra.mrb[16].mxu0 %vm831_vm3, %v18879_v20  ;;  %v11840_v20 = vld [vmem:[%s14466_s26 + $0x84] sm:$0xe] }
 0x190   : > { %13052 = vmatprep.mubr.msk.bf16.mxu0 %vm831_vm3, %v11637_v13  ;;  %v3917_v13 = vshll.u32 %v11739_v33, 16  ;;  %v11858_v33 = vrot.slane %v11842_v14, 9 }
 0x192   : > { %v3919_v36 = vrot.slane %v3917_v13, 5 }
 0x197   : > { %13053 = vmatmul.mubr.msk.bf16.gmra.mrb[20].mxu0 %vm831_vm3, %v18882_v1  ;;  %v14171_v1 = vld [vmem:[%s14466_s26 + $0x84] sm:$0xff]  }
 0x198   : > { %13056 = vmatprep.mubr.msk.bf16.mxu0 %vm831_vm3, %v11639_v46  ;;  %v11856_v46 = vrot.slane %v11840_v20, 9  ;;  %v15861_v20 = vld [vmem:[%s14466_s26 + $0x38] sm:$0x1] }
 0x19a   : > { %v15820_v21 = vsel %vm14817_vm6, %v11856_v46, %v4748_v51  ;;  %v15868_v46 = vrot.slane %v3971_v58, 5  ;;  %v15894_v58 = vld [vmem:[%s14466_s26 + $0xbc] sm:$0x1] }
 0x19b   : > { %18889 = vst [vmem:[#allocation6_spill] sm:$0xff] %v15820_v21 }
 0x19f   : > { %13057 = vmatmul.mubr.msk.bf16.gmra.mrb[24].mxu0 %vm831_vm3, %v18885_v49  ;;  %v15826_v49 = vsel %vm14817_vm6, %v4750_v54, %v4751_v30 }
 0x1a0   : > { %13060 = vmatprep.mubr.msk.bf16.mxu0 %vm831_vm3, %v11641_v35  ;;  %v14172_v35 = vld [vmem:[%s14466_s26 + $0x90] sm:$0xff]   ;;  %18890 = vst [vmem:[#allocation7_spill] sm:$0xff] %v15826_v49 }
 0x1a7   : > { %13061 = vmatmul.mubr.msk.bf16.gmra.mrb[28].mxu0 %vm831_vm3, %v18888_v50 }
 0x1a8   : > { %13072 = vmatprep.mubr.msk.bf16.mxu0 %vm831_vm3, %v14159_v48  ;;  %v3941_v48 = vshll.u32 %v11742_v45, 16  ;;  %v14174_v45 = vld [vmem:[%s14466_s26 + $0xa8] sm:$0xff]  }
 0x1aa   : > { %v3943_v27 = vrot.slane %v3941_v48, 5 }
 0x1ac   : > { %v3944_v48 = vor.u32 %v3943_v27, %v3940_v23  ;;  %v15891_v23 = vld [vmem:[%s14466_s26 + $0xb8] sm:$0xf]  ;;  %v4779_v27 = vrot.slane %v15894_v58, 5 }
 0x1af   : > { %13073 = vmatmul.mubr.msk.bf16.vlgmr.msra.gmra.mrb[0].mxu0 %vm831_vm3, %v14161_v11  ;;  %v3920_v11 = vor.u32 %v3919_v36, %v3916_v22  ;;  %v3986_v36 = vshrl.u32 %v11748_v2, 16 }
 0x1b0   : > { %13105 = vmatpush3.bf16.msra.mxu0 %v14160_v19  ;;  %13076 = vmatprep.mubr.msk.bf16.mxu0 %vm831_vm3, %v14162_v5  ;;  %v14166_v19 = vld [vmem:[%s14466_s26 + $0x54] sm:$0xff]   ;;  %v3930_v5 = vor.u32 %v3929_v38, %v15809_v43  ;;  %v3989_v38 = vshll.u32 %v11748_v2, 16 }
 0x1b1   : > { %13106 = vmatprep.subr.bf16.mxu0 %v14165_v10  ;;  %v3921_v6 = vrot.slane %v3920_v11, 4  ;;  %v3981_v11 = vshll.u32 %v15861_v20, 16  ;;  %v3988_v14 = vrot.slane %v3986_v36, 4  ;;  %v15915_v36 = vld [vmem:[%s14466_s26 + $0x4c] sm:$0xf] }
 0x1b4   : > { %13107 = vmatpush3.bf16.msra.mxu0 %v14165_v10  ;;  %v3933_v10 = vshll.u32 %v15816_v25, 16 }
 0x1b5   : > { %13108 = vmatprep.subr.bf16.mxu0 %v14170_v61 }
 0x1b6   : > { %v3935_v63 = vrot.slane %v3933_v10, 5 }
 0x1b7   : > { %13077 = vmatmul.mubr.msk.bf16.gmra.mrb[4].mxu0 %vm831_vm3, %v14163_v34  ;;  %v3962_v34 = vshrl.u32 %v11745_v17, 16 }
 0x1b8   : > { %13080 = vmatprep.mubr.msk.bf16.mxu0 %vm831_vm3, %v14164_v7  ;;  %13109 = vmatpush3.bf16.msra.mxu0 %v14170_v61  ;;  %v3951_v61 = vshrl.u32 %v15812_v59, 16  ;;  %v3965_v7 = vshll.u32 %v11745_v17, 16 }
 0x1b9   : > { %13110 = vmatprep.subr.bf16.mxu0 %v14175_v26  ;;  %v3964_v51 = vrot.slane %v3962_v34, 4 }
 0x1ba   : > { %v3967_v30 = vrot.slane %v3965_v7, 5  ;;  %v15888_v7 = vld [vmem:[%s14466_s26 + $0x44] sm:$0x1] }
 0x1bc   : > { %13111 = vmatpush3.bf16.msra.mxu0 %v14175_v26  ;;  %v15839_v26 = vld [vmem:[%s14466_s26 + $0xa0] sm:$0xf]  ;;  %v3968_v34 = vor.u32 %v3967_v30, %v3964_v51 }
 0x1bd   : > { %13144 = vmatprep.subr.bf16.mxu0 %v15753_v24  ;;  %v4762_v44 = vrot.slane %v15839_v26, 5 }
 0x1be   : > { %v15911_v30 = vrot.slane %v3968_v34, 4 }
 0x1bf   : > { %13081 = vmatmul.mubr.msk.bf16.gmra.mrb[8].mxu0 %vm831_vm3, %v14166_v19  ;;  %v4765_v19 = vrot.slane %v15842_v57, 5  ;;  %v4764_v13 = vrot.slane %v4762_v44, 4  ;;  %v15865_v22 = vsel %vm14817_vm6, %v11858_v33, %v4762_v44  ;;  %v3991_v44 = vrot.slane %v3989_v38, 5 }
 0x1c0   : > { %13084 = vmatprep.mubr.msk.bf16.mxu0 %vm831_vm3, %v14167_v41  ;;  %v15850_v41 = vld [vmem:[%s14466_s26 + $0x2c] sm:$0x1]  ;;  %18891 = vst [vmem:[#allocation8_spill] sm:$0xff] %v15865_v22  ;;  %v4001_v33 = vrot.slane %v3999_v60, 4  ;;  %v15922_v60 = vrot.slane %v3981_v11, 5 }
 0x1c1   : > { %v15872_v54 = vsel %vm14817_vm6, %v4764_v13, %v4765_v19  ;;  %v3957_v56 = vshll.u32 %v15850_v41, 16  ;;  %v4776_v19 = vrot.slane %v15891_v23, 5  ;;  %v11751_v13 = vld [vmem:[%s14466_s26 + $0x48] sm:$0xf]  ;;  %v15983_v22 = vld [vmem:[%s14466_s26 + $0x50] sm:$0x1] }
 0x1c2   : > { %18892 = vst [vmem:[#allocation9_spill] sm:$0xff] %v15872_v54  ;;  %v4010_v17 = vshrl.u32 %v11751_v13, 16  ;;  %v14178_v54 = vld [vmem:[%s14466_s26 + $0xcc] sm:$0xff]  }
 0x1c7   : > { %13085 = vmatmul.mubr.msk.bf16.gmra.mrb[12].mxu0 %vm831_vm3, %v14168_v52  ;;  %v3931_v52 = vrot.slane %v3930_v5, 4  ;;  %v3926_v5 = vsel %vm14501_vm2, %v3921_v6, %v15809_v43  ;;  %v11844_v43 = vld [vmem:[%s14466_s26 + $0xb4] sm:$0xe] }
 0x1c8   : > { %13088 = vmatprep.mubr.msk.bf16.mxu0 %vm831_vm3, %v14169_v32  ;;  %v3953_v32 = vrot.slane %v3951_v61, 4  ;;  %v11860_v6 = vrot.slane %v11844_v43, 9 }
 0x1c9   : > { %v3936_v10 = vsel %vm14501_vm2, %v3931_v52, %v3935_v63  ;;  %v15903_v52 = vrot.slane %v3944_v48, 4  ;;  %v14176_v63 = vld [vmem:[%s14466_s26 + $0xb4] sm:$0xff]   ;;  %v3992_v48 = vor.u32 %v3991_v44, %v3988_v14  ;;  %v4023_v14 = vshrl.u32 %v15915_v36, 16 }
 0x1ca   : > { %v3954_v61 = vor.u32 %v3953_v32, %v15852_v37  ;;  %v15905_v32 = vrot.slane %v3957_v56, 5  ;;  %v15919_v38 = vsel %vm14817_vm6, %v11860_v6, %v4776_v19  ;;  %v11754_v56 = vld [vmem:[%s14466_s26 + $0x54] sm:$0xf]  ;;  %v15952_v6 = vld [vmem:[%s14466_s26 + $0xd0] sm:$0xf] }
 0x1cb   : > { %18893 = vst [vmem:[#allocation10_spill] sm:$0xff] %v15919_v38  ;;  %v4790_v50 = vrot.slane %v15952_v6, 5 }
 0x1cc   : > { %v15909_v51 = vrot.slane %v3954_v61, 4 }
 0x1cd   : > { %v4792_v38 = vrot.slane %v4790_v50, 4 }
 0x1cf   : > { %13089 = vmatmul.mubr.msk.bf16.gmra.mrb[16].mxu0 %vm831_vm3, %v14171_v1  ;;  %v3977_v1 = vrot.slane %v3975_v0, 4 }
 0x1d0   : > { %13092 = vmatprep.mubr.msk.bf16.mxu0 %vm831_vm3, %v14172_v35  ;;  %v3995_v35 = vshll.u32 %v15857_v62, 16 }
 0x1d1   : > { %v3978_v0 = vor.u32 %v3977_v1, %v15868_v46  ;;  %v14177_v1 = vld [vmem:[%s14466_s26 + $0xc0] sm:$0xff]  }
 0x1d2   : > { %v15901_v2 = vrot.slane %v3995_v35, 5  ;;  %v11795_v35 = vcombine.low %v3926_v5, %v3936_v10  ;;  %v4013_v5 = vshll.u32 %v11751_v13, 16  ;;  %v4019_v10 = vshll.u32 %v15915_v36, 16  ;;  %v15955_v13 = vld [vmem:[%s14466_s26 + $0xd4] sm:$0x1] }
 0x1d3   : > { %v15929_v34 = vrot.slane %v3978_v0, 4  ;;  %v4793_v15 = vrot.slane %v15955_v13, 5 }
 0x1d4   : > { %v4002_v43 = vor.u32 %v4001_v33, %v15901_v2  ;;  %v4034_v33 = vshrl.u32 %v11754_v56, 16  ;;  %v15974_v44 = vrot.slane %v4019_v10, 5 }
 0x1d6   : > { %v15967_v8 = vrot.slane %v4002_v43, 4  ;;  %v15985_v49 = vrot.slane %v4034_v33, 4  ;;  %v4047_v43 = vshrl.u32 %v15741_v55, 16 }
 0x1d7   : > { %13093 = vmatmul.mubr.msk.bf16.gmra.mrb[20].mxu0 %vm831_vm3, %v14173_v53  ;;  %v4778_v53 = vrot.slane %v4776_v19, 4  ;;  %v11846_v19 = vld [vmem:[%s14466_s26 + $0xcc] sm:$0xe] }
 0x1d8   : > { %13096 = vmatprep.mubr.msk.bf16.mxu0 %vm831_vm3, %v14174_v45  ;;  %v4005_v45 = vshll.u32 %v15888_v7, 16  ;;  %v11862_v11 = vrot.slane %v11846_v19, 9 }
 0x1d9   : > { %v15927_v61 = vsel %vm14817_vm6, %v4778_v53, %v4779_v27  ;;  %v15958_v53 = vrot.slane %v3992_v48, 4  ;;  %v15969_v27 = vrot.slane %v4010_v17, 4  ;;  %v15972_v48 = vrot.slane %v4013_v5, 5 }
 0x1da   : > { %18894 = vst [vmem:[#allocation11_spill] sm:$0xff] %v15927_v61  ;;  %v15949_v0 = vrot.slane %v4005_v45, 5  ;;  %v15979_v61 = vld [vmem:[%s14466_s26 + $0x64] sm:$0xf]  ;;  %v4043_v17 = vshll.u32 %v15741_v55, 16  ;;  %v15991_v19 = vsel %vm14817_vm6, %v11862_v11, %v4790_v50  ;;  %v15997_v45 = vsel %vm14817_vm6, %v4792_v38, %v4793_v15 }
 0x1db   : > { %18895 = vst [vmem:[#allocation12_spill] sm:$0xff] %v15997_v45  ;;  %v4067_v21 = vshll.u32 %v15979_v61, 16  ;;  %v4071_v55 = vshrl.u32 %v15979_v61, 16  ;;  %v4016_v15 = vor.u32 %v15972_v48, %v15969_v27  ;;  %v4053_v50 = vshll.u32 %v15744_v40, 16 }
 0x1dc   : > { %v4008_v11 = vsel %vm14501_vm2, %v15967_v8, %v15949_v0  ;;  %v16020_v33 = vrot.slane %v4043_v17, 5  ;;  %v16026_v27 = vrot.slane %v4047_v43, 4  ;;  %v18896_v17 = vsel %vm14501_vm2, %v15909_v51, %v15905_v32 }
 0x1dd   : > { %v16104_v40 = vrot.slane %v4067_v21, 5  ;;  %v18897_v43 = vsel %vm14501_vm2, %v15903_v52, %v15852_v37  ;;  %v16119_v21 = vld [vmem:[%s14466_s26 + $0x68] sm:$0x1]  ;;  %v18899_v32 = vsel %vm14501_vm2, %v15911_v30, %v15868_v46  ;;  %v18900_v37 = vsel %vm14501_vm2, %v15958_v53, %v15901_v2 }
 0x1de   : > { %v11798_v52 = vcombine.low %v18900_v37, %v4008_v11  ;;  %v16146_v46 = vrot.slane %v4053_v50, 5  ;;  %v14180_v2 = vld [vmem:[%s18730_s1 + $0x108] sm:$0xff]   ;;  %v4101_v37 = vshll.u32 %v15773_v16, 16 }
 0x1df   : > { %13097 = vmatmul.mubr.msk.bf16.gmra.mrb[24].mxu0 %vm831_vm3, %v14176_v63  ;;  %v4037_v63 = vshll.u32 %v11754_v56, 16  ;;  %v15976_v56 = vrot.slane %v4023_v14, 4 }
 0x1e0   : > { %13100 = vmatprep.mubr.msk.bf16.mxu0 %vm831_vm3, %v14177_v1  ;;  %v11757_v1 = vld [vmem:[%s14466_s26 + $0x60] sm:$0xf] }
 0x1e1   : > { %v15993_v5 = vrot.slane %v4037_v63, 5  ;;  %v4058_v10 = vshrl.u32 %v11757_v1, 16  ;;  %v4061_v14 = vshll.u32 %v11757_v1, 16  ;;  %v4026_v38 = vor.u32 %v15976_v56, %v15974_v44  ;;  %v16017_v1 = vld [vmem:[%s14466_s26 + $0x6c] sm:$0xf] }
 0x1e2   : > { %v4029_v63 = vshll.u32 %v15983_v22, 16  ;;  %v18756_v56 = vmov 0  }
 0x1e3   : > { %v4040_v8 = vor.u32 %v15993_v5, %v15985_v49  ;;  %v16028_v0 = vrot.slane %v4058_v10, 4  ;;  %v16030_v48 = vrot.slane %v4061_v14, 5  ;;  %259 = vst.msk [vmem:[#allocation2 + $0x18] sm:$0xf] %vm251_vm7, %v18756_v56  ;;  %252 = vst.msk [vmem:[#allocation2] sm:$0xf] %vm251_vm7, %v18756_v56  ;;  %v11796_v5 = vcombine.low %v18897_v43, %v18896_v17 }
 0x1e4   : > { %253 = vst.msk [vmem:[#allocation2 + $0x4] sm:$0xf] %vm251_vm7, %v18756_v56  ;;  %256 = vst.msk [vmem:[#allocation2 + $0xc] sm:$0xf] %vm251_vm7, %v18756_v56  ;;  %v4073_v49 = vrot.slane %v4071_v55, 4  ;;  %v4017_v10 = vrot.slane %v4016_v15, 4 }
 0x1e5   : > { %257 = vst.msk [vmem:[#allocation2 + $0x10] sm:$0xf] %vm251_vm7, %v18756_v56  ;;  %260 = vst.msk [vmem:[#allocation2 + $0x1c] sm:$0xf] %vm251_vm7, %v18756_v56  ;;  %v4031_v14 = vrot.slane %v4029_v63, 5  ;;  %v4091_v55 = vshll.u32 %v15770_v4, 16  ;;  %v4064_v30 = vor.u32 %v16030_v48, %v16028_v0 }
 0x1e6   : > { %262 = vst.msk [vmem:[#allocation2 + $0x24] sm:$0xf] %vm251_vm7, %v18756_v56  ;;  %263 = vst.msk [vmem:[#allocation2 + $0x28] sm:$0xf] %vm251_vm7, %v18756_v56  ;;  %v4027_v15 = vrot.slane %v4026_v38, 4  ;;  %v4095_v63 = vshrl.u32 %v15770_v4, 16  ;;  %v4074_v53 = vor.u32 %v4073_v49, %v16104_v40  ;;  %v4022_v0 = vsel %vm14501_vm2, %v4017_v10, %v15974_v44 }
 0x1e7   : > { %13101 = vmatmul.mubr.msk.bf16.gmra.mrb[28].mxu0 %vm831_vm3, %v14178_v54  ;;  %265 = vst.msk [vmem:[#allocation2 + $0x30] sm:$0xf] %vm251_vm7, %v18756_v56  ;;  %266 = vst.msk [vmem:[#allocation2 + $0x34] sm:$0xf] %vm251_vm7, %v18756_v56  ;;  %v4082_v54 = vshrl.u32 %v16017_v1, 16  ;;  %v4077_v4 = vshll.u32 %v16119_v21, 16 }
 0x1e8   : > { %13112 = vmatprep.mubr.msk.bf16.mxu0 %vm831_vm3, %v11795_v35  ;;  %268 = vst.msk [vmem:[#allocation2 + $0x3c] sm:$0xf] %vm251_vm7, %v18756_v56  ;;  %269 = vst.msk [vmem:[#allocation2 + $0x40] sm:$0xf] %vm251_vm7, %v18756_v56  ;;  %v4085_v35 = vshll.u32 %v16017_v1, 16  ;;  %v18898_v1 = vsel %vm14501_vm2, %v15929_v34, %v15922_v60  ;;  %v16142_v60 = vrot.slane %v4040_v8, 4  ;;  %v4050_v34 = vor.u32 %v16026_v27, %v16020_v33 }
 0x1e9   : > { %271 = vst.msk [vmem:[#allocation2 + $0x48] sm:$0xf] %vm251_vm7, %v18756_v56  ;;  %272 = vst.msk [vmem:[#allocation2 + $0x4c] sm:$0xf] %vm251_vm7, %v18756_v56  ;;  %v11797_v51 = vcombine.low %v18899_v32, %v18898_v1  ;;  %v11763_v17 = vld [vmem:[%s14466_s26 + $0x78] sm:$0xf]  ;;  %v4032_v48 = vsel %vm14501_vm2, %v4027_v15, %v4031_v14 }
 0x1ea   : > { %274 = vst.msk [vmem:[#allocation2 + $0x54] sm:$0xf] %vm251_vm7, %v18756_v56  ;;  %275 = vst.msk [vmem:[#allocation2 + $0x58] sm:$0xf] %vm251_vm7, %v18756_v56  ;;  %v16140_v43 = vld [vmem:[%s14466_s26 + $0x7c] sm:$0xf] }
 0x1eb   : > { %277 = vst.msk [vmem:[#allocation2 + $0x60] sm:$0xf] %vm251_vm7, %v18756_v56  ;;  %278 = vst.msk [vmem:[#allocation2 + $0x64] sm:$0xf] %vm251_vm7, %v18756_v56  ;;  %v4084_v11 = vrot.slane %v4082_v54, 4  ;;  %v4087_v38 = vrot.slane %v4085_v35, 5 }
 0x1ec   : > { %280 = vst.msk [vmem:[#allocation2 + $0x6c] sm:$0xf] %vm251_vm7, %v18756_v56  ;;  %281 = vst.msk [vmem:[#allocation2 + $0x70] sm:$0xf] %vm251_vm7, %v18756_v56  ;;  %v11766_v8 = vld [vmem:[%s14466_s26 + $0x84] sm:$0xf] }
 0x1ed   : > { %283 = vst.msk [vmem:[#allocation2 + $0x78] sm:$0xf] %vm251_vm7, %v18756_v56  ;;  %284 = vst.msk [vmem:[#allocation2 + $0x7c] sm:$0xf] %vm251_vm7, %v18756_v56  ;;  %v16156_v1 = vrot.slane %v4091_v55, 5  ;;  %v4106_v32 = vshrl.u32 %v11763_v17, 16 }
 0x1ee   : > { %286 = vst.msk [vmem:[#allocation2 + $0x84] sm:$0xf] %vm251_vm7, %v18756_v56  ;;  %287 = vst.msk [vmem:[#allocation2 + $0x88] sm:$0xf] %vm251_vm7, %v18756_v56  ;;  %v4109_v27 = vshll.u32 %v11763_v17, 16  ;;  %v4115_v50 = vshll.u32 %v16140_v43, 16 }
 0x1ef   : > { %289 = vst.msk [vmem:[#allocation2 + $0x90] sm:$0xf] %vm251_vm7, %v18756_v56  ;;  %290 = vst.msk [vmem:[#allocation2 + $0x94] sm:$0xf] %vm251_vm7, %v18756_v56  ;;  %13113 = vmatmul.mubr.msk.bf16.vlgmr.msra.gmra.mrb[0].mxu0 %vm831_vm3, %v11796_v5  ;;  %v4097_v49 = vrot.slane %v4095_v63, 4  ;;  %v4119_v54 = vshrl.u32 %v16140_v43, 16 }
 0x1f0   : > { %292 = vst.msk [vmem:[#allocation2 + $0x9c] sm:$0xf] %vm251_vm7, %v18756_v56  ;;  %293 = vst.msk [vmem:[#allocation2 + $0xa0] sm:$0xf] %vm251_vm7, %v18756_v56  ;;  %13145 = vmatpush3.bf16.msra.mxu0 %v15753_v24  ;;  %13116 = vmatprep.mubr.msk.bf16.mxu0 %vm831_vm3, %v11797_v51  ;;  %v4051_v35 = vrot.slane %v4050_v34, 4  ;;  %v4065_v55 = vrot.slane %v4064_v30, 4  ;;  %v4088_v51 = vor.u32 %v4087_v38, %v4084_v11 }
 0x1f1   : > { %295 = vst.msk [vmem:[#allocation2 + $0xa8] sm:$0xf] %vm251_vm7, %v18756_v56  ;;  %296 = vst.msk [vmem:[#allocation2 + $0xac] sm:$0xf] %vm251_vm7, %v18756_v56  ;;  %v4130_v5 = vshrl.u32 %v11766_v8, 16  ;;  %13146 = vmatprep.subr.bf16.mxu0 %v14180_v2  ;;  %v4079_v17 = vrot.slane %v4077_v4, 5  ;;  %v11799_v30 = vcombine.low %v4022_v0, %v4032_v48  ;;  %v4098_v16 = vor.u32 %v4097_v49, %v16156_v1 }
 0x1f2   : > { %298 = vst.msk [vmem:[#allocation2 + $0xb4] sm:$0xf] %vm251_vm7, %v18756_v56  ;;  %299 = vst.msk [vmem:[#allocation2 + $0xb8] sm:$0xf] %vm251_vm7, %v18756_v56  ;;  %v14181_v44 = vld [vmem:[%s18730_s1 + $0x110] sm:$0xff]   ;;  %v4133_v10 = vshll.u32 %v11766_v8, 16  ;;  %v4046_v8 = vsel %vm14501_vm2, %v16142_v60, %v16020_v33 }
 0x1f3   : > { %301 = vst.msk [vmem:[#allocation2 + $0xc0] sm:$0xf] %vm251_vm7, %v18756_v56  ;;  %302 = vst.msk [vmem:[#allocation2 + $0xc4] sm:$0xf] %vm251_vm7, %v18756_v56  ;;  %v4139_v14 = vshll.u32 %v15799_v47, 16  ;;  %v4143_v24 = vshrl.u32 %v15799_v47, 16  ;;  %v4056_v47 = vsel %vm14501_vm2, %v4051_v35, %v16146_v46 }
 0x1f4   : > { %304 = vst.msk [vmem:[#allocation2 + $0xcc] sm:$0xf] %vm251_vm7, %v18756_v56  ;;  %305 = vst.msk [vmem:[#allocation2 + $0xd0] sm:$0xf] %vm251_vm7, %v18756_v56  ;;  %v4075_v15 = vrot.slane %v4074_v53, 4  ;;  %v4108_v63 = vrot.slane %v4106_v32, 4  ;;  %13147 = vmatpush3.bf16.msra.mxu0 %v14180_v2  ;;  %v4070_v32 = vsel %vm14501_vm2, %v4065_v55, %v16104_v40 }
 0x1f5   : > { %v4111_v34 = vrot.slane %v4109_v27, 5  ;;  %v16176_v56 = vld [vmem:[%s14466_s26 + $0x80] sm:$0x1]  ;;  %v16178_v4 = vrot.slane %v4115_v50, 5  ;;  %v4121_v45 = vrot.slane %v4119_v54, 4  ;;  %v16187_v53 = vrot.slane %v4101_v37, 5  ;;  %13148 = vmatprep.subr.bf16.mxu0 %v14181_v44 }
 0x1f6   : > { %v4132_v11 = vrot.slane %v4130_v5, 4  ;;  %v11769_v38 = vld [vmem:[%s14466_s26 + $0x90] sm:$0xf]  ;;  %v4135_v27 = vrot.slane %v4133_v10, 5  ;;  %v16193_v50 = vrot.slane %v4139_v14, 5  ;;  %v4145_v0 = vrot.slane %v4143_v24, 4 }
 0x1f7   : > { %v16196_v48 = vld [vmem:[%s14466_s26 + $0x94] sm:$0xf]  ;;  %v14182_v33 = vld [vmem:[%s18730_s1 + $0x118] sm:$0xff]   ;;  %v4080_v60 = vsel %vm14501_vm2, %v4075_v15, %v4079_v17  ;;  %v4089_v46 = vrot.slane %v4088_v51, 4  ;;  %v4112_v2 = vor.u32 %v4111_v34, %v4108_v63  ;;  %v4125_v49 = vshll.u32 %v16176_v56, 16  ;;  %13117 = vmatmul.mubr.msk.bf16.gmra.mrb[4].mxu0 %vm831_vm3, %v11798_v52 }
 0x1f8   : > { %v4099_v40 = vrot.slane %v4098_v16, 4  ;;  %v4122_v54 = vor.u32 %v4121_v45, %v16178_v4  ;;  %v4154_v35 = vshrl.u32 %v11769_v38, 16  ;;  %v4157_v55 = vshll.u32 %v11769_v38, 16  ;;  %13120 = vmatprep.mubr.msk.bf16.mxu0 %vm831_vm3, %v11799_v30  ;;  %13149 = vmatpush3.bf16.msra.mxu0 %v14181_v44  ;;  %v11772_v24 = vld [vmem:[%s14466_s26 + $0x9c] sm:$0xf] }
 0x1f9   : > { %v4163_v37 = vshll.u32 %v16196_v48, 16  ;;  %v4167_v5 = vshrl.u32 %v16196_v48, 16  ;;  %v11800_v17 = vcombine.low %v4046_v8, %v4056_v47  ;;  %v4136_v10 = vor.u32 %v4135_v27, %v4132_v11  ;;  %13150 = vmatprep.subr.bf16.mxu0 %v14182_v33  ;;  %v16216_v63 = vld [vmem:[%s14466_s26 + $0x98] sm:$0x1]  ;;  %v16225_v27 = vld [vmem:[%s14466_s26 + $0xac] sm:$0xf] }
 0x1fa   : > { %v4146_v14 = vor.u32 %v4145_v0, %v16193_v50  ;;  %v4149_v52 = vshll.u32 %v15802_v31, 16  ;;  %v11801_v45 = vcombine.low %v4070_v32, %v4080_v60  ;;  %v4094_v15 = vsel %vm14501_vm2, %v4089_v46, %v16156_v1  ;;  %v11775_v31 = vld [vmem:[%s14466_s26 + $0xa8] sm:$0xf] }
 0x1fb   : > { %v4113_v44 = vrot.slane %v4112_v2, 4  ;;  %v4127_v51 = vrot.slane %v4125_v49, 5  ;;  %v4104_v34 = vsel %vm14501_vm2, %v4099_v40, %v16187_v53  ;;  %v4123_v30 = vrot.slane %v4122_v54, 4 }
 0x1fc   : > { %v4156_v16 = vrot.slane %v4154_v35, 4  ;;  %v4159_v8 = vrot.slane %v4157_v55, 5  ;;  %v16222_v47 = vrot.slane %v4163_v37, 5  ;;  %v4169_v11 = vrot.slane %v4167_v5, 4  ;;  %13151 = vmatpush3.bf16.msra.mxu0 %v14182_v33 }
 0x1fd   : > { %v4178_v38 = vshrl.u32 %v11772_v24, 16  ;;  %v4181_v32 = vshll.u32 %v11772_v24, 16  ;;  %v4137_v1 = vrot.slane %v4136_v10, 4  ;;  %v4147_v0 = vrot.slane %v4146_v14, 4 }
 0x1fe   : > { %v4151_v60 = vrot.slane %v4149_v52, 5  ;;  %v4173_v46 = vshll.u32 %v16216_v63, 16  ;;  %v4187_v2 = vshll.u32 %v15839_v26, 16  ;;  %v4191_v53 = vshrl.u32 %v15839_v26, 16 }
 0x1ff   : > { %v4202_v49 = vshrl.u32 %v11775_v31, 16  ;;  %v4205_v40 = vshll.u32 %v11775_v31, 16  ;;  %13121 = vmatmul.mubr.msk.bf16.gmra.mrb[8].mxu0 %vm831_vm3, %v11800_v17  ;;  %v4118_v54 = vsel %vm14501_vm2, %v4113_v44, %v16178_v4  ;;  %v4128_v33 = vsel %vm14501_vm2, %v4123_v30, %v4127_v51 }
 0x200   : > { %v4211_v35 = vshll.u32 %v16225_v27, 16  ;;  %v4215_v55 = vshrl.u32 %v16225_v27, 16  ;;  %13124 = vmatprep.mubr.msk.bf16.mxu0 %vm831_vm3, %v11801_v45  ;;  %v4160_v37 = vor.u32 %v4159_v8, %v4156_v16  ;;  %v4170_v26 = vor.u32 %v4169_v11, %v16222_v47  ;;  %v16248_v16 = vld [vmem:[%s14466_s26 + $0xb0] sm:$0x1]  ;;  %v11778_v11 = vld [vmem:[%s14466_s26 + $0xb4] sm:$0xf] }
 0x201   : > { %v4180_v5 = vrot.slane %v4178_v38, 4  ;;  %v4183_v17 = vrot.slane %v4181_v32, 5  ;;  %v4142_v4 = vsel %vm14501_vm2, %v4137_v1, %v16193_v50  ;;  %v4152_v10 = vsel %vm14501_vm2, %v4147_v0, %v4151_v60 }
 0x202   : > { %v4175_v14 = vrot.slane %v4173_v46, 5  ;;  %v16245_v52 = vrot.slane %v4187_v2, 5  ;;  %v4193_v24 = vrot.slane %v4191_v53, 4  ;;  %v4204_v44 = vrot.slane %v4202_v49, 4 }
 0x203   : > { %v4207_v51 = vrot.slane %v4205_v40, 5  ;;  %v11802_v45 = vcombine.low %v4094_v15, %v4104_v34  ;;  %v11803_v30 = vcombine.low %v4118_v54, %v4128_v33  ;;  %v4213_v8 = vrot.slane %v4211_v35, 5  ;;  %v11781_v15 = vld [vmem:[%s14466_s26 + $0xc0] sm:$0xf]  ;;  %v16256_v34 = vld [vmem:[%s14466_s26 + $0xc4] sm:$0xf] }
 0x204   : > { %v4217_v31 = vrot.slane %v4215_v55, 4  ;;  %v4161_v38 = vrot.slane %v4160_v37, 4  ;;  %v4171_v50 = vrot.slane %v4170_v26, 4  ;;  %v4184_v32 = vor.u32 %v4183_v17, %v4180_v5 }
 0x205   : > { %v4197_v1 = vshll.u32 %v15842_v57, 16  ;;  %v11804_v0 = vcombine.low %v4142_v4, %v4152_v10  ;;  %v4194_v60 = vor.u32 %v4193_v24, %v16245_v52  ;;  %v4208_v46 = vor.u32 %v4207_v51, %v4204_v44 }
 0x206   : > { %v4221_v2 = vshll.u32 %v16248_v16, 16  ;;  %v4226_v53 = vshrl.u32 %v11778_v11, 16  ;;  %v4218_v49 = vor.u32 %v4217_v31, %v4213_v8  ;;  %v4229_v40 = vshll.u32 %v11778_v11, 16 }
 0x207   : > { %13125 = vmatmul.mubr.msk.bf16.gmra.mrb[12].mxu0 %vm831_vm3, %v11802_v45  ;;  %v4235_v54 = vshll.u32 %v15891_v23, 16  ;;  %v4239_v33 = vshrl.u32 %v15891_v23, 16  ;;  %v4166_v57 = vsel %vm14501_vm2, %v4161_v38, %v16222_v47  ;;  %v4176_v35 = vsel %vm14501_vm2, %v4171_v50, %v4175_v14 }
 0x208   : > { %13128 = vmatprep.mubr.msk.bf16.mxu0 %vm831_vm3, %v11803_v30  ;;  %v4185_v55 = vrot.slane %v4184_v32, 4  ;;  %v4199_v37 = vrot.slane %v4197_v1, 5  ;;  %v4250_v26 = vshrl.u32 %v11781_v15, 16  ;;  %v4253_v5 = vshll.u32 %v11781_v15, 16  ;;  %v11784_v32 = vld [vmem:[%s14466_s26 + $0xcc] sm:$0xf] }
 0x209   : > { %v4259_v17 = vshll.u32 %v16256_v34, 16  ;;  %v4263_v4 = vshrl.u32 %v16256_v34, 16  ;;  %v4195_v10 = vrot.slane %v4194_v60, 4  ;;  %v4209_v23 = vrot.slane %v4208_v46, 4 }
 0x20a   : > { %v4223_v24 = vrot.slane %v4221_v2, 5  ;;  %v4228_v44 = vrot.slane %v4226_v53, 4  ;;  %v4219_v51 = vrot.slane %v4218_v49, 4  ;;  %v4231_v45 = vrot.slane %v4229_v40, 5  ;;  %v16277_v2 = vld [vmem:[%s14466_s26 + $0xc8] sm:$0x1] }
 0x20b   : > { %v4237_v47 = vrot.slane %v4235_v54, 5  ;;  %v4241_v30 = vrot.slane %v4239_v33, 4  ;;  %v11805_v31 = vcombine.low %v4166_v57, %v4176_v35  ;;  %v4252_v14 = vrot.slane %v4250_v26, 4 }
 0x20c   : > { %v4255_v11 = vrot.slane %v4253_v5, 5  ;;  %v4261_v38 = vrot.slane %v4259_v17, 5  ;;  %v4265_v50 = vrot.slane %v4263_v4, 4  ;;  %v4190_v1 = vsel %vm14501_vm2, %v4185_v55, %v16245_v52 }
 0x20d   : > { %v4200_v60 = vsel %vm14501_vm2, %v4195_v10, %v4199_v37  ;;  %v4245_v46 = vshll.u32 %v15894_v58, 16  ;;  %v4214_v53 = vsel %vm14501_vm2, %v4209_v23, %v4213_v8  ;;  %v4224_v15 = vsel %vm14501_vm2, %v4219_v51, %v4223_v24 }
 0x20e   : > { %v4232_v49 = vor.u32 %v4231_v45, %v4228_v44  ;;  %v4242_v40 = vor.u32 %v4241_v30, %v4237_v47  ;;  %v4274_v52 = vshrl.u32 %v11784_v32, 16  ;;  %v4277_v54 = vshll.u32 %v11784_v32, 16 }
 0x20f   : > { %13129 = vmatmul.mubr.msk.bf16.gmra.mrb[16].mxu0 %vm831_vm3, %v11804_v0  ;;  %v4283_v33 = vshll.u32 %v15952_v6, 16  ;;  %v4287_v58 = vshrl.u32 %v15952_v6, 16  ;;  %v4256_v57 = vor.u32 %v4255_v11, %v4252_v14  ;;  %v4266_v35 = vor.u32 %v4265_v50, %v4261_v38 }
 0x210   : > { %13132 = vmatprep.mubr.msk.bf16.mxu0 %vm831_vm3, %v11805_v31  ;;  %v4269_v0 = vshll.u32 %v16277_v2, 16  ;;  %v11806_v55 = vcombine.low %v4190_v1, %v4200_v60  ;;  %v11807_v37 = vcombine.low %v4214_v53, %v4224_v15  ;;  %v4233_v8 = vrot.slane %v4232_v49, 4  ;;  %v11831_v1 = vld [vmem:[%s14466_s26 + $0x18] sm:$0xe] }
 0x211   : > { %v4243_v26 = vrot.slane %v4242_v40, 4  ;;  %v4247_v5 = vrot.slane %v4245_v46, 5  ;;  %v4276_v17 = vrot.slane %v4274_v52, 4  ;;  %v4279_v4 = vrot.slane %v4277_v54, 5 }
 0x212   : > { %v4285_v10 = vrot.slane %v4283_v33, 5  ;;  %v4289_v23 = vrot.slane %v4287_v58, 4  ;;  %v4257_v24 = vrot.slane %v4256_v57, 4  ;;  %v4267_v44 = vrot.slane %v4266_v35, 4  ;;  %v11832_v58 = vld [vmem:[%s14466_s26 + $0x24] sm:$0xe] }
 0x213   : > { %v4271_v51 = vrot.slane %v4269_v0, 5  ;;  %v4238_v6 = vsel %vm14501_vm2, %v4233_v8, %v4237_v47  ;;  %v4248_v45 = vsel %vm14501_vm2, %v4243_v26, %v4247_v5  ;;  %v4280_v30 = vor.u32 %v4279_v4, %v4276_v17  ;;  %v11833_v57 = vld [vmem:[%s14466_s26 + $0x30] sm:$0xe] }
 0x214   : > { %v4290_v31 = vor.u32 %v4289_v23, %v4285_v10  ;;  %v4293_v14 = vshll.u32 %v15955_v13, 16  ;;  %v4262_v11 = vsel %vm14501_vm2, %v4257_v24, %v4261_v38  ;;  %v4685_v32 = vrot.slane %v15782_v12, 5  ;;  %v11834_v23 = vld [vmem:[%s14466_s26 + $0x3c] sm:$0xe]  ;;  %v11835_v24 = vld [vmem:[%s14466_s26 + $0x48] sm:$0xe] }
 0x215   : > { %v4272_v50 = vsel %vm14501_vm2, %v4267_v44, %v4271_v51  ;;  %v11808_v47 = vcombine.low %v4238_v6, %v4248_v45  ;;  %v4281_v46 = vrot.slane %v4280_v30, 4  ;;  %v11847_v49 = vrot.slane %v11831_v1, 9 }
 0x216   : > { %v11809_v60 = vcombine.low %v4262_v11, %v4272_v50  ;;  %v4291_v53 = vrot.slane %v4290_v31, 4  ;;  %v4295_v15 = vrot.slane %v4293_v14, 5  ;;  %v4687_v40 = vrot.slane %v4685_v32, 4 }
 0x217   : > { %13133 = vmatmul.mubr.msk.bf16.gmra.mrb[20].mxu0 %vm831_vm3, %v11806_v55  ;;  %v4688_v13 = vrot.slane %v15816_v25, 5  ;;  %v4286_v38 = vsel %vm14501_vm2, %v4281_v46, %v4285_v10  ;;  %v4692_v52 = vrot.slane %v15812_v59, 5  ;;  %v4686_v54 = vsel %vm14817_vm6, %v11847_v49, %v4685_v32 }
 0x218   : > { %13136 = vmatprep.mubr.msk.bf16.mxu0 %vm831_vm3, %v11807_v37  ;;  %v4296_v12 = vsel %vm14501_vm2, %v4291_v53, %v4295_v15  ;;  %v4699_v25 = vrot.slane %v15830_v39, 5  ;;  %v11848_v55 = vrot.slane %v11832_v58, 9  ;;  %v4695_v8 = vrot.slane %v15850_v41, 5  ;;  %v11841_v58 = vld [vmem:[%s14466_s26 + $0x90] sm:$0xe] }
 0x219   : > { %v4689_v33 = vsel %vm14817_vm6, %v4687_v40, %v4688_v13  ;;  %v11810_v35 = vcombine.low %v4286_v38, %v4296_v12  ;;  %v4694_v37 = vrot.slane %v4692_v52, 4  ;;  %v11849_v26 = vrot.slane %v11833_v57, 9  ;;  %v11839_v40 = vld [vmem:[%s14466_s26 + $0x78] sm:$0xe] }
 0x21a   : > { %v11871_v0 = vcombine.low %v4686_v54, %v4689_v33  ;;  %v4701_v59 = vrot.slane %v4699_v25, 4  ;;  %v4702_v5 = vrot.slane %v15861_v20, 5  ;;  %v4693_v39 = vsel %vm14817_vm6, %v11848_v55, %v4692_v52  ;;  %v11843_v55 = vld [vmem:[%s14466_s26 + $0xa8] sm:$0xe] }
 0x21b   : > { %v4696_v17 = vsel %vm14817_vm6, %v4694_v37, %v4695_v8  ;;  %v4706_v4 = vrot.slane %v15857_v62, 5  ;;  %v4700_v10 = vsel %vm14817_vm6, %v11849_v26, %v4699_v25  ;;  %v4713_v20 = vrot.slane %v15915_v36, 5 }
 0x21c   : > { %v4703_v41 = vsel %vm14817_vm6, %v4701_v59, %v4702_v5  ;;  %v11872_v44 = vcombine.low %v4693_v39, %v4696_v17  ;;  %v11850_v6 = vrot.slane %v11834_v23, 9  ;;  %v4709_v30 = vrot.slane %v15888_v7, 5  ;;  %v11845_v17 = vld [vmem:[%s14466_s26 + $0xc0] sm:$0xe]  ;;  %v18906_v23 = vld [vmem:[#allocation8_spill] sm:$0xff] }
 0x21d   : > { %v11873_v51 = vcombine.low %v4700_v10, %v4703_v41  ;;  %v4708_v45 = vrot.slane %v4706_v4, 4  ;;  %v11851_v31 = vrot.slane %v11835_v24, 9  ;;  %v4715_v14 = vrot.slane %v4713_v20, 4 }
 0x21e   : > { %v4716_v62 = vrot.slane %v15983_v22, 5  ;;  %v4707_v11 = vsel %vm14817_vm6, %v11850_v6, %v4706_v4  ;;  %v4727_v32 = vrot.slane %v15979_v61, 5  ;;  %v11837_v22 = vld [vmem:[%s14466_s26 + $0x60] sm:$0xe]  ;;  %v4730_v53 = vrot.slane %v16119_v21, 5  ;;  %v18909_v6 = vld [vmem:[#allocation10_spill] sm:$0xff] }
 0x21f   : > { %13137 = vmatmul.mubr.msk.bf16.gmra.mrb[24].mxu0 %vm831_vm3, %v11808_v47  ;;  %v4710_v36 = vsel %vm14817_vm6, %v4708_v45, %v4709_v30  ;;  %v4714_v50 = vsel %vm14817_vm6, %v11851_v31, %v4713_v20  ;;  %v4741_v61 = vrot.slane %v16140_v43, 5  ;;  %v11855_v38 = vrot.slane %v11839_v40, 9  ;;  %v18907_v20 = vld [vmem:[#allocation9_spill] sm:$0xff]  ;;  %v18910_v45 = vld [vmem:[#allocation11_spill] sm:$0xff] }
 0x220   : > { %13140 = vmatprep.mubr.msk.bf16.mxu0 %vm831_vm3, %v11809_v60  ;;  %v4717_v7 = vsel %vm14817_vm6, %v4715_v14, %v4716_v62  ;;  %v11874_v1 = vcombine.low %v4707_v11, %v4710_v36  ;;  %v11853_v60 = vrot.slane %v11837_v22, 9  ;;  %v4729_v46 = vrot.slane %v4727_v32, 4  ;;  %v14184_v62 = vld [vmem:[%s18731_s2 + $0x28] sm:$0xff]   ;;  %v14185_v11 = vld [vmem:[%s18731_s2 + $0x30] sm:$0xff]   ;;  %v5796_v36 = vld [vmem:[#allocation2] sm:$0xf] }
 0x221   : > { %v11875_v47 = vcombine.low %v4714_v50, %v4717_v7  ;;  %v4743_v12 = vrot.slane %v4741_v61, 4  ;;  %v4744_v52 = vrot.slane %v16176_v56, 5  ;;  %v18901_v21 = vcombine.low %v15758_v9, %v15763_v42  ;;  %v5797_v50 = vld [vmem:[#allocation2 + $0x4] sm:$0xf]  ;;  %v14186_v7 = vld [vmem:[%s18731_s2 + $0x38] sm:$0xff]  }
 0x222   : > { %v4728_v15 = vsel %vm14817_vm6, %v11853_v60, %v4727_v32  ;;  %v4731_v49 = vsel %vm14817_vm6, %v4729_v46, %v4730_v53  ;;  %v4742_v54 = vsel %vm14817_vm6, %v11855_v38, %v4741_v61  ;;  %v4755_v33 = vrot.slane %v16196_v48, 5 }
 0x223   : > { %v11877_v13 = vcombine.low %v4728_v15, %v4731_v49  ;;  %v4745_v43 = vsel %vm14817_vm6, %v4743_v12, %v4744_v52  ;;  %v11857_v57 = vrot.slane %v11841_v58, 9  ;;  %v18902_v9 = vcombine.low %v15786_v28, %v15791_v18  ;;  %v18903_v28 = vld [vmem:[#allocation6_spill] sm:$0xff]  ;;  %v18904_v18 = vld [vmem:[#allocation7_spill] sm:$0xff] }
 0x224   : > { %v11879_v25 = vcombine.low %v4742_v54, %v4745_v43  ;;  %v4757_v56 = vrot.slane %v4755_v33, 4  ;;  %v11859_v8 = vrot.slane %v11843_v55, 9  ;;  %v4772_v26 = vrot.slane %v16248_v16, 5  ;;  %v16472_v58 = vld [vmem:[%s18732_s3] ss:$0 sm:$0xff] }
 0x225   : > { %v4756_v42 = vsel %vm14817_vm6, %v11857_v57, %v4755_v33  ;;  %v18905_v59 = vcombine.low %v18903_v28, %v18904_v18  ;;  %v11861_v10 = vrot.slane %v11845_v17, 9  ;;  %v4786_v16 = vrot.slane %v16277_v2, 5  ;;  %v18912_v2 = vld [vmem:[#allocation12_spill] sm:$0xff]  ;;  %v16466_v33 = vld [vmem:[%s18731_s2] sm:$0xff]  }
 0x226   : > { %v18908_v24 = vcombine.low %v18906_v23, %v18907_v20  ;;  %v18911_v30 = vcombine.low %v18909_v6, %v18910_v45  ;;  %v18913_v31 = vcombine.low %v15991_v19, %v18912_v2  ;;  %v18914_v14 = vmov 0   ;;  %v14183_v19 = vld [vmem:[%s18731_s2 + $0x20] sm:$0xff]  }
 0x227   : > { %13141 = vmatmul.mubr.msk.bf16.gmra.mrb[28].mxu0 %vm831_vm3, %v11810_v35  ;;  %v4758_v35 = vrot.slane %v16216_v63, 5  ;;  %261 = vst.msk [vmem:[#allocation2 + $0x20] sm:$0x1] %vm254_vm8, %v18914_v14  ;;  %255 = vst.msk [vmem:[#allocation2 + $0x8] sm:$0x1] %vm254_vm8, %v18914_v14  ;;  %13184 = vmatprep.subr.bf16.mxu1 %v14183_v19  ;;  %v5853_v32 = vshrl.u32 %v5796_v36, 16 }
 0x228   : > { %13152 = vmatprep.mubr.msk.bf16.mxu0 %vm831_vm3, %v11871_v0  ;;  %v4769_v0 = vrot.slane %v16225_v27, 5  ;;  %v4783_v27 = vrot.slane %v16256_v34, 5  ;;  %258 = vst.msk [vmem:[#allocation2 + $0x14] sm:$0x1] %vm254_vm8, %v18914_v14  ;;  %264 = vst.msk [vmem:[#allocation2 + $0x2c] sm:$0x1] %vm254_vm8, %v18914_v14  ;;  %13185 = vmatpush3.bf16.msra.mxu1 %v14183_v19 }
 0x229   : > { %v4759_v48 = vsel %vm14817_vm6, %v4757_v56, %v4758_v35  ;;  %267 = vst.msk [vmem:[#allocation2 + $0x38] sm:$0x1] %vm254_vm8, %v18914_v14  ;;  %270 = vst.msk [vmem:[#allocation2 + $0x44] sm:$0x1] %vm254_vm8, %v18914_v14  ;;  %13186 = vmatprep.subr.bf16.mxu1 %v14184_v62  ;;  %v5856_v22 = vshll.u32 %v5796_v36, 16  ;;  %v5855_v60 = vrot.slane %v5853_v32, 4 }
 0x22a   : > { %v11881_v37 = vcombine.low %v4756_v42, %v4759_v48  ;;  %v4771_v63 = vrot.slane %v4769_v0, 4  ;;  %v4770_v5 = vsel %vm14817_vm6, %v11859_v8, %v4769_v0  ;;  %v4785_v41 = vrot.slane %v4783_v27, 4  ;;  %273 = vst.msk [vmem:[#allocation2 + $0x50] sm:$0x1] %vm254_vm8, %v18914_v14  ;;  %276 = vst.msk [vmem:[#allocation2 + $0x5c] sm:$0x1] %vm254_vm8, %v18914_v14 }
 0x22b   : > { %279 = vst.msk [vmem:[#allocation2 + $0x68] sm:$0x1] %vm254_vm8, %v18914_v14  ;;  %282 = vst.msk [vmem:[#allocation2 + $0x74] sm:$0x1] %vm254_vm8, %v18914_v14  ;;  %v5858_v46 = vrot.slane %v5856_v22, 5 }
 0x22c   : > { %v4773_v39 = vsel %vm14817_vm6, %v4771_v63, %v4772_v26  ;;  %285 = vst.msk [vmem:[#allocation2 + $0x80] sm:$0x1] %vm254_vm8, %v18914_v14  ;;  %288 = vst.msk [vmem:[#allocation2 + $0x8c] sm:$0x1] %vm254_vm8, %v18914_v14  ;;  %13187 = vmatpush3.bf16.msra.mxu1 %v14184_v62  ;;  %v16477_v57 = vld [vmem:[%s18733_s4] ss:$0 sm:$0xff] }
 0x22d   : > { %v11883_v4 = vcombine.low %v4770_v5, %v4773_v39  ;;  %291 = vst.msk [vmem:[#allocation2 + $0x98] sm:$0x1] %vm254_vm8, %v18914_v14  ;;  %294 = vst.msk [vmem:[#allocation2 + $0xa4] sm:$0x1] %vm254_vm8, %v18914_v14  ;;  %13188 = vmatprep.subr.bf16.mxu1 %v14185_v11  ;;  %v5859_v61 = vor.u32 %v5858_v46, %v5855_v60 }
 0x22e   : > { %297 = vst.msk [vmem:[#allocation2 + $0xb0] sm:$0x1] %vm254_vm8, %v18914_v14  ;;  %300 = vst.msk [vmem:[#allocation2 + $0xbc] sm:$0x1] %vm254_vm8, %v18914_v14  ;;  %v5836_v49 = vld [vmem:[#allocation2 + $0x8] sm:$0x1] }
 0x22f   : > { %13153 = vmatmul.mubr.msk.bf16.vlgmr.msra.gmra.mrb[0].mxu0 %vm831_vm3, %v11872_v44  ;;  %v4784_v44 = vsel %vm14817_vm6, %v11861_v10, %v4783_v27  ;;  %303 = vst.msk [vmem:[#allocation2 + $0xc8] sm:$0x1] %vm254_vm8, %v18914_v14  ;;  %306 = vst.msk [vmem:[#allocation2 + $0xd4] sm:$0x1] %vm254_vm8, %v18914_v14  ;;  %v5860_v38 = vrot.slane %v5859_v61, 4 }
 0x230   : > { %13156 = vmatprep.mubr.msk.bf16.mxu0 %vm831_vm3, %v11873_v51  ;;  %v4787_v51 = vsel %vm14817_vm6, %v4785_v41, %v4786_v16  ;;  %13189 = vmatpush3.bf16.msra.mxu1 %v14185_v11 }
 0x231   : > { %v11885_v34 = vcombine.low %v4784_v44, %v4787_v51  ;;  %13190 = vmatprep.subr.bf16.mxu1 %v14186_v7 }
 0x234   : > { %13191 = vmatpush3.bf16.msra.mxu1 %v14186_v7  ;;  %v5682_v7 = vld [vmem:[#allocation2 + $0xc] sm:$0xf] }
 0x235   : > { %13224 = vmatprep.subr.bf16.mxu1 %v16466_v33 }
 0x237   : > { %13157 = vmatmul.mubr.msk.bf16.gmra.mrb[4].mxu0 %vm831_vm3, %v11874_v1  ;;  %v5862_v1 = vshll.u32 %v5797_v50, 16 }
 0x238   : > { %13160 = vmatprep.mubr.msk.bf16.mxu0 %vm831_vm3, %v11875_v47  ;;  %v5866_v47 = vshrl.u32 %v5797_v50, 16 }
 0x239   : > { %v5864_v53 = vrot.slane %v5862_v1, 5 }
 0x23a   : > { %v5868_v15 = vrot.slane %v5866_v47, 4 }
 0x23c   : > { %v5869_v40 = vor.u32 %v5868_v15, %v5864_v53 }
 0x23e   : > { %v5870_v12 = vrot.slane %v5869_v40, 4 }
 0x23f   : > { %13161 = vmatmul.mubr.msk.bf16.gmra.mrb[8].mxu0 %vm831_vm3, %v18901_v21  ;;  %v5865_v21 = vsel %vm14501_vm2, %v5860_v38, %v5864_v53  ;;  %v5695_v53 = vld [vmem:[#allocation2 + $0x20] sm:$0x1] }
 0x240   : > { %13164 = vmatprep.mubr.msk.bf16.mxu0 %vm831_vm3, %v11877_v13  ;;  %v5872_v13 = vshll.u32 %v5836_v49, 16 }
 0x242   : > { %v5874_v52 = vrot.slane %v5872_v13, 5  ;;  %v5688_v13 = vld [vmem:[#allocation2 + $0x14] sm:$0x1] }
 0x244   : > { %v5875_v54 = vsel %vm14501_vm2, %v5870_v12, %v5874_v52 }
 0x245   : > { %v11949_v43 = vcombine.low %v5865_v21, %v5875_v54 }
 0x247   : > { %13165 = vmatmul.mubr.msk.bf16.gmra.mrb[12].mxu0 %vm831_vm3, %v18902_v9  ;;  %13192 = vmatprep.mubr.msk.bf16.mxu1 %vm831_vm3, %v11949_v43 }
 0x248   : > { %13168 = vmatprep.mubr.msk.bf16.mxu0 %vm831_vm3, %v11879_v25 }
 0x24f   : > { %13169 = vmatmul.mubr.msk.bf16.gmra.mrb[16].mxu0 %vm831_vm3, %v18905_v59 }
 0x250   : > { %13172 = vmatprep.mubr.msk.bf16.mxu0 %vm831_vm3, %v11881_v37 }
 0x257   : > { %13173 = vmatmul.mubr.msk.bf16.gmra.mrb[20].mxu0 %vm831_vm3, %v18908_v24 }
 0x258   : > { %13176 = vmatprep.mubr.msk.bf16.mxu0 %vm831_vm3, %v11883_v4 }
 0x25f   : > { %13177 = vmatmul.mubr.msk.bf16.gmra.mrb[24].mxu0 %vm831_vm3, %v18911_v30 }
 0x260   : > { %13180 = vmatprep.mubr.msk.bf16.mxu0 %vm831_vm3, %v11885_v34  ;;  %v5691_v34 = vld [vmem:[#allocation2 + $0x18] sm:$0xf] }
 0x267   : > { %13181 = vmatmul.mubr.msk.bf16.gmra.mrb[28].mxu0 %vm831_vm3, %v18913_v31 }
 0x302   : > { %v13154_v25 = vpop.f32.mrb[0].mxu0 }
 0x303   : > { %v5126_v56 = vadd.f32 %v13154_v25, %v16472_v58  ;;  %v4958_v35 = vpop.f32.mrb[1].mxu0 }
 0x304   : > { %v5124_v9 = vadd.f32 %v16472_v58, %v4958_v35  ;;  %v13155_v42 = vpop.f32.mrb[2].mxu0 }
 0x305   : > { %vm5158_vm9 = vcmp.gt.f32.partialorder %v5126_v56, 0.0  ;;  %v5197_v48 = vmul.f32 %v16477_v57, %v5126_v56  ;;  %v5127_v0 = vadd.f32 %v13155_v42, %v16472_v58  ;;  %v4961_v55 = vpop.f32.mrb[3].mxu0 }
 0x306   : > { %vm5156_vm10 = vcmp.gt.f32.partialorder %v5124_v9, 0.0  ;;  %v5195_v37 = vmul.f32 %v16477_v57, %v5124_v9  ;;  %v5125_v8 = vadd.f32 %v16472_v58, %v4961_v55 }
 0x307   : > { %v5229_v63 = vsel %vm5158_vm9, %v5126_v56, %v5197_v48  ;;  %vm5159_vm12 = vcmp.gt.f32.partialorder %v5127_v0, 0.0  ;;  %v5198_v26 = vmul.f32 %v16477_v57, %v5127_v0 }
 0x308   : > { %v12433_v28 = vpack.c.bf16 %v5229_v63, %v5229_v63  ;;  %v5227_v18 = vsel %vm5156_vm10, %v5124_v9, %v5195_v37  ;;  %vm5157_vm13 = vcmp.gt.f32.partialorder %v5125_v8, 0.0  ;;  %v5196_v59 = vmul.f32 %v16477_v57, %v5125_v8 }
 0x309   : > { %v12431_v5 = vpack.c.bf16 %v5227_v18, %v5227_v18  ;;  %v5230_v39 = vsel %vm5159_vm12, %v5127_v0, %v5198_v26 }
 0x30a   : > { %v5376_v27 = vshrl.u32 %v12433_v28, 16  ;;  %v5379_v17 = vshll.u32 %v12433_v28, 16  ;;  %v12434_v4 = vpack.c.bf16 %v5230_v39, %v5230_v39  ;;  %v5228_v10 = vsel %vm5157_vm13, %v5125_v8, %v5196_v59  ;;  %v13158_v41 = vpop.f32.mrb[4].mxu0 }
 0x30b   : > { %v5359_v16 = vshrl.u32 %v12431_v5, 16  ;;  %v5362_v23 = vshll.u32 %v12431_v5, 16  ;;  %v12432_v20 = vpack.c.bf16 %v5228_v10, %v5228_v10  ;;  %v5130_v24 = vadd.f32 %v13158_v41, %v16472_v58  ;;  %v4974_v44 = vpop.f32.mrb[5].mxu0 }
 0x30c   : > { %v5378_v51 = vrot.slane %v5376_v27, 7  ;;  %v5384_v6 = vshrl.u32 %v12434_v4, 16  ;;  %v5387_v45 = vshll.u32 %v12434_v4, 16  ;;  %v5128_v30 = vadd.f32 %v16472_v58, %v4974_v44  ;;  %v13159_v2 = vpop.f32.mrb[6].mxu0 }
 0x30d   : > { %v5361_v14 = vrot.slane %v5359_v16, 7  ;;  %v5367_v19 = vshrl.u32 %v12432_v20, 16  ;;  %v5370_v62 = vshll.u32 %v12432_v20, 16  ;;  %vm5162_vm1 = vcmp.gt.f32.partialorder %v5130_v24, 0.0  ;;  %v4977_v11 = vpop.f32.mrb[7].mxu0 }
 0x30e   : > { %v5381_v36 = vor.u32 %v5379_v17, %v5378_v51  ;;  %v5382_v50 = vrot.slane %v5378_v51, 4  ;;  %v5386_v22 = vrot.slane %v5384_v6, 7  ;;  %v5201_v1 = vmul.f32 %v16477_v57, %v5130_v24  ;;  %v5705_v17 = vld [vmem:[#allocation2 + $0x30] sm:$0xf] }
 0x30f   : > { %v5364_v47 = vor.u32 %v5362_v23, %v5361_v14  ;;  %v5365_v60 = vrot.slane %v5361_v14, 4  ;;  %v5369_v15 = vrot.slane %v5367_v19, 7  ;;  %vm5160_vm9 = vcmp.gt.f32.partialorder %v5128_v30, 0.0 }
 0x310   : > { %v5692_v49 = vsel %vm16491_vm0, %v5381_v36, %v5691_v34  ;;  %v5389_v61 = vor.u32 %v5387_v45, %v5386_v22  ;;  %v5391_v40 = vrot.slane %v5386_v22, 4  ;;  %v5233_v38 = vsel %vm5162_vm1, %v5130_v24, %v5201_v1 }
 0x311   : > { %5693 = vst [vmem:[#allocation2 + $0x18] sm:$0xf] %v5692_v49  ;;  %v5683_v12 = vsel %vm16491_vm0, %v5364_v47, %v5682_v7  ;;  %v5372_v52 = vor.u32 %v5370_v62, %v5369_v15  ;;  %v5374_v21 = vrot.slane %v5369_v15, 4  ;;  %v12437_v54 = vpack.c.bf16 %v5233_v38, %v5233_v38 }
 0x312   : > { %5684 = vst [vmem:[#allocation2 + $0xc] sm:$0xf] %v5683_v12  ;;  %v5390_v43 = vsel %vm16497_vm4, %v5382_v50, %v5389_v61  ;;  %v5696_v25 = vsel %vm16504_vm5, %v5391_v40, %v5695_v53  ;;  %v5199_v56 = vmul.f32 %v16477_v57, %v5128_v30  ;;  %v5131_v35 = vadd.f32 %v13159_v2, %v16472_v58  ;;  %v13162_v9 = vpop.f32.mrb[8].mxu0  ;;  %v5698_v2 = vld [vmem:[#allocation2 + $0x24] sm:$0xf] }
 0x313   : > { %5694 = vst.msk [vmem:[#allocation2 + $0x1c] sm:$0xf] %vm251_vm7, %v5390_v43  ;;  %5697 = vst [vmem:[#allocation2 + $0x20] sm:$0x1] %v5696_v25  ;;  %v5373_v42 = vsel %vm16497_vm4, %v5365_v60, %v5372_v52  ;;  %v5689_v48 = vsel %vm16504_vm5, %v5374_v21, %v5688_v13  ;;  %v5410_v0 = vshrl.u32 %v12437_v54, 16  ;;  %v5413_v55 = vshll.u32 %v12437_v54, 16 }
 0x314   : > { %v4990_v37 = vpop.f32.mrb[9].mxu0  ;;  %5685 = vst.msk [vmem:[#allocation2 + $0x10] sm:$0xf] %vm251_vm7, %v5373_v42  ;;  %5690 = vst [vmem:[#allocation2 + $0x14] sm:$0x1] %v5689_v48  ;;  %v5231_v8 = vsel %vm5160_vm9, %v5128_v30, %v5199_v56  ;;  %vm5163_vm8 = vcmp.gt.f32.partialorder %v5131_v35, 0.0  ;;  %v5202_v63 = vmul.f32 %v16477_v57, %v5131_v35  ;;  %v5129_v26 = vadd.f32 %v16472_v58, %v4977_v11 }
 0x315   : > { %v13163_v28 = vpop.f32.mrb[10].mxu0  ;;  %v5412_v18 = vrot.slane %v5410_v0, 7  ;;  %v12435_v59 = vpack.c.bf16 %v5231_v8, %v5231_v8  ;;  %v5134_v5 = vadd.f32 %v13162_v9, %v16472_v58  ;;  %v5132_v39 = vadd.f32 %v16472_v58, %v4990_v37  ;;  %v5709_v40 = vld [vmem:[#allocation2 + $0x38] sm:$0x1]  ;;  %v5702_v43 = vld [vmem:[#allocation2 + $0x2c] sm:$0x1] }
 0x316   : > { %v16530_v27 = vpop.f32.mrb[11].mxu0  ;;  %v5234_v4 = vsel %vm5163_vm8, %v5131_v35, %v5202_v63  ;;  %vm5161_vm10 = vcmp.gt.f32.partialorder %v5129_v26, 0.0  ;;  %v5200_v10 = vmul.f32 %v16477_v57, %v5129_v26  ;;  %v5135_v41 = vadd.f32 %v13163_v28, %v16472_v58  ;;  %v5719_v28 = vld [vmem:[#allocation2 + $0x48] sm:$0xf] }
 0x317   : > { %v5415_v16 = vor.u32 %v5413_v55, %v5412_v18  ;;  %v5416_v23 = vrot.slane %v5412_v18, 4  ;;  %v5393_v20 = vshrl.u32 %v12435_v59, 16  ;;  %v5396_v24 = vshll.u32 %v12435_v59, 16 }
 0x318   : > { %v12438_v44 = vpack.c.bf16 %v5234_v4, %v5234_v4  ;;  %v5232_v51 = vsel %vm5161_vm10, %v5129_v26, %v5200_v10  ;;  %vm5166_vm11 = vcmp.gt.f32.partialorder %v5134_v5, 0.0  ;;  %v5205_v34 = vmul.f32 %v16477_v57, %v5134_v5 }
 0x319   : > { %v5706_v6 = vsel %vm16491_vm0, %v5415_v16, %v5705_v17  ;;  %v5395_v45 = vrot.slane %v5393_v20, 7  ;;  %v12436_v30 = vpack.c.bf16 %v5232_v51, %v5232_v51  ;;  %vm5164_vm12 = vcmp.gt.f32.partialorder %v5132_v39, 0.0  ;;  %v5712_v17 = vld [vmem:[#allocation2 + $0x3c] sm:$0xf] }
 0x31a   : > { %5707 = vst [vmem:[#allocation2 + $0x30] sm:$0xf] %v5706_v6  ;;  %v5418_v14 = vshrl.u32 %v12438_v44, 16  ;;  %v5421_v19 = vshll.u32 %v12438_v44, 16  ;;  %v5237_v62 = vsel %vm5166_vm11, %v5134_v5, %v5205_v34  ;;  %v5203_v11 = vmul.f32 %v16477_v57, %v5132_v39  ;;  %v13166_v36 = vpop.f32.mrb[12].mxu0 }
 0x31b   : > { %v5398_v50 = vor.u32 %v5396_v24, %v5395_v45  ;;  %v5399_v7 = vrot.slane %v5395_v45, 4  ;;  %v5401_v22 = vshrl.u32 %v12436_v30, 16  ;;  %v5404_v1 = vshll.u32 %v12436_v30, 16  ;;  %v5006_v47 = vpop.f32.mrb[13].mxu0 }
 0x31c   : > { %v5420_v60 = vrot.slane %v5418_v14, 7  ;;  %v12441_v53 = vpack.c.bf16 %v5237_v62, %v5237_v62  ;;  %v5235_v15 = vsel %vm5164_vm12, %v5132_v39, %v5203_v11  ;;  %vm5167_vm13 = vcmp.gt.f32.partialorder %v5135_v41, 0.0  ;;  %v13167_v49 = vpop.f32.mrb[14].mxu0 }
 0x31d   : > { %v5699_v61 = vsel %vm16491_vm0, %v5398_v50, %v5698_v2  ;;  %v5403_v13 = vrot.slane %v5401_v22, 7  ;;  %v12439_v38 = vpack.c.bf16 %v5235_v15, %v5235_v15  ;;  %v5206_v12 = vmul.f32 %v16477_v57, %v5135_v41  ;;  %v5009_v52 = vpop.f32.mrb[15].mxu0 }
 0x31e   : > { %5700 = vst [vmem:[#allocation2 + $0x24] sm:$0xf] %v5699_v61  ;;  %v5423_v21 = vor.u32 %v5421_v19, %v5420_v60  ;;  %v5425_v54 = vrot.slane %v5420_v60, 4  ;;  %v5444_v25 = vshrl.u32 %v12441_v53, 16  ;;  %v5447_v56 = vshll.u32 %v12441_v53, 16 }
 0x31f   : > { %v5406_v35 = vor.u32 %v5404_v1, %v5403_v13  ;;  %v5408_v9 = vrot.slane %v5403_v13, 4  ;;  %v5427_v42 = vshrl.u32 %v12439_v38, 16  ;;  %v5430_v48 = vshll.u32 %v12439_v38, 16  ;;  %v5723_v19 = vld [vmem:[#allocation2 + $0x50] sm:$0x1] }
 0x320   : > { %v5424_v0 = vsel %vm16497_vm4, %v5416_v23, %v5423_v21  ;;  %v5710_v55 = vsel %vm16504_vm5, %v5425_v54, %v5709_v40  ;;  %v5446_v37 = vrot.slane %v5444_v25, 7  ;;  %v5238_v8 = vsel %vm5167_vm13, %v5135_v41, %v5206_v12 }
 0x321   : > { %5708 = vst.msk [vmem:[#allocation2 + $0x34] sm:$0xf] %vm251_vm7, %v5424_v0  ;;  %5711 = vst [vmem:[#allocation2 + $0x38] sm:$0x1] %v5710_v55  ;;  %v5407_v63 = vsel %vm16497_vm4, %v5399_v7, %v5406_v35  ;;  %v5703_v26 = vsel %vm16504_vm5, %v5408_v9, %v5702_v43  ;;  %v16551_v18 = vrot.slane %v5427_v42, 7  ;;  %v12442_v59 = vpack.c.bf16 %v5238_v8, %v5238_v8 }
 0x322   : > { %5701 = vst.msk [vmem:[#allocation2 + $0x28] sm:$0xf] %vm251_vm7, %v5407_v63  ;;  %5704 = vst [vmem:[#allocation2 + $0x2c] sm:$0x1] %v5703_v26  ;;  %v5449_v5 = vor.u32 %v5447_v56, %v5446_v37  ;;  %v5450_v39 = vrot.slane %v5446_v37, 4  ;;  %v5133_v4 = vadd.f32 %v16472_v58, %v16530_v27  ;;  %v5138_v10 = vadd.f32 %v13166_v36, %v16472_v58  ;;  %v13170_v41 = vpop.f32.mrb[16].mxu0 }
 0x323   : > { %v5432_v16 = vor.u32 %v5430_v48, %v16551_v18  ;;  %v5433_v23 = vrot.slane %v16551_v18, 4  ;;  %v5452_v20 = vshrl.u32 %v12442_v59, 16  ;;  %v5455_v24 = vshll.u32 %v12442_v59, 16  ;;  %v16559_v44 = vpop.f32.mrb[17].mxu0  ;;  %v5716_v35 = vld [vmem:[#allocation2 + $0x44] sm:$0x1] }
 0x324   : > { %v5720_v51 = vsel %vm16491_vm0, %v5449_v5, %v5719_v28  ;;  %vm5165_vm14 = vcmp.gt.f32.partialorder %v5133_v4, 0.0  ;;  %v5204_v34 = vmul.f32 %v16477_v57, %v5133_v4  ;;  %vm5170_vm15 = vcmp.gt.f32.partialorder %v5138_v10, 0.0  ;;  %v16564_v6 = vpop.f32.mrb[18].mxu0  ;;  %v5733_v8 = vld [vmem:[#allocation2 + $0x60] sm:$0xf] }
 0x325   : > { %5721 = vst [vmem:[#allocation2 + $0x48] sm:$0xf] %v5720_v51  ;;  %v5713_v27 = vsel %vm16491_vm0, %v5432_v16, %v5712_v17  ;;  %v5454_v45 = vrot.slane %v5452_v20, 7  ;;  %v5209_v30 = vmul.f32 %v16477_v57, %v5138_v10  ;;  %v5136_v2 = vadd.f32 %v16472_v58, %v5006_v47  ;;  %v16570_v14 = vpop.f32.mrb[19].mxu0 }
 0x326   : > { %5714 = vst [vmem:[#allocation2 + $0x3c] sm:$0xf] %v5713_v27  ;;  %v5236_v62 = vsel %vm5165_vm14, %v5133_v4, %v5204_v34  ;;  %v5139_v11 = vadd.f32 %v13167_v49, %v16472_v58  ;;  %v5137_v36 = vadd.f32 %v16472_v58, %v5009_v52  ;;  %v5142_v50 = vadd.f32 %v13170_v41, %v16472_v58  ;;  %v5726_v41 = vld [vmem:[#allocation2 + $0x54] sm:$0xf]  ;;  %v5798_v27 = vld [vmem:[#allocation2 + $0xc] sm:$0xf] }
 0x327   : > { %v5457_v7 = vor.u32 %v5455_v24, %v5454_v45  ;;  %v5459_v22 = vrot.slane %v5454_v45, 4  ;;  %v12440_v1 = vpack.c.bf16 %v5236_v62, %v5236_v62  ;;  %v5241_v60 = vsel %vm5170_vm15, %v5138_v10, %v5209_v30 }
 0x328   : > { %v12445_v53 = vpack.c.bf16 %v5241_v60, %v5241_v60  ;;  %vm5168_vm1 = vcmp.gt.f32.partialorder %v5136_v2, 0.0  ;;  %v5207_v47 = vmul.f32 %v16477_v57, %v5136_v2  ;;  %vm5171_vm9 = vcmp.gt.f32.partialorder %v5139_v11, 0.0 }
 0x329   : > { %v5458_v15 = vsel %vm16497_vm4, %v5450_v39, %v5457_v7  ;;  %v5724_v49 = vsel %vm16504_vm5, %v5459_v22, %v5723_v19  ;;  %v5435_v61 = vshrl.u32 %v12440_v1, 16  ;;  %v5438_v40 = vshll.u32 %v12440_v1, 16 }
 0x32a   : > { %5722 = vst.msk [vmem:[#allocation2 + $0x4c] sm:$0xf] %vm251_vm7, %v5458_v15  ;;  %5725 = vst [vmem:[#allocation2 + $0x50] sm:$0x1] %v5724_v49  ;;  %v5478_v13 = vshrl.u32 %v12445_v53, 16  ;;  %v5481_v38 = vshll.u32 %v12445_v53, 16  ;;  %v5239_v12 = vsel %vm5168_vm1, %v5136_v2, %v5207_v47  ;;  %v5210_v52 = vmul.f32 %v16477_v57, %v5139_v11 }
 0x32b   : > { %v16583_v21 = vpop.f32.mrb[20].mxu0  ;;  %v5437_v54 = vrot.slane %v5435_v61, 7  ;;  %v12443_v43 = vpack.c.bf16 %v5239_v12, %v5239_v12  ;;  %vm5169_vm8 = vcmp.gt.f32.partialorder %v5137_v36, 0.0  ;;  %v5208_v25 = vmul.f32 %v16477_v57, %v5137_v36 }
 0x32c   : > { %v16586_v56 = vpop.f32.mrb[21].mxu0  ;;  %v5480_v9 = vrot.slane %v5478_v13, 7  ;;  %v5242_v42 = vsel %vm5171_vm9, %v5139_v11, %v5210_v52  ;;  %vm5174_vm10 = vcmp.gt.f32.partialorder %v5142_v50, 0.0  ;;  %v5213_v48 = vmul.f32 %v16477_v57, %v5142_v50 }
 0x32d   : > { %v16590_v0 = vpop.f32.mrb[22].mxu0  ;;  %v5440_v55 = vor.u32 %v5438_v40, %v5437_v54  ;;  %v5442_v37 = vrot.slane %v5437_v54, 4  ;;  %v5461_v63 = vshrl.u32 %v12443_v43, 16  ;;  %v5464_v26 = vshll.u32 %v12443_v43, 16 }
 0x32e   : > { %v16592_v28 = vpop.f32.mrb[23].mxu0  ;;  %v5483_v18 = vor.u32 %v5481_v38, %v5480_v9  ;;  %v5484_v59 = vrot.slane %v5480_v9, 4  ;;  %v12446_v5 = vpack.c.bf16 %v5242_v42, %v5242_v42  ;;  %v5240_v39 = vsel %vm5169_vm8, %v5137_v36, %v5208_v25  ;;  %v5747_v9 = vld [vmem:[#allocation2 + $0x78] sm:$0xf] }
 0x32f   : > { %v5441_v17 = vsel %vm16497_vm4, %v5433_v23, %v5440_v55  ;;  %v5717_v4 = vsel %vm16504_vm5, %v5442_v37, %v5716_v35  ;;  %v5463_v10 = vrot.slane %v5461_v63, 7  ;;  %v12444_v16 = vpack.c.bf16 %v5240_v39, %v5240_v39 }
 0x330   : > { %5715 = vst.msk [vmem:[#allocation2 + $0x40] sm:$0xf] %vm251_vm7, %v5441_v17  ;;  %5718 = vst [vmem:[#allocation2 + $0x44] sm:$0x1] %v5717_v4  ;;  %v5734_v20 = vsel %vm16491_vm0, %v5483_v18, %v5733_v8  ;;  %v5486_v24 = vshrl.u32 %v12446_v5, 16  ;;  %v5489_v51 = vshll.u32 %v12446_v5, 16  ;;  %v5245_v34 = vsel %vm5174_vm10, %v5142_v50, %v5213_v48 }
 0x331   : > { %5735 = vst [vmem:[#allocation2 + $0x60] sm:$0xf] %v5734_v20  ;;  %v5466_v45 = vor.u32 %v5464_v26, %v5463_v10  ;;  %v5467_v23 = vrot.slane %v5463_v10, 4  ;;  %v5469_v30 = vshrl.u32 %v12444_v16, 16  ;;  %v5472_v2 = vshll.u32 %v12444_v16, 16 }
 0x332   : > { %v5488_v19 = vrot.slane %v5486_v24, 7  ;;  %v12449_v62 = vpack.c.bf16 %v5245_v34, %v5245_v34  ;;  %v5140_v11 = vadd.f32 %v16472_v58, %v16559_v44  ;;  %v5143_v36 = vadd.f32 %v16564_v6, %v16472_v58  ;;  %v16607_v7 = vpop.f32.mrb[24].mxu0  ;;  %v5737_v50 = vld [vmem:[#allocation2 + $0x68] sm:$0x1]  ;;  %v5730_v44 = vld [vmem:[#allocation2 + $0x5c] sm:$0x1] }
 0x333   : > { %v5727_v22 = vsel %vm16491_vm0, %v5466_v45, %v5726_v41  ;;  %v5471_v1 = vrot.slane %v5469_v30, 7  ;;  %v5141_v60 = vadd.f32 %v16472_v58, %v16570_v14  ;;  %v5877_v53 = vshrl.u32 %v5798_v27, 16  ;;  %v16613_v47 = vpop.f32.mrb[25].mxu0  ;;  %v5799_v8 = vld [vmem:[#allocation2 + $0x10] sm:$0xf] }
 0x334   : > { %5728 = vst [vmem:[#allocation2 + $0x54] sm:$0xf] %v5727_v22  ;;  %v5491_v15 = vor.u32 %v5489_v51, %v5488_v19  ;;  %v5493_v49 = vrot.slane %v5488_v19, 4  ;;  %v5512_v61 = vshrl.u32 %v12449_v62, 16  ;;  %v5515_v40 = vshll.u32 %v12449_v62, 16  ;;  %v16615_v6 = vpop.f32.mrb[26].mxu0 }
 0x335   : > { %v5474_v13 = vor.u32 %v5472_v2, %v5471_v1  ;;  %v5476_v38 = vrot.slane %v5471_v1, 4  ;;  %vm5172_vm11 = vcmp.gt.f32.partialorder %v5140_v11, 0.0  ;;  %v5211_v12 = vmul.f32 %v16477_v57, %v5140_v11  ;;  %v16618_v52 = vpop.f32.mrb[27].mxu0  ;;  %v5837_v4 = vld [vmem:[#allocation2 + $0x14] sm:$0x1] }
 0x336   : > { %v5492_v14 = vsel %vm16497_vm4, %v5484_v59, %v5491_v15  ;;  %v5738_v54 = vsel %vm16504_vm5, %v5493_v49, %v5737_v50  ;;  %v16624_v43 = vrot.slane %v5512_v61, 7  ;;  %vm5175_vm12 = vcmp.gt.f32.partialorder %v5143_v36, 0.0  ;;  %v5740_v41 = vld [vmem:[#allocation2 + $0x6c] sm:$0xf]  ;;  %v5751_v49 = vld [vmem:[#allocation2 + $0x80] sm:$0x1] }
 0x337   : > { %5736 = vst.msk [vmem:[#allocation2 + $0x64] sm:$0xf] %vm251_vm7, %v5492_v14  ;;  %5739 = vst [vmem:[#allocation2 + $0x68] sm:$0x1] %v5738_v54  ;;  %v5475_v25 = vsel %vm16497_vm4, %v5467_v23, %v5474_v13  ;;  %v5731_v35 = vsel %vm16504_vm5, %v5476_v38, %v5730_v44  ;;  %v5243_v42 = vsel %vm5172_vm11, %v5140_v11, %v5211_v12  ;;  %vm5173_vm13 = vcmp.gt.f32.partialorder %v5141_v60, 0.0 }
 0x338   : > { %v5214_v48 = vmul.f32 %v16477_v57, %v5143_v36  ;;  %5729 = vst.msk [vmem:[#allocation2 + $0x58] sm:$0xf] %vm251_vm7, %v5475_v25  ;;  %5732 = vst [vmem:[#allocation2 + $0x5c] sm:$0x1] %v5731_v35  ;;  %v5517_v55 = vor.u32 %v5515_v40, %v16624_v43  ;;  %v12447_v37 = vpack.c.bf16 %v5243_v42, %v5243_v42  ;;  %v5879_v18 = vrot.slane %v5877_v53, 4 }
 0x339   : > { %v5212_v26 = vmul.f32 %v16477_v57, %v5141_v60  ;;  %v5880_v59 = vshll.u32 %v5798_v27, 16  ;;  %v5886_v24 = vshll.u32 %v5799_v8, 16  ;;  %v5890_v51 = vshrl.u32 %v5799_v8, 16  ;;  %v5800_v54 = vld [vmem:[#allocation2 + $0x18] sm:$0xf] }
 0x33a   : > { %v5246_v63 = vsel %vm5175_vm12, %v5143_v36, %v5214_v48  ;;  %v5748_v5 = vsel %vm16491_vm0, %v5517_v55, %v5747_v9  ;;  %v5495_v39 = vshrl.u32 %v12447_v37, 16  ;;  %v16637_v10 = vpop.f32.mrb[28].mxu0  ;;  %v5498_v23 = vshll.u32 %v12447_v37, 16  ;;  %v5801_v25 = vld [vmem:[#allocation2 + $0x1c] sm:$0xf] }
 0x33b   : > { %v12450_v17 = vpack.c.bf16 %v5246_v63, %v5246_v63  ;;  %5749 = vst [vmem:[#allocation2 + $0x78] sm:$0xf] %v5748_v5  ;;  %v5244_v16 = vsel %vm5173_vm13, %v5141_v60, %v5212_v26  ;;  %v5882_v20 = vrot.slane %v5880_v59, 5  ;;  %v16639_v34 = vpop.f32.mrb[29].mxu0  ;;  %v5888_v62 = vrot.slane %v5886_v24, 5  ;;  %v14188_v24 = vld [vmem:[%s18731_s2 + $0x8] sm:$0xff]  }
 0x33c   : > { %v5497_v45 = vrot.slane %v5495_v39, 7  ;;  %v12448_v27 = vpack.c.bf16 %v5244_v16, %v5244_v16  ;;  %v16641_v2 = vpop.f32.mrb[30].mxu0  ;;  %v5892_v11 = vrot.slane %v5890_v51, 4  ;;  %v5896_v36 = vshll.u32 %v5837_v4, 16  ;;  %v5744_v9 = vld [vmem:[#allocation2 + $0x74] sm:$0x1] }
 0x33d   : > { %v5520_v30 = vshrl.u32 %v12450_v17, 16  ;;  %v5883_v19 = vor.u32 %v5882_v20, %v5879_v18  ;;  %v16643_v22 = vpop.f32.mrb[31].mxu0  ;;  %v5523_v60 = vshll.u32 %v12450_v17, 16  ;;  %v5518_v15 = vrot.slane %v16624_v43, 4  ;;  %v5838_v26 = vld [vmem:[#allocation2 + $0x20] sm:$0x1] }
 0x33e   : > { %v5500_v50 = vor.u32 %v5498_v23, %v5497_v45  ;;  %v5503_v53 = vshrl.u32 %v12448_v27, 16  ;;  %v5506_v44 = vshll.u32 %v12448_v27, 16  ;;  %v5893_v40 = vor.u32 %v5892_v11, %v5888_v62  ;;  %v16654_v18 = vld [vmem:[#allocation2 + $0x24] sm:$0xf]  ;;  %v9364_v3 = vld [vmem:[#allocation2 + $0x60] sm:$0xf] }
 0x33f   : > { %v5522_v1 = vrot.slane %v5520_v30, 7  ;;  %v5884_v61 = vrot.slane %v5883_v19, 4  ;;  %v5501_v35 = vrot.slane %v5497_v45, 4  ;;  %v5898_v43 = vrot.slane %v5896_v36, 5 }
 0x340   : > { %v5741_v13 = vsel %vm16491_vm0, %v5500_v50, %v5740_v41  ;;  %v5505_v14 = vrot.slane %v5503_v53, 7  ;;  %v5894_v48 = vrot.slane %v5893_v40, 4  ;;  %v5901_v5 = vshrl.u32 %v5800_v54, 16 }
 0x341   : > { %v5525_v38 = vor.u32 %v5523_v60, %v5522_v1  ;;  %v5527_v12 = vrot.slane %v5522_v1, 4  ;;  %5742 = vst [vmem:[#allocation2 + $0x6c] sm:$0xf] %v5741_v13  ;;  %v5889_v42 = vsel %vm14501_vm2, %v5884_v61, %v5888_v62  ;;  %v5904_v39 = vshll.u32 %v5800_v54, 16 }
 0x342   : > { %v5508_v8 = vor.u32 %v5506_v44, %v5505_v14  ;;  %v5510_v63 = vrot.slane %v5505_v14, 4  ;;  %v5899_v59 = vsel %vm14501_vm2, %v5894_v48, %v5898_v43  ;;  %v5910_v17 = vshll.u32 %v5801_v25, 16  ;;  %v16859_v32 = vld [vmem:[#allocation2 + $0x78] sm:$0xf] }
 0x343   : > { %v5526_v55 = vsel %vm16497_vm4, %v5518_v15, %v5525_v38  ;;  %v5752_v37 = vsel %vm16504_vm5, %v5527_v12, %v5751_v49  ;;  %v11950_v16 = vcombine.low %v5889_v42, %v5899_v59  ;;  %v5914_v20 = vshrl.u32 %v5801_v25, 16 }
 0x344   : > { %5750 = vst.msk [vmem:[#allocation2 + $0x7c] sm:$0xf] %vm251_vm7, %v5526_v55  ;;  %5753 = vst [vmem:[#allocation2 + $0x80] sm:$0x1] %v5752_v37  ;;  %v5509_v4 = vsel %vm16497_vm4, %v5501_v35, %v5508_v8  ;;  %v5745_v41 = vsel %vm16504_vm5, %v5510_v63, %v5744_v9  ;;  %v5903_v51 = vrot.slane %v5901_v5, 4  ;;  %v5906_v45 = vrot.slane %v5904_v39, 5 }
 0x345   : > { %5743 = vst.msk [vmem:[#allocation2 + $0x70] sm:$0xf] %vm251_vm7, %v5509_v4  ;;  %5746 = vst [vmem:[#allocation2 + $0x74] sm:$0x1] %v5745_v41  ;;  %v5912_v23 = vrot.slane %v5910_v17, 5  ;;  %v5920_v30 = vshll.u32 %v5838_v26, 16  ;;  %13193 = vmatmul.mubr.msk.bf16.vlgmr.msra.gmra.mrb[0].mxu1 %vm831_vm3, %v11950_v16  ;;  %v5146_v19 = vadd.f32 %v16583_v21, %v16472_v58  ;;  %v5144_v62 = vadd.f32 %v16472_v58, %v16586_v56 }
 0x346   : > { %v5916_v27 = vrot.slane %v5914_v20, 4  ;;  %v5147_v11 = vadd.f32 %v16590_v0, %v16472_v58  ;;  %13225 = vmatpush3.bf16.msra.mxu1 %v16466_v33  ;;  %v5907_v36 = vor.u32 %v5906_v45, %v5903_v51  ;;  %v5145_v1 = vadd.f32 %v16472_v58, %v16592_v28  ;;  %v14189_v21 = vld [vmem:[%s18731_s2 + $0x10] sm:$0xff]   ;;  %v14190_v35 = vld [vmem:[%s18731_s2 + $0x18] sm:$0xff]   ;;  %v16692_v55 = vld [vmem:[#allocation2 + $0x28] sm:$0xf] }
 0x347   : > { %v5922_v50 = vrot.slane %v5920_v30, 5  ;;  %v5925_v60 = vshrl.u32 %v16654_v18, 16  ;;  %vm5178_vm14 = vcmp.gt.f32.partialorder %v5146_v19, 0.0  ;;  %v5217_v15 = vmul.f32 %v16477_v57, %v5146_v19  ;;  %13226 = vmatprep.subr.bf16.mxu1 %v14188_v24  ;;  %v5761_v37 = vld [vmem:[#allocation2 + $0x90] sm:$0xf]  ;;  %v16700_v30 = vld [vmem:[%s18731_s2 + $0x40] sm:$0xff]  }
 0x348   : > { %v5917_v53 = vor.u32 %v5916_v27, %v5912_v23  ;;  %vm5176_vm15 = vcmp.gt.f32.partialorder %v5144_v62, 0.0  ;;  %v5908_v56 = vrot.slane %v5907_v36, 4  ;;  %v5215_v33 = vmul.f32 %v16477_v57, %v5144_v62  ;;  %v5754_v39 = vld [vmem:[#allocation2 + $0x84] sm:$0xf]  ;;  %v5765_v17 = vld [vmem:[#allocation2 + $0x98] sm:$0x1] }
 0x349   : > { %vm5179_vm1 = vcmp.gt.f32.partialorder %v5147_v11, 0.0  ;;  %v5218_v0 = vmul.f32 %v16477_v57, %v5147_v11  ;;  %v5249_v28 = vsel %vm5178_vm14, %v5146_v19, %v5217_v15  ;;  %vm5177_vm9 = vcmp.gt.f32.partialorder %v5145_v1, 0.0  ;;  %v5758_v51 = vld [vmem:[#allocation2 + $0x8c] sm:$0x1]  ;;  %v16703_v36 = vld [vmem:[#allocation2 + $0x30] sm:$0xf] }
 0x34a   : > { %v5918_v49 = vrot.slane %v5917_v53, 4  ;;  %v5216_v44 = vmul.f32 %v16477_v57, %v5145_v1  ;;  %v5913_v61 = vsel %vm14501_vm2, %v5908_v56, %v5912_v23  ;;  %v12453_v40 = vpack.c.bf16 %v5249_v28, %v5249_v28  ;;  %13227 = vmatpush3.bf16.msra.mxu1 %v14188_v24 }
 0x34b   : > { %v5247_v13 = vsel %vm5176_vm15, %v5144_v62, %v5215_v33  ;;  %v5250_v38 = vsel %vm5179_vm1, %v5147_v11, %v5218_v0  ;;  %13228 = vmatprep.subr.bf16.mxu1 %v14189_v21  ;;  %v5927_v16 = vrot.slane %v5925_v60, 4  ;;  %v5928_v45 = vshll.u32 %v16654_v18, 16  ;;  %v16705_v18 = vld [vmem:[#allocation2 + $0x34] sm:$0xf]  ;;  %v5839_v33 = vld [vmem:[#allocation2 + $0x2c] sm:$0x1] }
 0x34c   : > { %v5923_v12 = vsel %vm14501_vm2, %v5918_v49, %v5922_v50  ;;  %v12451_v14 = vpack.c.bf16 %v5247_v13, %v5247_v13  ;;  %v12454_v54 = vpack.c.bf16 %v5250_v38, %v5250_v38  ;;  %v5248_v25 = vsel %vm5177_vm9, %v5145_v1, %v5216_v44 }
 0x34d   : > { %v11951_v9 = vcombine.low %v5913_v61, %v5923_v12  ;;  %v5546_v42 = vshrl.u32 %v12453_v40, 16  ;;  %v5549_v48 = vshll.u32 %v12453_v40, 16  ;;  %v12452_v43 = vpack.c.bf16 %v5248_v25, %v5248_v25  ;;  %v5840_v40 = vld [vmem:[#allocation2 + $0x38] sm:$0x1] }
 0x34e   : > { %v5529_v8 = vshrl.u32 %v12451_v14, 16  ;;  %v5532_v63 = vshll.u32 %v12451_v14, 16  ;;  %v5554_v26 = vshrl.u32 %v12454_v54, 16  ;;  %v5557_v59 = vshll.u32 %v12454_v54, 16  ;;  %13229 = vmatpush3.bf16.msra.mxu1 %v14189_v21 }
 0x34f   : > { %13196 = vmatprep.mubr.msk.bf16.mxu1 %vm831_vm3, %v11951_v9  ;;  %v5548_v5 = vrot.slane %v5546_v42, 7  ;;  %v5537_v4 = vshrl.u32 %v12452_v43, 16  ;;  %v5540_v41 = vshll.u32 %v12452_v43, 16  ;;  %v5934_v23 = vshll.u32 %v16692_v55, 16  ;;  %13230 = vmatprep.subr.bf16.mxu1 %v14190_v35 }
 0x350   : > { %v5531_v20 = vrot.slane %v5529_v8, 7  ;;  %v5556_v24 = vrot.slane %v5554_v26, 7  ;;  %v5938_v11 = vshrl.u32 %v16692_v55, 16  ;;  %v5930_v0 = vrot.slane %v5928_v45, 5 }
 0x351   : > { %v5551_v27 = vor.u32 %v5549_v48, %v5548_v5  ;;  %v5552_v19 = vrot.slane %v5548_v5, 4  ;;  %v5539_v62 = vrot.slane %v5537_v4, 7  ;;  %v5936_v61 = vrot.slane %v5934_v23, 5  ;;  %v16726_v5 = vld [vmem:[#allocation2 + $0x3c] sm:$0xf] }
 0x352   : > { %v5534_v50 = vor.u32 %v5532_v63, %v5531_v20  ;;  %v5535_v1 = vrot.slane %v5531_v20, 4  ;;  %v5559_v60 = vor.u32 %v5557_v59, %v5556_v24  ;;  %v5561_v53 = vrot.slane %v5556_v24, 4  ;;  %13231 = vmatpush3.bf16.msra.mxu1 %v14190_v35 }
 0x353   : > { %v5762_v15 = vsel %vm16491_vm0, %v5551_v27, %v5761_v37  ;;  %v5542_v21 = vor.u32 %v5540_v41, %v5539_v62  ;;  %v5544_v56 = vrot.slane %v5539_v62, 4  ;;  %13264 = vmatprep.subr.bf16.mxu1 %v16700_v30  ;;  %v5931_v12 = vor.u32 %v5930_v0, %v5927_v16 }
 0x354   : > { %5763 = vst [vmem:[#allocation2 + $0x90] sm:$0xf] %v5762_v15  ;;  %v5755_v49 = vsel %vm16491_vm0, %v5534_v50, %v5754_v39  ;;  %v5560_v28 = vsel %vm16497_vm4, %v5552_v19, %v5559_v60  ;;  %v5766_v44 = vsel %vm16504_vm5, %v5561_v53, %v5765_v17  ;;  %v5940_v14 = vrot.slane %v5938_v11, 4 }
 0x355   : > { %5756 = vst [vmem:[#allocation2 + $0x84] sm:$0xf] %v5755_v49  ;;  %5764 = vst.msk [vmem:[#allocation2 + $0x94] sm:$0xf] %vm251_vm7, %v5560_v28  ;;  %v5543_v13 = vsel %vm16497_vm4, %v5535_v1, %v5542_v21  ;;  %v5759_v38 = vsel %vm16504_vm5, %v5544_v56, %v5758_v51  ;;  %v5944_v54 = vshll.u32 %v5839_v33, 16  ;;  %v5949_v25 = vshrl.u32 %v16703_v36, 16 }
 0x356   : > { %5767 = vst [vmem:[#allocation2 + $0x98] sm:$0x1] %v5766_v44  ;;  %5757 = vst.msk [vmem:[#allocation2 + $0x88] sm:$0xf] %vm251_vm7, %v5543_v13  ;;  %v5952_v35 = vshll.u32 %v16703_v36, 16  ;;  %v5958_v9 = vshll.u32 %v16705_v18, 16  ;;  %v5941_v48 = vor.u32 %v5940_v14, %v5936_v61  ;;  %v5150_v20 = vadd.f32 %v16607_v7, %v16472_v58 }
 0x357   : > { %5760 = vst [vmem:[#allocation2 + $0x8c] sm:$0x1] %v5759_v38  ;;  %v5932_v42 = vrot.slane %v5931_v12, 4  ;;  %v5962_v43 = vshrl.u32 %v16705_v18, 16  ;;  %v5968_v37 = vshll.u32 %v5840_v40, 16  ;;  %v5946_v8 = vrot.slane %v5944_v54, 5 }
 0x358   : > { %v5951_v63 = vrot.slane %v5949_v25, 4  ;;  %v5954_v26 = vrot.slane %v5952_v35, 5  ;;  %v5960_v59 = vrot.slane %v5958_v9, 5  ;;  %v5942_v17 = vrot.slane %v5941_v48, 4  ;;  %v16755_v21 = vld [vmem:[#allocation2 + $0x40] sm:$0xf] }
 0x359   : > { %v5937_v39 = vsel %vm14501_vm2, %v5932_v42, %v5936_v61  ;;  %v5964_v4 = vrot.slane %v5962_v43, 4  ;;  %v5970_v41 = vrot.slane %v5968_v37, 5  ;;  %v5148_v24 = vadd.f32 %v16472_v58, %v16613_v47  ;;  %v5775_v42 = vld [vmem:[#allocation2 + $0xa8] sm:$0xf] }
 0x35a   : > { %v5955_v16 = vor.u32 %v5954_v26, %v5951_v63  ;;  %v5151_v51 = vadd.f32 %v16615_v6, %v16472_v58  ;;  %v5947_v45 = vsel %vm14501_vm2, %v5942_v17, %v5946_v8  ;;  %v5149_v27 = vadd.f32 %v16472_v58, %v16618_v52  ;;  %v16749_v58 = vld [vmem:[%s18733_s4] ss:$0 sm:$0xff] }
 0x35b   : > { %v5965_v23 = vor.u32 %v5964_v4, %v5960_v59  ;;  %v5973_v19 = vshrl.u32 %v16726_v5, 16  ;;  %v11952_v62 = vcombine.low %v5937_v39, %v5947_v45  ;;  %vm5182_vm8 = vcmp.gt.f32.partialorder %v5150_v20, 0.0 }
 0x35c   : > { %v5956_v11 = vrot.slane %v5955_v16, 4  ;;  %v5221_v7 = vmul.f32 %v16477_v57, %v5150_v20  ;;  %vm5180_vm10 = vcmp.gt.f32.partialorder %v5148_v24, 0.0  ;;  %v5219_v47 = vmul.f32 %v16477_v57, %v5148_v24  ;;  %v5779_v16 = vld [vmem:[#allocation2 + $0xb0] sm:$0x1] }
 0x35d   : > { %v5966_v50 = vrot.slane %v5965_v23, 4  ;;  %vm5183_vm11 = vcmp.gt.f32.partialorder %v5151_v51, 0.0  ;;  %13197 = vmatmul.mubr.msk.bf16.gmra.mrb[4].mxu1 %vm831_vm3, %v11952_v62  ;;  %v5222_v52 = vmul.f32 %v16749_v58, %v5151_v51  ;;  %vm5181_vm12 = vcmp.gt.f32.partialorder %v5149_v27, 0.0 }
 0x35e   : > { %v5961_v6 = vsel %vm14501_vm2, %v5956_v11, %v5960_v59  ;;  %v5253_v1 = vsel %vm5182_vm8, %v5150_v20, %v5221_v7  ;;  %v5251_v57 = vsel %vm5180_vm10, %v5148_v24, %v5219_v47  ;;  %v5220_v15 = vmul.f32 %v16749_v58, %v5149_v27  ;;  %v5768_v59 = vld [vmem:[#allocation2 + $0x9c] sm:$0xf]  ;;  %v16760_v24 = vld [vmem:[#allocation2 + $0x44] sm:$0x1]  ;;  %v16765_v11 = vld [vmem:[#allocation2 + $0x48] sm:$0xf] }
 0x35f   : > { %v5971_v60 = vsel %vm14501_vm2, %v5966_v50, %v5970_v41  ;;  %v12457_v53 = vpack.c.bf16 %v5253_v1, %v5253_v1  ;;  %v12455_v33 = vpack.c.bf16 %v5251_v57, %v5251_v57  ;;  %v5254_v0 = vsel %vm5183_vm11, %v5151_v51, %v5222_v52  ;;  %v16769_v1 = vld [vmem:[#allocation2 + $0x4c] sm:$0xf] }
 0x360   : > { %v11953_v56 = vcombine.low %v5961_v6, %v5971_v60  ;;  %v5975_v49 = vrot.slane %v5973_v19, 4  ;;  %v12458_v61 = vpack.c.bf16 %v5254_v0, %v5254_v0  ;;  %v5252_v40 = vsel %vm5181_vm12, %v5149_v27, %v5220_v15  ;;  %v5772_v19 = vld [vmem:[#allocation2 + $0xa4] sm:$0x1]  ;;  %v16776_v15 = vld [vmem:[#allocation2 + $0x50] sm:$0x1] }
 0x361   : > { %v5580_v28 = vshrl.u32 %v12457_v53, 16  ;;  %v5583_v44 = vshll.u32 %v12457_v53, 16  ;;  %v5563_v13 = vshrl.u32 %v12455_v33, 16  ;;  %v5566_v38 = vshll.u32 %v12455_v33, 16 }
 0x362   : > { %13200 = vmatprep.mubr.msk.bf16.mxu1 %vm831_vm3, %v11953_v56  ;;  %v12456_v12 = vpack.c.bf16 %v5252_v40, %v5252_v40  ;;  %v5976_v14 = vshll.u32 %v16726_v5, 16  ;;  %v5588_v25 = vshrl.u32 %v12458_v61, 16  ;;  %v5591_v35 = vshll.u32 %v12458_v61, 16 }
 0x363   : > { %v5582_v54 = vrot.slane %v5580_v28, 7  ;;  %v5982_v9 = vshll.u32 %v16755_v21, 16  ;;  %v5565_v48 = vrot.slane %v5563_v13, 7  ;;  %v5986_v62 = vshrl.u32 %v16755_v21, 16 }
 0x364   : > { %v5571_v43 = vshrl.u32 %v12456_v12, 16  ;;  %v5574_v37 = vshll.u32 %v12456_v12, 16  ;;  %v5978_v8 = vrot.slane %v5976_v14, 5  ;;  %v5590_v39 = vrot.slane %v5588_v25, 7  ;;  %v14267_v14 = vld [vmem:[%s18732_s3] ss:$0 sm:$0xff] }
 0x365   : > { %v5585_v63 = vor.u32 %v5583_v44, %v5582_v54  ;;  %v5586_v26 = vrot.slane %v5582_v54, 4  ;;  %v5984_v17 = vrot.slane %v5982_v9, 5  ;;  %v5568_v4 = vor.u32 %v5566_v38, %v5565_v48 }
 0x366   : > { %v5569_v41 = vrot.slane %v5565_v48, 4  ;;  %v5573_v20 = vrot.slane %v5571_v43, 7  ;;  %v5979_v51 = vor.u32 %v5978_v8, %v5975_v49  ;;  %v5593_v23 = vor.u32 %v5591_v35, %v5590_v39 }
 0x367   : > { %v5776_v45 = vsel %vm16491_vm0, %v5585_v63, %v5775_v42  ;;  %v5595_v27 = vrot.slane %v5590_v39, 4  ;;  %v5769_v7 = vsel %vm16491_vm0, %v5568_v4, %v5768_v59  ;;  %v5988_v53 = vrot.slane %v5986_v62, 4 }
 0x368   : > { %5777 = vst [vmem:[#allocation2 + $0xa8] sm:$0xf] %v5776_v45  ;;  %v5576_v50 = vor.u32 %v5574_v37, %v5573_v20  ;;  %v5578_v47 = vrot.slane %v5573_v20, 4  ;;  %v5980_v6 = vrot.slane %v5979_v51, 4  ;;  %5770 = vst [vmem:[#allocation2 + $0x9c] sm:$0xf] %v5769_v7  ;;  %v5594_v52 = vsel %vm16497_vm4, %v5586_v26, %v5593_v23 }
 0x369   : > { %v5780_v60 = vsel %vm16504_vm5, %v5595_v27, %v5779_v16  ;;  %v5992_v57 = vshll.u32 %v16760_v24, 16  ;;  %5778 = vst.msk [vmem:[#allocation2 + $0xac] sm:$0xf] %vm251_vm7, %v5594_v52  ;;  %v5997_v49 = vshrl.u32 %v16765_v11, 16  ;;  %v5989_v28 = vor.u32 %v5988_v53, %v5984_v17  ;;  %v16804_v23 = vld [vmem:[#allocation2 + $0x54] sm:$0xf] }
 0x36a   : > { %5781 = vst [vmem:[#allocation2 + $0xb0] sm:$0x1] %v5780_v60  ;;  %v5577_v56 = vsel %vm16497_vm4, %v5569_v41, %v5576_v50  ;;  %v5773_v33 = vsel %vm16504_vm5, %v5578_v47, %v5772_v19  ;;  %v5985_v0 = vsel %vm14501_vm2, %v5980_v6, %v5984_v17  ;;  %v6000_v61 = vshll.u32 %v16765_v11, 16  ;;  %v16806_v27 = vld [vmem:[#allocation2 + $0x58] sm:$0xf] }
 0x36b   : > { %5771 = vst.msk [vmem:[#allocation2 + $0xa0] sm:$0xf] %vm251_vm7, %v5577_v56  ;;  %5774 = vst [vmem:[#allocation2 + $0xa4] sm:$0x1] %v5773_v33  ;;  %v5994_v44 = vrot.slane %v5992_v57, 5  ;;  %v6006_v40 = vshll.u32 %v16769_v1, 16  ;;  %v5154_v54 = vadd.f32 %v14267_v14, %v16637_v10  ;;  %v5152_v42 = vadd.f32 %v14267_v14, %v16639_v34 }
 0x36c   : > { %v5999_v13 = vrot.slane %v5997_v49, 4  ;;  %v6010_v38 = vshrl.u32 %v16769_v1, 16  ;;  %v6016_v12 = vshll.u32 %v16776_v15, 16  ;;  %v5990_v25 = vrot.slane %v5989_v28, 4  ;;  %v5789_v60 = vld [vmem:[#allocation2 + $0xc0] sm:$0xf] }
 0x36d   : > { %v6002_v35 = vrot.slane %v6000_v61, 5  ;;  %v6008_v9 = vrot.slane %v6006_v40, 5  ;;  %vm5186_vm13 = vcmp.gt.f32.partialorder %v5154_v54, 0.0  ;;  %v5225_v37 = vmul.f32 %v16749_v58, %v5154_v54  ;;  %v5782_v33 = vld [vmem:[#allocation2 + $0xb4] sm:$0xf] }
 0x36e   : > { %v6012_v48 = vrot.slane %v6010_v38, 4  ;;  %v6018_v43 = vrot.slane %v6016_v12, 5  ;;  %v5995_v8 = vsel %vm14501_vm2, %v5990_v25, %v5994_v44  ;;  %vm5184_vm14 = vcmp.gt.f32.partialorder %v5152_v42, 0.0  ;;  %v16817_v38 = vld [vmem:[#allocation2 + $0x5c] sm:$0x1] }
 0x36f   : > { %v6003_v63 = vor.u32 %v6002_v35, %v5999_v13  ;;  %v5223_v26 = vmul.f32 %v16749_v58, %v5152_v42  ;;  %v11954_v59 = vcombine.low %v5985_v0, %v5995_v8  ;;  %v5257_v10 = vsel %vm5186_vm13, %v5154_v54, %v5225_v37  ;;  %v5793_v37 = vld [vmem:[#allocation2 + $0xc8] sm:$0x1] }
 0x370   : > { %v6013_v39 = vor.u32 %v6012_v48, %v6008_v9  ;;  %v5155_v17 = vadd.f32 %v14267_v14, %v16641_v2  ;;  %v12461_v41 = vpack.c.bf16 %v5257_v10, %v5257_v10  ;;  %v5153_v16 = vadd.f32 %v14267_v14, %v16643_v22  ;;  %v16822_v48 = vld [vmem:[#allocation2 + $0x60] sm:$0xf] }
 0x371   : > { %v6004_v4 = vrot.slane %v6003_v63, 4  ;;  %v5255_v34 = vsel %vm5184_vm14, %v5152_v42, %v5223_v26  ;;  %13201 = vmatmul.mubr.msk.bf16.gmra.mrb[8].mxu1 %vm831_vm3, %v11954_v59  ;;  %v6021_v0 = vshrl.u32 %v16804_v23, 16  ;;  %v6024_v49 = vshll.u32 %v16804_v23, 16 }
 0x372   : > { %v6014_v20 = vrot.slane %v6013_v39, 4  ;;  %v12459_v51 = vpack.c.bf16 %v5255_v34, %v5255_v34  ;;  %vm5187_vm15 = vcmp.gt.f32.partialorder %v5155_v17, 0.0  ;;  %v5226_v45 = vmul.f32 %v16749_v58, %v5155_v17 }
 0x373   : > { %v6009_v19 = vsel %vm14501_vm2, %v6004_v4, %v6008_v9  ;;  %v5614_v2 = vshrl.u32 %v12461_v41, 16  ;;  %v5617_v62 = vshll.u32 %v12461_v41, 16  ;;  %vm5185_vm1 = vcmp.gt.f32.partialorder %v5153_v16, 0.0  ;;  %v16828_v4 = vld [vmem:[#allocation2 + $0x64] sm:$0xf] }
 0x374   : > { %v6019_v22 = vsel %vm14501_vm2, %v6014_v20, %v6018_v43  ;;  %v5597_v7 = vshrl.u32 %v12459_v51, 16  ;;  %v5600_v50 = vshll.u32 %v12459_v51, 16  ;;  %v5258_v47 = vsel %vm5187_vm15, %v5155_v17, %v5226_v45  ;;  %v5786_v41 = vld [vmem:[#allocation2 + $0xbc] sm:$0x1]  ;;  %v16830_v51 = vld [vmem:[#allocation2 + $0x68] sm:$0x1] }
 0x375   : > { %v11955_v6 = vcombine.low %v6009_v19, %v6019_v22  ;;  %v5616_v52 = vrot.slane %v5614_v2, 7  ;;  %v12462_v53 = vpack.c.bf16 %v5258_v47, %v5258_v47  ;;  %v5224_v57 = vmul.f32 %v16749_v58, %v5153_v16  ;;  %v16838_v22 = vld [vmem:[#allocation2 + $0x6c] sm:$0xf] }
 0x376   : > { %v5599_v56 = vrot.slane %v5597_v7, 7  ;;  %v6030_v28 = vshll.u32 %v16806_v27, 16  ;;  %v6023_v54 = vrot.slane %v6021_v0, 4  ;;  %v6026_v42 = vrot.slane %v6024_v49, 5 }
 0x377   : > { %13204 = vmatprep.mubr.msk.bf16.mxu1 %vm831_vm3, %v11955_v6  ;;  %v5619_v44 = vor.u32 %v5617_v62, %v5616_v52  ;;  %v5620_v61 = vrot.slane %v5616_v52, 4  ;;  %v5622_v40 = vshrl.u32 %v12462_v53, 16  ;;  %v5625_v13 = vshll.u32 %v12462_v53, 16 }
 0x378   : > { %v5602_v12 = vor.u32 %v5600_v50, %v5599_v56  ;;  %v5603_v14 = vrot.slane %v5599_v56, 4  ;;  %v5256_v58 = vsel %vm5185_vm1, %v5153_v16, %v5224_v57  ;;  %v6032_v8 = vrot.slane %v6030_v28, 5  ;;  %v16846_v28 = vld [vmem:[#allocation2 + $0x70] sm:$0xf] }
 0x379   : > { %v5790_v25 = vsel %vm16491_vm0, %v5619_v44, %v5789_v60  ;;  %v5624_v35 = vrot.slane %v5622_v40, 7  ;;  %v12460_v9 = vpack.c.bf16 %v5256_v58, %v5256_v58  ;;  %v6034_v63 = vshrl.u32 %v16806_v27, 16 }
 0x37a   : > { %5791 = vst [vmem:[#allocation2 + $0xc0] sm:$0xf] %v5790_v25  ;;  %v5783_v43 = vsel %vm16491_vm0, %v5602_v12, %v5782_v33  ;;  %v6040_v26 = vshll.u32 %v16817_v38, 16  ;;  %v6027_v34 = vor.u32 %v6026_v42, %v6023_v54  ;;  %v6045_v31 = vshrl.u32 %v16822_v48, 16  ;;  %v16852_v12 = vld [vmem:[#allocation2 + $0x74] sm:$0x1] }
 0x37b   : > { %5784 = vst [vmem:[#allocation2 + $0xb4] sm:$0xf] %v5783_v43  ;;  %v5627_v59 = vor.u32 %v5625_v13, %v5624_v35  ;;  %v5629_v39 = vrot.slane %v5624_v35, 4  ;;  %v5605_v10 = vshrl.u32 %v12460_v9, 16  ;;  %v5608_v17 = vshll.u32 %v12460_v9, 16 }
 0x37c   : > { %v6036_v16 = vrot.slane %v6034_v63, 4  ;;  %v6042_v20 = vrot.slane %v6040_v26, 5  ;;  %v6048_v62 = vshll.u32 %v16822_v48, 16  ;;  %v6028_v7 = vrot.slane %v6027_v34, 4  ;;  %v16862_v43 = vld [vmem:[#allocation2 + $0x7c] sm:$0xf] }
 0x37d   : > { %v5628_v45 = vsel %vm16497_vm4, %v5620_v61, %v5627_v59  ;;  %v5794_v19 = vsel %vm16504_vm5, %v5629_v39, %v5793_v37  ;;  %v5607_v2 = vrot.slane %v5605_v10, 7  ;;  %v6047_v47 = vrot.slane %v6045_v31, 4  ;;  %v16866_v59 = vld [vmem:[#allocation2 + $0x80] sm:$0x1] }
 0x37e   : > { %5792 = vst.msk [vmem:[#allocation2 + $0xc4] sm:$0xf] %vm251_vm7, %v5628_v45  ;;  %5795 = vst [vmem:[#allocation2 + $0xc8] sm:$0x1] %v5794_v19  ;;  %v6037_v50 = vor.u32 %v6036_v16, %v6032_v8  ;;  %v6054_v6 = vshll.u32 %v16828_v4, 16  ;;  %v6050_v53 = vrot.slane %v6048_v62, 5  ;;  %v6033_v56 = vsel %vm14501_vm2, %v6028_v7, %v6032_v8 }
 0x37f   : > { %v5610_v52 = vor.u32 %v5608_v17, %v5607_v2  ;;  %v5612_v60 = vrot.slane %v5607_v2, 4  ;;  %v6058_v57 = vshrl.u32 %v16828_v4, 16  ;;  %v6064_v49 = vshll.u32 %v16830_v51, 16  ;;  %v16873_v45 = vld [vmem:[#allocation2 + $0x84] sm:$0xf] }
 0x380   : > { %v6038_v33 = vrot.slane %v6037_v50, 4  ;;  %v6056_v0 = vrot.slane %v6054_v6, 5  ;;  %v6051_v40 = vor.u32 %v6050_v53, %v6047_v47  ;;  %v6069_v25 = vshrl.u32 %v16838_v22, 16 }
 0x381   : > { %v5611_v44 = vsel %vm16497_vm4, %v5603_v14, %v5610_v52  ;;  %v5787_v61 = vsel %vm16504_vm5, %v5612_v60, %v5786_v41  ;;  %v6060_v13 = vrot.slane %v6058_v57, 4  ;;  %v6066_v54 = vrot.slane %v6064_v49, 5  ;;  %v16879_v60 = vld [vmem:[#allocation2 + $0x88] sm:$0xf] }
 0x382   : > { %5785 = vst.msk [vmem:[#allocation2 + $0xb8] sm:$0xf] %vm251_vm7, %v5611_v44  ;;  %5788 = vst [vmem:[#allocation2 + $0xbc] sm:$0x1] %v5787_v61  ;;  %v6043_v58 = vsel %vm14501_vm2, %v6038_v33, %v6042_v20  ;;  %v6072_v35 = vshll.u32 %v16838_v22, 16  ;;  %v6052_v46 = vrot.slane %v6051_v40, 4 }
 0x383   : > { %v11956_v14 = vcombine.low %v6033_v56, %v6043_v58  ;;  %v6061_v9 = vor.u32 %v6060_v13, %v6056_v0  ;;  %v6078_v42 = vshll.u32 %v16846_v28, 16  ;;  %v6071_v37 = vrot.slane %v6069_v25, 4  ;;  %v16886_v61 = vld [vmem:[#allocation2 + $0x8c] sm:$0x1] }
 0x384   : > { %v6074_v8 = vrot.slane %v6072_v35, 5  ;;  %v6082_v63 = vshrl.u32 %v16846_v28, 16  ;;  %v6088_v26 = vshll.u32 %v16852_v12, 16  ;;  %v6057_v39 = vsel %vm14501_vm2, %v6052_v46, %v6056_v0  ;;  %v16890_v35 = vld [vmem:[#allocation2 + $0x90] sm:$0xf] }
 0x385   : > { %13205 = vmatmul.mubr.msk.bf16.gmra.mrb[12].mxu1 %vm831_vm3, %v11956_v14  ;;  %v6062_v10 = vrot.slane %v6061_v9, 4  ;;  %v6080_v17 = vrot.slane %v6078_v42, 5  ;;  %v6093_v41 = vshrl.u32 %v16859_v32, 16  ;;  %v6096_v31 = vshll.u32 %v16859_v32, 16 }
 0x386   : > { %v6075_v34 = vor.u32 %v6074_v8, %v6071_v37  ;;  %v6084_v16 = vrot.slane %v6082_v63, 4  ;;  %v6090_v20 = vrot.slane %v6088_v26, 5  ;;  %v6102_v62 = vshll.u32 %v16862_v43, 16  ;;  %v16895_v37 = vld [vmem:[#allocation2 + $0x94] sm:$0xf] }
 0x387   : > { %v6067_v19 = vsel %vm14501_vm2, %v6062_v10, %v6066_v54  ;;  %v6095_v2 = vrot.slane %v6093_v41, 4  ;;  %v6106_v7 = vshrl.u32 %v16862_v43, 16  ;;  %v6098_v52 = vrot.slane %v6096_v31, 5  ;;  %v16898_v41 = vld [vmem:[#allocation2 + $0x98] sm:$0x1] }
 0x388   : > { %v11957_v50 = vcombine.low %v6057_v39, %v6067_v19  ;;  %v6076_v47 = vrot.slane %v6075_v34, 4  ;;  %v6085_v6 = vor.u32 %v6084_v16, %v6080_v17  ;;  %v6104_v53 = vrot.slane %v6102_v62, 5  ;;  %v16901_v16 = vld [vmem:[#allocation2 + $0x9c] sm:$0xf]  ;;  %v16910_v62 = vld [vmem:[#allocation2 + $0xa0] sm:$0xf] }
 0x389   : > { %v6108_v57 = vrot.slane %v6106_v7, 4  ;;  %v6112_v56 = vshll.u32 %v16866_v59, 16  ;;  %v6117_v33 = vshrl.u32 %v16873_v45, 16  ;;  %v6099_v44 = vor.u32 %v6098_v52, %v6095_v2 }
 0x38a   : > { %13208 = vmatprep.mubr.msk.bf16.mxu1 %vm831_vm3, %v11957_v50  ;;  %v6081_v0 = vsel %vm14501_vm2, %v6076_v47, %v6080_v17  ;;  %v6086_v49 = vrot.slane %v6085_v6, 4  ;;  %v6120_v40 = vshll.u32 %v16873_v45, 16  ;;  %v6126_v25 = vshll.u32 %v16879_v60, 16 }
 0x38b   : > { %v6109_v13 = vor.u32 %v6108_v57, %v6104_v53  ;;  %v6114_v58 = vrot.slane %v6112_v56, 5  ;;  %v6119_v54 = vrot.slane %v6117_v33, 4  ;;  %v6100_v46 = vrot.slane %v6099_v44, 4 }
 0x38c   : > { %v6091_v14 = vsel %vm14501_vm2, %v6086_v49, %v6090_v20  ;;  %v6122_v9 = vrot.slane %v6120_v40, 5  ;;  %v6130_v42 = vshrl.u32 %v16879_v60, 16  ;;  %v6128_v26 = vrot.slane %v6126_v25, 5  ;;  %v16921_v25 = vld [vmem:[#allocation2 + $0xa4] sm:$0x1] }
 0x38d   : > { %v11958_v8 = vcombine.low %v6081_v0, %v6091_v14  ;;  %v6110_v63 = vrot.slane %v6109_v13, 4  ;;  %v6136_v39 = vshll.u32 %v16886_v61, 16  ;;  %v6141_v34 = vshrl.u32 %v16890_v35, 16  ;;  %v16913_v0 = vld [vmem:[#allocation2 + $0xa8] sm:$0xf] }
 0x38e   : > { %v6123_v10 = vor.u32 %v6122_v9, %v6119_v54  ;;  %v6132_v17 = vrot.slane %v6130_v42, 4  ;;  %v6105_v20 = vsel %vm14501_vm2, %v6100_v46, %v6104_v53  ;;  %v6144_v19 = vshll.u32 %v16890_v35, 16 }
 0x38f   : > { %13209 = vmatmul.mubr.msk.bf16.gmra.mrb[16].mxu1 %vm831_vm3, %v11958_v8  ;;  %v6115_v31 = vsel %vm14501_vm2, %v6110_v63, %v6114_v58  ;;  %v6150_v2 = vshll.u32 %v16895_v37, 16  ;;  %v6143_v6 = vrot.slane %v6141_v34, 4  ;;  %v6138_v52 = vrot.slane %v6136_v39, 5  ;;  %v16927_v63 = vld [vmem:[#allocation2 + $0xac] sm:$0xf] }
 0x390   : > { %v11959_v7 = vcombine.low %v6105_v20, %v6115_v31  ;;  %v6124_v50 = vrot.slane %v6123_v10, 4  ;;  %v6133_v47 = vor.u32 %v6132_v17, %v6128_v26  ;;  %v6146_v57 = vrot.slane %v6144_v19, 5 }
 0x391   : > { %v6152_v56 = vrot.slane %v6150_v2, 5  ;;  %v6154_v33 = vshrl.u32 %v16895_v37, 16  ;;  %v6160_v49 = vshll.u32 %v16898_v41, 16  ;;  %v6165_v44 = vshrl.u32 %v16901_v16, 16 }
 0x392   : > { %13212 = vmatprep.mubr.msk.bf16.mxu1 %vm831_vm3, %v11959_v7  ;;  %v6134_v53 = vrot.slane %v6133_v47, 4  ;;  %v6168_v40 = vshll.u32 %v16901_v16, 16  ;;  %v6129_v13 = vsel %vm14501_vm2, %v6124_v50, %v6128_v26  ;;  %v6147_v58 = vor.u32 %v6146_v57, %v6143_v6  ;;  %v16932_v50 = vld [vmem:[#allocation2 + $0xb0] sm:$0x1] }
 0x393   : > { %v6156_v54 = vrot.slane %v6154_v33, 4  ;;  %v6174_v14 = vshll.u32 %v16910_v62, 16  ;;  %v6167_v9 = vrot.slane %v6165_v44, 4  ;;  %v6178_v8 = vshrl.u32 %v16910_v62, 16  ;;  %v16938_v44 = vld [vmem:[#allocation2 + $0xb4] sm:$0xf] }
 0x394   : > { %v6139_v46 = vsel %vm14501_vm2, %v6134_v53, %v6138_v52  ;;  %v6170_v42 = vrot.slane %v6168_v40, 5  ;;  %v6148_v10 = vrot.slane %v6147_v58, 4  ;;  %v6184_v31 = vshll.u32 %v16921_v25, 16 }
 0x395   : > { %v11960_v39 = vcombine.low %v6129_v13, %v6139_v46  ;;  %v6157_v17 = vor.u32 %v6156_v54, %v6152_v56  ;;  %v6176_v34 = vrot.slane %v6174_v14, 5  ;;  %v6180_v20 = vrot.slane %v6178_v8, 4  ;;  %v16943_v54 = vld [vmem:[#allocation2 + $0xb8] sm:$0xf] }
 0x396   : > { %v6171_v26 = vor.u32 %v6170_v42, %v6167_v9  ;;  %v6189_v19 = vshrl.u32 %v16913_v0, 16  ;;  %v6162_v7 = vrot.slane %v6160_v49, 5  ;;  %v6192_v47 = vshll.u32 %v16913_v0, 16 }
 0x397   : > { %13213 = vmatmul.mubr.msk.bf16.gmra.mrb[20].mxu1 %vm831_vm3, %v11960_v39  ;;  %v6158_v2 = vrot.slane %v6157_v17, 4  ;;  %v6198_v6 = vshll.u32 %v16927_v63, 16  ;;  %v6153_v52 = vsel %vm14501_vm2, %v6148_v10, %v6152_v56  ;;  %v6181_v33 = vor.u32 %v6180_v20, %v6176_v34  ;;  %v16946_v39 = vld [vmem:[#allocation2 + $0xbc] sm:$0x1] }
 0x398   : > { %v6172_v57 = vrot.slane %v6171_v26, 4  ;;  %v6191_v53 = vrot.slane %v6189_v19, 4  ;;  %v6194_v13 = vrot.slane %v6192_v47, 5  ;;  %v6202_v49 = vshrl.u32 %v16927_v63, 16 }
 0x399   : > { %v6163_v40 = vsel %vm14501_vm2, %v6158_v2, %v6162_v7  ;;  %v6200_v58 = vrot.slane %v6198_v6, 5  ;;  %v6182_v46 = vrot.slane %v6181_v33, 4  ;;  %v6186_v9 = vrot.slane %v6184_v31, 5 }
 0x39a   : > { %v11961_v14 = vcombine.low %v6153_v52, %v6163_v40  ;;  %v6208_v42 = vshll.u32 %v16932_v50, 16  ;;  %v6195_v56 = vor.u32 %v6194_v13, %v6191_v53  ;;  %v6204_v8 = vrot.slane %v6202_v49, 4 }
 0x39b   : > { %v6213_v10 = vshrl.u32 %v16938_v44, 16  ;;  %v6216_v17 = vshll.u32 %v16938_v44, 16  ;;  %v6177_v26 = vsel %vm14501_vm2, %v6172_v57, %v6176_v34  ;;  %v6187_v20 = vsel %vm14501_vm2, %v6182_v46, %v6186_v9  ;;  %v14268_v9 = vld [vmem:[#allocation2] sm:$0xf] }
 0x39c   : > { %13216 = vmatprep.mubr.msk.bf16.mxu1 %vm831_vm3, %v11961_v14  ;;  %v6222_v31 = vshll.u32 %v16943_v54, 16  ;;  %v6226_v19 = vshrl.u32 %v16943_v54, 16  ;;  %v11962_v2 = vcombine.low %v6177_v26, %v6187_v20  ;;  %v6196_v7 = vrot.slane %v6195_v56, 4  ;;  %v16963_v56 = vld [vmem:[#allocation2 + $0x4] sm:$0xf] }
 0x39d   : > { %v6205_v47 = vor.u32 %v6204_v8, %v6200_v58  ;;  %v6215_v6 = vrot.slane %v6213_v10, 4  ;;  %v6218_v52 = vrot.slane %v6216_v17, 5  ;;  %v6232_v40 = vshll.u32 %v16946_v39, 16 }
 0x39e   : > { %v6224_v33 = vrot.slane %v6222_v31, 5  ;;  %v6228_v53 = vrot.slane %v6226_v19, 4  ;;  %v6210_v34 = vrot.slane %v6208_v42, 5  ;;  %v6201_v14 = vsel %vm14501_vm2, %v6196_v7, %v6200_v58 }
 0x39f   : > { %13217 = vmatmul.mubr.msk.bf16.gmra.mrb[24].mxu1 %vm831_vm3, %v11962_v2  ;;  %v6206_v13 = vrot.slane %v6205_v47, 4  ;;  %v6219_v57 = vor.u32 %v6218_v52, %v6215_v6  ;;  %v11985_v8 = vcombine.low %v14268_v9, %v16963_v56  ;;  %v6234_v20 = vrot.slane %v6232_v40, 5 }
 0x3a0   : > { %v6229_v49 = vor.u32 %v6228_v53, %v6224_v33  ;;  %v11992_v42 = vcombine.low %v16804_v23, %v16806_v27  ;;  %v11993_v31 = vcombine.low %v16822_v48, %v16828_v4  ;;  %v11994_v58 = vcombine.low %v16838_v22, %v16846_v28  ;;  %v6839_v48 = vld [vmem:[#allocation2] sm:$0xe] }
 0x3a1   : > { %v6211_v46 = vsel %vm14501_vm2, %v6206_v13, %v6210_v34  ;;  %v6220_v17 = vrot.slane %v6219_v57, 4  ;;  %v11995_v19 = vcombine.low %v16859_v32, %v16862_v43  ;;  %v11996_v47 = vcombine.low %v16873_v45, %v16879_v60  ;;  %v16991_v34 = vld [vmem:[#allocation2 + $0x10] sm:$0xf]  ;;  %v6849_v13 = vld [vmem:[#allocation2 + $0x78] sm:$0xe] }
 0x3a2   : > { %v11963_v10 = vcombine.low %v6201_v14, %v6211_v46  ;;  %v6230_v26 = vrot.slane %v6229_v49, 4  ;;  %v14192_v49 = vld [vmem:[%s18731_s2 + $0x48] sm:$0xff]   ;;  %v14272_v14 = vld [vmem:[#allocation2 + $0x18] sm:$0xf]  ;;  %v16997_v46 = vld [vmem:[#allocation2 + $0x1c] sm:$0xf]  ;;  %v18921_v23 = vcombine.low %v16890_v35, %v16895_v37  ;;  %v18922_v32 = vcombine.low %v16901_v16, %v16910_v62 }
 0x3a3   : > { %v6225_v2 = vsel %vm14501_vm2, %v6220_v17, %v6224_v33  ;;  %v14270_v33 = vld [vmem:[#allocation2 + $0xc] sm:$0xf]  ;;  %v11987_v9 = vcombine.low %v14272_v14, %v16997_v46  ;;  %v6847_v17 = vld [vmem:[#allocation2 + $0x60] sm:$0xe]  ;;  %v6941_v14 = vrot.slane %v16817_v38, 5  ;;  %v6896_v35 = vrot.slane %v16991_v34, 5 }
 0x3a4   : > { %13220 = vmatprep.mubr.msk.bf16.mxu1 %vm831_vm3, %v11963_v10  ;;  %v6235_v7 = vsel %vm14501_vm2, %v6230_v26, %v6234_v20  ;;  %v11986_v57 = vcombine.low %v14270_v33, %v16991_v34  ;;  %v6846_v10 = vld [vmem:[#allocation2 + $0x54] sm:$0xe]  ;;  %v18924_v16 = vcombine.low %v16938_v44, %v16943_v54 }
 0x3a5   : > { %v11964_v52 = vcombine.low %v6225_v2, %v6235_v7  ;;  %v14195_v26 = vld [vmem:[%s18731_s2 + $0x50] sm:$0xff]   ;;  %v12028_v20 = vrot.slane %v6846_v10, 9  ;;  %v6945_v2 = vrot.slane %v16828_v4, 5  ;;  %v6848_v7 = vld [vmem:[#allocation2 + $0x6c] sm:$0xe]  ;;  %v6948_v10 = vrot.slane %v16830_v51, 5 }
 0x3a6   : > { %v12030_v38 = vrot.slane %v6848_v7, 9  ;;  %v14275_v4 = vld [vmem:[#allocation2 + $0x8] sm:$0x1] }
 0x3a7   : > { %13221 = vmatmul.mubr.msk.bf16.gmra.mrb[28].mxu1 %vm831_vm3, %v11964_v52  ;;  %v14274_v52 = vld [vmem:[#allocation2 + $0x24] sm:$0xf]  ;;  %v6947_v53 = vrot.slane %v6945_v2, 4  ;;  %v6892_v22 = vrot.slane %v14275_v4, 5  ;;  %v14280_v4 = vld [vmem:[#allocation2 + $0x2c] sm:$0x1] }
 0x3a8   : > { %13232 = vmatprep.mubr.msk.bf16.mxu1 %vm831_vm3, %v11985_v8  ;;  %v6938_v8 = vrot.slane %v16806_v27, 5  ;;  %v11988_v33 = vcombine.low %v14274_v52, %v16692_v55  ;;  %v6889_v27 = vrot.slane %v16963_v56, 5 }
 0x3a9   : > { %v17033_v51 = vsel %vm14817_vm6, %v6947_v53, %v6948_v10  ;;  %v6966_v10 = vrot.slane %v16879_v60, 5 }
 0x3aa   : > { %v17014_v40 = vsel %vm14817_vm6, %v12028_v20, %v6938_v8  ;;  %v6850_v20 = vld [vmem:[#allocation2 + $0x84] sm:$0xe] }
 0x3af   : > { %13233 = vmatmul.mubr.msk.bf16.vlgmr.msra.gmra.mrb[0].mxu1 %vm831_vm3, %v11986_v57  ;;  %v6940_v57 = vrot.slane %v6938_v8, 4  ;;  %v6959_v8 = vrot.slane %v16862_v43, 5  ;;  %v18923_v43 = vcombine.low %v16913_v0, %v16927_v63 }
 0x3b0   : > { %13265 = vmatpush3.bf16.msra.mxu1 %v16700_v30  ;;  %13236 = vmatprep.mubr.msk.bf16.mxu1 %vm831_vm3, %v11987_v9  ;;  %v12029_v30 = vrot.slane %v6847_v17, 9  ;;  %v11989_v9 = vcombine.low %v16703_v36, %v16705_v18  ;;  %v6952_v17 = vrot.slane %v16846_v28, 5  ;;  %v14200_v36 = vld [vmem:[%s18731_s2 + $0x58] sm:$0xff]   ;;  %v6853_v18 = vld [vmem:[#allocation2 + $0xa8] sm:$0xe]  ;;  %v12021_v28 = vrot.slane %v6839_v48, 9 }
 0x3b1   : > { %13266 = vmatprep.subr.bf16.mxu1 %v14192_v49  ;;  %v17019_v6 = vsel %vm14817_vm6, %v6940_v57, %v6941_v14  ;;  %v6955_v57 = vrot.slane %v16852_v12, 5  ;;  %v6851_v14 = vld [vmem:[#allocation2 + $0x90] sm:$0xe]  ;;  %v12032_v12 = vrot.slane %v6850_v20, 9  ;;  %v6852_v20 = vld [vmem:[#allocation2 + $0x9c] sm:$0xe] }
 0x3b2   : > { %v17023_v55 = vsel %vm14817_vm6, %v12029_v30, %v6945_v2  ;;  %v17040_v7 = vsel %vm14817_vm6, %v12030_v38, %v6952_v17  ;;  %v6954_v52 = vrot.slane %v6952_v17, 4  ;;  %v6962_v30 = vrot.slane %v16866_v59, 5 }
 0x3b3   : > { %v6969_v17 = vrot.slane %v16886_v61, 5  ;;  %v11990_v61 = vcombine.low %v16726_v5, %v16755_v21  ;;  %v6976_v2 = vrot.slane %v16898_v41, 5  ;;  %v17075_v59 = vsel %vm14817_vm6, %v12032_v12, %v6966_v10  ;;  %v6854_v12 = vld [vmem:[#allocation2 + $0xb4] sm:$0xe] }
 0x3b4   : > { %13267 = vmatpush3.bf16.msra.mxu1 %v14192_v49  ;;  %v12031_v49 = vrot.slane %v6849_v13, 9  ;;  %v6961_v13 = vrot.slane %v6959_v8, 4  ;;  %v17053_v38 = vsel %vm14817_vm6, %v6954_v52, %v6955_v57  ;;  %v6980_v5 = vrot.slane %v16910_v62, 5  ;;  %v6840_v62 = vld [vmem:[#allocation2 + $0xc] sm:$0xe] }
 0x3b5   : > { %13268 = vmatprep.subr.bf16.mxu1 %v14195_v26  ;;  %v6890_v45 = vsel %vm14817_vm6, %v12021_v28, %v6889_v27  ;;  %v6843_v28 = vld [vmem:[#allocation2 + $0x30] sm:$0xe] }
 0x3b6   : > { %v17046_v53 = vsel %vm14817_vm6, %v12031_v49, %v6959_v8  ;;  %v17060_v49 = vld [vmem:[%s18731_s2 + $0x60] sm:$0xff]   ;;  %v12033_v8 = vrot.slane %v6851_v14, 9 }
 0x3b7   : > { %13237 = vmatmul.mubr.msk.bf16.gmra.mrb[4].mxu1 %vm831_vm3, %v11988_v33  ;;  %v6973_v33 = vrot.slane %v16895_v37, 5  ;;  %v6903_v37 = vrot.slane %v16997_v46, 5  ;;  %v14278_v46 = vld [vmem:[#allocation2 + $0x28] sm:$0xf] }
 0x3b8   : > { %13240 = vmatprep.mubr.msk.bf16.mxu1 %vm831_vm3, %v11989_v9  ;;  %13269 = vmatpush3.bf16.msra.mxu1 %v14195_v26  ;;  %v17066_v26 = vsel %vm14817_vm6, %v6961_v13, %v6962_v30  ;;  %v6968_v9 = vrot.slane %v6966_v10, 4  ;;  %v12034_v30 = vrot.slane %v6852_v20, 9  ;;  %v6987_v10 = vrot.slane %v16927_v63, 5  ;;  %v14276_v63 = vld [vmem:[#allocation2 + $0x14] sm:$0x1] }
 0x3b9   : > { %13270 = vmatprep.subr.bf16.mxu1 %v14200_v36  ;;  %v12055_v52 = vcombine.low %v17046_v53, %v17066_v26  ;;  %v6975_v57 = vrot.slane %v6973_v33, 4  ;;  %v17083_v14 = vsel %vm14817_vm6, %v12033_v8, %v6973_v33  ;;  %v6982_v33 = vrot.slane %v6980_v5, 4 }
 0x3ba   : > { %v17079_v13 = vsel %vm14817_vm6, %v6968_v9, %v6969_v17  ;;  %v6983_v9 = vrot.slane %v16921_v25, 5  ;;  %v11991_v8 = vcombine.low %v16765_v11, %v16769_v1  ;;  %v6989_v21 = vrot.slane %v6987_v10, 4 }
 0x3bb   : > { %v17090_v41 = vsel %vm14817_vm6, %v6975_v57, %v6976_v2  ;;  %v6990_v2 = vrot.slane %v16932_v50, 5  ;;  %v6994_v20 = vrot.slane %v16943_v54, 5  ;;  %v17104_v57 = vsel %vm14817_vm6, %v12034_v30, %v6980_v5  ;;  %v14279_v54 = vld [vmem:[#allocation2 + $0x34] sm:$0xf]  ;;  %v17360_v30 = vld [vmem:[#allocation2 + $0xa0] sm:$0xf] }
 0x3bc   : > { %13271 = vmatpush3.bf16.msra.mxu1 %v14200_v36  ;;  %v12035_v36 = vrot.slane %v6853_v18, 9  ;;  %v17108_v17 = vsel %vm14817_vm6, %v6982_v33, %v6983_v9  ;;  %v12036_v11 = vrot.slane %v6854_v12, 9  ;;  %v6997_v5 = vrot.slane %v16946_v39, 5  ;;  %v8472_v33 = vld [vmem:[#allocation2 + $0x90] sm:$0xe] }
 0x3bd   : > { %13304 = vmatprep.subr.bf16.mxu1 %v17060_v49  ;;  %v17119_v18 = vsel %vm14817_vm6, %v6989_v21, %v6990_v2  ;;  %v6891_v39 = vrot.slane %v6889_v27, 4  ;;  %v6905_v0 = vrot.slane %v6903_v37, 4  ;;  %v12022_v21 = vrot.slane %v6840_v62, 9  ;;  %v6842_v27 = vld [vmem:[#allocation2 + $0x24] sm:$0xe] }
 0x3be   : > { %v17112_v25 = vsel %vm14817_vm6, %v12035_v36, %v6987_v10  ;;  %v17126_v10 = vsel %vm14817_vm6, %v12036_v11, %v6994_v20  ;;  %v6910_v9 = vrot.slane %v14278_v46, 5  ;;  %v17214_v46 = vld [vmem:[%s18731_s2 + $0x80] sm:$0xff]   ;;  %v17378_v50 = vld [vmem:[#allocation2 + $0xac] sm:$0xf] }
 0x3bf   : > { %13241 = vmatmul.mubr.msk.bf16.gmra.mrb[8].mxu1 %vm831_vm3, %v11990_v61  ;;  %v6996_v61 = vrot.slane %v6994_v20, 4  ;;  %v6893_v60 = vsel %vm14817_vm6, %v6891_v39, %v6892_v22  ;;  %v6897_v2 = vsel %vm14817_vm6, %v12022_v21, %v6896_v35  ;;  %v6913_v22 = vrot.slane %v14280_v4, 5  ;;  %v14281_v39 = vld [vmem:[#allocation2 + $0x38] sm:$0x1]  ;;  %v6845_v21 = vld [vmem:[#allocation2 + $0x48] sm:$0xe] }
 0x3c0   : > { %13244 = vmatprep.mubr.msk.bf16.mxu1 %vm831_vm3, %v11991_v8  ;;  %v12045_v56 = vcombine.low %v6890_v45, %v6893_v60  ;;  %v6917_v8 = vrot.slane %v14279_v54, 5  ;;  %v12024_v45 = vrot.slane %v6842_v27, 9  ;;  %v18925_v27 = vcombine.low %v17014_v40, %v17019_v6 }
 0x3c1   : > { %v17130_v12 = vsel %vm14817_vm6, %v6996_v61, %v6997_v5  ;;  %v14205_v61 = vld [vmem:[%s18731_s2 + $0x68] sm:$0xff]  }
 0x3c2   : > { %v6919_v48 = vrot.slane %v6917_v8, 4 }
 0x3c7   : > { %13245 = vmatmul.mubr.msk.bf16.gmra.mrb[12].mxu1 %vm831_vm3, %v11992_v42  ;;  %v6898_v42 = vrot.slane %v6896_v35, 4  ;;  %v14282_v35 = vld [vmem:[#allocation2 + $0x40] sm:$0xf] }
 0x3c8   : > { %13248 = vmatprep.mubr.msk.bf16.mxu1 %vm831_vm3, %v11993_v31  ;;  %v6899_v31 = vrot.slane %v14276_v63, 5  ;;  %v14207_v63 = vld [vmem:[%s18731_s2 + $0x78] sm:$0xff]  }
 0x3ca   : > { %v6900_v34 = vsel %vm14817_vm6, %v6898_v42, %v6899_v31  ;;  %v6931_v42 = vrot.slane %v16769_v1, 5  ;;  %v6927_v1 = vrot.slane %v16760_v24, 5 }
 0x3cb   : > { %v12046_v20 = vcombine.low %v6897_v2, %v6900_v34  ;;  %v6934_v34 = vrot.slane %v16776_v15, 5 }
 0x3cf   : > { %13249 = vmatmul.mubr.msk.bf16.gmra.mrb[16].mxu1 %vm831_vm3, %v11994_v58  ;;  %v6841_v58 = vld [vmem:[#allocation2 + $0x18] sm:$0xe] }
 0x3d0   : > { %13252 = vmatprep.mubr.msk.bf16.mxu1 %vm831_vm3, %v11995_v19  ;;  %v14277_v19 = vld [vmem:[#allocation2 + $0x20] sm:$0x1]  ;;  %v12023_v36 = vrot.slane %v6841_v58, 9 }
 0x3d2   : > { %v6904_v11 = vsel %vm14817_vm6, %v12023_v36, %v6903_v37  ;;  %v6924_v37 = vrot.slane %v14282_v35, 5  ;;  %v17253_v35 = vld [vmem:[#allocation2 + $0x58] sm:$0xf] }
 0x3d4   : > { %v6926_v58 = vrot.slane %v6924_v37, 4 }
 0x3d6   : > { %v6928_v36 = vsel %vm14817_vm6, %v6926_v58, %v6927_v1  ;;  %v8467_v1 = vld [vmem:[#allocation2 + $0x54] sm:$0xe] }
 0x3d7   : > { %13253 = vmatmul.mubr.msk.bf16.gmra.mrb[20].mxu1 %vm831_vm3, %v11996_v47  ;;  %v6906_v47 = vrot.slane %v14277_v19, 5  ;;  %v6844_v19 = vld [vmem:[#allocation2 + $0x3c] sm:$0xe] }
 0x3d8   : > { %13256 = vmatprep.mubr.msk.bf16.mxu1 %vm831_vm3, %v18921_v23  ;;  %v6912_v23 = vrot.slane %v6910_v9, 4 }
 0x3d9   : > { %v6907_v44 = vsel %vm14817_vm6, %v6905_v0, %v6906_v47  ;;  %v6933_v47 = vrot.slane %v6931_v42, 4 }
 0x3da   : > { %v12047_v5 = vcombine.low %v6904_v11, %v6907_v44  ;;  %v6914_v60 = vsel %vm14817_vm6, %v6912_v23, %v6913_v22  ;;  %v12027_v44 = vrot.slane %v6845_v21, 9  ;;  %v8463_v11 = vld [vmem:[#allocation2 + $0x24] sm:$0xe]  ;;  %v17233_v23 = vld [vmem:[#allocation2 + $0x38] sm:$0x1] }
 0x3db   : > { %v6935_v54 = vsel %vm14817_vm6, %v6933_v47, %v6934_v34  ;;  %v8464_v22 = vld [vmem:[#allocation2 + $0x30] sm:$0xe]  ;;  %v17274_v21 = vld [vmem:[#allocation2 + $0x68] sm:$0x1] }
 0x3dc   : > { %v6932_v15 = vsel %vm14817_vm6, %v12027_v44, %v6931_v42  ;;  %v17276_v34 = vld [vmem:[#allocation2 + $0x70] sm:$0xf] }
 0x3dd   : > { %v12051_v2 = vcombine.low %v6932_v15, %v6935_v54 }
 0x3df   : > { %13257 = vmatmul.mubr.msk.bf16.gmra.mrb[24].mxu1 %vm831_vm3, %v18922_v32  ;;  %v6920_v32 = vrot.slane %v14281_v39, 5  ;;  %v17246_v39 = vld [vmem:[#allocation2 + $0x40] sm:$0xf] }
 0x3e0   : > { %13260 = vmatprep.mubr.msk.bf16.mxu1 %vm831_vm3, %v18923_v43  ;;  %v14206_v43 = vld [vmem:[%s18731_s2 + $0x70] sm:$0xff]  }
 0x3e7   : > { %13261 = vmatmul.mubr.msk.bf16.gmra.mrb[28].mxu1 %vm831_vm3, %v18924_v16  ;;  %v6911_v16 = vsel %vm14817_vm6, %v12024_v45, %v6910_v9  ;;  %v12026_v9 = vrot.slane %v6844_v19, 9  ;;  %v17248_v45 = vld [vmem:[#allocation2 + $0x44] sm:$0x1] }
 0x3e8   : > { %13272 = vmatprep.mubr.msk.bf16.mxu1 %vm831_vm3, %v12045_v56  ;;  %v12025_v56 = vrot.slane %v6843_v28, 9  ;;  %v12048_v62 = vcombine.low %v6911_v16, %v6914_v60  ;;  %v18926_v28 = vcombine.low %v17023_v55, %v17033_v51  ;;  %v17250_v60 = vld [vmem:[#allocation2 + $0x50] sm:$0x1]  ;;  %v12172_v55 = vrot.slane %v8464_v22, 9 }
 0x3e9   : > { %v6925_v24 = vsel %vm14817_vm6, %v12026_v9, %v6924_v37  ;;  %v8551_v16 = vrot.slane %v17233_v23, 5  ;;  %v8558_v19 = vrot.slane %v17248_v45, 5  ;;  %v8565_v15 = vrot.slane %v17250_v60, 5 }
 0x3ea   : > { %v6918_v0 = vsel %vm14817_vm6, %v12025_v56, %v6917_v8  ;;  %v12050_v8 = vcombine.low %v6925_v24, %v6928_v36  ;;  %v8466_v56 = vld [vmem:[#allocation2 + $0x48] sm:$0xe] }
 0x3eb   : > { %v12174_v54 = vrot.slane %v8466_v56, 9 }
 0x3ef   : > { %13273 = vmatmul.mubr.msk.bf16.vlgmr.msra.gmra.mrb[0].mxu1 %vm831_vm3, %v12046_v20  ;;  %v17227_v20 = vld [vmem:[#allocation2 + $0x28] sm:$0xf] }
 0x3f0   : > { %13305 = vmatpush3.bf16.msra.mxu1 %v17060_v49  ;;  %13276 = vmatprep.mubr.msk.bf16.mxu1 %vm831_vm3, %v12047_v5  ;;  %v6921_v49 = vsel %vm14817_vm6, %v6919_v48, %v6920_v32  ;;  %v17231_v5 = vld [vmem:[#allocation2 + $0x34] sm:$0xf]  ;;  %v17239_v48 = vld [vmem:[#allocation2 + $0x4c] sm:$0xf]  ;;  %v8541_v4 = vrot.slane %v17227_v20, 5  ;;  %v12171_v32 = vrot.slane %v8463_v11, 9 }
 0x3f1   : > { %13306 = vmatprep.subr.bf16.mxu1 %v14205_v61  ;;  %v12049_v31 = vcombine.low %v6918_v0, %v6921_v49  ;;  %v8548_v51 = vrot.slane %v17231_v5, 5  ;;  %v17260_v49 = vld [vmem:[#allocation2 + $0x5c] sm:$0x1]  ;;  %v8555_v0 = vrot.slane %v17246_v39, 5  ;;  %v8562_v47 = vrot.slane %v17239_v48, 5 }
 0x3f2   : > { %v8543_v6 = vrot.slane %v8541_v4, 4  ;;  %v17257_v37 = vsel %vm14817_vm6, %v12171_v32, %v8541_v4  ;;  %v8468_v11 = vld [vmem:[#allocation2 + $0x60] sm:$0xe]  ;;  %v17296_v4 = vld [vmem:[#allocation2 + $0x74] sm:$0x1]  ;;  %v8572_v56 = vrot.slane %v17260_v49, 5 }
 0x3f3   : > { %18927 = vst [vmem:[#allocation6_spill] sm:$0xff] %v17257_v37  ;;  %v8550_v58 = vrot.slane %v8548_v51, 4  ;;  %v17280_v9 = vsel %vm14817_vm6, %v12172_v55, %v8548_v51  ;;  %v8557_v44 = vrot.slane %v8555_v0, 4  ;;  %v17306_v32 = vsel %vm14817_vm6, %v12174_v54, %v8562_v47  ;;  %v10106_v37 = vld [vmem:[#allocation2 + $0x60] sm:$0xe] }
 0x3f4   : > { %13307 = vmatpush3.bf16.msra.mxu1 %v14205_v61  ;;  %v17229_v61 = vld [vmem:[#allocation2 + $0x2c] sm:$0x1]  ;;  %18929 = vst [vmem:[#allocation8_spill] sm:$0xff] %v17280_v9  ;;  %18934 = vst [vmem:[#allocation12_spill] sm:$0xff] %v17306_v32  ;;  %v14217_v32 = vld [vmem:[#allocation2 + $0x60] sm:$0xff]  }
 0x3f5   : > { %13308 = vmatprep.subr.bf16.mxu1 %v14206_v43  ;;  %v8544_v40 = vrot.slane %v17229_v61, 5  ;;  %v17288_v24 = vsel %vm14817_vm6, %v8550_v58, %v8551_v16  ;;  %v17323_v16 = vld [vmem:[#allocation2 + $0x88] sm:$0xf]  ;;  %v17332_v58 = vld [vmem:[#allocation2 + $0x8c] sm:$0x1]  ;;  %v14227_v9 = vld [vmem:[#allocation2 + $0xc0] sm:$0xff]  }
 0x3f6   : > { %18931 = vst [vmem:[#allocation10_spill] sm:$0xff] %v17288_v24  ;;  %v14223_v24 = vld [vmem:[#allocation2 + $0x9c] sm:$0xff]  }
 0x3f7   : > { %13277 = vmatmul.mubr.msk.bf16.gmra.mrb[4].mxu1 %vm831_vm3, %v12048_v62  ;;  %v17264_v42 = vsel %vm14817_vm6, %v8543_v6, %v8544_v40  ;;  %v8469_v6 = vld [vmem:[#allocation2 + $0x6c] sm:$0xe] }
 0x3f8   : > { %13280 = vmatprep.mubr.msk.bf16.mxu1 %vm831_vm3, %v12049_v31  ;;  %13309 = vmatpush3.bf16.msra.mxu1 %v14206_v43  ;;  %v8465_v43 = vld [vmem:[#allocation2 + $0x3c] sm:$0xe]  ;;  %18928 = vst [vmem:[#allocation7_spill] sm:$0xff] %v17264_v42  ;;  %v8597_v31 = vrot.slane %v17323_v16, 5  ;;  %v17708_v42 = vld [vmem:[#allocation2 + $0x70] sm:$0xf] }
 0x3f9   : > { %13310 = vmatprep.subr.bf16.mxu1 %v14207_v63  ;;  %v12173_v62 = vrot.slane %v8465_v43, 9  ;;  %v12175_v43 = vrot.slane %v8467_v1, 9  ;;  %v12177_v1 = vrot.slane %v8469_v6, 9  ;;  %18979 = vst [vmem:[#allocation52_spill] sm:$0xff] %v17708_v42 }
 0x3fb   : > { %v17284_v36 = vsel %vm14817_vm6, %v12173_v62, %v8555_v0  ;;  %v8470_v0 = vld [vmem:[#allocation2 + $0x78] sm:$0xe] }
 0x3fc   : > { %13311 = vmatpush3.bf16.msra.mxu1 %v14207_v63  ;;  %v17268_v63 = vld [vmem:[#allocation2 + $0x64] sm:$0xf]  ;;  %18930 = vst [vmem:[#allocation9_spill] sm:$0xff] %v17284_v36  ;;  %v12178_v53 = vrot.slane %v8470_v0, 9 }
 0x3fd   : > { %13344 = vmatprep.subr.bf16.mxu1 %v17214_v46  ;;  %v8576_v62 = vrot.slane %v17268_v63, 5 }
 0x3ff   : > { %13281 = vmatmul.mubr.msk.bf16.gmra.mrb[8].mxu1 %vm831_vm3, %v12050_v8  ;;  %v8564_v8 = vrot.slane %v8562_v47, 4  ;;  %v8579_v47 = vrot.slane %v17274_v21, 5 }
 0x400   : > { %13284 = vmatprep.mubr.msk.bf16.mxu1 %vm831_vm3, %v12051_v2  ;;  %v8569_v2 = vrot.slane %v17253_v35, 5 }
 0x401   : > { %v17320_v55 = vsel %vm14817_vm6, %v8564_v8, %v8565_v15  ;;  %v8578_v8 = vrot.slane %v8576_v62, 4  ;;  %v8586_v15 = vrot.slane %v17296_v4, 5 }
 0x402   : > { %18935 = vst [vmem:[#allocation13_spill] sm:$0xff] %v17320_v55  ;;  %v8571_v51 = vrot.slane %v8569_v2, 4  ;;  %v17329_v26 = vsel %vm14817_vm6, %v12175_v43, %v8569_v2  ;;  %v7742_v43 = vld [vmem:[#allocation2 + $0x98] sm:$0x1] }
 0x403   : > { %18936 = vst [vmem:[#allocation14_spill] sm:$0xff] %v17329_v26  ;;  %v17356_v54 = vsel %vm14817_vm6, %v8578_v8, %v8579_v47  ;;  %v17376_v8 = vld [vmem:[#allocation2 + $0xa4] sm:$0x1] }
 0x404   : > { %18940 = vst [vmem:[#allocation18_spill] sm:$0xff] %v17356_v54 }
 0x407   : > { %13285 = vmatmul.mubr.msk.bf16.gmra.mrb[12].mxu1 %vm831_vm3, %v18925_v27  ;;  %v18932_v27 = vcombine.low %v17040_v7, %v17053_v38  ;;  %v17312_v7 = vld [vmem:[#allocation2 + $0x7c] sm:$0xf]  ;;  %v17314_v38 = vld [vmem:[#allocation2 + $0x80] sm:$0x1] }
 0x408   : > { %13288 = vmatprep.mubr.msk.bf16.mxu1 %vm831_vm3, %v18926_v28  ;;  %v17302_v28 = vsel %vm14817_vm6, %v8557_v44, %v8558_v19  ;;  %v17336_v19 = vsel %vm14817_vm6, %v8571_v51, %v8572_v56  ;;  %v8583_v44 = vrot.slane %v17276_v34, 5  ;;  %v8590_v2 = vrot.slane %v17312_v7, 5 }
 0x409   : > { %18933 = vst [vmem:[#allocation11_spill] sm:$0xff] %v17302_v28  ;;  %18937 = vst [vmem:[#allocation15_spill] sm:$0xff] %v17336_v19  ;;  %v8593_v22 = vrot.slane %v17314_v38, 5 }
 0x40a   : > { %v17352_v6 = vsel %vm14817_vm6, %v12177_v1, %v8583_v44  ;;  %v8585_v56 = vrot.slane %v8583_v44, 4  ;;  %v8592_v40 = vrot.slane %v8590_v2, 4  ;;  %v17370_v0 = vsel %vm14817_vm6, %v12178_v53, %v8590_v2  ;;  %v8473_v1 = vld [vmem:[#allocation2 + $0x9c] sm:$0xe] }
 0x40b   : > { %18939 = vst [vmem:[#allocation17_spill] sm:$0xff] %v17352_v6  ;;  %18942 = vst [vmem:[#allocation20_spill] sm:$0xff] %v17370_v0  ;;  %v18943_v44 = vcombine.low %v17075_v59, %v17079_v13  ;;  %v8599_v53 = vrot.slane %v8597_v31, 4  ;;  %v8600_v2 = vrot.slane %v17332_v58, 5  ;;  %v7748_v59 = vld [vmem:[#allocation2 + $0xb0] sm:$0x1] }
 0x40c   : > { %v7751_v0 = vld [vmem:[#allocation2 + $0xbc] sm:$0x1] }
 0x40f   : > { %13289 = vmatmul.mubr.msk.bf16.gmra.mrb[16].mxu1 %vm831_vm3, %v18932_v27  ;;  %v17344_v27 = vld [vmem:[#allocation2 + $0x94] sm:$0xf] }
 0x410   : > { %13292 = vmatprep.mubr.msk.bf16.mxu1 %vm831_vm3, %v12055_v52  ;;  %v12176_v52 = vrot.slane %v8468_v11, 9  ;;  %v8471_v11 = vld [vmem:[#allocation2 + $0x84] sm:$0xe] }
 0x411   : > { %v12179_v47 = vrot.slane %v8471_v11, 9  ;;  %v18945_v11 = vcombine.low %v17083_v14, %v17090_v41  ;;  %v8607_v14 = vrot.slane %v7742_v43, 5  ;;  %v12181_v41 = vrot.slane %v8473_v1, 9 }
 0x412   : > { %v17348_v51 = vsel %vm14817_vm6, %v12176_v52, %v8576_v62  ;;  %v17366_v62 = vsel %vm14817_vm6, %v8585_v56, %v8586_v15  ;;  %v17384_v15 = vsel %vm14817_vm6, %v8592_v40, %v8593_v22  ;;  %v8604_v22 = vrot.slane %v17344_v27, 5  ;;  %v8474_v40 = vld [vmem:[#allocation2 + $0xa8] sm:$0xe]  ;;  %v17398_v52 = vld [vmem:[#allocation2 + $0xb8] sm:$0xf] }
 0x413   : > { %18938 = vst [vmem:[#allocation16_spill] sm:$0xff] %v17348_v51  ;;  %18941 = vst [vmem:[#allocation19_spill] sm:$0xff] %v17366_v62  ;;  %v17395_v56 = vsel %vm14817_vm6, %v12179_v47, %v8597_v31  ;;  %v17402_v62 = vsel %vm14817_vm6, %v8599_v53, %v8600_v2  ;;  %v8614_v31 = vrot.slane %v17376_v8, 5  ;;  %v8475_v47 = vld [vmem:[#allocation2 + $0xb4] sm:$0xe]  ;;  %v12182_v53 = vrot.slane %v8474_v40, 9 }
 0x414   : > { %18944 = vst [vmem:[#allocation21_spill] sm:$0xff] %v17384_v15  ;;  %18946 = vst [vmem:[#allocation22_spill] sm:$0xff] %v17395_v56  ;;  %v8606_v15 = vrot.slane %v8604_v22, 4  ;;  %v17417_v2 = vld [vmem:[#allocation2 + $0xc4] sm:$0xf]  ;;  %v8621_v56 = vrot.slane %v7748_v59, 5 }
 0x415   : > { %18947 = vst [vmem:[#allocation23_spill] sm:$0xff] %v17402_v62  ;;  %v8625_v54 = vrot.slane %v17398_v52, 5  ;;  %v8628_v51 = vrot.slane %v7751_v0, 5 }
 0x416   : > { %v17421_v13 = vsel %vm14817_vm6, %v8606_v15, %v8607_v14  ;;  %v7713_v15 = vld [vmem:[#allocation2 + $0x24] sm:$0xf] }
 0x417   : > { %13293 = vmatmul.mubr.msk.bf16.gmra.mrb[20].mxu1 %vm831_vm3, %v18943_v44  ;;  %v12180_v44 = vrot.slane %v8472_v33, 9  ;;  %v8618_v33 = vrot.slane %v17378_v50, 5  ;;  %18950 = vst [vmem:[#allocation26_spill] sm:$0xff] %v17421_v13  ;;  %v8627_v14 = vrot.slane %v8625_v54, 4 }
 0x418   : > { %13296 = vmatprep.mubr.msk.bf16.mxu1 %vm831_vm3, %v18945_v11  ;;  %v8611_v11 = vrot.slane %v17360_v30, 5 }
 0x419   : > { %v17411_v6 = vsel %vm14817_vm6, %v12180_v44, %v8604_v22  ;;  %v8620_v62 = vrot.slane %v8618_v33, 4  ;;  %v17432_v40 = vsel %vm14817_vm6, %v12182_v53, %v8618_v33  ;;  %v8476_v44 = vld [vmem:[#allocation2 + $0xc0] sm:$0xe]  ;;  %v17457_v0 = vsel %vm14817_vm6, %v8627_v14, %v8628_v51  ;;  %v7707_v14 = vld [vmem:[#allocation2 + $0xc] sm:$0xf] }
 0x41a   : > { %18948 = vst [vmem:[#allocation24_spill] sm:$0xff] %v17411_v6  ;;  %v17415_v43 = vsel %vm14817_vm6, %v12181_v41, %v8611_v11  ;;  %v8613_v1 = vrot.slane %v8611_v11, 4  ;;  %18952 = vst [vmem:[#allocation28_spill] sm:$0xff] %v17432_v40  ;;  %v12183_v41 = vrot.slane %v8475_v47, 9  ;;  %v7754_v11 = vld [vmem:[#allocation2 + $0xc8] sm:$0x1]  ;;  %v18960_v51 = vcombine.low %v17126_v10, %v17130_v12 }
 0x41b   : > { %18949 = vst [vmem:[#allocation25_spill] sm:$0xff] %v17415_v43  ;;  %v17438_v59 = vsel %vm14817_vm6, %v8620_v62, %v8621_v56  ;;  %v8632_v47 = vrot.slane %v17417_v2, 5  ;;  %18957 = vst [vmem:[#allocation31_spill] sm:$0xff] %v17457_v0  ;;  %v8635_v53 = vrot.slane %v7754_v11, 5  ;;  %v14211_v11 = vld [vmem:[#allocation2 + $0x24] sm:$0xff]   ;;  %v14219_v10 = vld [vmem:[%s18731_s2 + $0x90] sm:$0xff]  }
 0x41c   : > { %v17428_v22 = vsel %vm14817_vm6, %v8613_v1, %v8614_v31  ;;  %18953 = vst [vmem:[#allocation29_spill] sm:$0xff] %v17438_v59  ;;  %v18954_v31 = vcombine.low %v17104_v57, %v17108_v17  ;;  %v18955_v1 = vcombine.low %v17112_v25, %v17119_v18  ;;  %v17453_v62 = vsel %vm14817_vm6, %v12183_v41, %v8625_v54  ;;  %v14208_v54 = vld [vmem:[#allocation2 + $0xc] sm:$0xff]   ;;  %v17499_v33 = vld [vmem:[%s18731_s2 + $0xa0] sm:$0xff]   ;;  %v17503_v0 = vld [vmem:[#allocation2 + $0x14] sm:$0x1] }
 0x41d   : > { %18951 = vst [vmem:[#allocation27_spill] sm:$0xff] %v17428_v22  ;;  %18956 = vst [vmem:[#allocation30_spill] sm:$0xff] %v17453_v62  ;;  %v12184_v57 = vrot.slane %v8476_v44, 9  ;;  %v8634_v56 = vrot.slane %v8632_v47, 4  ;;  %v14210_v44 = vld [vmem:[#allocation2 + $0x18] sm:$0xff]   ;;  %v14214_v41 = vld [vmem:[%s18731_s2 + $0x88] sm:$0xff]  }
 0x41e   : > { %v17485_v12 = vld [vmem:[#allocation2 + $0x10] sm:$0xf]  ;;  %v14215_v62 = vld [vmem:[#allocation2 + $0x48] sm:$0xff]   ;;  %v14216_v59 = vld [vmem:[#allocation2 + $0x54] sm:$0xff]  }
 0x41f   : > { %13297 = vmatmul.mubr.msk.bf16.gmra.mrb[24].mxu1 %vm831_vm3, %v18954_v31  ;;  %v17463_v31 = vsel %vm14817_vm6, %v12184_v57, %v8632_v47  ;;  %v17467_v25 = vsel %vm14817_vm6, %v8634_v56, %v8635_v53  ;;  %v7765_v47 = vshll.u32 %v17485_v12, 16  ;;  %v7710_v57 = vld [vmem:[#allocation2 + $0x18] sm:$0xf]  ;;  %v14212_v56 = vld [vmem:[#allocation2 + $0x30] sm:$0xff]   ;;  %v14213_v53 = vld [vmem:[#allocation2 + $0x3c] sm:$0xff]  }
 0x420   : > { %13300 = vmatprep.mubr.msk.bf16.mxu1 %vm831_vm3, %v18955_v1  ;;  %18958 = vst [vmem:[#allocation32_spill] sm:$0xff] %v17463_v31  ;;  %18959 = vst [vmem:[#allocation33_spill] sm:$0xff] %v17467_v25  ;;  %v7769_v1 = vshrl.u32 %v17485_v12, 16  ;;  %v7783_v17 = vshll.u32 %v7710_v57, 16  ;;  %v17508_v43 = vld [vmem:[#allocation2 + $0x20] sm:$0x1] }
 0x422   : > { %v7771_v18 = vrot.slane %v7769_v1, 4  ;;  %v7804_v1 = vshrl.u32 %v7713_v15, 16 }
 0x427   : > { %13301 = vmatmul.mubr.msk.bf16.gmra.mrb[28].mxu1 %vm831_vm3, %v18960_v51  ;;  %v7759_v51 = vshll.u32 %v7707_v14, 16 }
 0x428   : > { %13312 = vmatprep.mubr.msk.bf16.mxu1 %vm831_vm3, %v14208_v54  ;;  %v7756_v54 = vshrl.u32 %v7707_v14, 16 }
 0x429   : > { %v7761_v14 = vrot.slane %v7759_v51, 5 }
 0x42a   : > { %v7758_v25 = vrot.slane %v7756_v54, 4  ;;  %v7775_v54 = vshll.u32 %v17503_v0, 16 }
 0x42c   : > { %v7762_v40 = vor.u32 %v7761_v14, %v7758_v25  ;;  %v7777_v25 = vrot.slane %v7775_v54, 5 }
 0x42e   : > { %v7763_v6 = vrot.slane %v7762_v40, 4 }
 0x42f   : > { %13313 = vmatmul.mubr.msk.bf16.vlgmr.msra.gmra.mrb[0].mxu1 %vm831_vm3, %v14210_v44  ;;  %v17493_v44 = vld [vmem:[#allocation2 + $0x1c] sm:$0xf] }
 0x430   : > { %13345 = vmatpush3.bf16.msra.mxu1 %v17214_v46  ;;  %13316 = vmatprep.mubr.msk.bf16.mxu1 %vm831_vm3, %v14211_v11  ;;  %v14224_v46 = vld [vmem:[%s18731_s2 + $0x98] sm:$0xff]   ;;  %v7780_v11 = vshrl.u32 %v7710_v57, 16  ;;  %v7793_v31 = vshrl.u32 %v17493_v44, 16  ;;  %v7807_v57 = vshll.u32 %v7713_v15, 16 }
 0x431   : > { %13346 = vmatprep.subr.bf16.mxu1 %v14214_v41 }
 0x432   : > { %v7795_v22 = vrot.slane %v7793_v31, 4  ;;  %v7809_v13 = vrot.slane %v7807_v57, 5  ;;  %v7716_v31 = vld [vmem:[#allocation2 + $0x30] sm:$0xf] }
 0x433   : > { %v7831_v57 = vshll.u32 %v7716_v31, 16 }
 0x434   : > { %13347 = vmatpush3.bf16.msra.mxu1 %v14214_v41  ;;  %v7767_v41 = vrot.slane %v7765_v47, 5  ;;  %v7785_v47 = vrot.slane %v7783_v17, 5 }
 0x435   : > { %13348 = vmatprep.subr.bf16.mxu1 %v14219_v10 }
 0x437   : > { %13317 = vmatmul.mubr.msk.bf16.gmra.mrb[4].mxu1 %vm831_vm3, %v14212_v56  ;;  %v7789_v56 = vshll.u32 %v17493_v44, 16 }
 0x438   : > { %13320 = vmatprep.mubr.msk.bf16.mxu1 %vm831_vm3, %v14213_v53  ;;  %13349 = vmatpush3.bf16.msra.mxu1 %v14219_v10  ;;  %v7782_v53 = vrot.slane %v7780_v11, 4  ;;  %v7772_v10 = vor.u32 %v7771_v18, %v7767_v41  ;;  %v7813_v11 = vshll.u32 %v17227_v20, 16  ;;  %v7817_v18 = vshrl.u32 %v17227_v20, 16 }
 0x439   : > { %13350 = vmatprep.subr.bf16.mxu1 %v14224_v46  ;;  %v7791_v51 = vrot.slane %v7789_v56, 5  ;;  %v7799_v56 = vshll.u32 %v17508_v43, 16 }
 0x43a   : > { %v7773_v15 = vrot.slane %v7772_v10, 4  ;;  %v7786_v17 = vor.u32 %v7785_v47, %v7782_v53  ;;  %v17514_v19 = vrot.slane %v7813_v11, 5  ;;  %v7828_v53 = vshrl.u32 %v7716_v31, 16  ;;  %v7719_v10 = vld [vmem:[#allocation2 + $0x3c] sm:$0xf]  ;;  %v14218_v47 = vld [vmem:[#allocation2 + $0x6c] sm:$0xff]  }
 0x43b   : > { %v7796_v14 = vor.u32 %v7795_v22, %v7791_v51  ;;  %v7768_v22 = vsel %vm14501_vm2, %v7763_v6, %v7767_v41  ;;  %v7852_v6 = vshrl.u32 %v7719_v10, 16  ;;  %v7855_v41 = vshll.u32 %v7719_v10, 16 }
 0x43c   : > { %13351 = vmatpush3.bf16.msra.mxu1 %v14224_v46  ;;  %v7806_v46 = vrot.slane %v7804_v1, 4  ;;  %v7778_v26 = vsel %vm14501_vm2, %v7773_v15, %v7777_v25  ;;  %v7787_v55 = vrot.slane %v7786_v17, 4  ;;  %v7801_v1 = vrot.slane %v7799_v56, 5  ;;  %v7722_v25 = vld [vmem:[#allocation2 + $0x48] sm:$0xf] }
 0x43d   : > { %13384 = vmatprep.subr.bf16.mxu1 %v17499_v33  ;;  %v7797_v40 = vrot.slane %v7796_v14, 4  ;;  %v17522_v54 = vcombine.low %v7768_v22, %v7778_v26  ;;  %v7865_v26 = vshrl.u32 %v17246_v39, 16  ;;  %v7833_v56 = vrot.slane %v7831_v57, 5  ;;  %v14221_v57 = vld [vmem:[#allocation2 + $0x84] sm:$0xff]  }
 0x43e   : > { %v7810_v20 = vor.u32 %v7809_v13, %v7806_v46  ;;  %v7837_v13 = vshll.u32 %v17231_v5, 16  ;;  %v7830_v46 = vrot.slane %v7828_v53, 4  ;;  %v7889_v31 = vshrl.u32 %v17239_v48, 16 }
 0x43f   : > { %13321 = vmatmul.mubr.msk.bf16.gmra.mrb[8].mxu1 %vm831_vm3, %v14215_v62  ;;  %v7819_v62 = vrot.slane %v7817_v18, 4  ;;  %v7841_v18 = vshrl.u32 %v17231_v5, 16  ;;  %v7802_v14 = vsel %vm14501_vm2, %v7797_v40, %v7801_v1  ;;  %v7885_v5 = vshll.u32 %v17239_v48, 16 }
 0x440   : > { %13324 = vmatprep.mubr.msk.bf16.mxu1 %vm831_vm3, %v14216_v59  ;;  %v7823_v59 = vshll.u32 %v17229_v61, 16  ;;  %v7792_v61 = vsel %vm14501_vm2, %v7787_v55, %v7791_v51  ;;  %v7811_v15 = vrot.slane %v7810_v20, 4  ;;  %v17536_v55 = vrot.slane %v7837_v13, 5  ;;  %v7725_v13 = vld [vmem:[#allocation2 + $0x54] sm:$0xf] }
 0x441   : > { %v7820_v11 = vor.u32 %v7819_v62, %v17514_v19  ;;  %v7843_v51 = vrot.slane %v7841_v18, 4  ;;  %v7847_v20 = vshll.u32 %v17233_v23, 16  ;;  %v7857_v53 = vrot.slane %v7855_v41, 5 }
 0x442   : > { %v7825_v17 = vrot.slane %v7823_v59, 5  ;;  %v7854_v59 = vrot.slane %v7852_v6, 4  ;;  %v7876_v10 = vshrl.u32 %v7722_v25, 16  ;;  %v17539_v22 = vcombine.low %v7792_v61, %v7802_v14 }
 0x443   : > { %v7821_v62 = vrot.slane %v7820_v11, 4  ;;  %v7867_v40 = vrot.slane %v7865_v26, 4  ;;  %v7909_v1 = vshll.u32 %v17253_v35, 16  ;;  %v7816_v48 = vsel %vm14501_vm2, %v7811_v15, %v17514_v19  ;;  %v7728_v26 = vld [vmem:[#allocation2 + $0x60] sm:$0xf] }
 0x444   : > { %v17547_v11 = vrot.slane %v7885_v5, 5  ;;  %v7891_v23 = vrot.slane %v7889_v31, 4  ;;  %v7913_v18 = vshrl.u32 %v17253_v35, 16  ;;  %v7834_v6 = vor.u32 %v7833_v56, %v7830_v46 }
 0x445   : > { %v7826_v61 = vsel %vm14501_vm2, %v7821_v62, %v7825_v17  ;;  %v7844_v41 = vor.u32 %v7843_v51, %v17536_v55  ;;  %v7858_v19 = vor.u32 %v7857_v53, %v7854_v59  ;;  %v7871_v15 = vshll.u32 %v17248_v45, 16 }
 0x446   : > { %v7900_v5 = vshrl.u32 %v7725_v13, 16  ;;  %v7903_v31 = vshll.u32 %v7725_v13, 16  ;;  %v7892_v17 = vor.u32 %v7891_v23, %v17547_v11  ;;  %v7915_v46 = vrot.slane %v7913_v18, 4 }
 0x447   : > { %13325 = vmatmul.mubr.msk.bf16.gmra.mrb[12].mxu1 %vm831_vm3, %v14217_v32  ;;  %v7861_v32 = vshll.u32 %v17246_v39, 16  ;;  %v14220_v39 = vld [vmem:[#allocation2 + $0x78] sm:$0xff]   ;;  %v7924_v56 = vshrl.u32 %v7728_v26, 16  ;;  %v7927_v62 = vshll.u32 %v7728_v26, 16  ;;  %v17562_v51 = vcombine.low %v7816_v48, %v7826_v61 }
 0x448   : > { %13328 = vmatprep.mubr.msk.bf16.mxu1 %vm831_vm3, %v14218_v47  ;;  %v7879_v47 = vshll.u32 %v7722_v25, 16  ;;  %v7878_v25 = vrot.slane %v7876_v10, 4  ;;  %v7933_v59 = vshll.u32 %v17268_v63, 16  ;;  %v7937_v45 = vshrl.u32 %v17268_v63, 16 }
 0x449   : > { %v17541_v28 = vrot.slane %v7861_v32, 5  ;;  %v17554_v32 = vrot.slane %v7847_v20, 5  ;;  %v7835_v20 = vrot.slane %v7834_v6, 4  ;;  %v7845_v53 = vrot.slane %v7844_v41, 4 }
 0x44a   : > { %v7881_v14 = vrot.slane %v7879_v47, 5  ;;  %v7873_v10 = vrot.slane %v7871_v15, 5  ;;  %v7859_v13 = vrot.slane %v7858_v19, 4  ;;  %v7902_v23 = vrot.slane %v7900_v5, 4 }
 0x44b   : > { %v7868_v35 = vor.u32 %v7867_v40, %v17541_v28  ;;  %v7895_v40 = vshll.u32 %v17250_v60, 16  ;;  %v7905_v18 = vrot.slane %v7903_v31, 5  ;;  %v7893_v26 = vrot.slane %v7892_v17, 4 }
 0x44c   : > { %v7882_v47 = vor.u32 %v7881_v14, %v7878_v25  ;;  %v7926_v61 = vrot.slane %v7924_v56, 4  ;;  %v7929_v6 = vrot.slane %v7927_v62, 5  ;;  %v17569_v63 = vrot.slane %v7933_v59, 5 }
 0x44d   : > { %v7869_v36 = vrot.slane %v7868_v35, 4  ;;  %v7939_v41 = vrot.slane %v7937_v45, 4  ;;  %v7840_v60 = vsel %vm14501_vm2, %v7835_v20, %v17536_v55  ;;  %v7897_v14 = vrot.slane %v7895_v40, 5  ;;  %v10100_v40 = vld [vmem:[#allocation2 + $0x18] sm:$0xe] }
 0x44e   : > { %v7883_v19 = vrot.slane %v7882_v47, 4  ;;  %v7919_v35 = vshll.u32 %v17260_v49, 16  ;;  %v7850_v5 = vsel %vm14501_vm2, %v7845_v53, %v17554_v32  ;;  %v7864_v31 = vsel %vm14501_vm2, %v7859_v13, %v17541_v28  ;;  %v17606_v47 = vld [vmem:[#allocation2 + $0x20] sm:$0x1] }
 0x44f   : > { %13329 = vmatmul.mubr.msk.bf16.gmra.mrb[16].mxu1 %vm831_vm3, %v14220_v39  ;;  %v17559_v39 = vrot.slane %v7909_v1, 5  ;;  %v14222_v1 = vld [vmem:[#allocation2 + $0x90] sm:$0xff]   ;;  %v7874_v17 = vsel %vm14501_vm2, %v7869_v36, %v7873_v10  ;;  %v7898_v55 = vsel %vm14501_vm2, %v7893_v26, %v7897_v14  ;;  %v7930_v49 = vor.u32 %v7929_v6, %v7926_v61  ;;  %v17597_v36 = vld [vmem:[#allocation2 + $0x1c] sm:$0xf]  ;;  %18962 = vst [vmem:[#allocation35_spill] sm:$0xff] %v17606_v47 }
 0x450   : > { %13332 = vmatprep.mubr.msk.bf16.mxu1 %vm831_vm3, %v14221_v57  ;;  %v7731_v57 = vld [vmem:[#allocation2 + $0x6c] sm:$0xf]  ;;  %v7943_v62 = vshll.u32 %v17274_v21, 16  ;;  %v7940_v32 = vor.u32 %v7939_v41, %v17569_v63  ;;  %v7957_v28 = vshll.u32 %v17276_v34, 16  ;;  %18961 = vst [vmem:[#allocation34_spill] sm:$0xff] %v17597_v36  ;;  %v7888_v45 = vsel %vm14501_vm2, %v7883_v19, %v17547_v11 }
 0x451   : > { %v7916_v48 = vor.u32 %v7915_v46, %v17559_v39  ;;  %v7948_v15 = vshrl.u32 %v7731_v57, 16  ;;  %v7951_v25 = vshll.u32 %v7731_v57, 16  ;;  %v17584_v46 = vld [vmem:[#allocation2 + $0x78] sm:$0xf]  ;;  %v17602_v53 = vrot.slane %v7919_v35, 5  ;;  %v14225_v57 = vld [vmem:[#allocation2 + $0xa8] sm:$0xff]  }
 0x452   : > { %v7961_v10 = vshrl.u32 %v17276_v34, 16  ;;  %v7972_v21 = vshrl.u32 %v17584_v46, 16  ;;  %v17610_v13 = vcombine.low %v7864_v31, %v7874_v17  ;;  %v17616_v26 = vld [vmem:[#allocation2 + $0x28] sm:$0xf]  ;;  %v17618_v11 = vld [vmem:[#allocation2 + $0x34] sm:$0xf] }
 0x453   : > { %v17588_v56 = vrot.slane %v7916_v48, 4  ;;  %v17592_v20 = vrot.slane %v7948_v15, 4  ;;  %v17594_v59 = vrot.slane %v7951_v25, 5  ;;  %18963 = vst [vmem:[#allocation36_spill] sm:$0xff] %v17616_v26  ;;  %18964 = vst [vmem:[#allocation37_spill] sm:$0xff] %v17618_v11  ;;  %v14226_v48 = vld [vmem:[#allocation2 + $0xb4] sm:$0xff]  }
 0x454   : > { %v17624_v61 = vrot.slane %v7930_v49, 4  ;;  %v17626_v6 = vrot.slane %v7943_v62, 5  ;;  %v17629_v15 = vld [vmem:[#allocation2 + $0x2c] sm:$0x1]  ;;  %v17632_v25 = vrot.slane %v7940_v32, 4  ;;  %v17636_v19 = vrot.slane %v7957_v28, 5 }
 0x455   : > { %18965 = vst [vmem:[#allocation38_spill] sm:$0xff] %v17629_v15  ;;  %v17638_v14 = vld [vmem:[#allocation2 + $0x38] sm:$0x1]  ;;  %v10166_v35 = vrot.slane %v17597_v36, 5  ;;  %v17642_v31 = vrot.slane %v7961_v10, 4  ;;  %v17644_v17 = vrot.slane %v7972_v21, 4 }
 0x456   : > { %18966 = vst [vmem:[#allocation39_spill] sm:$0xff] %v17638_v14  ;;  %v10102_v49 = vld [vmem:[#allocation2 + $0x30] sm:$0xe]  ;;  %v17648_v32 = vld [vmem:[#allocation2 + $0x40] sm:$0xf]  ;;  %v10180_v41 = vrot.slane %v17618_v11, 5 }
 0x457   : > { %13333 = vmatmul.mubr.msk.bf16.gmra.mrb[20].mxu1 %vm831_vm3, %v14222_v1  ;;  %v17608_v1 = vcombine.low %v7840_v60, %v7850_v5  ;;  %v10101_v5 = vld [vmem:[#allocation2 + $0x24] sm:$0xe]  ;;  %18967 = vst [vmem:[#allocation40_spill] sm:$0xff] %v17648_v32  ;;  %v10168_v28 = vrot.slane %v10166_v35, 4  ;;  %v17655_v10 = vld [vmem:[#allocation2 + $0x4c] sm:$0xf] }
 0x458   : > { %13336 = vmatprep.mubr.msk.bf16.mxu1 %vm831_vm3, %v14223_v24  ;;  %v7906_v24 = vor.u32 %v7905_v18, %v7902_v23  ;;  %v17612_v23 = vcombine.low %v7888_v45, %v7898_v55  ;;  %v12317_v55 = vrot.slane %v10100_v40, 9  ;;  %v10169_v45 = vrot.slane %v17606_v47, 5  ;;  %v10103_v60 = vld [vmem:[#allocation2 + $0x3c] sm:$0xe]  ;;  %v17669_v36 = vld [vmem:[#allocation2 + $0x50] sm:$0x1] }
 0x459   : > { %v12318_v40 = vrot.slane %v10101_v5, 9  ;;  %v10176_v62 = vrot.slane %v17629_v15, 5  ;;  %v12319_v47 = vrot.slane %v10102_v49, 9  ;;  %18971 = vst [vmem:[#allocation44_spill] sm:$0xff] %v17669_v36  ;;  %v10182_v5 = vrot.slane %v10180_v41, 4 }
 0x45a   : > { %v17614_v18 = vrot.slane %v7906_v24, 4  ;;  %v17659_v21 = vsel %vm14817_vm6, %v12317_v55, %v10166_v35  ;;  %v17664_v34 = vsel %vm14817_vm6, %v10168_v28, %v10169_v45  ;;  %v10183_v55 = vrot.slane %v17638_v14, 5  ;;  %v10104_v11 = vld [vmem:[#allocation2 + $0x48] sm:$0xe]  ;;  %v17674_v28 = vld [vmem:[#allocation2 + $0x58] sm:$0xf] }
 0x45b   : > { %18969 = vst [vmem:[#allocation42_spill] sm:$0xff] %v17659_v21  ;;  %18970 = vst [vmem:[#allocation43_spill] sm:$0xff] %v17664_v34  ;;  %v17676_v45 = vld [vmem:[#allocation2 + $0x64] sm:$0xf]  ;;  %v17688_v35 = vsel %vm14817_vm6, %v12319_v47, %v10180_v41  ;;  %v10187_v34 = vrot.slane %v17648_v32, 5  ;;  %v10194_v32 = vrot.slane %v17655_v10, 5 }
 0x45c   : > { %18972 = vst [vmem:[#allocation45_spill] sm:$0xff] %v17674_v28  ;;  %18975 = vst [vmem:[#allocation48_spill] sm:$0xff] %v17688_v35  ;;  %v10105_v21 = vld [vmem:[#allocation2 + $0x54] sm:$0xe]  ;;  %v17691_v14 = vld [vmem:[#allocation2 + $0x5c] sm:$0x1] }
 0x45d   : > { %18976 = vst [vmem:[#allocation49_spill] sm:$0xff] %v17691_v14  ;;  %v17693_v15 = vld [vmem:[#allocation2 + $0x68] sm:$0x1]  ;;  %v10189_v41 = vrot.slane %v10187_v34, 4  ;;  %v17716_v47 = vld [vmem:[#allocation2 + $0x7c] sm:$0xf] }
 0x45e   : > { %18977 = vst [vmem:[#allocation50_spill] sm:$0xff] %v17693_v15  ;;  %18981 = vst [vmem:[#allocation54_spill] sm:$0xff] %v17716_v47  ;;  %v10204_v35 = vrot.slane %v17691_v14, 5  ;;  %v10108_v14 = vld [vmem:[#allocation2 + $0x78] sm:$0xe] }
 0x45f   : > { %13337 = vmatmul.mubr.msk.bf16.gmra.mrb[24].mxu1 %vm831_vm3, %v14225_v57  ;;  %v10173_v57 = vrot.slane %v17616_v26, 5 }
 0x460   : > { %13340 = vmatprep.mubr.msk.bf16.mxu1 %vm831_vm3, %v14226_v48  ;;  %v17653_v48 = vld [vmem:[#allocation2 + $0x44] sm:$0x1] }
 0x461   : > { %18968 = vst [vmem:[#allocation41_spill] sm:$0xff] %v17653_v48  ;;  %v10175_v24 = vrot.slane %v10173_v57, 4  ;;  %v17680_v49 = vsel %vm14817_vm6, %v12318_v40, %v10173_v57  ;;  %v17699_v57 = vsel %vm14817_vm6, %v10182_v5, %v10183_v55  ;;  %v12321_v40 = vrot.slane %v10104_v11, 9 }
 0x462   : > { %18973 = vst [vmem:[#allocation46_spill] sm:$0xff] %v17680_v49  ;;  %18978 = vst [vmem:[#allocation51_spill] sm:$0xff] %v17699_v57  ;;  %v10197_v5 = vrot.slane %v17669_v36, 5  ;;  %v10201_v55 = vrot.slane %v17674_v28, 5  ;;  %v10196_v57 = vrot.slane %v10194_v32, 4  ;;  %v12323_v49 = vrot.slane %v10106_v37, 9 }
 0x463   : > { %v17684_v26 = vsel %vm14817_vm6, %v10175_v24, %v10176_v62  ;;  %v12320_v24 = vrot.slane %v10103_v60, 9  ;;  %v10190_v62 = vrot.slane %v17653_v48, 5  ;;  %v10208_v36 = vrot.slane %v17676_v45, 5  ;;  %v9372_v48 = vld [vmem:[#allocation2 + $0x80] sm:$0x1] }
 0x464   : > { %18974 = vst [vmem:[#allocation47_spill] sm:$0xff] %v17684_v26  ;;  %v10203_v26 = vrot.slane %v10201_v55, 4  ;;  %v17742_v28 = vld [vmem:[#allocation2 + $0x88] sm:$0xf] }
 0x465   : > { %v17712_v60 = vsel %vm14817_vm6, %v12320_v24, %v10187_v34  ;;  %v17720_v11 = vsel %vm14817_vm6, %v10189_v41, %v10190_v62  ;;  %v10107_v34 = vld [vmem:[#allocation2 + $0x6c] sm:$0xe]  ;;  %v17727_v24 = vld [vmem:[#allocation2 + $0x74] sm:$0x1]  ;;  %v17734_v62 = vsel %vm14817_vm6, %v10196_v57, %v10197_v5  ;;  %v10211_v41 = vrot.slane %v17693_v15, 5  ;;  %18987 = vst [vmem:[#allocation60_spill] sm:$0xff] %v17742_v28 }
 0x466   : > { %18980 = vst [vmem:[#allocation53_spill] sm:$0xff] %v17712_v60  ;;  %18982 = vst [vmem:[#allocation55_spill] sm:$0xff] %v17720_v11  ;;  %v10210_v57 = vrot.slane %v10208_v36, 4  ;;  %v12324_v5 = vrot.slane %v10107_v34, 9  ;;  %v10109_v11 = vld [vmem:[#allocation2 + $0x84] sm:$0xe]  ;;  %v17759_v15 = vsel %vm14817_vm6, %v12323_v49, %v10208_v36 }
 0x467   : > { %13341 = vmatmul.mubr.msk.bf16.gmra.mrb[28].mxu1 %vm831_vm3, %v14227_v9  ;;  %v12322_v9 = vrot.slane %v10105_v21, 9  ;;  %18984 = vst [vmem:[#allocation57_spill] sm:$0xff] %v17727_v24  ;;  %18985 = vst [vmem:[#allocation58_spill] sm:$0xff] %v17734_v62  ;;  %v17748_v21 = vsel %vm14817_vm6, %v10203_v26, %v10204_v35  ;;  %v10218_v26 = vrot.slane %v17727_v24, 5  ;;  %v9375_v35 = vld [vmem:[#allocation2 + $0x8c] sm:$0x1] }
 0x468   : > { %13352 = vmatprep.mubr.msk.bf16.mxu1 %vm831_vm3, %v17522_v54  ;;  %v17724_v54 = vsel %vm14817_vm6, %v12321_v40, %v10194_v32  ;;  %v10215_v40 = vrot.slane %v17708_v42, 5  ;;  %18988 = vst [vmem:[#allocation61_spill] sm:$0xff] %v17748_v21  ;;  %18990 = vst [vmem:[#allocation63_spill] sm:$0xff] %v17759_v15  ;;  %v9378_v62 = vld [vmem:[#allocation2 + $0x98] sm:$0x1]  ;;  %v17764_v34 = vsel %vm14817_vm6, %v10210_v57, %v10211_v41  ;;  %v12325_v42 = vrot.slane %v10108_v14, 9 }
 0x469   : > { %18983 = vst [vmem:[#allocation56_spill] sm:$0xff] %v17724_v54  ;;  %v17738_v32 = vsel %vm14817_vm6, %v12322_v9, %v10201_v55  ;;  %v14229_v9 = vld [vmem:[%s18731_s2 + $0xa8] sm:$0xff]   ;;  %v17753_v55 = vld [vmem:[#allocation2 + $0x94] sm:$0xf]  ;;  %18991 = vst [vmem:[#allocation64_spill] sm:$0xff] %v17764_v34  ;;  %v10222_v60 = vrot.slane %v17716_v47, 5 }
 0x46a   : > { %18986 = vst [vmem:[#allocation59_spill] sm:$0xff] %v17738_v32  ;;  %18989 = vst [vmem:[#allocation62_spill] sm:$0xff] %v17753_v55  ;;  %v10217_v37 = vrot.slane %v10215_v40, 4  ;;  %v17768_v54 = vsel %vm14817_vm6, %v12324_v5, %v10215_v40  ;;  %v9380_v36 = vld [vmem:[#allocation2 + $0xa0] sm:$0xf]  ;;  %v12326_v41 = vrot.slane %v10109_v11, 9 }
 0x46b   : > { %18992 = vst [vmem:[#allocation65_spill] sm:$0xff] %v17768_v54  ;;  %v10229_v57 = vrot.slane %v17742_v28, 5  ;;  %v10110_v32 = vld [vmem:[#allocation2 + $0x90] sm:$0xe]  ;;  %v9383_v14 = vld [vmem:[#allocation2 + $0xac] sm:$0xf]  ;;  %v17787_v40 = vsel %vm14817_vm6, %v12325_v42, %v10222_v60 }
 0x46c   : > { %v17777_v21 = vsel %vm14817_vm6, %v10217_v37, %v10218_v26  ;;  %v10224_v5 = vrot.slane %v10222_v60, 4  ;;  %v10225_v37 = vrot.slane %v9372_v48, 5  ;;  %v10111_v26 = vld [vmem:[#allocation2 + $0x9c] sm:$0xe]  ;;  %v14230_v11 = vld [vmem:[%s18731_s2 + $0xb0] sm:$0xff]   ;;  %v10232_v34 = vrot.slane %v9375_v35, 5 }
 0x46d   : > { %18993 = vst [vmem:[#allocation66_spill] sm:$0xff] %v17777_v21  ;;  %v10231_v49 = vrot.slane %v10229_v57, 4  ;;  %v9384_v21 = vld [vmem:[#allocation2 + $0xb0] sm:$0x1]  ;;  %v12327_v48 = vrot.slane %v10110_v32, 9  ;;  %v10239_v60 = vrot.slane %v9378_v62, 5 }
 0x46e   : > { %v17799_v42 = vsel %vm14817_vm6, %v10224_v5, %v10225_v37  ;;  %v10243_v54 = vrot.slane %v9380_v36, 5  ;;  %v9386_v15 = vld [vmem:[#allocation2 + $0xb8] sm:$0xf]  ;;  %v12328_v35 = vrot.slane %v10111_v26, 9  ;;  %v10112_v24 = vld [vmem:[#allocation2 + $0xa8] sm:$0xe] }
 0x46f   : > { %13353 = vmatmul.mubr.msk.bf16.vlgmr.msra.gmra.mrb[0].mxu1 %vm831_vm3, %v17539_v22  ;;  %v10236_v22 = vrot.slane %v17753_v55, 5  ;;  %v18996_v55 = vshll.u32 %v17312_v7, 16  ;;  %v10113_v5 = vld [vmem:[#allocation2 + $0xb4] sm:$0xe]  ;;  %v9389_v37 = vld [vmem:[#allocation2 + $0xc4] sm:$0xf] }
 0x470   : > { %13385 = vmatpush3.bf16.msra.mxu1 %v17499_v33  ;;  %13356 = vmatprep.mubr.msk.bf16.mxu1 %vm831_vm3, %v17562_v51  ;;  %v9381_v33 = vld [vmem:[#allocation2 + $0xa4] sm:$0x1]  ;;  %v17794_v51 = vsel %vm14817_vm6, %v12326_v41, %v10229_v57  ;;  %v17805_v41 = vsel %vm14817_vm6, %v10231_v49, %v10232_v34  ;;  %v10245_v32 = vrot.slane %v10243_v54, 4  ;;  %v14231_v34 = vld [vmem:[%s18731_s2 + $0xb8] sm:$0xff]   ;;  %v17826_v26 = vsel %vm14817_vm6, %v12328_v35, %v10243_v54 }
 0x471   : > { %13386 = vmatprep.subr.bf16.mxu1 %v14229_v9  ;;  %18994 = vst [vmem:[#allocation67_spill] sm:$0xff] %v17794_v51  ;;  %18995 = vst [vmem:[#allocation68_spill] sm:$0xff] %v17805_v41  ;;  %v10238_v57 = vrot.slane %v10236_v22, 4  ;;  %v17809_v47 = vrot.slane %v18996_v55, 5  ;;  %v10246_v36 = vrot.slane %v9381_v33, 5  ;;  %v10250_v33 = vrot.slane %v9383_v14, 5 }
 0x472   : > { %v9387_v49 = vld [vmem:[#allocation2 + $0xbc] sm:$0x1]  ;;  %v12329_v41 = vrot.slane %v10112_v24, 9  ;;  %v10257_v51 = vrot.slane %v9386_v15, 5  ;;  %v12330_v14 = vrot.slane %v10113_v5, 9  ;;  %v18997_v35 = vshrl.u32 %v17312_v7, 16 }
 0x473   : > { %v17822_v55 = vsel %vm14817_vm6, %v10238_v57, %v10239_v60  ;;  %v17832_v28 = vsel %vm14817_vm6, %v10245_v32, %v10246_v36  ;;  %v10252_v54 = vrot.slane %v10250_v33, 4  ;;  %v10253_v57 = vrot.slane %v9384_v21, 5  ;;  %v7737_v62 = vld [vmem:[#allocation2 + $0x84] sm:$0xf] }
 0x474   : > { %13387 = vmatpush3.bf16.msra.mxu1 %v14229_v9  ;;  %v17818_v9 = vsel %vm14817_vm6, %v12327_v48, %v10236_v22  ;;  %v10114_v22 = vld [vmem:[#allocation2 + $0xc0] sm:$0xe]  ;;  %v9390_v48 = vld [vmem:[#allocation2 + $0xc8] sm:$0x1]  ;;  %v12352_v60 = vcombine.low %v17826_v26, %v17832_v28  ;;  %v7987_v32 = vrot.slane %v18997_v35, 4  ;;  %v10259_v24 = vrot.slane %v10257_v51, 4 }
 0x475   : > { %13388 = vmatprep.subr.bf16.mxu1 %v14230_v11  ;;  %v10260_v15 = vrot.slane %v9387_v49, 5  ;;  %v10264_v36 = vrot.slane %v9389_v37, 5  ;;  %v17849_v21 = vsel %vm14817_vm6, %v12329_v41, %v10250_v33  ;;  %v17857_v7 = vsel %vm14817_vm6, %v12330_v14, %v10257_v51  ;;  %v12381_v28 = vld [vmem:[%s14466_s26 + $0x18] sm:$0xf]  ;;  %v12378_v26 = vld [vmem:[%s14466_s26 + $0xc] sm:$0xf] }
 0x476   : > { %v10267_v35 = vrot.slane %v9390_v48, 5  ;;  %v18998_v41 = vshll.u32 %v17584_v46, 16  ;;  %v7999_v14 = vshll.u32 %v7737_v62, 16  ;;  %v7912_v46 = vsel %vm14501_vm2, %v17614_v18, %v17559_v39 }
 0x477   : > { %13357 = vmatmul.mubr.msk.bf16.gmra.mrb[4].mxu1 %vm831_vm3, %v17608_v1  ;;  %v17845_v1 = vld [vmem:[%s18731_s2 + $0xc0] sm:$0xff]   ;;  %v17863_v49 = vsel %vm14817_vm6, %v10259_v24, %v10260_v15  ;;  %v10266_v37 = vrot.slane %v10264_v36, 4  ;;  %v19000_v15 = vsel %vm14501_vm2, %v17588_v56, %v17602_v53  ;;  %v7936_v39 = vsel %vm14501_vm2, %v17624_v61, %v17569_v63 }
 0x478   : > { %13360 = vmatprep.mubr.msk.bf16.mxu1 %vm831_vm3, %v17610_v13  ;;  %13389 = vmatpush3.bf16.msra.mxu1 %v14230_v11  ;;  %v17853_v13 = vsel %vm14817_vm6, %v10252_v54, %v10253_v57  ;;  %v12331_v11 = vrot.slane %v10114_v22, 9  ;;  %v7977_v33 = vrot.slane %v18998_v41, 5  ;;  %v8005_v54 = vshll.u32 %v17323_v16, 16 }
 0x479   : > { %13390 = vmatprep.subr.bf16.mxu1 %v14231_v34  ;;  %v8009_v57 = vshrl.u32 %v17323_v16, 16  ;;  %v12354_v51 = vcombine.low %v17857_v7, %v17863_v49  ;;  %v7996_v22 = vshrl.u32 %v7737_v62, 16  ;;  %v17877_v48 = vsel %vm14817_vm6, %v10266_v37, %v10267_v35  ;;  %v7740_v37 = vld [vmem:[#allocation2 + $0x90] sm:$0xf] }
 0x47a   : > { %v17873_v5 = vsel %vm14817_vm6, %v12331_v11, %v10264_v36  ;;  %v18999_v16 = vor.u32 %v17642_v31, %v17636_v19  ;;  %v7988_v62 = vor.u32 %v7987_v32, %v17809_v47  ;;  %v12139_v36 = vcombine.low %v7912_v46, %v19000_v15 }
 0x47b   : > { %v7946_v18 = vsel %vm14501_vm2, %v17632_v25, %v17626_v6  ;;  %v19001_v31 = vshll.u32 %v17296_v4, 16  ;;  %v7991_v11 = vshll.u32 %v17314_v38, 16  ;;  %v17908_v56 = vrot.slane %v8005_v54, 5 }
 0x47c   : > { %13391 = vmatpush3.bf16.msra.mxu1 %v14231_v34  ;;  %v7965_v24 = vrot.slane %v18999_v16, 4  ;;  %v12355_v34 = vcombine.low %v17873_v5, %v17877_v48  ;;  %v8011_v53 = vrot.slane %v8009_v57, 4  ;;  %v19002_v63 = vor.u32 %v17594_v59, %v17592_v20  ;;  %v7743_v16 = vld [vmem:[#allocation2 + $0x9c] sm:$0xf] }
 0x47d   : > { %13424 = vmatprep.subr.bf16.mxu1 %v17845_v1  ;;  %v7969_v32 = vrot.slane %v19001_v31, 5  ;;  %v7978_v6 = vor.u32 %v7977_v33, %v17644_v17  ;;  %v7998_v25 = vrot.slane %v7996_v22, 4  ;;  %v8001_v35 = vrot.slane %v7999_v14, 5 }
 0x47e   : > { %v7955_v61 = vrot.slane %v19002_v63, 4  ;;  %v7989_v41 = vrot.slane %v7988_v62, 4  ;;  %v8020_v38 = vshrl.u32 %v7740_v37, 16  ;;  %v8023_v54 = vshll.u32 %v7740_v37, 16 }
 0x47f   : > { %13361 = vmatmul.mubr.msk.bf16.gmra.mrb[8].mxu1 %vm831_vm3, %v17612_v23  ;;  %v12140_v23 = vcombine.low %v7936_v39, %v7946_v18  ;;  %v7970_v4 = vsel %vm14501_vm2, %v7965_v24, %v7969_v32  ;;  %v8029_v57 = vshll.u32 %v17344_v27, 16  ;;  %v8033_v46 = vshrl.u32 %v17344_v27, 16 }
 0x480   : > { %13364 = vmatprep.mubr.msk.bf16.mxu1 %vm831_vm3, %v12139_v36  ;;  %v7993_v15 = vrot.slane %v7991_v11, 5  ;;  %v8012_v20 = vor.u32 %v8011_v53, %v17908_v56  ;;  %v8053_v59 = vshll.u32 %v17360_v30, 16  ;;  %v8057_v17 = vshrl.u32 %v17360_v30, 16 }
 0x481   : > { %v7960_v33 = vsel %vm14501_vm2, %v7955_v61, %v17636_v19  ;;  %v7979_v22 = vrot.slane %v7978_v6, 4  ;;  %v8002_v14 = vor.u32 %v8001_v35, %v7998_v25  ;;  %v8015_v24 = vshll.u32 %v17332_v58, 16  ;;  %v7746_v35 = vld [vmem:[#allocation2 + $0xa8] sm:$0xf] }
 0x482   : > { %v12141_v62 = vcombine.low %v7960_v33, %v7970_v4  ;;  %v7994_v27 = vsel %vm14501_vm2, %v7989_v41, %v7993_v15  ;;  %v8044_v36 = vshrl.u32 %v7743_v16, 16  ;;  %v8047_v39 = vshll.u32 %v7743_v16, 16 }
 0x483   : > { %v8022_v18 = vrot.slane %v8020_v38, 4  ;;  %v8025_v31 = vrot.slane %v8023_v54, 5  ;;  %v17928_v32 = vrot.slane %v8029_v57, 5  ;;  %v8035_v11 = vrot.slane %v8033_v46, 4  ;;  %v7749_v54 = vld [vmem:[#allocation2 + $0xb4] sm:$0xf] }
 0x484   : > { %v8013_v30 = vrot.slane %v8012_v20, 4  ;;  %v17931_v53 = vrot.slane %v8053_v59, 5  ;;  %v8059_v19 = vrot.slane %v8057_v17, 4  ;;  %v7984_v58 = vsel %vm14501_vm2, %v7979_v22, %v17809_v47  ;;  %v14283_v20 = vld [vmem:[#allocation2 + $0x98] sm:$0x1] }
 0x485   : > { %v8003_v37 = vrot.slane %v8002_v14, 4  ;;  %v12142_v63 = vcombine.low %v7984_v58, %v7994_v27  ;;  %v8017_v61 = vrot.slane %v8015_v24, 5  ;;  %v8046_v6 = vrot.slane %v8044_v36, 4 }
 0x486   : > { %v8049_v25 = vrot.slane %v8047_v39, 5  ;;  %v8026_v4 = vor.u32 %v8025_v31, %v8022_v18  ;;  %v8036_v41 = vor.u32 %v8035_v11, %v17928_v32  ;;  %v8081_v38 = vshrl.u32 %v17378_v50, 16 }
 0x487   : > { %13365 = vmatmul.mubr.msk.bf16.gmra.mrb[12].mxu1 %vm831_vm3, %v12140_v23  ;;  %v8077_v23 = vshll.u32 %v17378_v50, 16  ;;  %v8018_v57 = vsel %vm14501_vm2, %v8013_v30, %v8017_v61  ;;  %v8060_v46 = vor.u32 %v8059_v19, %v17931_v53  ;;  %v8101_v47 = vshll.u32 %v17398_v52, 16 }
 0x488   : > { %13368 = vmatprep.mubr.msk.bf16.mxu1 %vm831_vm3, %v12141_v62  ;;  %v8105_v16 = vshrl.u32 %v17398_v52, 16  ;;  %v8008_v15 = vsel %vm14501_vm2, %v8003_v37, %v17908_v56  ;;  %v8039_v59 = vshll.u32 %v14283_v20, 16  ;;  %v8068_v17 = vshrl.u32 %v7746_v35, 16 }
 0x489   : > { %v8071_v33 = vshll.u32 %v7746_v35, 16  ;;  %v8050_v22 = vor.u32 %v8049_v25, %v8046_v6  ;;  %v8063_v50 = vshll.u32 %v17376_v8, 16  ;;  %v8092_v14 = vshrl.u32 %v7749_v54, 16  ;;  %v7752_v6 = vld [vmem:[#allocation2 + $0xc0] sm:$0xf] }
 0x48a   : > { %v8095_v24 = vshll.u32 %v7749_v54, 16  ;;  %v12143_v62 = vcombine.low %v8008_v15, %v8018_v57  ;;  %v8037_v27 = vrot.slane %v8036_v41, 4  ;;  %v8079_v36 = vrot.slane %v8077_v23, 5  ;;  %v14284_v57 = vld [vmem:[#allocation2 + $0xb0] sm:$0x1] }
 0x48b   : > { %v8083_v39 = vrot.slane %v8081_v38, 4  ;;  %v8027_v52 = vrot.slane %v8026_v4, 4  ;;  %v8061_v18 = vrot.slane %v8060_v46, 4  ;;  %v8103_v31 = vrot.slane %v8101_v47, 5 }
 0x48c   : > { %v8107_v11 = vrot.slane %v8105_v16, 4  ;;  %v8041_v56 = vrot.slane %v8039_v59, 5  ;;  %v8070_v30 = vrot.slane %v8068_v17, 4  ;;  %v8073_v19 = vrot.slane %v8071_v33, 5 }
 0x48d   : > { %v8051_v58 = vrot.slane %v8050_v22, 4  ;;  %v8065_v37 = vrot.slane %v8063_v50, 5  ;;  %v8094_v8 = vrot.slane %v8092_v14, 4  ;;  %v8097_v61 = vrot.slane %v8095_v24, 5 }
 0x48e   : > { %v8042_v25 = vsel %vm14501_vm2, %v8037_v27, %v8041_v56  ;;  %v8084_v35 = vor.u32 %v8083_v39, %v8079_v36  ;;  %v8129_v4 = vshrl.u32 %v17417_v2, 16  ;;  %v8032_v41 = vsel %vm14501_vm2, %v8027_v52, %v17928_v32 }
 0x48f   : > { %13369 = vmatmul.mubr.msk.bf16.gmra.mrb[16].mxu1 %vm831_vm3, %v12142_v63  ;;  %v8125_v63 = vshll.u32 %v17417_v2, 16  ;;  %v8066_v23 = vsel %vm14501_vm2, %v8061_v18, %v8065_v37  ;;  %v8108_v38 = vor.u32 %v8107_v11, %v8103_v31  ;;  %v8074_v54 = vor.u32 %v8073_v19, %v8070_v30  ;;  %v14285_v2 = vld [vmem:[#allocation2 + $0xbc] sm:$0x1]  ;;  %v14286_v37 = vld [vmem:[#allocation2 + $0xc8] sm:$0x1] }
 0x490   : > { %13372 = vmatprep.mubr.msk.bf16.mxu1 %vm831_vm3, %v12143_v62  ;;  %v8087_v46 = vshll.u32 %v14284_v57, 16  ;;  %v8116_v47 = vshrl.u32 %v7752_v6, 16  ;;  %v8119_v16 = vshll.u32 %v7752_v6, 16  ;;  %v12144_v15 = vcombine.low %v8032_v41, %v8042_v25 }
 0x491   : > { %v8056_v20 = vsel %vm14501_vm2, %v8051_v58, %v17931_v53  ;;  %v8098_v59 = vor.u32 %v8097_v61, %v8094_v8  ;;  %v8111_v17 = vshll.u32 %v14285_v2, 16  ;;  %v8085_v22 = vrot.slane %v8084_v35, 4 }
 0x492   : > { %v12145_v33 = vcombine.low %v8056_v20, %v8066_v23  ;;  %v8127_v32 = vrot.slane %v8125_v63, 5  ;;  %v8131_v50 = vrot.slane %v8129_v4, 4  ;;  %v8109_v14 = vrot.slane %v8108_v38, 4 }
 0x493   : > { %v8075_v24 = vrot.slane %v8074_v54, 4  ;;  %v8089_v62 = vrot.slane %v8087_v46, 5  ;;  %v8118_v27 = vrot.slane %v8116_v47, 4  ;;  %v8121_v39 = vrot.slane %v8119_v16, 5 }
 0x494   : > { %v8099_v52 = vrot.slane %v8098_v59, 4  ;;  %v8113_v18 = vrot.slane %v8111_v17, 5  ;;  %v8132_v11 = vor.u32 %v8131_v50, %v8127_v32  ;;  %v8527_v30 = vrot.slane %v17485_v12, 5  ;;  %v8461_v12 = vld [vmem:[#allocation2 + $0xc] sm:$0xe] }
 0x495   : > { %v8090_v53 = vsel %vm14501_vm2, %v8085_v22, %v8089_v62  ;;  %v8080_v19 = vsel %vm14501_vm2, %v8075_v24, %v8079_v36  ;;  %v8122_v58 = vor.u32 %v8121_v39, %v8118_v27  ;;  %v8135_v8 = vshll.u32 %v14286_v37, 16  ;;  %v19003_v22 = vld [vmem:[#allocation6_spill] sm:$0xff]  ;;  %v19006_v24 = vld [vmem:[#allocation8_spill] sm:$0xff]  ;;  %v19010_v39 = vld [vmem:[#allocation11_spill] sm:$0xff] }
 0x496   : > { %v8114_v56 = vsel %vm14501_vm2, %v8109_v14, %v8113_v18  ;;  %v12146_v61 = vcombine.low %v8080_v19, %v8090_v53  ;;  %v8104_v6 = vsel %vm14501_vm2, %v8099_v52, %v8103_v31  ;;  %v8133_v35 = vrot.slane %v8132_v11, 4  ;;  %v14235_v14 = vld [vmem:[%s18731_s2 + $0xd8] sm:$0xff]   ;;  %v14237_v18 = vld [vmem:[%s18731_s2 + $0xe0] sm:$0xff]   ;;  %v19012_v53 = vld [vmem:[#allocation12_spill] sm:$0xff] }
 0x497   : > { %13373 = vmatmul.mubr.msk.bf16.gmra.mrb[20].mxu1 %vm831_vm3, %v12144_v15  ;;  %v12147_v25 = vcombine.low %v8104_v6, %v8114_v56  ;;  %v8529_v63 = vrot.slane %v8527_v30, 4  ;;  %v8123_v4 = vrot.slane %v8122_v58, 4  ;;  %v8137_v41 = vrot.slane %v8135_v8, 5  ;;  %v19007_v62 = vld [vmem:[#allocation10_spill] sm:$0xff]  ;;  %v19013_v11 = vld [vmem:[#allocation13_spill] sm:$0xff]  ;;  %v19016_v19 = vld [vmem:[#allocation15_spill] sm:$0xff] }
 0x498   : > { %13376 = vmatprep.mubr.msk.bf16.mxu1 %vm831_vm3, %v12145_v33  ;;  %v8530_v23 = vrot.slane %v17503_v0, 5  ;;  %v8534_v38 = vrot.slane %v17493_v44, 5  ;;  %v12169_v54 = vrot.slane %v8461_v12, 9  ;;  %v8462_v0 = vld [vmem:[#allocation2 + $0x18] sm:$0xe]  ;;  %v8537_v44 = vrot.slane %v17508_v43, 5 }
 0x499   : > { %v8138_v36 = vsel %vm14501_vm2, %v8133_v35, %v8137_v41  ;;  %v8128_v57 = vsel %vm14501_vm2, %v8123_v4, %v8127_v32  ;;  %v12170_v20 = vrot.slane %v8462_v0, 9  ;;  %v14233_v33 = vld [vmem:[%s18731_s2 + $0xc8] sm:$0xff]   ;;  %v19004_v32 = vld [vmem:[#allocation7_spill] sm:$0xff]  ;;  %v14234_v43 = vld [vmem:[%s18731_s2 + $0xd0] sm:$0xff]   ;;  %v19008_v27 = vcombine.low %v19006_v24, %v19007_v62 }
 0x49a   : > { %v8531_v31 = vsel %vm14817_vm6, %v8529_v63, %v8530_v23  ;;  %v12148_v46 = vcombine.low %v8128_v57, %v8138_v36  ;;  %v8528_v47 = vsel %vm14817_vm6, %v12169_v54, %v8527_v30  ;;  %v8536_v15 = vrot.slane %v8534_v38, 4  ;;  %v19015_v30 = vld [vmem:[#allocation14_spill] sm:$0xff]  ;;  %v19018_v37 = vld [vmem:[#allocation16_spill] sm:$0xff]  ;;  %v19021_v6 = vld [vmem:[#allocation17_spill] sm:$0xff] }
 0x49b   : > { %v12193_v16 = vcombine.low %v8528_v47, %v8531_v31  ;;  %v8535_v2 = vsel %vm14817_vm6, %v12170_v20, %v8534_v38  ;;  %v19005_v50 = vcombine.low %v19003_v22, %v19004_v32  ;;  %v19014_v56 = vcombine.low %v19012_v53, %v19013_v11  ;;  %v19019_v8 = vld [vmem:[#allocation18_spill] sm:$0xff]  ;;  %v19024_v63 = vld [vmem:[#allocation20_spill] sm:$0xff]  ;;  %v19025_v4 = vld [vmem:[#allocation21_spill] sm:$0xff] }
 0x49c   : > { %v8538_v59 = vsel %vm14817_vm6, %v8536_v15, %v8537_v44  ;;  %v19017_v58 = vcombine.low %v19015_v30, %v19016_v19  ;;  %v19026_v41 = vcombine.low %v19024_v63, %v19025_v4  ;;  %v19027_v12 = vld [vmem:[#allocation22_spill] sm:$0xff]  ;;  %v19028_v23 = vld [vmem:[#allocation23_spill] sm:$0xff]  ;;  %v19030_v38 = vld [vmem:[#allocation24_spill] sm:$0xff]  ;;  %v10686_v7 = vshrl.u32 %v12378_v26, 16 }
 0x49d   : > { %v12194_v17 = vcombine.low %v8535_v2, %v8538_v59  ;;  %v19029_v36 = vcombine.low %v19027_v12, %v19028_v23  ;;  %v19031_v54 = vld [vmem:[#allocation26_spill] sm:$0xff]  ;;  %v19033_v57 = vld [vmem:[#allocation25_spill] sm:$0xff]  ;;  %v19040_v20 = vld [vmem:[#allocation31_spill] sm:$0xff]  ;;  %v10689_v49 = vshll.u32 %v12378_v26, 16 }
 0x49e   : > { %v19032_v31 = vcombine.low %v19030_v38, %v19031_v54  ;;  %v19037_v15 = vld [vmem:[#allocation29_spill] sm:$0xff]  ;;  %v19039_v44 = vld [vmem:[#allocation30_spill] sm:$0xff]  ;;  %v14238_v32 = vld [vmem:[#allocation2 + $0x24] sm:$0xff]  }
 0x49f   : > { %13377 = vmatmul.mubr.msk.bf16.gmra.mrb[24].mxu1 %vm831_vm3, %v12146_v61  ;;  %v19020_v61 = vcombine.low %v19018_v37, %v19019_v8  ;;  %v19041_v59 = vcombine.low %v19039_v44, %v19040_v20  ;;  %v14236_v2 = vld [vmem:[#allocation2 + $0x18] sm:$0xff]   ;;  %v14248_v8 = vld [vmem:[#allocation2 + $0x84] sm:$0xff]  }
 0x4a0   : > { %13380 = vmatprep.mubr.msk.bf16.mxu1 %vm831_vm3, %v12147_v25  ;;  %v19022_v25 = vld [vmem:[#allocation19_spill] sm:$0xff]  ;;  %v14252_v62 = vld [vmem:[%s18731_s2 + $0xf8] sm:$0xff]  }
 0x4a1   : > { %v19023_v35 = vcombine.low %v19021_v6, %v19022_v25  ;;  %v14240_v24 = vld [vmem:[#allocation2 + $0x3c] sm:$0xff]   ;;  %v9346_v11 = vld [vmem:[#allocation2 + $0x18] sm:$0xf] }
 0x4a2   : > { %v14246_v53 = vld [vmem:[#allocation2 + $0x78] sm:$0xff]   ;;  %v9398_v37 = vshll.u32 %v9346_v11, 16 }
 0x4a4   : > { %v9400_v4 = vrot.slane %v9398_v37, 5  ;;  %v14253_v37 = vld [vmem:[#allocation2 + $0xb4] sm:$0xff]  }
 0x4a7   : > { %13381 = vmatmul.mubr.msk.bf16.gmra.mrb[28].mxu1 %vm831_vm3, %v12148_v46  ;;  %v19034_v46 = vld [vmem:[#allocation27_spill] sm:$0xff] }
 0x4a8   : > { %13392 = vmatprep.mubr.msk.bf16.mxu1 %vm831_vm3, %v12193_v16  ;;  %v19035_v47 = vcombine.low %v19033_v57, %v19034_v46  ;;  %v19036_v16 = vld [vmem:[#allocation28_spill] sm:$0xff]  ;;  %v19047_v46 = vld [vmem:[#allocation35_spill] sm:$0xff] }
 0x4a9   : > { %v19038_v0 = vcombine.low %v19036_v16, %v19037_v15  ;;  %v14250_v16 = vld [vmem:[#allocation2 + $0x9c] sm:$0xff]  }
 0x4af   : > { %13393 = vmatmul.mubr.msk.bf16.vlgmr.msra.gmra.mrb[0].mxu1 %vm831_vm3, %v12194_v17  ;;  %v19042_v17 = vld [vmem:[#allocation32_spill] sm:$0xff] }
 0x4b0   : > { %13425 = vmatpush3.bf16.msra.mxu1 %v17845_v1  ;;  %13396 = vmatprep.mubr.msk.bf16.mxu1 %vm831_vm3, %v19005_v50  ;;  %v19009_v1 = vld [vmem:[#allocation9_spill] sm:$0xff]  ;;  %v14242_v50 = vld [vmem:[%s18731_s2 + $0xe8] sm:$0xff]  }
 0x4b1   : > { %13426 = vmatprep.subr.bf16.mxu1 %v14233_v33  ;;  %v19011_v52 = vcombine.low %v19009_v1, %v19010_v39  ;;  %v18080_v1 = vld [vmem:[%s18731_s2 + $0x100] sm:$0xff]   ;;  %v14243_v39 = vld [vmem:[#allocation2 + $0x54] sm:$0xff]  }
 0x4b4   : > { %13427 = vmatpush3.bf16.msra.mxu1 %v14233_v33  ;;  %v19043_v33 = vld [vmem:[#allocation33_spill] sm:$0xff] }
 0x4b5   : > { %13428 = vmatprep.subr.bf16.mxu1 %v14234_v43  ;;  %v19044_v22 = vcombine.low %v19042_v17, %v19043_v33 }
 0x4b7   : > { %13397 = vmatmul.mubr.msk.bf16.gmra.mrb[4].mxu1 %vm831_vm3, %v19008_v27  ;;  %v14241_v27 = vld [vmem:[#allocation2 + $0x48] sm:$0xff]  }
 0x4b8   : > { %13400 = vmatprep.mubr.msk.bf16.mxu1 %vm831_vm3, %v19011_v52  ;;  %13429 = vmatpush3.bf16.msra.mxu1 %v14234_v43  ;;  %v14239_v43 = vld [vmem:[#allocation2 + $0x30] sm:$0xff]   ;;  %v14244_v52 = vld [vmem:[#allocation2 + $0x60] sm:$0xff]  }
 0x4b9   : > { %13430 = vmatprep.subr.bf16.mxu1 %v14235_v14 }
 0x4bc   : > { %13431 = vmatpush3.bf16.msra.mxu1 %v14235_v14  ;;  %v14247_v14 = vld [vmem:[%s18731_s2 + $0xf0] sm:$0xff]  }
 0x4bd   : > { %13464 = vmatprep.subr.bf16.mxu1 %v14237_v18 }
 0x4bf   : > { %13401 = vmatmul.mubr.msk.bf16.gmra.mrb[8].mxu1 %vm831_vm3, %v19014_v56  ;;  %v19045_v56 = vld [vmem:[#allocation34_spill] sm:$0xff] }
 0x4c0   : > { %13404 = vmatprep.mubr.msk.bf16.mxu1 %vm831_vm3, %v19017_v58  ;;  %v9404_v30 = vshll.u32 %v19045_v56, 16  ;;  %v9408_v19 = vshrl.u32 %v19045_v56, 16  ;;  %v9395_v58 = vshrl.u32 %v9346_v11, 16 }
 0x4c2   : > { %v9406_v6 = vrot.slane %v9404_v30, 5  ;;  %v9410_v25 = vrot.slane %v9408_v19, 4  ;;  %v9397_v63 = vrot.slane %v9395_v58, 4 }
 0x4c4   : > { %v9411_v12 = vor.u32 %v9410_v25, %v9406_v6  ;;  %v9401_v57 = vor.u32 %v9400_v4, %v9397_v63  ;;  %v14254_v63 = vld [vmem:[#allocation2 + $0xc0] sm:$0xff]  }
 0x4c6   : > { %v9412_v44 = vrot.slane %v9411_v12, 4 }
 0x4c7   : > { %13405 = vmatmul.mubr.msk.bf16.gmra.mrb[12].mxu1 %vm831_vm3, %v19020_v61  ;;  %v14249_v61 = vld [vmem:[#allocation2 + $0x90] sm:$0xff]  }
 0x4c8   : > { %13408 = vmatprep.mubr.msk.bf16.mxu1 %vm831_vm3, %v19023_v35  ;;  %v9349_v35 = vld [vmem:[#allocation2 + $0x24] sm:$0xf] }
 0x4c9   : > { %v9422_v23 = vshll.u32 %v9349_v35, 16 }
 0x4cb   : > { %v9424_v20 = vrot.slane %v9422_v23, 5  ;;  %v19051_v23 = vld [vmem:[#allocation40_spill] sm:$0xff] }
 0x4cf   : > { %13409 = vmatmul.mubr.msk.bf16.gmra.mrb[16].mxu1 %vm831_vm3, %v19026_v41  ;;  %v9419_v41 = vshrl.u32 %v9349_v35, 16  ;;  %v9358_v35 = vld [vmem:[#allocation2 + $0x48] sm:$0xf] }
 0x4d0   : > { %13412 = vmatprep.mubr.msk.bf16.mxu1 %vm831_vm3, %v19029_v36  ;;  %v19046_v36 = vld [vmem:[#allocation36_spill] sm:$0xff] }
 0x4d1   : > { %v9428_v38 = vshll.u32 %v19046_v36, 16  ;;  %v9432_v54 = vshrl.u32 %v19046_v36, 16  ;;  %v9421_v15 = vrot.slane %v9419_v41, 4  ;;  %v19050_v41 = vld [vmem:[#allocation39_spill] sm:$0xff]  ;;  %v9476_v36 = vshll.u32 %v19051_v23, 16 }
 0x4d2   : > { %v9462_v12 = vshll.u32 %v19050_v41, 16 }
 0x4d3   : > { %v9434_v17 = vrot.slane %v9432_v54, 4 }
 0x4d7   : > { %13413 = vmatmul.mubr.msk.bf16.gmra.mrb[20].mxu1 %vm831_vm3, %v19032_v31  ;;  %v9352_v31 = vld [vmem:[#allocation2 + $0x30] sm:$0xf] }
 0x4d8   : > { %13416 = vmatprep.mubr.msk.bf16.mxu1 %vm831_vm3, %v19035_v47  ;;  %v9414_v47 = vshll.u32 %v19047_v46, 16  ;;  %v9446_v33 = vshll.u32 %v9352_v31, 16  ;;  %v18114_v46 = vld [vmem:[#allocation2 + $0xd0] sm:$0xf] }
 0x4da   : > { %v9448_v11 = vrot.slane %v9446_v33, 5  ;;  %v19052_v33 = vld [vmem:[#allocation45_spill] sm:$0xff] }
 0x4df   : > { %13417 = vmatmul.mubr.msk.bf16.gmra.mrb[24].mxu1 %vm831_vm3, %v19038_v0  ;;  %v14251_v0 = vld [vmem:[#allocation2 + $0xa8] sm:$0xff]  }
 0x4e0   : > { %13420 = vmatprep.mubr.msk.bf16.mxu1 %vm831_vm3, %v19041_v59  ;;  %v18094_v59 = vrot.slane %v9428_v38, 5  ;;  %v9480_v38 = vshrl.u32 %v19051_v23, 16 }
 0x4e7   : > { %13421 = vmatmul.mubr.msk.bf16.gmra.mrb[28].mxu1 %vm831_vm3, %v19044_v22  ;;  %v19048_v22 = vld [vmem:[#allocation37_spill] sm:$0xff] }
 0x4e8   : > { %13432 = vmatprep.mubr.msk.bf16.mxu1 %vm831_vm3, %v14236_v2  ;;  %v9443_v2 = vshrl.u32 %v9352_v31, 16 }
 0x4ef   : > { %13433 = vmatmul.mubr.msk.bf16.vlgmr.msra.gmra.mrb[0].mxu1 %vm831_vm3, %v14238_v32  ;;  %v9452_v32 = vshll.u32 %v19048_v22, 16 }
 0x4f0   : > { %13465 = vmatpush3.bf16.msra.mxu1 %v14237_v18  ;;  %13436 = vmatprep.mubr.msk.bf16.mxu1 %vm831_vm3, %v14239_v43  ;;  %v14245_v18 = vld [vmem:[#allocation2 + $0x6c] sm:$0xff]   ;;  %v9402_v43 = vrot.slane %v9401_v57, 4  ;;  %v9500_v57 = vshll.u32 %v17655_v10, 16 }
 0x4f1   : > { %13466 = vmatprep.subr.bf16.mxu1 %v14242_v50  ;;  %v18104_v56 = vrot.slane %v9452_v32, 5  ;;  %v9528_v32 = vshrl.u32 %v19052_v33, 16 }
 0x4f2   : > { %v9407_v19 = vsel %vm14501_vm2, %v9402_v43, %v9406_v6  ;;  %v18124_v43 = vrot.slane %v9476_v36, 5  ;;  %v19053_v36 = vld [vmem:[#allocation41_spill] sm:$0xff] }
 0x4f4   : > { %13467 = vmatpush3.bf16.msra.mxu1 %v14242_v50  ;;  %v9456_v50 = vshrl.u32 %v19048_v22, 16  ;;  %v9524_v22 = vshll.u32 %v19052_v33, 16  ;;  %v9548_v33 = vshll.u32 %v17676_v45, 16 }
 0x4f5   : > { %13468 = vmatprep.subr.bf16.mxu1 %v14247_v14 }
 0x4f6   : > { %v9458_v30 = vrot.slane %v9456_v50, 4 }
 0x4f7   : > { %13437 = vmatmul.mubr.msk.bf16.gmra.mrb[4].mxu1 %vm831_vm3, %v14240_v24  ;;  %v19049_v24 = vld [vmem:[#allocation38_spill] sm:$0xff] }
 0x4f8   : > { %13440 = vmatprep.mubr.msk.bf16.mxu1 %vm831_vm3, %v14241_v27  ;;  %13469 = vmatpush3.bf16.msra.mxu1 %v14247_v14  ;;  %v9416_v14 = vrot.slane %v9414_v47, 5  ;;  %v9355_v27 = vld [vmem:[#allocation2 + $0x3c] sm:$0xf]  ;;  %v9459_v6 = vor.u32 %v9458_v30, %v18104_v56  ;;  %v18116_v47 = vld [vmem:[#allocation2 + $0xd4] sm:$0x1] }
 0x4f9   : > { %13470 = vmatprep.subr.bf16.mxu1 %v14252_v62  ;;  %v9467_v58 = vshrl.u32 %v9355_v27, 16  ;;  %v9470_v25 = vshll.u32 %v9355_v27, 16  ;;  %v14255_v27 = vld [vmem:[#allocation2 + $0xcc] sm:$0xff]  }
 0x4fc   : > { %13471 = vmatpush3.bf16.msra.mxu1 %v14252_v62  ;;  %v9438_v62 = vshll.u32 %v19049_v24, 16  ;;  %v9491_v24 = vshrl.u32 %v9358_v35, 16 }
 0x4fd   : > { %13504 = vmatprep.subr.bf16.mxu1 %v18080_v1 }
 0x4ff   : > { %13441 = vmatmul.mubr.msk.bf16.gmra.mrb[8].mxu1 %vm831_vm3, %v14243_v39  ;;  %v9417_v39 = vsel %vm14501_vm2, %v9412_v44, %v9416_v14  ;;  %v10271_v44 = vrot.slane %v18114_v46, 5  ;;  %v9482_v14 = vrot.slane %v9480_v38, 4  ;;  %v9486_v38 = vshll.u32 %v19053_v36, 16 }
 0x500   : > { %13444 = vmatprep.mubr.msk.bf16.mxu1 %vm831_vm3, %v14244_v52  ;;  %v9425_v52 = vor.u32 %v9424_v20, %v9421_v15  ;;  %v9504_v15 = vshrl.u32 %v17655_v10, 16  ;;  %v10274_v20 = vrot.slane %v18116_v47, 5  ;;  %v9494_v10 = vshll.u32 %v9358_v35, 16 }
 0x502   : > { %v9426_v4 = vrot.slane %v9425_v52, 4  ;;  %v18126_v52 = vrot.slane %v9500_v57, 5  ;;  %v9483_v57 = vor.u32 %v9482_v14, %v18124_v43  ;;  %v9488_v14 = vrot.slane %v9486_v38, 5 }
 0x507   : > { %13445 = vmatmul.mubr.msk.bf16.gmra.mrb[12].mxu1 %vm831_vm3, %v14245_v18  ;;  %v9445_v18 = vrot.slane %v9443_v2, 4  ;;  %v9472_v2 = vrot.slane %v9470_v25, 5  ;;  %v9530_v25 = vrot.slane %v9528_v32, 4 }
 0x508   : > { %13448 = vmatprep.mubr.msk.bf16.mxu1 %vm831_vm3, %v14246_v53  ;;  %v9435_v53 = vor.u32 %v9434_v17, %v18094_v59  ;;  %v9361_v17 = vld [vmem:[#allocation2 + $0x54] sm:$0xf] }
 0x509   : > { %v9449_v31 = vor.u32 %v9448_v11, %v9445_v18  ;;  %v9515_v11 = vshrl.u32 %v9361_v17, 16  ;;  %v9518_v30 = vshll.u32 %v9361_v17, 16 }
 0x50a   : > { %v9436_v54 = vrot.slane %v9435_v53, 4  ;;  %v9506_v53 = vrot.slane %v9504_v15, 4  ;;  %v9493_v15 = vrot.slane %v9491_v24, 4  ;;  %v19055_v24 = vld [vmem:[#allocation49_spill] sm:$0xff] }
 0x50b   : > { %v9450_v23 = vrot.slane %v9449_v31, 4 }
 0x50d   : > { %v9455_v17 = vsel %vm14501_vm2, %v9450_v23, %v18104_v56  ;;  %v14257_v56 = vld [vmem:[%s18731_s2 + $0x108] sm:$0xff]  }
 0x50f   : > { %13449 = vmatmul.mubr.msk.bf16.gmra.mrb[16].mxu1 %vm831_vm3, %v14248_v8  ;;  %v12281_v8 = vcombine.low %v9407_v19, %v9417_v39  ;;  %v9460_v39 = vrot.slane %v9459_v6, 4 }
 0x510   : > { %13452 = vmatprep.mubr.msk.bf16.mxu1 %vm831_vm3, %v14249_v61  ;;  %v9440_v61 = vrot.slane %v9438_v62, 5  ;;  %v10273_v62 = vrot.slane %v10271_v44, 4 }
 0x512   : > { %v18134_v19 = vsel %vm14817_vm6, %v10273_v62, %v10274_v20  ;;  %v9441_v41 = vsel %vm14501_vm2, %v9436_v54, %v9440_v61  ;;  %v9520_v61 = vrot.slane %v9518_v30, 5  ;;  %v9542_v20 = vshll.u32 %v9364_v3, 16 }
 0x513   : > { %v9534_v62 = vshll.u32 %v19055_v24, 16 }
 0x515   : > { %v9536_v38 = vrot.slane %v9534_v62, 5 }
 0x517   : > { %13453 = vmatmul.mubr.msk.bf16.gmra.mrb[20].mxu1 %vm831_vm3, %v14250_v16  ;;  %v9469_v16 = vrot.slane %v9467_v58, 4  ;;  %v9464_v58 = vrot.slane %v9462_v12, 5 }
 0x518   : > { %13456 = vmatprep.mubr.msk.bf16.mxu1 %vm831_vm3, %v14251_v0  ;;  %v10115_v0 = vld [vmem:[#allocation2 + $0xcc] sm:$0xe] }
 0x519   : > { %v12332_v50 = vrot.slane %v10115_v0, 9  ;;  %v9465_v12 = vsel %vm14501_vm2, %v9460_v39, %v9464_v58  ;;  %v9473_v6 = vor.u32 %v9472_v2, %v9469_v16  ;;  %v9496_v0 = vrot.slane %v9494_v10, 5  ;;  %v19054_v16 = vld [vmem:[#allocation44_spill] sm:$0xff] }
 0x51a   : > { %v9510_v2 = vshll.u32 %v19054_v16, 16  ;;  %v12283_v32 = vcombine.low %v9455_v17, %v9465_v12  ;;  %v9544_v58 = vrot.slane %v9542_v20, 5 }
 0x51b   : > { %v18130_v18 = vsel %vm14817_vm6, %v12332_v50, %v10271_v44  ;;  %v9539_v44 = vshrl.u32 %v9364_v3, 16  ;;  %v9474_v50 = vrot.slane %v9473_v6, 4  ;;  %v9497_v39 = vor.u32 %v9496_v0, %v9493_v15  ;;  %v19056_v3 = vld [vmem:[#allocation52_spill] sm:$0xff] }
 0x51c   : > { %v12356_v35 = vcombine.low %v18130_v18, %v18134_v19  ;;  %v9572_v12 = vshll.u32 %v19056_v3, 16  ;;  %v9576_v6 = vshrl.u32 %v19056_v3, 16 }
 0x51d   : > { %v9541_v30 = vrot.slane %v9539_v44, 4  ;;  %v9479_v36 = vsel %vm14501_vm2, %v9474_v50, %v18124_v43  ;;  %v9498_v0 = vrot.slane %v9497_v39, 4 }
 0x51f   : > { %13457 = vmatmul.mubr.msk.bf16.gmra.mrb[24].mxu1 %vm831_vm3, %v14253_v37  ;;  %v18136_v37 = vrot.slane %v9524_v22, 5  ;;  %v9367_v22 = vld [vmem:[#allocation2 + $0x6c] sm:$0xf]  ;;  %v9503_v24 = vsel %vm14501_vm2, %v9498_v0, %v18126_v52 }
 0x520   : > { %13460 = vmatprep.mubr.msk.bf16.mxu1 %vm831_vm3, %v14254_v63  ;;  %v9431_v63 = vsel %vm14501_vm2, %v9426_v4, %v18094_v59  ;;  %v9507_v59 = vor.u32 %v9506_v53, %v18126_v52  ;;  %v9517_v4 = vrot.slane %v9515_v11, 4  ;;  %v9566_v23 = vshll.u32 %v9367_v22, 16 }
 0x521   : > { %v12282_v54 = vcombine.low %v9431_v63, %v9441_v41  ;;  %v9531_v31 = vor.u32 %v9530_v25, %v18136_v37  ;;  %v9563_v25 = vshrl.u32 %v9367_v22, 16  ;;  %v9512_v63 = vrot.slane %v9510_v2, 5  ;;  %v19058_v22 = vld [vmem:[#allocation54_spill] sm:$0xff] }
 0x522   : > { %v9508_v10 = vrot.slane %v9507_v59, 4  ;;  %v9521_v53 = vor.u32 %v9520_v61, %v9517_v4  ;;  %v9545_v61 = vor.u32 %v9544_v58, %v9541_v30  ;;  %v9568_v17 = vrot.slane %v9566_v23, 5  ;;  %v14259_v30 = vld [vmem:[%s18731_s2 + $0x118] sm:$0xff]   ;;  %v9376_v23 = vld [vmem:[#allocation2 + $0x90] sm:$0xf] }
 0x523   : > { %v9532_v11 = vrot.slane %v9531_v31, 4  ;;  %v9565_v44 = vrot.slane %v9563_v25, 4  ;;  %v9600_v50 = vshrl.u32 %v19058_v22, 16  ;;  %v19059_v25 = vld [vmem:[#allocation57_spill] sm:$0xff]  ;;  %v9635_v0 = vshrl.u32 %v9376_v23, 16 }
 0x524   : > { %v9513_v59 = vsel %vm14501_vm2, %v9508_v10, %v9512_v63  ;;  %v9522_v4 = vrot.slane %v9521_v53, 4  ;;  %v9546_v10 = vrot.slane %v9545_v61, 4  ;;  %v9582_v63 = vshll.u32 %v19059_v25, 16 }
 0x525   : > { %v9537_v43 = vsel %vm14501_vm2, %v9532_v11, %v9536_v38  ;;  %v9373_v11 = vld [vmem:[#allocation2 + $0x84] sm:$0xf]  ;;  %v9569_v58 = vor.u32 %v9568_v17, %v9565_v44  ;;  %v9602_v38 = vrot.slane %v9600_v50, 4 }
 0x526   : > { %v9527_v62 = vsel %vm14501_vm2, %v9522_v4, %v18136_v37  ;;  %v9611_v3 = vshrl.u32 %v9373_v11, 16  ;;  %v19061_v4 = vld [vmem:[#allocation62_spill] sm:$0xff]  ;;  %v9584_v44 = vrot.slane %v9582_v63, 5 }
 0x527   : > { %13461 = vmatmul.mubr.msk.bf16.gmra.mrb[28].mxu1 %vm831_vm3, %v14255_v27  ;;  %v9484_v27 = vrot.slane %v9483_v57, 4  ;;  %v9370_v57 = vld [vmem:[#allocation2 + $0x78] sm:$0xf]  ;;  %v12286_v39 = vcombine.low %v9527_v62, %v9537_v43  ;;  %v9644_v43 = vshll.u32 %v19061_v4, 16  ;;  %v9648_v61 = vshrl.u32 %v19061_v4, 16 }
 0x528   : > { %13472 = vmatprep.mubr.msk.bf16.mxu1 %vm831_vm3, %v12281_v8  ;;  %v9552_v8 = vshrl.u32 %v17676_v45, 16  ;;  %v18163_v45 = vrot.slane %v9548_v33, 5  ;;  %v9587_v16 = vshrl.u32 %v9370_v57, 16  ;;  %v9590_v2 = vshll.u32 %v9370_v57, 16  ;;  %v14290_v4 = vld [vmem:[#allocation2 + $0x98] sm:$0x1] }
 0x529   : > { %v9489_v15 = vsel %vm14501_vm2, %v9484_v27, %v9488_v14  ;;  %v18184_v33 = vrot.slane %v9572_v12, 5  ;;  %v12285_v27 = vcombine.low %v9503_v24, %v9513_v59  ;;  %v9614_v12 = vshll.u32 %v9373_v11, 16 }
 0x52a   : > { %v9554_v41 = vrot.slane %v9552_v8, 4  ;;  %v9578_v8 = vrot.slane %v9576_v6, 4  ;;  %v12284_v14 = vcombine.low %v9479_v36, %v9489_v15  ;;  %v9592_v52 = vrot.slane %v9590_v2, 5  ;;  %v19060_v6 = vld [vmem:[#allocation60_spill] sm:$0xff]  ;;  %v14287_v2 = vld [vmem:[#allocation2 + $0x80] sm:$0x1] }
 0x52b   : > { %v9620_v57 = vshll.u32 %v19060_v6, 16  ;;  %v9624_v15 = vshrl.u32 %v19060_v6, 16  ;;  %v9638_v59 = vshll.u32 %v9376_v23, 16  ;;  %v9637_v24 = vrot.slane %v9635_v0, 4  ;;  %v14289_v6 = vld [vmem:[#allocation2 + $0xa0] sm:$0xf] }
 0x52c   : > { %v9555_v20 = vor.u32 %v9554_v41, %v18163_v45  ;;  %v9589_v41 = vrot.slane %v9587_v16, 4  ;;  %v9382_v0 = vld [vmem:[#allocation2 + $0xa8] sm:$0xf] }
 0x52d   : > { %v18213_v50 = vrot.slane %v9620_v57, 5  ;;  %v9640_v62 = vrot.slane %v9638_v59, 5  ;;  %v9668_v57 = vshll.u32 %v14289_v6, 16 }
 0x52e   : > { %v9556_v37 = vrot.slane %v9555_v20, 4  ;;  %v9593_v20 = vor.u32 %v9592_v52, %v9589_v41 }
 0x52f   : > { %13473 = vmatmul.mubr.msk.bf16.vlgmr.msra.gmra.mrb[0].mxu1 %vm831_vm3, %v12282_v54  ;;  %v19057_v54 = vld [vmem:[#allocation50_spill] sm:$0xff] }
 0x530   : > { %13505 = vmatpush3.bf16.msra.mxu1 %v18080_v1  ;;  %13476 = vmatprep.mubr.msk.bf16.mxu1 %vm831_vm3, %v12283_v32  ;;  %v9558_v31 = vshll.u32 %v19057_v54, 16  ;;  %v14258_v1 = vld [vmem:[%s18731_s2 + $0x110] sm:$0xff]   ;;  %v9596_v32 = vshll.u32 %v19058_v22, 16  ;;  %v9551_v54 = vsel %vm14501_vm2, %v9546_v10, %v18163_v45  ;;  %v9613_v22 = vrot.slane %v9611_v3, 4  ;;  %v9379_v10 = vld [vmem:[#allocation2 + $0x9c] sm:$0xf] }
 0x531   : > { %13506 = vmatprep.subr.bf16.mxu1 %v14257_v56  ;;  %v18215_v45 = vrot.slane %v9644_v43, 5  ;;  %v9659_v52 = vshrl.u32 %v9379_v10, 16  ;;  %v9662_v23 = vshll.u32 %v9379_v10, 16  ;;  %v9641_v3 = vor.u32 %v9640_v62, %v9637_v24 }
 0x532   : > { %v9560_v53 = vrot.slane %v9558_v31, 5  ;;  %v18200_v36 = vrot.slane %v9596_v32, 5  ;;  %v9570_v31 = vrot.slane %v9569_v58, 4  ;;  %v9616_v32 = vrot.slane %v9614_v12, 5 }
 0x533   : > { %v9594_v58 = vrot.slane %v9593_v20, 4  ;;  %v9654_v43 = vshll.u32 %v14290_v4, 16 }
 0x534   : > { %13507 = vmatpush3.bf16.msra.mxu1 %v14257_v56  ;;  %v9579_v56 = vor.u32 %v9578_v8, %v18184_v33  ;;  %v9561_v17 = vsel %vm14501_vm2, %v9556_v37, %v9560_v53  ;;  %v9606_v8 = vshll.u32 %v14287_v2, 16  ;;  %v9575_v53 = vsel %vm14501_vm2, %v9570_v31, %v18184_v33 }
 0x535   : > { %13508 = vmatprep.subr.bf16.mxu1 %v14258_v1  ;;  %v12287_v11 = vcombine.low %v9551_v54, %v9561_v17  ;;  %v9599_v33 = vsel %vm14501_vm2, %v9594_v58, %v18200_v36  ;;  %v9661_v17 = vrot.slane %v9659_v52, 4  ;;  %v9656_v62 = vrot.slane %v9654_v43, 5 }
 0x536   : > { %v9580_v16 = vrot.slane %v9579_v56, 4  ;;  %v9608_v37 = vrot.slane %v9606_v8, 5  ;;  %v14288_v56 = vld [vmem:[#allocation2 + $0x8c] sm:$0x1]  ;;  %v9683_v8 = vshrl.u32 %v9382_v0, 16 }
 0x537   : > { %13477 = vmatmul.mubr.msk.bf16.gmra.mrb[4].mxu1 %vm831_vm3, %v12284_v14  ;;  %v9626_v14 = vrot.slane %v9624_v15, 4  ;;  %v9672_v15 = vshrl.u32 %v14289_v6, 16 }
 0x538   : > { %13480 = vmatprep.mubr.msk.bf16.mxu1 %vm831_vm3, %v12285_v27  ;;  %13509 = vmatpush3.bf16.msra.mxu1 %v14258_v1  ;;  %v9603_v1 = vor.u32 %v9602_v38, %v18200_v36  ;;  %v9650_v27 = vrot.slane %v9648_v61, 4  ;;  %v9585_v25 = vsel %vm14501_vm2, %v9580_v16, %v9584_v44  ;;  %v9630_v38 = vshll.u32 %v14288_v56, 16  ;;  %v14291_v61 = vld [vmem:[#allocation2 + $0xac] sm:$0xf] }
 0x539   : > { %13510 = vmatprep.subr.bf16.mxu1 %v14259_v30  ;;  %v9627_v41 = vor.u32 %v9626_v14, %v18213_v50  ;;  %v12288_v12 = vcombine.low %v9575_v53, %v9585_v25  ;;  %v9692_v54 = vshll.u32 %v14291_v61, 16  ;;  %v9696_v31 = vshrl.u32 %v14291_v61, 16 }
 0x53a   : > { %v9604_v63 = vrot.slane %v9603_v1, 4  ;;  %v9664_v16 = vrot.slane %v9662_v23, 5  ;;  %v9642_v1 = vrot.slane %v9641_v3, 4  ;;  %v9686_v36 = vshll.u32 %v9382_v0, 16  ;;  %v14293_v3 = vld [vmem:[#allocation2 + $0xb8] sm:$0xf] }
 0x53b   : > { %v9628_v20 = vrot.slane %v9627_v41, 4  ;;  %v18231_v14 = vrot.slane %v9668_v57, 5  ;;  %v9674_v24 = vrot.slane %v9672_v15, 4  ;;  %v9698_v10 = vrot.slane %v9696_v31, 4  ;;  %v14294_v57 = vld [vmem:[#allocation2 + $0xc4] sm:$0xf] }
 0x53c   : > { %13511 = vmatpush3.bf16.msra.mxu1 %v14259_v30  ;;  %v9617_v30 = vor.u32 %v9616_v32, %v9613_v22  ;;  %v9609_v59 = vsel %vm14501_vm2, %v9604_v63, %v9608_v37  ;;  %v9632_v32 = vrot.slane %v9630_v38, 5  ;;  %v9665_v25 = vor.u32 %v9664_v16, %v9661_v17  ;;  %v14292_v63 = vld [vmem:[#allocation2 + $0xa4] sm:$0x1]  ;;  %v9391_v17 = vld [vmem:[#allocation2 + $0xcc] sm:$0xf] }
 0x53d   : > { %v12289_v22 = vcombine.low %v9599_v33, %v9609_v59  ;;  %v9647_v41 = vsel %vm14501_vm2, %v9642_v1, %v18215_v45  ;;  %v9685_v23 = vrot.slane %v9683_v8, 4  ;;  %v9688_v37 = vrot.slane %v9686_v36, 5 }
 0x53e   : > { %v9618_v44 = vrot.slane %v9617_v30, 4  ;;  %v9633_v53 = vsel %vm14501_vm2, %v9628_v20, %v9632_v32  ;;  %v9678_v30 = vshll.u32 %v14292_v63, 16  ;;  %v9675_v56 = vor.u32 %v9674_v24, %v18231_v14 }
 0x53f   : > { %13481 = vmatmul.mubr.msk.bf16.gmra.mrb[8].mxu1 %vm831_vm3, %v12286_v39  ;;  %v9651_v39 = vor.u32 %v9650_v27, %v18215_v45  ;;  %v18234_v27 = vrot.slane %v9692_v54, 5  ;;  %v9740_v15 = vshll.u32 %v14294_v57, 16  ;;  %v9744_v0 = vshrl.u32 %v14294_v57, 16  ;;  %v14295_v54 = vld [vmem:[#allocation2 + $0xb0] sm:$0x1] }
 0x540   : > { %13484 = vmatprep.mubr.msk.bf16.mxu1 %vm831_vm3, %v12287_v11  ;;  %v9385_v11 = vld [vmem:[#allocation2 + $0xb4] sm:$0xf]  ;;  %v9623_v58 = vsel %vm14501_vm2, %v9618_v44, %v18213_v50  ;;  %v9716_v50 = vshll.u32 %v14293_v3, 16  ;;  %v9666_v4 = vrot.slane %v9665_v25, 4  ;;  %v9680_v43 = vrot.slane %v9678_v30, 5 }
 0x541   : > { %v9652_v2 = vrot.slane %v9651_v39, 4  ;;  %v9707_v38 = vshrl.u32 %v9385_v11, 16  ;;  %v9720_v39 = vshrl.u32 %v14293_v3, 16  ;;  %v9699_v33 = vor.u32 %v9698_v10, %v18234_v27 }
 0x542   : > { %v9710_v6 = vshll.u32 %v9385_v11, 16  ;;  %v12290_v59 = vcombine.low %v9623_v58, %v9633_v53  ;;  %v9689_v61 = vor.u32 %v9688_v37, %v9685_v23  ;;  %v9702_v31 = vshll.u32 %v14295_v54, 16 }
 0x543   : > { %v9657_v52 = vsel %vm14501_vm2, %v9652_v2, %v9656_v62  ;;  %v9676_v16 = vrot.slane %v9675_v56, 4  ;;  %v9709_v1 = vrot.slane %v9707_v38, 4  ;;  %v9718_v2 = vrot.slane %v9716_v50, 5  ;;  %v14296_v38 = vld [vmem:[#allocation2 + $0xbc] sm:$0x1] }
 0x544   : > { %v12291_v45 = vcombine.low %v9647_v41, %v9657_v52  ;;  %v9722_v8 = vrot.slane %v9720_v39, 4  ;;  %v9700_v36 = vrot.slane %v9699_v33, 4  ;;  %v9742_v32 = vrot.slane %v9740_v15, 5  ;;  %v14297_v15 = vld [vmem:[#allocation2 + $0xc8] sm:$0x1] }
 0x545   : > { %v9746_v24 = vrot.slane %v9744_v0, 4  ;;  %v9755_v62 = vshrl.u32 %v9391_v17, 16  ;;  %v9758_v10 = vshll.u32 %v9391_v17, 16  ;;  %v9764_v11 = vshll.u32 %v18114_v46, 16 }
 0x546   : > { %v9768_v58 = vshrl.u32 %v18114_v46, 16  ;;  %v9690_v53 = vrot.slane %v9689_v61, 4  ;;  %v9704_v25 = vrot.slane %v9702_v31, 5  ;;  %v9671_v41 = vsel %vm14501_vm2, %v9666_v4, %v18231_v14 }
 0x547   : > { %13485 = vmatmul.mubr.msk.bf16.gmra.mrb[12].mxu1 %vm831_vm3, %v12288_v12  ;;  %v9388_v12 = vld [vmem:[#allocation2 + $0xc0] sm:$0xf]  ;;  %v9681_v52 = vsel %vm14501_vm2, %v9676_v16, %v9680_v43  ;;  %v9723_v23 = vor.u32 %v9722_v8, %v9718_v2  ;;  %v9726_v3 = vshll.u32 %v14296_v38, 16  ;;  %v9747_v50 = vor.u32 %v9746_v24, %v9742_v32 }
 0x548   : > { %13488 = vmatprep.mubr.msk.bf16.mxu1 %vm831_vm3, %v12289_v22  ;;  %v9731_v44 = vshrl.u32 %v9388_v12, 16  ;;  %v9734_v20 = vshll.u32 %v9388_v12, 16  ;;  %v9712_v22 = vrot.slane %v9710_v6, 5  ;;  %v9705_v37 = vsel %vm14501_vm2, %v9700_v36, %v9704_v25 }
 0x549   : > { %v9757_v46 = vrot.slane %v9755_v62, 4  ;;  %v9760_v39 = vrot.slane %v9758_v10, 5  ;;  %v9766_v12 = vrot.slane %v9764_v11, 5  ;;  %v9770_v33 = vrot.slane %v9768_v58, 4 }
 0x54a   : > { %v9733_v63 = vrot.slane %v9731_v44, 4  ;;  %v9736_v30 = vrot.slane %v9734_v20, 5  ;;  %v9713_v56 = vor.u32 %v9712_v22, %v9709_v1  ;;  %v12292_v6 = vcombine.low %v9671_v41, %v9681_v52  ;;  %v19068_v41 = vld [vmem:[#allocation48_spill] sm:$0xff]  ;;  %v19069_v52 = vld [vmem:[#allocation51_spill] sm:$0xff] }
 0x54b   : > { %v9695_v14 = vsel %vm14501_vm2, %v9690_v53, %v18234_v27  ;;  %v9750_v0 = vshll.u32 %v14297_v15, 16  ;;  %v9728_v4 = vrot.slane %v9726_v3, 5  ;;  %v9748_v43 = vrot.slane %v9747_v50, 4  ;;  %v19063_v53 = vld [vmem:[#allocation43_spill] sm:$0xff]  ;;  %v19074_v3 = vld [vmem:[#allocation56_spill] sm:$0xff]  ;;  %v19075_v50 = vld [vmem:[#allocation58_spill] sm:$0xff] }
 0x54c   : > { %v9737_v57 = vor.u32 %v9736_v30, %v9733_v63  ;;  %v9714_v61 = vrot.slane %v9713_v56, 4  ;;  %v9761_v54 = vor.u32 %v9760_v39, %v9757_v46  ;;  %v9771_v31 = vor.u32 %v9770_v33, %v9766_v12  ;;  %v19066_v63 = vld [vmem:[#allocation47_spill] sm:$0xff]  ;;  %v19083_v15 = vld [vmem:[#allocation65_spill] sm:$0xff] }
 0x54d   : > { %v9774_v44 = vshll.u32 %v18116_v47, 16  ;;  %v9752_v17 = vrot.slane %v9750_v0, 5  ;;  %v19072_v56 = vld [vmem:[#allocation55_spill] sm:$0xff]  ;;  %v19076_v46 = vcombine.low %v19074_v3, %v19075_v50  ;;  %v19084_v0 = vld [vmem:[#allocation66_spill] sm:$0xff] }
 0x54e   : > { %v9738_v20 = vrot.slane %v9737_v57, 4  ;;  %v9719_v1 = vsel %vm14501_vm2, %v9714_v61, %v9718_v2  ;;  %v9762_v8 = vrot.slane %v9761_v54, 4  ;;  %v9772_v36 = vrot.slane %v9771_v31, 4  ;;  %v19062_v2 = vld [vmem:[#allocation42_spill] sm:$0xff]  ;;  %v19077_v39 = vld [vmem:[#allocation59_spill] sm:$0xff] }
 0x54f   : > { %13489 = vmatmul.mubr.msk.bf16.gmra.mrb[16].mxu1 %vm831_vm3, %v12290_v59  ;;  %v12293_v59 = vcombine.low %v9695_v14, %v9705_v37  ;;  %v9753_v16 = vsel %vm14501_vm2, %v9748_v43, %v9752_v17  ;;  %v9776_v22 = vrot.slane %v9774_v44, 5  ;;  %v19064_v25 = vcombine.low %v19062_v2, %v19063_v53  ;;  %v19071_v37 = vld [vmem:[#allocation53_spill] sm:$0xff]  ;;  %v19081_v14 = vld [vmem:[#allocation64_spill] sm:$0xff] }
 0x550   : > { %13492 = vmatprep.mubr.msk.bf16.mxu1 %vm831_vm3, %v12291_v45  ;;  %v9724_v45 = vrot.slane %v9723_v23, 4  ;;  %v9743_v62 = vsel %vm14501_vm2, %v9738_v20, %v9742_v32  ;;  %v9767_v47 = vsel %vm14501_vm2, %v9762_v8, %v9766_v12  ;;  %v19065_v32 = vld [vmem:[#allocation46_spill] sm:$0xff]  ;;  %v19070_v23 = vcombine.low %v19068_v41, %v19069_v52  ;;  %v19078_v12 = vld [vmem:[#allocation61_spill] sm:$0xff]  ;;  %v19088_v43 = vld [vmem:[#allocation68_spill] sm:$0xff] }
 0x551   : > { %v12295_v10 = vcombine.low %v9743_v62, %v9753_v16  ;;  %v9777_v11 = vsel %vm14501_vm2, %v9772_v36, %v9776_v22  ;;  %v19067_v30 = vcombine.low %v19065_v32, %v19066_v63  ;;  %v19073_v38 = vcombine.low %v19071_v37, %v19072_v56  ;;  %v12387_v8 = vld [vmem:[%s14466_s26 + $0x30] sm:$0xf]  ;;  %v12380_v36 = vld [vmem:[%s14466_s26 + $0x14] sm:$0x1]  ;;  %v12384_v32 = vld [vmem:[%s14466_s26 + $0x24] sm:$0xf] }
 0x552   : > { %v9729_v27 = vsel %vm14501_vm2, %v9724_v45, %v9728_v4  ;;  %v12296_v58 = vcombine.low %v9767_v47, %v9777_v11  ;;  %v19079_v33 = vcombine.low %v19077_v39, %v19078_v12  ;;  %v19086_v45 = vcombine.low %v17787_v40, %v17799_v42  ;;  %v19087_v4 = vld [vmem:[#allocation67_spill] sm:$0xff]  ;;  %v12382_v42 = vld [vmem:[%s14466_s26 + $0x1c] sm:$0xf]  ;;  %v12388_v53 = vld [vmem:[%s14466_s26 + $0x34] sm:$0xf] }
 0x553   : > { %v12294_v24 = vcombine.low %v9719_v1, %v9729_v27  ;;  %v19089_v61 = vcombine.low %v19087_v4, %v19088_v43  ;;  %v19090_v54 = vcombine.low %v17818_v9, %v17822_v55  ;;  %v19091_v40 = vcombine.low %v17849_v21, %v17853_v13  ;;  %v12379_v13 = vld [vmem:[%s14466_s26 + $0x10] sm:$0xf] }
 0x554   : > { %v10710_v9 = vshrl.u32 %v12381_v28, 16  ;;  %v10713_v55 = vshll.u32 %v12381_v28, 16  ;;  %v10723_v21 = vshrl.u32 %v12382_v42, 16  ;;  %v10699_v18 = vshrl.u32 %v12379_v13, 16 }
 0x555   : > { %v10688_v31 = vrot.slane %v10686_v7, 4  ;;  %v10691_v44 = vrot.slane %v10689_v49, 5  ;;  %v10758_v62 = vshrl.u32 %v12387_v8, 16  ;;  %v10705_v2 = vshll.u32 %v12380_v36, 16 }
 0x556   : > { %v10712_v5 = vrot.slane %v10710_v9, 4  ;;  %v10725_v19 = vrot.slane %v10723_v21, 4  ;;  %v10701_v1 = vrot.slane %v10699_v18, 4  ;;  %v10767_v56 = vshll.u32 %v12388_v53, 16  ;;  %v12386_v9 = vld [vmem:[%s14466_s26 + $0x2c] sm:$0x1] }
 0x557   : > { %13493 = vmatmul.mubr.msk.bf16.gmra.mrb[20].mxu1 %vm831_vm3, %v12292_v6  ;;  %v19080_v6 = vld [vmem:[#allocation63_spill] sm:$0xff]  ;;  %v10692_v22 = vor.u32 %v10691_v44, %v10688_v31  ;;  %v10707_v37 = vrot.slane %v10705_v2, 5  ;;  %v10734_v3 = vshrl.u32 %v12384_v32, 16  ;;  %v10737_v50 = vshll.u32 %v12384_v32, 16 }
 0x558   : > { %13496 = vmatprep.mubr.msk.bf16.mxu1 %vm831_vm3, %v12293_v59  ;;  %v19082_v57 = vcombine.low %v19080_v6, %v19081_v14  ;;  %v19085_v59 = vcombine.low %v19083_v15, %v19084_v0  ;;  %v12390_v6 = vld [vmem:[%s14466_s26 + $0x3c] sm:$0xf]  ;;  %v18371_v43 = vrot.slane %v10767_v56, 5  ;;  %v10753_v18 = vshll.u32 %v12386_v9, 16  ;;  %v12399_v31 = vld [vmem:[%s14466_s26 + $0x60] sm:$0xf] }
 0x559   : > { %v10736_v28 = vrot.slane %v10734_v3, 4  ;;  %v10785_v26 = vshll.u32 %v12390_v6, 16 }
 0x55f   : > { %13497 = vmatmul.mubr.msk.bf16.gmra.mrb[24].mxu1 %vm831_vm3, %v12294_v24 }
 0x560   : > { %13500 = vmatprep.mubr.msk.bf16.mxu1 %vm831_vm3, %v12295_v10  ;;  %v10761_v10 = vshll.u32 %v12387_v8, 16 }
 0x562   : > { %v10763_v41 = vrot.slane %v10761_v10, 5 }
 0x567   : > { %13501 = vmatmul.mubr.msk.bf16.gmra.mrb[28].mxu1 %vm831_vm3, %v12296_v58 }
 0x568   : > { %13512 = vmatprep.mubr.msk.bf16.mxu1 %vm831_vm3, %v19064_v25  ;;  %v10693_v25 = vrot.slane %v10692_v22, 4 }
 0x56f   : > { %13513 = vmatmul.mubr.msk.bf16.vlgmr.msra.gmra.mrb[0].mxu1 %vm831_vm3, %v19067_v30  ;;  %v10760_v30 = vrot.slane %v10758_v62, 4 }
 0x570   : > { %13516 = vmatprep.mubr.msk.bf16.mxu1 %vm831_vm3, %v19070_v23 }
 0x577   : > { %13517 = vmatmul.mubr.msk.bf16.gmra.mrb[4].mxu1 %vm831_vm3, %v19073_v38  ;;  %v12385_v38 = vld [vmem:[%s14466_s26 + $0x28] sm:$0xf] }
 0x578   : > { %13520 = vmatprep.mubr.msk.bf16.mxu1 %vm831_vm3, %v19076_v46  ;;  %v12393_v46 = vld [vmem:[%s14466_s26 + $0x48] sm:$0xf]  ;;  %v10743_v15 = vshll.u32 %v12385_v38, 16  ;;  %v10747_v0 = vshrl.u32 %v12385_v38, 16 }
 0x57f   : > { %13521 = vmatmul.mubr.msk.bf16.gmra.mrb[8].mxu1 %vm831_vm3, %v19079_v33  ;;  %v10771_v33 = vshrl.u32 %v12388_v53, 16 }
 0x580   : > { %13524 = vmatprep.mubr.msk.bf16.mxu1 %vm831_vm3, %v19082_v57  ;;  %v10764_v57 = vor.u32 %v10763_v41, %v10760_v30 }
 0x582   : > { %v10765_v2 = vrot.slane %v10764_v57, 4 }
 0x587   : > { %13525 = vmatmul.mubr.msk.bf16.gmra.mrb[12].mxu1 %vm831_vm3, %v19085_v59  ;;  %v12394_v59 = vld [vmem:[%s14466_s26 + $0x4c] sm:$0xf] }
 0x588   : > { %13528 = vmatprep.mubr.msk.bf16.mxu1 %vm831_vm3, %v19086_v45  ;;  %v12391_v45 = vld [vmem:[%s14466_s26 + $0x40] sm:$0xf]  ;;  %v10819_v21 = vshrl.u32 %v12394_v59, 16 }
 0x589   : > { %v10795_v7 = vshrl.u32 %v12391_v45, 16 }
 0x58a   : > { %v10821_v22 = vrot.slane %v10819_v21, 4 }
 0x58b   : > { %v10797_v62 = vrot.slane %v10795_v7, 4 }
 0x58f   : > { %13529 = vmatmul.mubr.msk.bf16.gmra.mrb[16].mxu1 %vm831_vm3, %v19089_v61  ;;  %v12389_v61 = vld [vmem:[%s14466_s26 + $0x38] sm:$0x1] }
 0x590   : > { %13532 = vmatprep.mubr.msk.bf16.mxu1 %vm831_vm3, %v19090_v54  ;;  %v10806_v54 = vshrl.u32 %v12393_v46, 16 }
 0x597   : > { %13533 = vmatmul.mubr.msk.bf16.gmra.mrb[20].mxu1 %vm831_vm3, %v12352_v60  ;;  %v10719_v60 = vshll.u32 %v12382_v42, 16  ;;  %v10739_v42 = vrot.slane %v10737_v50, 5 }
 0x598   : > { %13536 = vmatprep.mubr.msk.bf16.mxu1 %vm831_vm3, %v19091_v40  ;;  %v10809_v40 = vshll.u32 %v12393_v46, 16  ;;  %v12400_v46 = vld [vmem:[%s14466_s26 + $0x64] sm:$0xf] }
 0x599   : > { %v10721_v48 = vrot.slane %v10719_v60, 5  ;;  %v10815_v60 = vshll.u32 %v12394_v59, 16  ;;  %v10867_v9 = vshrl.u32 %v12400_v46, 16 }
 0x59b   : > { %v10726_v27 = vor.u32 %v10725_v19, %v10721_v48  ;;  %v10808_v19 = vrot.slane %v10806_v54, 4  ;;  %v10817_v8 = vrot.slane %v10815_v60, 5  ;;  %v12397_v54 = vld [vmem:[%s14466_s26 + $0x58] sm:$0xf] }
 0x59d   : > { %v10727_v47 = vrot.slane %v10726_v27, 4  ;;  %v10787_v27 = vrot.slane %v10785_v26, 5  ;;  %v10822_v56 = vor.u32 %v10821_v22, %v10817_v8  ;;  %v12401_v22 = vld [vmem:[%s14466_s26 + $0x68] sm:$0x1] }
 0x59f   : > { %13537 = vmatmul.mubr.msk.bf16.gmra.mrb[24].mxu1 %vm831_vm3, %v12354_v51  ;;  %v10715_v51 = vrot.slane %v10713_v55, 5  ;;  %v10782_v55 = vshrl.u32 %v12390_v6, 16  ;;  %v10770_v6 = vsel %vm14501_vm2, %v10765_v2, %v18371_v43 }
 0x5a0   : > { %13540 = vmatprep.mubr.msk.bf16.mxu1 %vm831_vm3, %v12355_v34  ;;  %v10695_v34 = vshll.u32 %v12379_v13, 16  ;;  %v10791_v13 = vshll.u32 %v12391_v45, 16  ;;  %v18399_v26 = vunpack.c.l.bf16 %v10770_v6 }
 0x5a1   : > { %v10716_v20 = vor.u32 %v10715_v51, %v10712_v5  ;;  %v18377_v5 = vrot.slane %v10743_v15, 5  ;;  %v10773_v51 = vrot.slane %v10771_v33, 4 }
 0x5a2   : > { %v10697_v17 = vrot.slane %v10695_v34, 5  ;;  %v10777_v34 = vshll.u32 %v12389_v61, 16  ;;  %v18384_v36 = vrot.slane %v10791_v13, 5 }
 0x5a3   : > { %v10717_v24 = vrot.slane %v10716_v20, 4  ;;  %v10740_v20 = vor.u32 %v10739_v42, %v10736_v28  ;;  %v10774_v10 = vor.u32 %v10773_v51, %v18371_v43  ;;  %v10863_v42 = vshll.u32 %v12400_v46, 16 }
 0x5a4   : > { %v10702_v58 = vor.u32 %v10701_v1, %v10697_v17  ;;  %v10698_v12 = vsel %vm14501_vm2, %v10693_v25, %v10697_v17  ;;  %v10784_v17 = vrot.slane %v10782_v55, 4  ;;  %v12396_v1 = vld [vmem:[%s14466_s26 + $0x54] sm:$0xf]  ;;  %v10798_v38 = vor.u32 %v10797_v62, %v18384_v36  ;;  %v12405_v55 = vld [vmem:[%s14466_s26 + $0x78] sm:$0xf] }
 0x5a5   : > { %v10722_v63 = vsel %vm14501_vm2, %v10717_v24, %v10721_v48  ;;  %v18375_v49 = vunpack.c.l.bf16 %v10698_v12  ;;  %v10749_v48 = vrot.slane %v10747_v0, 4  ;;  %v12392_v24 = vld [vmem:[%s14466_s26 + $0x44] sm:$0x1]  ;;  %v10830_v25 = vshrl.u32 %v12396_v1, 16 }
 0x5a6   : > { %v10703_v23 = vrot.slane %v10702_v58, 4  ;;  %v18360_v39 = vunpack.c.l.bf16 %v10722_v63  ;;  %v10857_v58 = vshll.u32 %v12399_v31, 16  ;;  %v10833_v32 = vshll.u32 %v12396_v1, 16 }
 0x5a7   : > { %13541 = vmatmul.mubr.msk.bf16.gmra.mrb[28].mxu1 %vm831_vm3, %v12356_v35  ;;  %v12383_v35 = vld [vmem:[%s14466_s26 + $0x20] sm:$0x1]  ;;  %v10741_v63 = vrot.slane %v10740_v20, 4  ;;  %v10788_v30 = vor.u32 %v10787_v27, %v10784_v17  ;;  %v10775_v3 = vrot.slane %v10774_v10, 4  ;;  %v10832_v15 = vrot.slane %v10830_v25, 4 }
 0x5a8   : > { %v10729_v16 = vshll.u32 %v12383_v35, 16  ;;  %v10708_v4 = vsel %vm14501_vm2, %v10703_v23, %v10707_v37  ;;  %v10811_v35 = vrot.slane %v10809_v40, 5  ;;  %v10779_v23 = vrot.slane %v10777_v34, 5 }
 0x5a9   : > { %v18380_v44 = vunpack.c.l.bf16 %v10708_v4  ;;  %v10755_v37 = vrot.slane %v10753_v18, 5  ;;  %v10859_v33 = vrot.slane %v10857_v58, 5  ;;  %v10835_v0 = vrot.slane %v10833_v32, 5  ;;  %v12402_v58 = vld [vmem:[%s14466_s26 + $0x6c] sm:$0xf] }
 0x5aa   : > { %v10731_v11 = vrot.slane %v10729_v16, 5  ;;  %v12395_v16 = vld [vmem:[%s14466_s26 + $0x50] sm:$0x1]  ;;  %v10812_v53 = vor.u32 %v10811_v35, %v10808_v19  ;;  %v10746_v59 = vsel %vm14501_vm2, %v10741_v63, %v18377_v5  ;;  %v10789_v45 = vrot.slane %v10788_v30, 4  ;;  %v18416_v35 = vld [vmem:[%s18734_s5] ss:$0 sm:$0xff] }
 0x5ab   : > { %v10825_v41 = vshll.u32 %v12395_v16, 16  ;;  %v10823_v40 = vrot.slane %v10822_v56, 4  ;;  %v10799_v28 = vrot.slane %v10798_v38, 4  ;;  %v10780_v43 = vsel %vm14501_vm2, %v10775_v3, %v10779_v23  ;;  %v12406_v56 = vld [vmem:[%s14466_s26 + $0x7c] sm:$0xf] }
 0x5ac   : > { %v10732_v52 = vsel %vm14501_vm2, %v10727_v47, %v10731_v11  ;;  %v10750_v47 = vor.u32 %v10749_v48, %v18377_v5  ;;  %v10854_v11 = vshrl.u32 %v12399_v31, 16  ;;  %v10813_v57 = vrot.slane %v10812_v53, 4 }
 0x5ad   : > { %v18365_v14 = vunpack.c.l.bf16 %v10732_v52  ;;  %v10801_v52 = vshll.u32 %v12392_v24, 16  ;;  %v10827_v4 = vrot.slane %v10825_v41, 5  ;;  %v10836_v7 = vor.u32 %v10835_v0, %v10832_v15  ;;  %v12398_v24 = vld [vmem:[%s14466_s26 + $0x5c] sm:$0x1] }
 0x5ae   : > { %v10751_v50 = vrot.slane %v10750_v47, 4  ;;  %v10856_v12 = vrot.slane %v10854_v11, 4  ;;  %v10818_v13 = vsel %vm14501_vm2, %v10813_v57, %v10817_v8  ;;  %v10839_v5 = vshll.u32 %v12397_v54, 16 }
 0x5af   : > { %v10803_v61 = vrot.slane %v10801_v52, 5  ;;  %v10843_v51 = vshrl.u32 %v12397_v54, 16  ;;  %v18408_v48 = vunpack.c.l.bf16 %v10746_v59  ;;  %v10794_v34 = vsel %vm14501_vm2, %v10789_v45, %v18384_v36  ;;  %v12403_v54 = vld [vmem:[%s14466_s26 + $0x70] sm:$0xf] }
 0x5b0   : > { %v10756_v60 = vsel %vm14501_vm2, %v10751_v50, %v10755_v37  ;;  %v10860_v21 = vor.u32 %v10859_v33, %v10856_v12  ;;  %v10902_v18 = vshrl.u32 %v12405_v55, 16  ;;  %v10905_v19 = vshll.u32 %v12405_v55, 16 }
 0x5b1   : > { %v10828_v31 = vsel %vm14501_vm2, %v10823_v40, %v10827_v4  ;;  %v10804_v20 = vsel %vm14501_vm2, %v10799_v28, %v10803_v61  ;;  %v10865_v17 = vrot.slane %v10863_v42, 5  ;;  %v10869_v27 = vrot.slane %v10867_v9, 4  ;;  %v12411_v42 = vld [vmem:[%s14466_s26 + $0x90] sm:$0xf] }
 0x5b2   : > { %v18422_v16 = vunpack.c.l.bf16 %v10780_v43  ;;  %v18424_v1 = vunpack.c.l.bf16 %v10756_v60  ;;  %v18426_v8 = vunpack.c.l.bf16 %v10818_v13  ;;  %v10861_v36 = vrot.slane %v10860_v21, 4  ;;  %v12408_v21 = vld [vmem:[%s14466_s26 + $0x84] sm:$0xf] }
 0x5b3   : > { %v18434_v62 = vunpack.c.l.bf16 %v10794_v34  ;;  %v10837_v10 = vrot.slane %v10836_v7, 4  ;;  %v10841_v47 = vrot.slane %v10839_v5, 5  ;;  %v10845_v11 = vrot.slane %v10843_v51, 4  ;;  %v12407_v51 = vld [vmem:[%s14466_s26 + $0x80] sm:$0x1] }
 0x5b4   : > { %v18437_v53 = vunpack.c.l.bf16 %v10828_v31  ;;  %v18439_v25 = vunpack.c.l.bf16 %v10804_v20  ;;  %v10904_v32 = vrot.slane %v10902_v18, 4  ;;  %v10907_v63 = vrot.slane %v10905_v19, 5 }
 0x5b5   : > { %v10870_v52 = vor.u32 %v10869_v27, %v10865_v17  ;;  %v10873_v23 = vshll.u32 %v12401_v22, 16  ;;  %v10849_v37 = vshll.u32 %v12398_v24, 16  ;;  %v10866_v50 = vsel %vm14501_vm2, %v10861_v36, %v10865_v17  ;;  %v12412_v36 = vld [vmem:[%s14466_s26 + $0x94] sm:$0xf] }
 0x5b6   : > { %v10878_v46 = vshrl.u32 %v12402_v58, 16  ;;  %v10881_v12 = vshll.u32 %v12402_v58, 16  ;;  %v10842_v15 = vsel %vm14501_vm2, %v10837_v10, %v10841_v47  ;;  %v10846_v0 = vor.u32 %v10845_v11, %v10841_v47 }
 0x5b7   : > { %v10908_v4 = vor.u32 %v10907_v63, %v10904_v32  ;;  %v10911_v61 = vshll.u32 %v12406_v56, 16  ;;  %v18459_v40 = vrot.slane %v10873_v23, 5  ;;  %v10915_v28 = vshrl.u32 %v12406_v56, 16  ;;  %v12409_v23 = vld [vmem:[%s14466_s26 + $0x88] sm:$0xf] }
 0x5b8   : > { %v18467_v55 = vunpack.c.l.bf16 %v10866_v50  ;;  %v10880_v43 = vrot.slane %v10878_v46, 4  ;;  %v10883_v60 = vrot.slane %v10881_v12, 5  ;;  %v18474_v13 = vrot.slane %v10870_v52, 4 }
 0x5b9   : > { %v10887_v7 = vshll.u32 %v12403_v54, 16  ;;  %v10891_v5 = vshrl.u32 %v12403_v54, 16  ;;  %v18479_v18 = vrot.slane %v10846_v0, 4  ;;  %v18483_v19 = vrot.slane %v10911_v61, 5 }
 0x5ba   : > { %v10950_v31 = vshrl.u32 %v12411_v42, 16  ;;  %v10917_v27 = vrot.slane %v10915_v28, 4  ;;  %v10953_v22 = vshll.u32 %v12411_v42, 16  ;;  %v10926_v24 = vshrl.u32 %v12408_v21, 16 }
 0x5bb   : > { %v10884_v11 = vor.u32 %v10883_v60, %v10880_v43  ;;  %v10921_v58 = vshll.u32 %v12407_v51, 16  ;;  %v10893_v52 = vrot.slane %v10891_v5, 4  ;;  %v10959_v50 = vshll.u32 %v12412_v36, 16 }
 0x5bc   : > { %v10955_v46 = vrot.slane %v10953_v22, 5  ;;  %v10963_v12 = vshrl.u32 %v12412_v36, 16  ;;  %v10876_v0 = vsel %vm14501_vm2, %v18474_v13, %v18459_v40 }
 0x5bd   : > { %v10885_v61 = vrot.slane %v10884_v11, 4  ;;  %v18519_v54 = vrot.slane %v10921_v58, 5  ;;  %v18523_v42 = vrot.slane %v10959_v50, 5 }
 0x642   : > { %v13514_v2 = vpop.f32.mrb[0].mxu1 }
 0x643   : > { %v10607_v30 = vadd.f32 %v13514_v2, %v18416_v35  ;;  %v10439_v41 = vpop.f32.mrb[1].mxu1  ;;  %v10929_v2 = vshll.u32 %v12408_v21, 16 }
 0x644   : > { %v10605_v38 = vadd.f32 %v18416_v35, %v10439_v41  ;;  %v13515_v3 = vpop.f32.mrb[2].mxu1  ;;  %v18490_v41 = vrot.slane %v10887_v7, 5  ;;  %v12413_v7 = vld [vmem:[%s14466_s26 + $0x98] sm:$0x1] }
 0x645   : > { %v11135_v33 = vadd.f32 %v18360_v39, %v10607_v30  ;;  %v10608_v6 = vadd.f32 %v13515_v3, %v18416_v35  ;;  %v10442_v57 = vpop.f32.mrb[3].mxu1  ;;  %v10952_v3 = vrot.slane %v10950_v31, 4  ;;  %v12410_v31 = vld [vmem:[%s14466_s26 + $0x8c] sm:$0x1] }
 0x646   : > { %v11133_v59 = vadd.f32 %v18375_v49, %v10605_v38  ;;  %v10606_v45 = vadd.f32 %v18416_v35, %v10442_v57  ;;  %v18461_v49 = vrot.slane %v10849_v37, 5  ;;  %v12404_v38 = vld [vmem:[%s14466_s26 + $0x74] sm:$0x1]  ;;  %v10931_v57 = vrot.slane %v10929_v2, 5 }
 0x647   : > { %11167 = vst.msk [vmem:[%s18454_s15 + $0x10] sm:$0xff] %vm831_vm3, %v11135_v33  ;;  %v11136_v39 = vadd.f32 %v18365_v14, %v10608_v6  ;;  %v18472_v14 = vunpack.c.l.bf16 %v10842_v15  ;;  %v10928_v33 = vrot.slane %v10926_v24, 4  ;;  %v10935_v15 = vshll.u32 %v12409_v23, 16 }
 0x648   : > { %11165 = vst.msk [vmem:[%s18454_s15] sm:$0xff] %vm831_vm3, %v11133_v59  ;;  %v11134_v9 = vadd.f32 %v18380_v44, %v10606_v45  ;;  %v18481_v44 = vrot.slane %v10908_v4, 4  ;;  %v10918_v59 = vor.u32 %v10917_v27, %v18483_v19  ;;  %v10897_v45 = vshll.u32 %v12404_v38, 16 }
 0x649   : > { %11168 = vst.msk [vmem:[%s18454_s15 + $0x18] sm:$0xff] %vm831_vm3, %v11136_v39  ;;  %v10894_v39 = vor.u32 %v10893_v52, %v18490_v41  ;;  %v10956_v28 = vor.u32 %v10955_v46, %v10952_v3  ;;  %v10932_v21 = vor.u32 %v10931_v57, %v10928_v33  ;;  %v18526_v13 = vrot.slane %v10935_v15, 5 }
 0x64a   : > { %11166 = vst.msk [vmem:[%s18454_s15 + $0x8] sm:$0xff] %vm831_vm3, %v11134_v9  ;;  %v13518_v34 = vpop.f32.mrb[4].mxu1  ;;  %v10914_v4 = vsel %vm14501_vm2, %v18481_v44, %v18483_v19  ;;  %v10965_v9 = vrot.slane %v10963_v12, 4  ;;  %v10919_v44 = vrot.slane %v10918_v59, 4  ;;  %v10899_v19 = vrot.slane %v10897_v45, 5 }
 0x64b   : > { %v10611_v20 = vadd.f32 %v13518_v34, %v18416_v35  ;;  %v10455_v17 = vpop.f32.mrb[5].mxu1  ;;  %v10890_v27 = vsel %vm14501_vm2, %v10885_v61, %v18490_v41  ;;  %v10895_v36 = vrot.slane %v10894_v39, 4  ;;  %v10957_v22 = vrot.slane %v10956_v28, 4  ;;  %v12415_v45 = vld [vmem:[%s14466_s26 + $0xa0] sm:$0xf] }
 0x64c   : > { %v10609_v10 = vadd.f32 %v18416_v35, %v10455_v17  ;;  %v13519_v47 = vpop.f32.mrb[6].mxu1  ;;  %v10966_v24 = vor.u32 %v10965_v9, %v18523_v42  ;;  %v10933_v11 = vrot.slane %v10932_v21, 4  ;;  %v10945_v2 = vshll.u32 %v12410_v31, 16 }
 0x64d   : > { %v11139_v32 = vadd.f32 %v18399_v26, %v10611_v20  ;;  %v10612_v63 = vadd.f32 %v13519_v47, %v18416_v35  ;;  %v10458_v30 = vpop.f32.mrb[7].mxu1  ;;  %v12417_v47 = vld [vmem:[%s14466_s26 + $0xa8] sm:$0xf]  ;;  %v10900_v52 = vsel %vm14501_vm2, %v10895_v36, %v10899_v19  ;;  %v10962_v50 = vsel %vm14501_vm2, %v10957_v22, %v18523_v42 }
 0x64e   : > { %v11137_v37 = vadd.f32 %v18408_v48, %v10609_v10  ;;  %v10610_v56 = vadd.f32 %v18416_v35, %v10458_v30  ;;  %v10939_v48 = vshrl.u32 %v12409_v23, 16  ;;  %v10969_v10 = vshll.u32 %v12413_v7, 16 }
 0x64f   : > { %11171 = vst.msk [vmem:[%s18454_s15 + $0x30] sm:$0xff] %vm831_vm3, %v11139_v32  ;;  %v11140_v26 = vadd.f32 %v18422_v16, %v10612_v63  ;;  %v10852_v16 = vsel %vm14501_vm2, %v18479_v18, %v18461_v49  ;;  %v11116_v32 = vunpack.c.l.bf16 %v10876_v0  ;;  %v18548_v30 = vunpack.c.l.bf16 %v10914_v4 }
 0x650   : > { %11169 = vst.msk [vmem:[%s18454_s15 + $0x20] sm:$0xff] %vm831_vm3, %v11137_v37  ;;  %v11138_v6 = vadd.f32 %v18424_v1, %v10610_v56  ;;  %v10941_v5 = vrot.slane %v10939_v48, 4  ;;  %v11114_v63 = vunpack.c.l.bf16 %v10852_v16  ;;  %v10998_v23 = vshrl.u32 %v12417_v47, 16  ;;  %v12414_v56 = vld [vmem:[%s14466_s26 + $0x9c] sm:$0xf] }
 0x651   : > { %11172 = vst.msk [vmem:[%s18454_s15 + $0x38] sm:$0xff] %vm831_vm3, %v11140_v26  ;;  %v11001_v37 = vshll.u32 %v12417_v47, 16  ;;  %v10967_v26 = vrot.slane %v10966_v24, 4  ;;  %v10971_v46 = vrot.slane %v10969_v10, 5  ;;  %v10947_v15 = vrot.slane %v10945_v2, 5 }
 0x652   : > { %11170 = vst.msk [vmem:[%s18454_s15 + $0x28] sm:$0xff] %vm831_vm3, %v11138_v6  ;;  %v13522_v1 = vpop.f32.mrb[8].mxu1  ;;  %v10942_v58 = vor.u32 %v10941_v5, %v18526_v13  ;;  %v10938_v6 = vsel %vm14501_vm2, %v10933_v11, %v18526_v13  ;;  %v12418_v48 = vld [vmem:[%s14466_s26 + $0xac] sm:$0xf]  ;;  %v10977_v4 = vshll.u32 %v12414_v56, 16  ;;  %v11000_v39 = vrot.slane %v10998_v23, 4 }
 0x653   : > { %v10615_v40 = vadd.f32 %v13522_v1, %v18416_v35  ;;  %v10471_v49 = vpop.f32.mrb[9].mxu1  ;;  %v10974_v1 = vshrl.u32 %v12414_v56, 16  ;;  %v11007_v28 = vshll.u32 %v12418_v48, 16  ;;  %v11011_v42 = vshrl.u32 %v12418_v48, 16  ;;  %v12423_v24 = vld [vmem:[%s14466_s26 + $0xc0] sm:$0xf] }
 0x654   : > { %v10613_v43 = vadd.f32 %v18416_v35, %v10471_v49  ;;  %v13523_v60 = vpop.f32.mrb[10].mxu1  ;;  %v10943_v57 = vrot.slane %v10942_v58, 4  ;;  %v11118_v13 = vunpack.c.l.bf16 %v10900_v52  ;;  %v10979_v5 = vrot.slane %v10977_v4, 5  ;;  %v12420_v2 = vld [vmem:[%s14466_s26 + $0xb4] sm:$0xf] }
 0x655   : > { %v11143_v51 = vadd.f32 %v18426_v8, %v10615_v40  ;;  %v10616_v34 = vadd.f32 %v13523_v60, %v18416_v35  ;;  %v10474_v18 = vpop.f32.mrb[11].mxu1  ;;  %v11003_v40 = vrot.slane %v11001_v37, 5  ;;  %v10987_v60 = vshrl.u32 %v12415_v45, 16  ;;  %v12424_v23 = vld [vmem:[%s14466_s26 + $0xc4] sm:$0xf] }
 0x656   : > { %v11141_v20 = vadd.f32 %v18434_v62, %v10613_v43  ;;  %v10614_v17 = vadd.f32 %v18416_v35, %v10474_v18  ;;  %v10983_v43 = vshll.u32 %v12415_v45, 16  ;;  %v10976_v7 = vrot.slane %v10974_v1, 4 }
 0x657   : > { %11175 = vst.msk [vmem:[%s18454_s15 + $0x50] sm:$0xff] %vm831_vm3, %v11143_v51  ;;  %v11144_v8 = vadd.f32 %v18437_v53, %v10616_v34  ;;  %v18550_v53 = vunpack.c.l.bf16 %v10890_v27  ;;  %v12419_v51 = vld [vmem:[%s14466_s26 + $0xb0] sm:$0x1]  ;;  %v11123_v18 = vunpack.c.l.bf16 %v10962_v50  ;;  %v11004_v31 = vor.u32 %v11003_v40, %v11000_v39  ;;  %v12421_v50 = vld [vmem:[%s14466_s26 + $0xb8] sm:$0xf] }
 0x658   : > { %11173 = vst.msk [vmem:[%s18454_s15 + $0x40] sm:$0xff] %vm831_vm3, %v11141_v20  ;;  %v11142_v62 = vadd.f32 %v18439_v25, %v10614_v17  ;;  %v10924_v25 = vsel %vm14501_vm2, %v10919_v44, %v18519_v54  ;;  %v18587_v44 = vunpack.c.l.bf16 %v10938_v6  ;;  %v12416_v20 = vld [vmem:[%s14466_s26 + $0xa4] sm:$0x1]  ;;  %v11013_v22 = vrot.slane %v11011_v42, 4 }
 0x659   : > { %11176 = vst.msk [vmem:[%s18454_s15 + $0x58] sm:$0xff] %vm831_vm3, %v11144_v8  ;;  %v11120_v21 = vunpack.c.l.bf16 %v10924_v25  ;;  %v18595_v8 = vrot.slane %v11007_v28, 5  ;;  %v11017_v11 = vshll.u32 %v12419_v51, 16  ;;  %v10989_v58 = vrot.slane %v10987_v60, 4 }
 0x65a   : > { %11174 = vst.msk [vmem:[%s18454_s15 + $0x48] sm:$0xff] %vm831_vm3, %v11142_v62  ;;  %v13526_v41 = vpop.f32.mrb[12].mxu1  ;;  %v18599_v62 = vrot.slane %v10983_v43, 5  ;;  %v10980_v25 = vor.u32 %v10979_v5, %v10976_v7  ;;  %v10993_v52 = vshll.u32 %v12416_v20, 16  ;;  %v12425_v5 = vld [vmem:[%s14466_s26 + $0xc8] sm:$0x1] }
 0x65b   : > { %v10619_v38 = vadd.f32 %v13526_v41, %v18416_v35  ;;  %v10487_v3 = vpop.f32.mrb[13].mxu1  ;;  %v11019_v48 = vrot.slane %v11017_v11, 5 }
 0x65c   : > { %v10617_v12 = vadd.f32 %v18416_v35, %v10487_v3  ;;  %v13527_v33 = vpop.f32.mrb[14].mxu1  ;;  %v11049_v3 = vshll.u32 %v12423_v24, 16  ;;  %v10990_v6 = vor.u32 %v10989_v58, %v18599_v62  ;;  %v10981_v45 = vrot.slane %v10980_v25, 4 }
 0x65d   : > { %v11147_v0 = vadd.f32 %v18467_v55, %v10619_v38  ;;  %v10620_v16 = vadd.f32 %v13527_v33, %v18416_v35  ;;  %v10490_v59 = vpop.f32.mrb[15].mxu1  ;;  %v10972_v55 = vsel %vm14501_vm2, %v10967_v26, %v10971_v46  ;;  %v11046_v38 = vshrl.u32 %v12423_v24, 16 }
 0x65e   : > { %v11145_v61 = vadd.f32 %v18472_v14, %v10617_v12  ;;  %v10618_v54 = vadd.f32 %v18416_v35, %v10490_v59  ;;  %v10948_v14 = vsel %vm14501_vm2, %v10943_v57, %v10947_v15  ;;  %v18589_v19 = vunpack.c.l.bf16 %v10972_v55 }
 0x65f   : > { %11179 = vst.msk [vmem:[%s18454_s15 + $0x70] sm:$0xff] %vm831_vm3, %v11147_v0  ;;  %v11148_v49 = vadd.f32 %v11116_v32, %v10620_v16  ;;  %v18593_v36 = vunpack.c.l.bf16 %v10948_v14  ;;  %v11022_v46 = vshrl.u32 %v12420_v2, 16  ;;  %v11025_v12 = vshll.u32 %v12420_v2, 16 }
 0x660   : > { %11177 = vst.msk [vmem:[%s18454_s15 + $0x60] sm:$0xff] %vm831_vm3, %v11145_v61  ;;  %v11146_v9 = vadd.f32 %v11114_v63, %v10618_v54  ;;  %v11055_v57 = vshll.u32 %v12424_v23, 16  ;;  %v11005_v15 = vrot.slane %v11004_v31, 4  ;;  %v11031_v0 = vshll.u32 %v12421_v50, 16 }
 0x661   : > { %11180 = vst.msk [vmem:[%s18454_s15 + $0x78] sm:$0xff] %vm831_vm3, %v11148_v49  ;;  %v11035_v16 = vshrl.u32 %v12421_v50, 16  ;;  %v10995_v1 = vrot.slane %v10993_v52, 5  ;;  %v11048_v4 = vrot.slane %v11046_v38, 4  ;;  %v11051_v61 = vrot.slane %v11049_v3, 5 }
 0x662   : > { %11178 = vst.msk [vmem:[%s18454_s15 + $0x68] sm:$0xff] %vm831_vm3, %v11146_v9  ;;  %v13530_v34 = vpop.f32.mrb[16].mxu1  ;;  %v11024_v49 = vrot.slane %v11022_v46, 4  ;;  %v11027_v55 = vrot.slane %v11025_v12, 5  ;;  %v10991_v9 = vrot.slane %v10990_v6, 4  ;;  %v11057_v14 = vrot.slane %v11055_v57, 5 }
 0x663   : > { %v10623_v17 = vadd.f32 %v13530_v34, %v18416_v35  ;;  %v10503_v27 = vpop.f32.mrb[17].mxu1  ;;  %v11033_v7 = vrot.slane %v11031_v0, 5  ;;  %v11037_v51 = vrot.slane %v11035_v16, 4  ;;  %v11010_v20 = vsel %vm14501_vm2, %v11005_v15, %v18595_v8 }
 0x664   : > { %v10621_v10 = vadd.f32 %v18416_v35, %v10503_v27  ;;  %v13531_v47 = vpop.f32.mrb[18].mxu1  ;;  %v12422_v27 = vld [vmem:[%s14466_s26 + $0xbc] sm:$0x1]  ;;  %v11028_v24 = vor.u32 %v11027_v55, %v11024_v49  ;;  %v11127_v11 = vunpack.c.l.bf16 %v11010_v20  ;;  %s12463_s26 = sshll.u32 %s14422_s25, 12  ;;  %s18688_s25 = scalar_lea.sflag [#allocation4], %s242_s11 }
 0x665   : > { %v11151_v32 = vadd.f32 %v18548_v30, %v10623_v17  ;;  %v10624_v63 = vadd.f32 %v13531_v47, %v18416_v35  ;;  %v10506_v41 = vpop.f32.mrb[19].mxu1  ;;  %v11014_v30 = vor.u32 %v11013_v22, %v18595_v8  ;;  %v11052_v17 = vor.u32 %v11051_v61, %v11048_v4  ;;  %s18676_s19 = scalar_lea.hbm %s18735_s6, %s12463_s26 }
 0x666   : > { %v11149_v37 = vadd.f32 %v18550_v53, %v10621_v10  ;;  %v10622_v56 = vadd.f32 %v18416_v35, %v10506_v41  ;;  %v11059_v53 = vshrl.u32 %v12424_v23, 16  ;;  %v10986_v22 = vsel %vm14501_vm2, %v10981_v45, %v18599_v62 }
 0x667   : > { %11183 = vst.msk [vmem:[%s18454_s15 + $0x90] sm:$0xff] %vm831_vm3, %v11151_v32  ;;  %v11152_v26 = vadd.f32 %v11120_v21, %v10624_v63  ;;  %v11015_v40 = vrot.slane %v11014_v30, 4  ;;  %v11065_v47 = vshll.u32 %v12425_v5, 16  ;;  %v11038_v58 = vor.u32 %v11037_v51, %v11033_v7 }
 0x668   : > { %11181 = vst.msk [vmem:[%s18454_s15 + $0x80] sm:$0xff] %vm831_vm3, %v11149_v37  ;;  %v11150_v33 = vadd.f32 %v11118_v13, %v10622_v56  ;;  %v11061_v43 = vrot.slane %v11059_v53, 4  ;;  %v11041_v2 = vshll.u32 %v12422_v27, 16  ;;  %v11125_v32 = vunpack.c.l.bf16 %v10986_v22 }
 0x669   : > { %11184 = vst.msk [vmem:[%s18454_s15 + $0x98] sm:$0xff] %vm831_vm3, %v11152_v26  ;;  %v11020_v10 = vsel %vm14501_vm2, %v11015_v40, %v11019_v48  ;;  %v11053_v63 = vrot.slane %v11052_v17, 4  ;;  %v11029_v52 = vrot.slane %v11028_v24, 4  ;;  %v11067_v3 = vrot.slane %v11065_v47, 5 }
 0x66a   : > { %11182 = vst.msk [vmem:[%s18454_s15 + $0x88] sm:$0xff] %vm831_vm3, %v11150_v33  ;;  %v13534_v59 = vpop.f32.mrb[20].mxu1  ;;  %v11062_v8 = vor.u32 %v11061_v43, %v11057_v14  ;;  %v11128_v25 = vunpack.c.l.bf16 %v11020_v10  ;;  %v11039_v46 = vrot.slane %v11038_v58, 4  ;;  %v11043_v12 = vrot.slane %v11041_v2, 5 }
 0x66b   : > { %v10627_v54 = vadd.f32 %v13534_v59, %v18416_v35  ;;  %v10519_v39 = vpop.f32.mrb[21].mxu1  ;;  %v11058_v57 = vsel %vm14501_vm2, %v11053_v63, %v11057_v14  ;;  %v11034_v15 = vsel %vm14501_vm2, %v11029_v52, %v11033_v7 }
 0x66c   : > { %v10625_v28 = vadd.f32 %v18416_v35, %v10519_v39  ;;  %v13535_v42 = vpop.f32.mrb[22].mxu1  ;;  %v11063_v38 = vrot.slane %v11062_v8, 4  ;;  %v11131_v16 = vunpack.c.l.bf16 %v11058_v57  ;;  %v11044_v59 = vsel %vm14501_vm2, %v11039_v46, %v11043_v12 }
 0x66d   : > { %v11155_v60 = vadd.f32 %v11123_v18, %v10627_v54  ;;  %v10628_v21 = vadd.f32 %v13535_v42, %v18416_v35  ;;  %v10522_v13 = vpop.f32.mrb[23].mxu1  ;;  %v11130_v49 = vunpack.c.l.bf16 %v11044_v59 }
 0x66e   : > { %v11153_v34 = vadd.f32 %v18587_v44, %v10625_v28  ;;  %v10626_v31 = vadd.f32 %v18416_v35, %v10522_v13  ;;  %v11068_v0 = vsel %vm14501_vm2, %v11063_v38, %v11067_v3 }
 0x66f   : > { %11187 = vst.msk [vmem:[%s18454_s15 + $0xb0] sm:$0xff] %vm831_vm3, %v11155_v60  ;;  %v11156_v18 = vadd.f32 %v18589_v19, %v10628_v21  ;;  %v10996_v19 = vsel %vm14501_vm2, %v10991_v9, %v10995_v1  ;;  %v11129_v1 = vunpack.c.l.bf16 %v11034_v15  ;;  %v11132_v54 = vunpack.c.l.bf16 %v11068_v0 }
 0x670   : > { %11185 = vst.msk [vmem:[%s18454_s15 + $0xa0] sm:$0xff] %vm831_vm3, %v11153_v34  ;;  %v11154_v44 = vadd.f32 %v18593_v36, %v10626_v31  ;;  %v11126_v56 = vunpack.c.l.bf16 %v10996_v19 }
 0x671   : > { %11188 = vst.msk [vmem:[%s18454_s15 + $0xb8] sm:$0xff] %vm831_vm3, %v11156_v18 }
 0x672   : > { %11186 = vst.msk [vmem:[%s18454_s15 + $0xa8] sm:$0xff] %vm831_vm3, %v11154_v44  ;;  %v13538_v62 = vpop.f32.mrb[24].mxu1 }
 0x673   : > { %v10631_v36 = vadd.f32 %v13538_v62, %v18416_v35  ;;  %v10535_v41 = vpop.f32.mrb[25].mxu1 }
 0x674   : > { %v10629_v23 = vadd.f32 %v18416_v35, %v10535_v41  ;;  %v13539_v37 = vpop.f32.mrb[26].mxu1 }
 0x675   : > { %v11159_v50 = vadd.f32 %v11127_v11, %v10631_v36  ;;  %v10632_v26 = vadd.f32 %v13539_v37, %v18416_v35  ;;  %v10538_v30 = vpop.f32.mrb[27].mxu1 }
 0x676   : > { %v11157_v33 = vadd.f32 %v11125_v32, %v10629_v23  ;;  %v10630_v6 = vadd.f32 %v18416_v35, %v10538_v30 }
 0x677   : > { %11191 = vst.msk [vmem:[%s18454_s15 + $0xd0] sm:$0xff] %vm831_vm3, %v11159_v50  ;;  %v11160_v53 = vadd.f32 %v11128_v25, %v10632_v26 }
 0x678   : > { %11189 = vst.msk [vmem:[%s18454_s15 + $0xc0] sm:$0xff] %vm831_vm3, %v11157_v33  ;;  %v11158_v48 = vadd.f32 %v11126_v56, %v10630_v6 }
 0x679   : > { %11192 = vst.msk [vmem:[%s18454_s15 + $0xd8] sm:$0xff] %vm831_vm3, %v11160_v53 }
 0x67a   : > { %11190 = vst.msk [vmem:[%s18454_s15 + $0xc8] sm:$0xff] %vm831_vm3, %v11158_v48  ;;  %v13542_v45 = vpop.f32.mrb[28].mxu1 }
 0x67b   : > { %v10635_v4 = vadd.f32 %v13542_v45, %v18416_v35  ;;  %v10551_v61 = vpop.f32.mrb[29].mxu1 }
 0x67c   : > { %v10633_v39 = vadd.f32 %v18416_v35, %v10551_v61  ;;  %v13543_v40 = vpop.f32.mrb[30].mxu1 }
 0x67d   : > { %v11163_v29 = vadd.f32 %v11131_v16, %v10635_v4  ;;  %v10636_v55 = vadd.f32 %v13543_v40, %v18416_v35  ;;  %v10554_v28 = vpop.f32.mrb[31].mxu1 }
 0x67e   : > { %v11161_v42 = vadd.f32 %v11129_v1, %v10633_v39  ;;  %v10634_v9 = vadd.f32 %v18416_v35, %v10554_v28 }
 0x67f   : > { %11195 = vst.msk [vmem:[%s18454_s15 + $0xf0] sm:$0xff] %vm831_vm3, %v11163_v29  ;;  %v11164_v14 = vadd.f32 %v11132_v54, %v10636_v55 }
 0x680   : > { %11193 = vst.msk [vmem:[%s18454_s15 + $0xe0] sm:$0xff] %vm831_vm3, %v11161_v42  ;;  %v11162_v43 = vadd.f32 %v11130_v49, %v10634_v9 }
 0x681   : > { %11196 = vst.msk [vmem:[%s18454_s15 + $0xf8] sm:$0xff] %vm831_vm3, %v11164_v14 }
 0x682   : > { %11194 = vst.msk [vmem:[%s18454_s15 + $0xe8] sm:$0xff] %vm831_vm3, %v11162_v43 }
 0x683   : > { %14311 = shalt.err (!%p14308_p3)
}
 0x684   : > { %s14312_s10 = scalar_lea.hbm %s18676_s19, 4096  ;;  %s14316_s13 = scalar_lea.hbm %s18735_s6, 8192 }
 0x685   : > { %p14313_p4 = scmp.ne.s32.totalorder %s18676_s19, %s14312_s10  ;;  %p14317_p9 = scmp.lt.u32.totalorder %s18676_s19, %s18735_s6 }
 0x686   : > { %p14318_p10 = scmp.lt.u32.totalorder %s14316_s13, %s14312_s10  ;;  %p14320_p12 = scmp.lt.u32.totalorder %s14312_s10, %s18676_s19 }
 0x687   : > { %p14314_p7 = pnand %p14313_p4, %p14439_p5 }
 0x688   : > { %p14319_p11 = por %p14318_p10, %p14317_p9 }
 0x689   : > { %p14315_p8 = pneg %p14314_p7 }
 0x68a   : > { %p14321_p13 = por %p14320_p12, %p14319_p11 }
 0x68c   : > { %p14322_p0 = pnand %p14321_p13, %p14315_p8 }
 0x68e   : > { %14325 = shalt.err (!%p14322_p0)
}
 0x68f   : > { %s14364_s26 = smov 128   ;;  %s14365_s17 = smov 8  }
 0x690   : > { %14057 = dma.vmem_to_hbm [thread:$0]  (%p14439_p5), %s18678_s16, 4096, %s18676_s19, %s18688_s25, %s14364_s26, %s14364_s26, %s14365_s17  }
 0x691 PF: > { %p14063_p1 = scmp.ge.s32.totalorder %s14360_s24, 2  ;;  %s11226_s18 = sand.u32 1, %s14348_s21  }
 0x692   : > { %s11227_s20 = scalar_lea.sflag [#allocation4], %s11226_s18 }
 0x693   : > { %p14060_p2 = pnand %p14063_p1, %p14443_p6 }
 0x695   : > { %14343 = dma.done.wait (!%p14060_p2), %s11227_s20, 4096  }
 0x696   : > { %14345 = vsyncadd (!%p14060_p2), %s11227_s20, 4294963200  ;;  %p16_p3 = scmp.ge.s32.totalorder %s14426_s27, 4   ;;  %s19092_s21 = smov %s14352_s22 }
 0x697   : > { %s19093_s22 = smov %s14356_s23  ;;  %s19094_s23 = smov %s14437_s30 }
 0x698   : > { %s19095_s24 = smov %s14426_s27  ;;  %18 = sbr.rel (!%p16_p3) target bundleno = 3 (0x3), region = 99 }
 0x69f   :  { %11232 = vsyncpa [#allocation4], 1 }
 0x6a0   :  { %11234 = vsyncpa [#allocation4 + $0x1], 1 }

</bundles_post_ra>
